<compile_context>
chip_gen: v7x
topology: tpu7x:2x2x1
jax: 0.10.0
libtpu: 0.0.40
codegen_flags: <defaults>
</compile_context>

<pallas_src>
import functools

import jax
import jax.numpy as jnp
from jax.experimental import pallas as pl
from jax.experimental.pallas import tpu as pltpu

NEG_SLOPE = 0.2  # LeakyReLU(0.2)


def _round_up(x, m):
    return (x + m - 1) // m * m


# ---------------------------------------------------------------------------
# Kernel 1: M-tiled matmul + bias (+ LeakyReLU)   (conv0 stages and lastconv)
# ---------------------------------------------------------------------------
def _matmul_bias_act_kernel(x_ref, w_ref, b_ref, o_ref, *, apply_lrelu):
    acc = jnp.dot(x_ref[...], w_ref[...], preferred_element_type=jnp.float32)
    acc = acc + b_ref[...]                      # [1, Cout] broadcasts over rows
    if apply_lrelu:
        acc = jnp.where(acc >= 0, acc, NEG_SLOPE * acc)
    o_ref[...] = acc.astype(o_ref.dtype)


def matmul_bias_act(x, w, b, apply_lrelu, out_dtype=jnp.float32, tm=2048):
    """[M,K] @ [K,Cout] + b (+LeakyReLU).  bf16 MXU operands, f32 accumulation.

    No explicit padding of M: the grid uses cdiv and the tail block is partial
    (out-of-bounds rows are never stored, garbage rows never feed anything).
    """
    M, K = x.shape
    Kw, Cout = w.shape
    assert K == Kw
    xb = x.astype(jnp.bfloat16)
    wb = w.astype(jnp.bfloat16)
    b2 = b.reshape(1, Cout).astype(jnp.float32)

    TM = min(tm, _round_up(M, 8))               # tile rows (multiple of 8)
    grid_m = pl.cdiv(M, TM)

    kernel = functools.partial(_matmul_bias_act_kernel, apply_lrelu=apply_lrelu)
    out = pl.pallas_call(
        kernel,
        out_shape=jax.ShapeDtypeStruct((M, Cout), out_dtype),
        grid=(grid_m,),
        in_specs=[
            pl.BlockSpec((TM, K), lambda i: (i, 0)),       # activation tile
            pl.BlockSpec((K, Cout), lambda i: (0, 0)),     # weights (pinned)
            pl.BlockSpec((1, Cout), lambda i: (0, 0)),     # bias (pinned)
        ],
        out_specs=pl.BlockSpec((TM, Cout), lambda i: (i, 0)),
        compiler_params=pltpu.CompilerParams(
            dimension_semantics=("parallel",)),            # 2 TCs on v7x
        cost_estimate=pl.CostEstimate(
            flops=2 * M * K * Cout,
            transcendentals=0,
            bytes_accessed=(M * K * 2 + K * Cout * 2 + Cout * 4
                            + M * Cout * jnp.dtype(out_dtype).itemsize)),
    )(xb, wb, b2)
    return out


# ---------------------------------------------------------------------------
# Kernel 2: fused 8 x ResConv, feature map resident in VMEM (bf16)
#
# Layout: the feature map is zero-padded by 1 on every spatial side, the row
# stride is padded up to a multiple of 8 (Wp8) so the dy=+-1 tap offsets are
# sublane aligned, and the map is flattened row-major to [P, c],
# P = N*(H4+2)*Wp8.  In that layout the 3x3 tap (ky, kx) of output row p is
# row p + (ky-1)*Wp8 + (kx-1), so each conv layer is 9 constant-offset shifted
# MXU matmuls.  Halo rows/cols are re-zeroed by an interior mask after every
# layer so the next layer still sees correct zero padding; guard rows (G each
# side) keep the shifted slices in bounds.  The feature map enters/leaves the
# kernel via explicit DMA (pl.ANY) straight into/out of the interior slab.
# ---------------------------------------------------------------------------
def _fused_resblocks_kernel(feat_hbm, w_ref, b_ref, beta_ref, mask_ref,
                            o_hbm, buf_ref, sem, *, n_layers, wp8, g, p):
    c = buf_ref.shape[-1]

    # Zero only the guard regions; the interior (incl. its zero halo) is about
    # to be overwritten by the DMA of the already zero-padded map.
    buf_ref[0:g, :] = jnp.zeros((g, c), buf_ref.dtype)
    buf_ref[g + p:, :] = jnp.zeros((g, c), buf_ref.dtype)

    cp_in = pltpu.make_async_copy(feat_hbm, buf_ref.at[pl.ds(g, p), :], sem)
    cp_in.start()
    cp_in.wait()

    mask01 = mask_ref[...]                                  # [p, 1] bf16 0/1

    for l in range(n_layers):                               # fully unrolled
        center = buf_ref[pl.ds(g, p), :]                    # bf16; tap 4 + residual
        acc = jnp.dot(center, w_ref[l * 9 + 4],
                      preferred_element_type=jnp.float32)
        for t in range(9):                                  # 3x3 taps, unrolled
            if t == 4:
                continue
            dy, dx = t // 3 - 1, t % 3 - 1
            off = g + dy * wp8 + dx                         # static offset
            # TODO(synk): the dx=+-1 shifts could move to the XLU with
            # pltpu.roll on the aligned dy-slab instead of unaligned slices.
            acc = acc + jnp.dot(buf_ref[pl.ds(off, p), :], w_ref[l * 9 + t],
                                preferred_element_type=jnp.float32)
        y = (acc + b_ref[l]) * beta_ref[l] + center.astype(jnp.float32)
        y = jnp.where(y >= 0, y, NEG_SLOPE * y)
        # Keep halo/pad rows at zero for the next layer's implicit padding.
        buf_ref[pl.ds(g, p), :] = y.astype(jnp.bfloat16) * mask01

    cp_out = pltpu.make_async_copy(buf_ref.at[pl.ds(g, p), :], o_hbm, sem)
    cp_out.start()
    cp_out.wait()


def fused_resblocks(feat_nhwc, w_all, b_all, beta_all):
    """8 fused ResConv layers.  Returns the *padded* map (N, H4+2, Wp8, c) bf16
    with a zero halo, which downstream (lastconv) consumes directly."""
    N, H4, W4, c = feat_nhwc.shape
    Hp, Wp = H4 + 2, W4 + 2
    Wp8 = _round_up(Wp, 8)                      # aligned row stride
    P = N * Hp * Wp8                            # multiple of 8 (Wp8 is)
    G = Wp8 + 8                                 # guard rows, sublane aligned

    xpad = jnp.pad(feat_nhwc.astype(jnp.bfloat16),
                   ((0, 0), (1, 1), (1, Wp8 - W4 - 1), (0, 0))).reshape(P, c)
    mask = jnp.pad(jnp.ones((N, H4, W4, 1), jnp.bfloat16),
                   ((0, 0), (1, 1), (1, Wp8 - W4 - 1), (0, 0))).reshape(P, 1)

    n_layers = b_all.shape[0]
    buf_rows = P + 2 * G
    buf_bytes = buf_rows * c * 2
    vmem_limit = int(min(60 * (1 << 20),
                         max(32 * (1 << 20), 2 * buf_bytes + (8 << 20))))

    kernel = functools.partial(_fused_resblocks_kernel,
                               n_layers=n_layers, wp8=Wp8, g=G, p=P)
    # TODO(synk): for very large frames (4K) tile spatially into row bands with
    # recomputed 8-row halos so the resident map stays under v7x's 64 MiB VMEM
    # and the two v7x TensorCores can split bands.
    out = pl.pallas_call(
        kernel,
        out_shape=jax.ShapeDtypeStruct((P, c), jnp.bfloat16),
        grid=(1,),
        in_specs=[
            pl.BlockSpec(memory_space=pl.ANY),                    # feat in HBM
            pl.BlockSpec(w_all.shape, lambda i: (0, 0, 0)),       # 8x9 [c,c] bf16
            pl.BlockSpec(b_all.shape, lambda i: (0, 0, 0)),       # [8,1,c]
            pl.BlockSpec(beta_all.shape, lambda i: (0, 0, 0)),    # [8,1,c]
            pl.BlockSpec((P, 1), lambda i: (0, 0)),               # interior mask
        ],
        out_specs=pl.BlockSpec(memory_space=pl.ANY),              # padded map out
        scratch_shapes=[pltpu.VMEM((buf_rows, c), jnp.bfloat16),
                        pltpu.SemaphoreType.DMA(())],
        compiler_params=pltpu.CompilerParams(
            dimension_semantics=("arbitrary",),
            vmem_limit_bytes=vmem_limit),
    )(xpad, w_all, b_all, beta_all, mask)

    return out.reshape(N, Hp, Wp8, c)


# ---------------------------------------------------------------------------
# JAX glue: im2col, lastconv lowering, bilinear resize
# ---------------------------------------------------------------------------
def im2col(x_nhwc, kh, kw, stride, pad):
    """x: [N,H,W,C] -> patches [N,Ho,Wo,kh*kw*C] (tap order: ky, kx, ci)."""
    # TODO(synk): pull im2col into the matmul kernel with overlapping row
    # windows (element-indexed BlockSpecs) to avoid the inflated HBM patches
    # buffer; most valuable on v5e.
    N, H, W, C = x_nhwc.shape
    xp = jnp.pad(x_nhwc, ((0, 0), (pad, pad), (pad, pad), (0, 0)))
    Ho = (H + 2 * pad - kh) // stride + 1
    Wo = (W + 2 * pad - kw) // stride + 1
    cols = []
    for ky in range(kh):
        for kx in range(kw):
            cols.append(xp[:, ky:ky + stride * Ho:stride,
                           kx:kx + stride * Wo:stride, :])
    return jnp.concatenate(cols, axis=-1), Ho, Wo


def conv2d_act(x_nhwc, w_oihw, b, stride, pad, apply_lrelu):
    N, H, W, C = x_nhwc.shape
    Cout, Cin, kh, kw = w_oihw.shape
    assert Cin == C
    patches, Ho, Wo = im2col(x_nhwc.astype(jnp.bfloat16), kh, kw, stride, pad)
    X = patches.reshape(N * Ho * Wo, kh * kw * C)
    W2 = jnp.transpose(w_oihw, (2, 3, 1, 0)).reshape(kh * kw * C, Cout)
    y = matmul_bias_act(X, W2, b, apply_lrelu, out_dtype=jnp.bfloat16)
    return y.reshape(N, Ho, Wo, Cout)


def build_lastconv_matmul_params(w_iohw, bias):
    """ConvTranspose2d(c, 24, 4, 2, 1) lowered as ONE 3x3 'valid' conv over the
    zero-padded feature map with 96 = (py, px, 24) output channels.

    Phase (py, px):  y[2m+py, 2q+px] = sum_{dy,dx in {0,1}}
        xpad[m+py+dy, q+px+dx] @ W[:, :, 3-py-2*dy, 3-px-2*dx] + b
    Tap (a, b_) of the 3x3 conv covers (dy, dx) = (a-py, b_-px) when valid.
    """
    Cin, Cout = w_iohw.shape[0], w_iohw.shape[1]
    W = jnp.zeros((3, 3, Cin, 2, 2, Cout), jnp.float32)
    for a in range(3):
        for bb in range(3):
            for py in range(2):
                for px in range(2):
                    dy, dx = a - py, bb - px
                    if 0 <= dy <= 1 and 0 <= dx <= 1:
                        ky, kx = 3 - py - 2 * dy, 3 - px - 2 * dx
                        W = W.at[a, bb, :, py, px, :].set(w_iohw[:, :, ky, kx])
    return W.reshape(9 * Cin, 4 * Cout), jnp.tile(bias, 4)


def lastconv_pixelshuffle(feat_padded, w_iohw, bias, H4, W4):
    """ConvTranspose2d(c, 24, 4, 2, 1) + PixelShuffle(2) in one matmul launch.

    feat_padded: (N, H4+2, Wp8, c) bf16 with zero halo (fused_resblocks output).
    Returns (N, 4*H4, 4*W4, 6) f32.
    """
    N = feat_padded.shape[0]
    c = feat_padded.shape[-1]
    Wp = W4 + 2
    xp = feat_padded[:, :, :Wp, :]                      # drop stride-pad cols
    patches, Ho, Wo = im2col(xp, 3, 3, 1, 0)            # Ho=H4, Wo=W4
    X = patches.reshape(N * H4 * W4, 9 * c)
    W2, b2 = build_lastconv_matmul_params(w_iohw, bias)
    y = matmul_bias_act(X, W2, b2, apply_lrelu=False, out_dtype=jnp.float32)

    c6 = w_iohw.shape[1] // 4                           # channels after shuffle
    # columns are (py, px, c6, i, j); final[n, 4m+2py+i, 4q+2px+j, c6]
    y = y.reshape(N, H4, W4, 2, 2, c6, 2, 2)            # n,m,q,py,px,c6,i,j
    y = jnp.transpose(y, (0, 1, 3, 6, 2, 4, 7, 5))      # n,m,py,i,q,px,j,c6
    return y.reshape(N, 4 * H4, 4 * W4, c6)


def interpolate_bilinear_nchw(x, factor):
    # TODO(synk): bilinear resize stays in XLA (jax.image.resize); identity for
    # the default scale=1 path exercised here.
    if factor == 1 or factor == 1.0:
        return x
    N, C, H, W = x.shape
    newH, newW = int(H * factor), int(W * factor)
    return jax.image.resize(x, (N, C, newH, newW), method="bilinear",
                            antialias=False)


# ---------------------------------------------------------------------------
# IFBlock parameters + forward
# ---------------------------------------------------------------------------
def init_params(key, in_planes, c):
    keys = iter(jax.random.split(key, 32))

    def conv_w(cout, cin, k):
        fan_in = cin * k * k
        return jax.random.normal(next(keys), (cout, cin, k, k),
                                 jnp.float32) * (1.0 / fan_in) ** 0.5

    def bias(n):
        return jax.random.normal(next(keys), (n,), jnp.float32) * 0.01

    p = {}
    p["conv0_0_w"], p["conv0_0_b"] = conv_w(c // 2, in_planes, 3), bias(c // 2)
    p["conv0_1_w"], p["conv0_1_b"] = conv_w(c, c // 2, 3), bias(c)
    for i in range(8):
        p[f"res{i}_w"] = conv_w(c, c, 3)
        p[f"res{i}_b"] = bias(c)
        p[f"res{i}_beta"] = jnp.ones((c,), jnp.float32)
    # ConvTranspose2d weight layout in PyTorch: [Cin, Cout, kH, kW]
    fan_in = c * 4 * 4
    p["last_w"] = jax.random.normal(next(keys), (c, 4 * 6, 4, 4),
                                    jnp.float32) * (1.0 / fan_in) ** 0.5
    p["last_b"] = bias(4 * 6)
    return p


def pack_res_params(params, n_layers=8):
    """Stack the 8 ResConv layers' weights for the fused kernel.

    w_all[(l*9 + ky*3 + kx), ci, co] = res{l}_w[co, ci, ky, kx]   (bf16)
    """
    w = jnp.stack([params[f"res{i}_w"] for i in range(n_layers)])  # [L,co,ci,3,3]
    L, co, ci, _, _ = w.shape
    w_all = jnp.transpose(w, (0, 3, 4, 2, 1)).reshape(L * 9, ci, co)
    b_all = jnp.stack([params[f"res{i}_b"] for i in range(n_layers)]
                      ).reshape(L, 1, co).astype(jnp.float32)
    beta_all = jnp.stack([params[f"res{i}_beta"] for i in range(n_layers)]
                         ).reshape(L, 1, co).astype(jnp.float32)
    return w_all.astype(jnp.bfloat16), b_all, beta_all


def ifblock_forward(params, x_nchw, flow_nchw=None, scale=1):
    x = interpolate_bilinear_nchw(x_nchw, 1.0 / scale)
    if flow_nchw is not None:
        flow = interpolate_bilinear_nchw(flow_nchw, 1.0 / scale) * (1.0 / scale)
        x = jnp.concatenate([x, flow], axis=1)

    x = jnp.transpose(x, (0, 2, 3, 1))  # NCHW -> NHWC

    # conv0: two stride-2 conv + LeakyReLU stages (bf16 activations)
    feat = conv2d_act(x, params["conv0_0_w"], params["conv0_0_b"], 2, 1, True)
    feat = conv2d_act(feat, params["conv0_1_w"], params["conv0_1_b"], 2, 1, True)
    N, H4, W4, c = feat.shape

    # convblock: 8 x ResConv fused into one kernel (bf16 VMEM-resident map)
    w_all, b_all, beta_all = pack_res_params(params)
    featp = fused_resblocks(feat, w_all, b_all, beta_all)   # padded map (bf16)

    # lastconv: ConvTranspose2d(c, 24, 4, 2, 1) + PixelShuffle(2) in one launch
    tmp = lastconv_pixelshuffle(featp, params["last_w"], params["last_b"], H4, W4)

    tmp = jnp.transpose(tmp, (0, 3, 1, 2))  # NHWC -> NCHW
    tmp = interpolate_bilinear_nchw(tmp, scale)
    flow_out = tmp[:, :4] * scale
    mask = tmp[:, 4:5]
    return flow_out, mask


# ---------------------------------------------------------------------------
if __name__ == "__main__":
    key = jax.random.PRNGKey(0)
    k_x, k_p = jax.random.split(key)

    in_planes, c = 8, 32
    N, H, W = 2, 16, 16
    x = jax.random.normal(k_x, (N, in_planes, H, W), jnp.float32)
    params = init_params(k_p, in_planes, c)

    fwd = jax.jit(lambda p, xx: ifblock_forward(p, xx, flow_nchw=None, scale=1))
    flow, mask = fwd(params, x)
    flow, mask = jax.block_until_ready((flow, mask))

    assert flow.shape == (N, 4, H, W), flow.shape
    assert mask.shape == (N, 1, H, W), mask.shape
    assert jnp.all(jnp.isfinite(flow)) and jnp.all(jnp.isfinite(mask))
    print("KERNEL_OK")
</pallas_src>

<mosaic_0001>
module attributes {stable_mosaic.version = 11 : i64} {
  func.func @_matmul_bias_act_kernel(%arg0: i32, %arg1: memref<128x72xbf16, #tpu.memory_space<vmem>>, %arg2: memref<72x16xbf16, #tpu.memory_space<vmem>>, %arg3: memref<1x16xf32, #tpu.memory_space<vmem>>, %arg4: memref<128x16xbf16, #tpu.memory_space<vmem>>) attributes {dimension_semantics = [#tpu.dimension_semantics<parallel>], iteration_bounds = array<i64: 1>, scalar_prefetch = 0 : i64, scratch_operands = 0 : i64, tpu.core_type = #tpu.core_type<tc>, window_params = [{transform_indices = @transform_0, window_bounds = array<i64: 128, 72>}, {pipeline_mode = #tpu.pipeline_mode<synchronous>, transform_indices = @transform_1, window_bounds = array<i64: 72, 16>}, {pipeline_mode = #tpu.pipeline_mode<synchronous>, transform_indices = @transform_2, window_bounds = array<i64: 1, 16>}, {transform_indices = @transform_3, window_bounds = array<i64: 128, 16>}]} {
    %c0 = arith.constant 0 : index
    %c0_0 = arith.constant 0 : index
    %0 = vector.load %arg1[%c0, %c0_0] : memref<128x72xbf16, #tpu.memory_space<vmem>>, vector<128x72xbf16>
    %c0_1 = arith.constant 0 : index
    %c0_2 = arith.constant 0 : index
    %1 = vector.load %arg2[%c0_1, %c0_2] : memref<72x16xbf16, #tpu.memory_space<vmem>>, vector<72x16xbf16>
    %cst = arith.constant dense<0.000000e+00> : vector<128x16xf32>
    %2 = tpu.matmul %0, %1, %cst {dimension_numbers = #tpu.dot_dimension_numbers<[1], [0], [0], [1], [0, 0, 1, 1], [], []>} : vector<128x72xbf16>, vector<72x16xbf16>, vector<128x16xf32> -> vector<128x16xf32>
    %c0_3 = arith.constant 0 : index
    %c0_4 = arith.constant 0 : index
    %3 = vector.load %arg3[%c0_3, %c0_4] : memref<1x16xf32, #tpu.memory_space<vmem>>, vector<1x16xf32>
    %4 = vector.broadcast %3 : vector<1x16xf32> to vector<128x16xf32>
    %5 = arith.addf %2, %4 : vector<128x16xf32>
    %cst_5 = arith.constant 0.000000e+00 : f32
    %6 = vector.broadcast %cst_5 : f32 to vector<128x16xf32>
    %7 = arith.cmpf oge, %5, %6 : vector<128x16xf32>
    %cst_6 = arith.constant 2.000000e-01 : f32
    %8 = vector.broadcast %cst_6 : f32 to vector<128x16xf32>
    %9 = arith.mulf %8, %5 : vector<128x16xf32>
    %10 = arith.select %7, %5, %9 : vector<128x16xi1>, vector<128x16xf32>
    %11 = arith.truncf %10 : vector<128x16xf32> to vector<128x16xbf16>
    %c0_7 = arith.constant 0 : index
    %c0_8 = arith.constant 0 : index
    %12 = vector.load %arg4[%c0_7, %c0_8] : memref<128x16xbf16, #tpu.memory_space<vmem>>, vector<128x16xbf16>
    tpu.vector_store %arg4[%c0_7, %c0_8], %11 {strides = array<i32>} : memref<128x16xbf16, #tpu.memory_space<vmem>>, vector<128x16xbf16>,
    return
  }
  func.func @transform_0(%arg0: i32) -> (i32, i32) {
    %c0_i32 = arith.constant 0 : i32
    %c0_i32_0 = arith.constant 0 : i32
    return %arg0, %c0_i32 : i32, i32
  }
  func.func @transform_1(%arg0: i32) -> (i32, i32) {
    %c0_i32 = arith.constant 0 : i32
    %c0_i32_0 = arith.constant 0 : i32
    %c0_i32_1 = arith.constant 0 : i32
    return %c0_i32, %c0_i32_0 : i32, i32
  }
  func.func @transform_2(%arg0: i32) -> (i32, i32) {
    %c0_i32 = arith.constant 0 : i32
    %c0_i32_0 = arith.constant 0 : i32
    %c0_i32_1 = arith.constant 0 : i32
    return %c0_i32, %c0_i32_0 : i32, i32
  }
  func.func @transform_3(%arg0: i32) -> (i32, i32) {
    %c0_i32 = arith.constant 0 : i32
    %c0_i32_0 = arith.constant 0 : i32
    return %arg0, %c0_i32 : i32, i32
  }
}

module attributes {stable_mosaic.version = 11 : i64} {
  func.func @_matmul_bias_act_kernel(%arg0: i32, %arg1: memref<32x144xbf16, #tpu.memory_space<vmem>>, %arg2: memref<144x32xbf16, #tpu.memory_space<vmem>>, %arg3: memref<1x32xf32, #tpu.memory_space<vmem>>, %arg4: memref<32x32xbf16, #tpu.memory_space<vmem>>) attributes {dimension_semantics = [#tpu.dimension_semantics<parallel>], iteration_bounds = array<i64: 1>, scalar_prefetch = 0 : i64, scratch_operands = 0 : i64, tpu.core_type = #tpu.core_type<tc>, window_params = [{transform_indices = @transform_0, window_bounds = array<i64: 32, 144>}, {pipeline_mode = #tpu.pipeline_mode<synchronous>, transform_indices = @transform_1, window_bounds = array<i64: 144, 32>}, {pipeline_mode = #tpu.pipeline_mode<synchronous>, transform_indices = @transform_2, window_bounds = array<i64: 1, 32>}, {transform_indices = @transform_3, window_bounds = array<i64: 32, 32>}]} {
    %c0 = arith.constant 0 : index
    %c0_0 = arith.constant 0 : index
    %0 = vector.load %arg1[%c0, %c0_0] : memref<32x144xbf16, #tpu.memory_space<vmem>>, vector<32x144xbf16>
    %c0_1 = arith.constant 0 : index
    %c0_2 = arith.constant 0 : index
    %1 = vector.load %arg2[%c0_1, %c0_2] : memref<144x32xbf16, #tpu.memory_space<vmem>>, vector<144x32xbf16>
    %cst = arith.constant dense<0.000000e+00> : vector<32x32xf32>
    %2 = tpu.matmul %0, %1, %cst {dimension_numbers = #tpu.dot_dimension_numbers<[1], [0], [0], [1], [0, 0, 1, 1], [], []>} : vector<32x144xbf16>, vector<144x32xbf16>, vector<32x32xf32> -> vector<32x32xf32>
    %c0_3 = arith.constant 0 : index
    %c0_4 = arith.constant 0 : index
    %3 = vector.load %arg3[%c0_3, %c0_4] : memref<1x32xf32, #tpu.memory_space<vmem>>, vector<1x32xf32>
    %4 = vector.broadcast %3 : vector<1x32xf32> to vector<32x32xf32>
    %5 = arith.addf %2, %4 : vector<32x32xf32>
    %cst_5 = arith.constant 0.000000e+00 : f32
    %6 = vector.broadcast %cst_5 : f32 to vector<32x32xf32>
    %7 = arith.cmpf oge, %5, %6 : vector<32x32xf32>
    %cst_6 = arith.constant 2.000000e-01 : f32
    %8 = vector.broadcast %cst_6 : f32 to vector<32x32xf32>
    %9 = arith.mulf %8, %5 : vector<32x32xf32>
    %10 = arith.select %7, %5, %9 : vector<32x32xi1>, vector<32x32xf32>
    %11 = arith.truncf %10 : vector<32x32xf32> to vector<32x32xbf16>
    %c0_7 = arith.constant 0 : index
    %c0_8 = arith.constant 0 : index
    %12 = vector.load %arg4[%c0_7, %c0_8] : memref<32x32xbf16, #tpu.memory_space<vmem>>, vector<32x32xbf16>
    tpu.vector_store %arg4[%c0_7, %c0_8], %11 {strides = array<i32>} : memref<32x32xbf16, #tpu.memory_space<vmem>>, vector<32x32xbf16>,
    return
  }
  func.func @transform_0(%arg0: i32) -> (i32, i32) {
    %c0_i32 = arith.constant 0 : i32
    %c0_i32_0 = arith.constant 0 : i32
    return %arg0, %c0_i32 : i32, i32
  }
  func.func @transform_1(%arg0: i32) -> (i32, i32) {
    %c0_i32 = arith.constant 0 : i32
    %c0_i32_0 = arith.constant 0 : i32
    %c0_i32_1 = arith.constant 0 : i32
    return %c0_i32, %c0_i32_0 : i32, i32
  }
  func.func @transform_2(%arg0: i32) -> (i32, i32) {
    %c0_i32 = arith.constant 0 : i32
    %c0_i32_0 = arith.constant 0 : i32
    %c0_i32_1 = arith.constant 0 : i32
    return %c0_i32, %c0_i32_0 : i32, i32
  }
  func.func @transform_3(%arg0: i32) -> (i32, i32) {
    %c0_i32 = arith.constant 0 : i32
    %c0_i32_0 = arith.constant 0 : i32
    return %arg0, %c0_i32 : i32, i32
  }
}

module attributes {stable_mosaic.version = 11 : i64} {
  func.func @_fused_resblocks_kernel(%arg0: i32, %arg1: memref<96x32xbf16, #tpu.memory_space<any>>, %arg2: memref<72x32x32xbf16, #tpu.memory_space<vmem>>, %arg3: memref<8x1x32xf32, #tpu.memory_space<vmem>>, %arg4: memref<8x1x32xf32, #tpu.memory_space<vmem>>, %arg5: memref<96x1xbf16, #tpu.memory_space<vmem>>, %arg6: memref<96x32xbf16, #tpu.memory_space<any>>, %arg7: memref<128x32xbf16, #tpu.memory_space<vmem>>, %arg8: memref<!tpu.dma_semaphore, #tpu.memory_space<semaphore_mem>>) attributes {dimension_semantics = [#tpu.dimension_semantics<arbitrary>], iteration_bounds = array<i64: 1>, scalar_prefetch = 0 : i64, scratch_operands = 2 : i64, tpu.core_type = #tpu.core_type<tc>, window_params = [{}, {pipeline_mode = #tpu.pipeline_mode<synchronous>, transform_indices = @transform_1, window_bounds = array<i64: 72, 32, 32>}, {pipeline_mode = #tpu.pipeline_mode<synchronous>, transform_indices = @transform_2, window_bounds = array<i64: 8, 1, 32>}, {pipeline_mode = #tpu.pipeline_mode<synchronous>, transform_indices = @transform_3, window_bounds = array<i64: 8, 1, 32>}, {pipeline_mode = #tpu.pipeline_mode<synchronous>, transform_indices = @transform_4, window_bounds = array<i64: 96, 1>}, {}]} {
    %cst = arith.constant 0.000000e+00 : bf16
    %0 = vector.broadcast %cst : bf16 to vector<16x32xbf16>
    %c0 = arith.constant 0 : index
    %c0_0 = arith.constant 0 : index
    %1 = vector.load %arg7[%c0, %c0_0] : memref<128x32xbf16, #tpu.memory_space<vmem>>, vector<16x32xbf16>
    tpu.vector_store %arg7[%c0, %c0_0], %0 {strides = array<i32>} : memref<128x32xbf16, #tpu.memory_space<vmem>>, vector<16x32xbf16>,
    %cst_1 = arith.constant 0.000000e+00 : bf16
    %2 = vector.broadcast %cst_1 : bf16 to vector<16x32xbf16>
    %c112 = arith.constant 112 : index
    %c0_2 = arith.constant 0 : index
    %3 = vector.load %arg7[%c112, %c0_2] : memref<128x32xbf16, #tpu.memory_space<vmem>>, vector<16x32xbf16>
    tpu.vector_store %arg7[%c112, %c0_2], %2 {strides = array<i32>} : memref<128x32xbf16, #tpu.memory_space<vmem>>, vector<16x32xbf16>,
    %c16_i32 = arith.constant 16 : i32
    %c0_i32 = arith.constant 0 : i32
    %4 = tpu.memref_slice %arg7[%c16_i32, %c0_i32] : memref<128x32xbf16, #tpu.memory_space<vmem>> -> memref<96x32xbf16, #tpu.memory_space<vmem>>
    tpu.enqueue_dma source(%arg1 : memref<96x32xbf16, #tpu.memory_space<any>>) target(%4 : memref<96x32xbf16, #tpu.memory_space<vmem>>) target_semaphore(%arg8 : memref<!tpu.dma_semaphore, #tpu.memory_space<semaphore_mem>>)
    %c16_i32_3 = arith.constant 16 : i32
    %c0_i32_4 = arith.constant 0 : i32
    %5 = tpu.memref_slice %arg7[%c16_i32_3, %c0_i32_4] : memref<128x32xbf16, #tpu.memory_space<vmem>> -> memref<96x32xbf16, #tpu.memory_space<vmem>>
    tpu.wait_dma2 semaphore(%arg8 : memref<!tpu.dma_semaphore, #tpu.memory_space<semaphore_mem>>) src(%arg1 : memref<96x32xbf16, #tpu.memory_space<any>>) dst(%5 : memref<96x32xbf16, #tpu.memory_space<vmem>>)
    %c0_5 = arith.constant 0 : index
    %c0_6 = arith.constant 0 : index
    %6 = vector.load %arg5[%c0_5, %c0_6] : memref<96x1xbf16, #tpu.memory_space<vmem>>, vector<96x1xbf16>
    %c16 = arith.constant 16 : index
    %c0_7 = arith.constant 0 : index
    %7 = vector.load %arg7[%c16, %c0_7] : memref<128x32xbf16, #tpu.memory_space<vmem>>, vector<96x32xbf16>
    %c4 = arith.constant 4 : index
    %c0_8 = arith.constant 0 : index
    %c0_9 = arith.constant 0 : index
    %8 = vector.load %arg2[%c4, %c0_8, %c0_9] : memref<72x32x32xbf16, #tpu.memory_space<vmem>>, vector<1x32x32xbf16>
    %9 = vector.shape_cast %8 : vector<1x32x32xbf16> to vector<32x32xbf16>
    %cst_10 = arith.constant dense<0.000000e+00> : vector<96x32xf32>
    %10 = tpu.matmul %7, %9, %cst_10 {dimension_numbers = #tpu.dot_dimension_numbers<[1], [0], [0], [1], [0, 0, 1, 1], [], []>} : vector<96x32xbf16>, vector<32x32xbf16>, vector<96x32xf32> -> vector<96x32xf32>
    %c7 = arith.constant 7 : index
    %c0_11 = arith.constant 0 : index
    %11 = vector.load %arg7[%c7, %c0_11] : memref<128x32xbf16, #tpu.memory_space<vmem>>, vector<96x32xbf16>
    %c0_12 = arith.constant 0 : index
    %c0_13 = arith.constant 0 : index
    %c0_14 = arith.constant 0 : index
    %12 = vector.load %arg2[%c0_12, %c0_13, %c0_14] : memref<72x32x32xbf16, #tpu.memory_space<vmem>>, vector<1x32x32xbf16>
    %13 = vector.shape_cast %12 : vector<1x32x32xbf16> to vector<32x32xbf16>
    %cst_15 = arith.constant dense<0.000000e+00> : vector<96x32xf32>
    %14 = tpu.matmul %11, %13, %cst_15 {dimension_numbers = #tpu.dot_dimension_numbers<[1], [0], [0], [1], [0, 0, 1, 1], [], []>} : vector<96x32xbf16>, vector<32x32xbf16>, vector<96x32xf32> -> vector<96x32xf32>
    %15 = arith.addf %10, %14 : vector<96x32xf32>
    %c8 = arith.constant 8 : index
    %c0_16 = arith.constant 0 : index
    %16 = vector.load %arg7[%c8, %c0_16] : memref<128x32xbf16, #tpu.memory_space<vmem>>, vector<96x32xbf16>
    %c1 = arith.constant 1 : index
    %c0_17 = arith.constant 0 : index
    %c0_18 = arith.constant 0 : index
    %17 = vector.load %arg2[%c1, %c0_17, %c0_18] : memref<72x32x32xbf16, #tpu.memory_space<vmem>>, vector<1x32x32xbf16>
    %18 = vector.shape_cast %17 : vector<1x32x32xbf16> to vector<32x32xbf16>
    %cst_19 = arith.constant dense<0.000000e+00> : vector<96x32xf32>
    %19 = tpu.matmul %16, %18, %cst_19 {dimension_numbers = #tpu.dot_dimension_numbers<[1], [0], [0], [1], [0, 0, 1, 1], [], []>} : vector<96x32xbf16>, vector<32x32xbf16>, vector<96x32xf32> -> vector<96x32xf32>
    %20 = arith.addf %15, %19 : vector<96x32xf32>
    %c9 = arith.constant 9 : index
    %c0_20 = arith.constant 0 : index
    %21 = vector.load %arg7[%c9, %c0_20] : memref<128x32xbf16, #tpu.memory_space<vmem>>, vector<96x32xbf16>
    %c2 = arith.constant 2 : index
    %c0_21 = arith.constant 0 : index
    %c0_22 = arith.constant 0 : index
    %22 = vector.load %arg2[%c2, %c0_21, %c0_22] : memref<72x32x32xbf16, #tpu.memory_space<vmem>>, vector<1x32x32xbf16>
    %23 = vector.shape_cast %22 : vector<1x32x32xbf16> to vector<32x32xbf16>
    %cst_23 = arith.constant dense<0.000000e+00> : vector<96x32xf32>
    %24 = tpu.matmul %21, %23, %cst_23 {dimension_numbers = #tpu.dot_dimension_numbers<[1], [0], [0], [1], [0, 0, 1, 1], [], []>} : vector<96x32xbf16>, vector<32x32xbf16>, vector<96x32xf32> -> vector<96x32xf32>
    %25 = arith.addf %20, %24 : vector<96x32xf32>
    %c15 = arith.constant 15 : index
    %c0_24 = arith.constant 0 : index
    %26 = vector.load %arg7[%c15, %c0_24] : memref<128x32xbf16, #tpu.memory_space<vmem>>, vector<96x32xbf16>
    %c3 = arith.constant 3 : index
    %c0_25 = arith.constant 0 : index
    %c0_26 = arith.constant 0 : index
    %27 = vector.load %arg2[%c3, %c0_25, %c0_26] : memref<72x32x32xbf16, #tpu.memory_space<vmem>>, vector<1x32x32xbf16>
    %28 = vector.shape_cast %27 : vector<1x32x32xbf16> to vector<32x32xbf16>
    %cst_27 = arith.constant dense<0.000000e+00> : vector<96x32xf32>
    %29 = tpu.matmul %26, %28, %cst_27 {dimension_numbers = #tpu.dot_dimension_numbers<[1], [0], [0], [1], [0, 0, 1, 1], [], []>} : vector<96x32xbf16>, vector<32x32xbf16>, vector<96x32xf32> -> vector<96x32xf32>
    %30 = arith.addf %25, %29 : vector<96x32xf32>
    %c17 = arith.constant 17 : index
    %c0_28 = arith.constant 0 : index
    %31 = vector.load %arg7[%c17, %c0_28] : memref<128x32xbf16, #tpu.memory_space<vmem>>, vector<96x32xbf16>
    %c5 = arith.constant 5 : index
    %c0_29 = arith.constant 0 : index
    %c0_30 = arith.constant 0 : index
    %32 = vector.load %arg2[%c5, %c0_29, %c0_30] : memref<72x32x32xbf16, #tpu.memory_space<vmem>>, vector<1x32x32xbf16>
    %33 = vector.shape_cast %32 : vector<1x32x32xbf16> to vector<32x32xbf16>
    %cst_31 = arith.constant dense<0.000000e+00> : vector<96x32xf32>
    %34 = tpu.matmul %31, %33, %cst_31 {dimension_numbers = #tpu.dot_dimension_numbers<[1], [0], [0], [1], [0, 0, 1, 1], [], []>} : vector<96x32xbf16>, vector<32x32xbf16>, vector<96x32xf32> -> vector<96x32xf32>
    %35 = arith.addf %30, %34 : vector<96x32xf32>
    %c23 = arith.constant 23 : index
    %c0_32 = arith.constant 0 : index
    %36 = vector.load %arg7[%c23, %c0_32] : memref<128x32xbf16, #tpu.memory_space<vmem>>, vector<96x32xbf16>
    %c6 = arith.constant 6 : index
    %c0_33 = arith.constant 0 : index
    %c0_34 = arith.constant 0 : index
    %37 = vector.load %arg2[%c6, %c0_33, %c0_34] : memref<72x32x32xbf16, #tpu.memory_space<vmem>>, vector<1x32x32xbf16>
    %38 = vector.shape_cast %37 : vector<1x32x32xbf16> to vector<32x32xbf16>
    %cst_35 = arith.constant dense<0.000000e+00> : vector<96x32xf32>
    %39 = tpu.matmul %36, %38, %cst_35 {dimension_numbers = #tpu.dot_dimension_numbers<[1], [0], [0], [1], [0, 0, 1, 1], [], []>} : vector<96x32xbf16>, vector<32x32xbf16>, vector<96x32xf32> -> vector<96x32xf32>
    %40 = arith.addf %35, %39 : vector<96x32xf32>
    %c24 = arith.constant 24 : index
    %c0_36 = arith.constant 0 : index
    %41 = vector.load %arg7[%c24, %c0_36] : memref<128x32xbf16, #tpu.memory_space<vmem>>, vector<96x32xbf16>
    %c7_37 = arith.constant 7 : index
    %c0_38 = arith.constant 0 : index
    %c0_39 = arith.constant 0 : index
    %42 = vector.load %arg2[%c7_37, %c0_38, %c0_39] : memref<72x32x32xbf16, #tpu.memory_space<vmem>>, vector<1x32x32xbf16>
    %43 = vector.shape_cast %42 : vector<1x32x32xbf16> to vector<32x32xbf16>
    %cst_40 = arith.constant dense<0.000000e+00> : vector<96x32xf32>
    %44 = tpu.matmul %41, %43, %cst_40 {dimension_numbers = #tpu.dot_dimension_numbers<[1], [0], [0], [1], [0, 0, 1, 1], [], []>} : vector<96x32xbf16>, vector<32x32xbf16>, vector<96x32xf32> -> vector<96x32xf32>
    %45 = arith.addf %40, %44 : vector<96x32xf32>
    %c25 = arith.constant 25 : index
    %c0_41 = arith.constant 0 : index
    %46 = vector.load %arg7[%c25, %c0_41] : memref<128x32xbf16, #tpu.memory_space<vmem>>, vector<96x32xbf16>
    %c8_42 = arith.constant 8 : index
    %c0_43 = arith.constant 0 : index
    %c0_44 = arith.constant 0 : index
    %47 = vector.load %arg2[%c8_42, %c0_43, %c0_44] : memref<72x32x32xbf16, #tpu.memory_space<vmem>>, vector<1x32x32xbf16>
    %48 = vector.shape_cast %47 : vector<1x32x32xbf16> to vector<32x32xbf16>
    %cst_45 = arith.constant dense<0.000000e+00> : vector<96x32xf32>
    %49 = tpu.matmul %46, %48, %cst_45 {dimension_numbers = #tpu.dot_dimension_numbers<[1], [0], [0], [1], [0, 0, 1, 1], [], []>} : vector<96x32xbf16>, vector<32x32xbf16>, vector<96x32xf32> -> vector<96x32xf32>
    %50 = arith.addf %45, %49 : vector<96x32xf32>
    %c0_46 = arith.constant 0 : index
    %c0_47 = arith.constant 0 : index
    %c0_48 = arith.constant 0 : index
    %51 = vector.load %arg3[%c0_46, %c0_47, %c0_48] : memref<8x1x32xf32, #tpu.memory_space<vmem>>, vector<1x1x32xf32>
    %52 = vector.shape_cast %51 : vector<1x1x32xf32> to vector<1x32xf32>
    %53 = vector.broadcast %52 : vector<1x32xf32> to vector<96x32xf32>
    %54 = arith.addf %50, %53 : vector<96x32xf32>
    %c0_49 = arith.constant 0 : index
    %c0_50 = arith.constant 0 : index
    %c0_51 = arith.constant 0 : index
    %55 = vector.load %arg4[%c0_49, %c0_50, %c0_51] : memref<8x1x32xf32, #tpu.memory_space<vmem>>, vector<1x1x32xf32>
    %56 = vector.shape_cast %55 : vector<1x1x32xf32> to vector<1x32xf32>
    %57 = vector.broadcast %56 : vector<1x32xf32> to vector<96x32xf32>
    %58 = arith.mulf %54, %57 : vector<96x32xf32>
    %59 = arith.extf %7 : vector<96x32xbf16> to vector<96x32xf32>
    %60 = arith.addf %58, %59 : vector<96x32xf32>
    %cst_52 = arith.constant 0.000000e+00 : f32
    %61 = vector.broadcast %cst_52 : f32 to vector<96x32xf32>
    %62 = arith.cmpf oge, %60, %61 : vector<96x32xf32>
    %cst_53 = arith.constant 2.000000e-01 : f32
    %63 = vector.broadcast %cst_53 : f32 to vector<96x32xf32>
    %64 = arith.mulf %63, %60 : vector<96x32xf32>
    %65 = arith.select %62, %60, %64 : vector<96x32xi1>, vector<96x32xf32>
    %66 = arith.truncf %65 : vector<96x32xf32> to vector<96x32xbf16>
    %67 = vector.broadcast %6 : vector<96x1xbf16> to vector<96x32xbf16>
    %68 = arith.mulf %66, %67 : vector<96x32xbf16>
    %c16_54 = arith.constant 16 : index
    %c0_55 = arith.constant 0 : index
    %69 = vector.load %arg7[%c16_54, %c0_55] : memref<128x32xbf16, #tpu.memory_space<vmem>>, vector<96x32xbf16>
    tpu.vector_store %arg7[%c16_54, %c0_55], %68 {strides = array<i32>} : memref<128x32xbf16, #tpu.memory_space<vmem>>, vector<96x32xbf16>,
    %c16_56 = arith.constant 16 : index
    %c0_57 = arith.constant 0 : index
    %70 = vector.load %arg7[%c16_56, %c0_57] : memref<128x32xbf16, #tpu.memory_space<vmem>>, vector<96x32xbf16>
    %c13 = arith.constant 13 : index
    %c0_58 = arith.constant 0 : index
    %c0_59 = arith.constant 0 : index
    %71 = vector.load %arg2[%c13, %c0_58, %c0_59] : memref<72x32x32xbf16, #tpu.memory_space<vmem>>, vector<1x32x32xbf16>
    %72 = vector.shape_cast %71 : vector<1x32x32xbf16> to vector<32x32xbf16>
    %cst_60 = arith.constant dense<0.000000e+00> : vector<96x32xf32>
    %73 = tpu.matmul %70, %72, %cst_60 {dimension_numbers = #tpu.dot_dimension_numbers<[1], [0], [0], [1], [0, 0, 1, 1], [], []>} : vector<96x32xbf16>, vector<32x32xbf16>, vector<96x32xf32> -> vector<96x32xf32>
    %c7_61 = arith.constant 7 : index
    %c0_62 = arith.constant 0 : index
    %74 = vector.load %arg7[%c7_61, %c0_62] : memref<128x32xbf16, #tpu.memory_space<vmem>>, vector<96x32xbf16>
    %c9_63 = arith.constant 9 : index
    %c0_64 = arith.constant 0 : index
    %c0_65 = arith.constant 0 : index
    %75 = vector.load %arg2[%c9_63, %c0_64, %c0_65] : memref<72x32x32xbf16, #tpu.memory_space<vmem>>, vector<1x32x32xbf16>
    %76 = vector.shape_cast %75 : vector<1x32x32xbf16> to vector<32x32xbf16>
    %cst_66 = arith.constant dense<0.000000e+00> : vector<96x32xf32>
    %77 = tpu.matmul %74, %76, %cst_66 {dimension_numbers = #tpu.dot_dimension_numbers<[1], [0], [0], [1], [0, 0, 1, 1], [], []>} : vector<96x32xbf16>, vector<32x32xbf16>, vector<96x32xf32> -> vector<96x32xf32>
    %78 = arith.addf %73, %77 : vector<96x32xf32>
    %c8_67 = arith.constant 8 : index
    %c0_68 = arith.constant 0 : index
    %79 = vector.load %arg7[%c8_67, %c0_68] : memref<128x32xbf16, #tpu.memory_space<vmem>>, vector<96x32xbf16>
    %c10 = arith.constant 10 : index
    %c0_69 = arith.constant 0 : index
    %c0_70 = arith.constant 0 : index
    %80 = vector.load %arg2[%c10, %c0_69, %c0_70] : memref<72x32x32xbf16, #tpu.memory_space<vmem>>, vector<1x32x32xbf16>
    %81 = vector.shape_cast %80 : vector<1x32x32xbf16> to vector<32x32xbf16>
    %cst_71 = arith.constant dense<0.000000e+00> : vector<96x32xf32>
    %82 = tpu.matmul %79, %81, %cst_71 {dimension_numbers = #tpu.dot_dimension_numbers<[1], [0], [0], [1], [0, 0, 1, 1], [], []>} : vector<96x32xbf16>, vector<32x32xbf16>, vector<96x32xf32> -> vector<96x32xf32>
    %83 = arith.addf %78, %82 : vector<96x32xf32>
    %c9_72 = arith.constant 9 : index
    %c0_73 = arith.constant 0 : index
    %84 = vector.load %arg7[%c9_72, %c0_73] : memref<128x32xbf16, #tpu.memory_space<vmem>>, vector<96x32xbf16>
    %c11 = arith.constant 11 : index
    %c0_74 = arith.constant 0 : index
    %c0_75 = arith.constant 0 : index
    %85 = vector.load %arg2[%c11, %c0_74, %c0_75] : memref<72x32x32xbf16, #tpu.memory_space<vmem>>, vector<1x32x32xbf16>
    %86 = vector.shape_cast %85 : vector<1x32x32xbf16> to vector<32x32xbf16>
    %cst_76 = arith.constant dense<0.000000e+00> : vector<96x32xf32>
    %87 = tpu.matmul %84, %86, %cst_76 {dimension_numbers = #tpu.dot_dimension_numbers<[1], [0], [0], [1], [0, 0, 1, 1], [], []>} : vector<96x32xbf16>, vector<32x32xbf16>, vector<96x32xf32> -> vector<96x32xf32>
    %88 = arith.addf %83, %87 : vector<96x32xf32>
    %c15_77 = arith.constant 15 : index
    %c0_78 = arith.constant 0 : index
    %89 = vector.load %arg7[%c15_77, %c0_78] : memref<128x32xbf16, #tpu.memory_space<vmem>>, vector<96x32xbf16>
    %c12 = arith.constant 12 : index
    %c0_79 = arith.constant 0 : index
    %c0_80 = arith.constant 0 : index
    %90 = vector.load %arg2[%c12, %c0_79, %c0_80] : memref<72x32x32xbf16, #tpu.memory_space<vmem>>, vector<1x32x32xbf16>
    %91 = vector.shape_cast %90 : vector<1x32x32xbf16> to vector<32x32xbf16>
    %cst_81 = arith.constant dense<0.000000e+00> : vector<96x32xf32>
    %92 = tpu.matmul %89, %91, %cst_81 {dimension_numbers = #tpu.dot_dimension_numbers<[1], [0], [0], [1], [0, 0, 1, 1], [], []>} : vector<96x32xbf16>, vector<32x32xbf16>, vector<96x32xf32> -> vector<96x32xf32>
    %93 = arith.addf %88, %92 : vector<96x32xf32>
    %c17_82 = arith.constant 17 : index
    %c0_83 = arith.constant 0 : index
    %94 = vector.load %arg7[%c17_82, %c0_83] : memref<128x32xbf16, #tpu.memory_space<vmem>>, vector<96x32xbf16>
    %c14 = arith.constant 14 : index
    %c0_84 = arith.constant 0 : index
    %c0_85 = arith.constant 0 : index
    %95 = vector.load %arg2[%c14, %c0_84, %c0_85] : memref<72x32x32xbf16, #tpu.memory_space<vmem>>, vector<1x32x32xbf16>
    %96 = vector.shape_cast %95 : vector<1x32x32xbf16> to vector<32x32xbf16>
    %cst_86 = arith.constant dense<0.000000e+00> : vector<96x32xf32>
    %97 = tpu.matmul %94, %96, %cst_86 {dimension_numbers = #tpu.dot_dimension_numbers<[1], [0], [0], [1], [0, 0, 1, 1], [], []>} : vector<96x32xbf16>, vector<32x32xbf16>, vector<96x32xf32> -> vector<96x32xf32>
    %98 = arith.addf %93, %97 : vector<96x32xf32>
    %c23_87 = arith.constant 23 : index
    %c0_88 = arith.constant 0 : index
    %99 = vector.load %arg7[%c23_87, %c0_88] : memref<128x32xbf16, #tpu.memory_space<vmem>>, vector<96x32xbf16>
    %c15_89 = arith.constant 15 : index
    %c0_90 = arith.constant 0 : index
    %c0_91 = arith.constant 0 : index
    %100 = vector.load %arg2[%c15_89, %c0_90, %c0_91] : memref<72x32x32xbf16, #tpu.memory_space<vmem>>, vector<1x32x32xbf16>
    %101 = vector.shape_cast %100 : vector<1x32x32xbf16> to vector<32x32xbf16>
    %cst_92 = arith.constant dense<0.000000e+00> : vector<96x32xf32>
    %102 = tpu.matmul %99, %101, %cst_92 {dimension_numbers = #tpu.dot_dimension_numbers<[1], [0], [0], [1], [0, 0, 1, 1], [], []>} : vector<96x32xbf16>, vector<32x32xbf16>, vector<96x32xf32> -> vector<96x32xf32>
    %103 = arith.addf %98, %102 : vector<96x32xf32>
    %c24_93 = arith.constant 24 : index
    %c0_94 = arith.constant 0 : index
    %104 = vector.load %arg7[%c24_93, %c0_94] : memref<128x32xbf16, #tpu.memory_space<vmem>>, vector<96x32xbf16>
    %c16_95 = arith.constant 16 : index
    %c0_96 = arith.constant 0 : index
    %c0_97 = arith.constant 0 : index
    %105 = vector.load %arg2[%c16_95, %c0_96, %c0_97] : memref<72x32x32xbf16, #tpu.memory_space<vmem>>, vector<1x32x32xbf16>
    %106 = vector.shape_cast %105 : vector<1x32x32xbf16> to vector<32x32xbf16>
    %cst_98 = arith.constant dense<0.000000e+00> : vector<96x32xf32>
    %107 = tpu.matmul %104, %106, %cst_98 {dimension_numbers = #tpu.dot_dimension_numbers<[1], [0], [0], [1], [0, 0, 1, 1], [], []>} : vector<96x32xbf16>, vector<32x32xbf16>, vector<96x32xf32> -> vector<96x32xf32>
    %108 = arith.addf %103, %107 : vector<96x32xf32>
    %c25_99 = arith.constant 25 : index
    %c0_100 = arith.constant 0 : index
    %109 = vector.load %arg7[%c25_99, %c0_100] : memref<128x32xbf16, #tpu.memory_space<vmem>>, vector<96x32xbf16>
    %c17_101 = arith.constant 17 : index
    %c0_102 = arith.constant 0 : index
    %c0_103 = arith.constant 0 : index
    %110 = vector.load %arg2[%c17_101, %c0_102, %c0_103] : memref<72x32x32xbf16, #tpu.memory_space<vmem>>, vector<1x32x32xbf16>
    %111 = vector.shape_cast %110 : vector<1x32x32xbf16> to vector<32x32xbf16>
    %cst_104 = arith.constant dense<0.000000e+00> : vector<96x32xf32>
    %112 = tpu.matmul %109, %111, %cst_104 {dimension_numbers = #tpu.dot_dimension_numbers<[1], [0], [0], [1], [0, 0, 1, 1], [], []>} : vector<96x32xbf16>, vector<32x32xbf16>, vector<96x32xf32> -> vector<96x32xf32>
    %113 = arith.addf %108, %112 : vector<96x32xf32>
    %c1_105 = arith.constant 1 : index
    %c0_106 = arith.constant 0 : index
    %c0_107 = arith.constant 0 : index
    %114 = vector.load %arg3[%c1_105, %c0_106, %c0_107] : memref<8x1x32xf32, #tpu.memory_space<vmem>>, vector<1x1x32xf32>
    %115 = vector.shape_cast %114 : vector<1x1x32xf32> to vector<1x32xf32>
    %116 = vector.broadcast %115 : vector<1x32xf32> to vector<96x32xf32>
    %117 = arith.addf %113, %116 : vector<96x32xf32>
    %c1_108 = arith.constant 1 : index
    %c0_109 = arith.constant 0 : index
    %c0_110 = arith.constant 0 : index
    %118 = vector.load %arg4[%c1_108, %c0_109, %c0_110] : memref<8x1x32xf32, #tpu.memory_space<vmem>>, vector<1x1x32xf32>
    %119 = vector.shape_cast %118 : vector<1x1x32xf32> to vector<1x32xf32>
    %120 = vector.broadcast %119 : vector<1x32xf32> to vector<96x32xf32>
    %121 = arith.mulf %117, %120 : vector<96x32xf32>
    %122 = arith.extf %70 : vector<96x32xbf16> to vector<96x32xf32>
    %123 = arith.addf %121, %122 : vector<96x32xf32>
    %cst_111 = arith.constant 0.000000e+00 : f32
    %124 = vector.broadcast %cst_111 : f32 to vector<96x32xf32>
    %125 = arith.cmpf oge, %123, %124 : vector<96x32xf32>
    %cst_112 = arith.constant 2.000000e-01 : f32
    %126 = vector.broadcast %cst_112 : f32 to vector<96x32xf32>
    %127 = arith.mulf %126, %123 : vector<96x32xf32>
    %128 = arith.select %125, %123, %127 : vector<96x32xi1>, vector<96x32xf32>
    %129 = arith.truncf %128 : vector<96x32xf32> to vector<96x32xbf16>
    %130 = vector.broadcast %6 : vector<96x1xbf16> to vector<96x32xbf16>
    %131 = arith.mulf %129, %130 : vector<96x32xbf16>
    %c16_113 = arith.constant 16 : index
    %c0_114 = arith.constant 0 : index
    %132 = vector.load %arg7[%c16_113, %c0_114] : memref<128x32xbf16, #tpu.memory_space<vmem>>, vector<96x32xbf16>
    tpu.vector_store %arg7[%c16_113, %c0_114], %131 {strides = array<i32>} : memref<128x32xbf16, #tpu.memory_space<vmem>>, vector<96x32xbf16>,
    %c16_115 = arith.constant 16 : index
    %c0_116 = arith.constant 0 : index
    %133 = vector.load %arg7[%c16_115, %c0_116] : memref<128x32xbf16, #tpu.memory_space<vmem>>, vector<96x32xbf16>
    %c22 = arith.constant 22 : index
    %c0_117 = arith.constant 0 : index
    %c0_118 = arith.constant 0 : index
    %134 = vector.load %arg2[%c22, %c0_117, %c0_118] : memref<72x32x32xbf16, #tpu.memory_space<vmem>>, vector<1x32x32xbf16>
    %135 = vector.shape_cast %134 : vector<1x32x32xbf16> to vector<32x32xbf16>
    %cst_119 = arith.constant dense<0.000000e+00> : vector<96x32xf32>
    %136 = tpu.matmul %133, %135, %cst_119 {dimension_numbers = #tpu.dot_dimension_numbers<[1], [0], [0], [1], [0, 0, 1, 1], [], []>} : vector<96x32xbf16>, vector<32x32xbf16>, vector<96x32xf32> -> vector<96x32xf32>
    %c7_120 = arith.constant 7 : index
    %c0_121 = arith.constant 0 : index
    %137 = vector.load %arg7[%c7_120, %c0_121] : memref<128x32xbf16, #tpu.memory_space<vmem>>, vector<96x32xbf16>
    %c18 = arith.constant 18 : index
    %c0_122 = arith.constant 0 : index
    %c0_123 = arith.constant 0 : index
    %138 = vector.load %arg2[%c18, %c0_122, %c0_123] : memref<72x32x32xbf16, #tpu.memory_space<vmem>>, vector<1x32x32xbf16>
    %139 = vector.shape_cast %138 : vector<1x32x32xbf16> to vector<32x32xbf16>
    %cst_124 = arith.constant dense<0.000000e+00> : vector<96x32xf32>
    %140 = tpu.matmul %137, %139, %cst_124 {dimension_numbers = #tpu.dot_dimension_numbers<[1], [0], [0], [1], [0, 0, 1, 1], [], []>} : vector<96x32xbf16>, vector<32x32xbf16>, vector<96x32xf32> -> vector<96x32xf32>
    %141 = arith.addf %136, %140 : vector<96x32xf32>
    %c8_125 = arith.constant 8 : index
    %c0_126 = arith.constant 0 : index
    %142 = vector.load %arg7[%c8_125, %c0_126] : memref<128x32xbf16, #tpu.memory_space<vmem>>, vector<96x32xbf16>
    %c19 = arith.constant 19 : index
    %c0_127 = arith.constant 0 : index
    %c0_128 = arith.constant 0 : index
    %143 = vector.load %arg2[%c19, %c0_127, %c0_128] : memref<72x32x32xbf16, #tpu.memory_space<vmem>>, vector<1x32x32xbf16>
    %144 = vector.shape_cast %143 : vector<1x32x32xbf16> to vector<32x32xbf16>
    %cst_129 = arith.constant dense<0.000000e+00> : vector<96x32xf32>
    %145 = tpu.matmul %142, %144, %cst_129 {dimension_numbers = #tpu.dot_dimension_numbers<[1], [0], [0], [1], [0, 0, 1, 1], [], []>} : vector<96x32xbf16>, vector<32x32xbf16>, vector<96x32xf32> -> vector<96x32xf32>
    %146 = arith.addf %141, %145 : vector<96x32xf32>
    %c9_130 = arith.constant 9 : index
    %c0_131 = arith.constant 0 : index
    %147 = vector.load %arg7[%c9_130, %c0_131] : memref<128x32xbf16, #tpu.memory_space<vmem>>, vector<96x32xbf16>
    %c20 = arith.constant 20 : index
    %c0_132 = arith.constant 0 : index
    %c0_133 = arith.constant 0 : index
    %148 = vector.load %arg2[%c20, %c0_132, %c0_133] : memref<72x32x32xbf16, #tpu.memory_space<vmem>>, vector<1x32x32xbf16>
    %149 = vector.shape_cast %148 : vector<1x32x32xbf16> to vector<32x32xbf16>
    %cst_134 = arith.constant dense<0.000000e+00> : vector<96x32xf32>
    %150 = tpu.matmul %147, %149, %cst_134 {dimension_numbers = #tpu.dot_dimension_numbers<[1], [0], [0], [1], [0, 0, 1, 1], [], []>} : vector<96x32xbf16>, vector<32x32xbf16>, vector<96x32xf32> -> vector<96x32xf32>
    %151 = arith.addf %146, %150 : vector<96x32xf32>
    %c15_135 = arith.constant 15 : index
    %c0_136 = arith.constant 0 : index
    %152 = vector.load %arg7[%c15_135, %c0_136] : memref<128x32xbf16, #tpu.memory_space<vmem>>, vector<96x32xbf16>
    %c21 = arith.constant 21 : index
    %c0_137 = arith.constant 0 : index
    %c0_138 = arith.constant 0 : index
    %153 = vector.load %arg2[%c21, %c0_137, %c0_138] : memref<72x32x32xbf16, #tpu.memory_space<vmem>>, vector<1x32x32xbf16>
    %154 = vector.shape_cast %153 : vector<1x32x32xbf16> to vector<32x32xbf16>
    %cst_139 = arith.constant dense<0.000000e+00> : vector<96x32xf32>
    %155 = tpu.matmul %152, %154, %cst_139 {dimension_numbers = #tpu.dot_dimension_numbers<[1], [0], [0], [1], [0, 0, 1, 1], [], []>} : vector<96x32xbf16>, vector<32x32xbf16>, vector<96x32xf32> -> vector<96x32xf32>
    %156 = arith.addf %151, %155 : vector<96x32xf32>
    %c17_140 = arith.constant 17 : index
    %c0_141 = arith.constant 0 : index
    %157 = vector.load %arg7[%c17_140, %c0_141] : memref<128x32xbf16, #tpu.memory_space<vmem>>, vector<96x32xbf16>
    %c23_142 = arith.constant 23 : index
    %c0_143 = arith.constant 0 : index
    %c0_144 = arith.constant 0 : index
    %158 = vector.load %arg2[%c23_142, %c0_143, %c0_144] : memref<72x32x32xbf16, #tpu.memory_space<vmem>>, vector<1x32x32xbf16>
    %159 = vector.shape_cast %158 : vector<1x32x32xbf16> to vector<32x32xbf16>
    %cst_145 = arith.constant dense<0.000000e+00> : vector<96x32xf32>
    %160 = tpu.matmul %157, %159, %cst_145 {dimension_numbers = #tpu.dot_dimension_numbers<[1], [0], [0], [1], [0, 0, 1, 1], [], []>} : vector<96x32xbf16>, vector<32x32xbf16>, vector<96x32xf32> -> vector<96x32xf32>
    %161 = arith.addf %156, %160 : vector<96x32xf32>
    %c23_146 = arith.constant 23 : index
    %c0_147 = arith.constant 0 : index
    %162 = vector.load %arg7[%c23_146, %c0_147] : memref<128x32xbf16, #tpu.memory_space<vmem>>, vector<96x32xbf16>
    %c24_148 = arith.constant 24 : index
    %c0_149 = arith.constant 0 : index
    %c0_150 = arith.constant 0 : index
    %163 = vector.load %arg2[%c24_148, %c0_149, %c0_150] : memref<72x32x32xbf16, #tpu.memory_space<vmem>>, vector<1x32x32xbf16>
    %164 = vector.shape_cast %163 : vector<1x32x32xbf16> to vector<32x32xbf16>
    %cst_151 = arith.constant dense<0.000000e+00> : vector<96x32xf32>
    %165 = tpu.matmul %162, %164, %cst_151 {dimension_numbers = #tpu.dot_dimension_numbers<[1], [0], [0], [1], [0, 0, 1, 1], [], []>} : vector<96x32xbf16>, vector<32x32xbf16>, vector<96x32xf32> -> vector<96x32xf32>
    %166 = arith.addf %161, %165 : vector<96x32xf32>
    %c24_152 = arith.constant 24 : index
    %c0_153 = arith.constant 0 : index
    %167 = vector.load %arg7[%c24_152, %c0_153] : memref<128x32xbf16, #tpu.memory_space<vmem>>, vector<96x32xbf16>
    %c25_154 = arith.constant 25 : index
    %c0_155 = arith.constant 0 : index
    %c0_156 = arith.constant 0 : index
    %168 = vector.load %arg2[%c25_154, %c0_155, %c0_156] : memref<72x32x32xbf16, #tpu.memory_space<vmem>>, vector<1x32x32xbf16>
    %169 = vector.shape_cast %168 : vector<1x32x32xbf16> to vector<32x32xbf16>
    %cst_157 = arith.constant dense<0.000000e+00> : vector<96x32xf32>
    %170 = tpu.matmul %167, %169, %cst_157 {dimension_numbers = #tpu.dot_dimension_numbers<[1], [0], [0], [1], [0, 0, 1, 1], [], []>} : vector<96x32xbf16>, vector<32x32xbf16>, vector<96x32xf32> -> vector<96x32xf32>
    %171 = arith.addf %166, %170 : vector<96x32xf32>
    %c25_158 = arith.constant 25 : index
    %c0_159 = arith.constant 0 : index
    %172 = vector.load %arg7[%c25_158, %c0_159] : memref<128x32xbf16, #tpu.memory_space<vmem>>, vector<96x32xbf16>
    %c26 = arith.constant 26 : index
    %c0_160 = arith.constant 0 : index
    %c0_161 = arith.constant 0 : index
    %173 = vector.load %arg2[%c26, %c0_160, %c0_161] : memref<72x32x32xbf16, #tpu.memory_space<vmem>>, vector<1x32x32xbf16>
    %174 = vector.shape_cast %173 : vector<1x32x32xbf16> to vector<32x32xbf16>
    %cst_162 = arith.constant dense<0.000000e+00> : vector<96x32xf32>
    %175 = tpu.matmul %172, %174, %cst_162 {dimension_numbers = #tpu.dot_dimension_numbers<[1], [0], [0], [1], [0, 0, 1, 1], [], []>} : vector<96x32xbf16>, vector<32x32xbf16>, vector<96x32xf32> -> vector<96x32xf32>
    %176 = arith.addf %171, %175 : vector<96x32xf32>
    %c2_163 = arith.constant 2 : index
    %c0_164 = arith.constant 0 : index
    %c0_165 = arith.constant 0 : index
    %177 = vector.load %arg3[%c2_163, %c0_164, %c0_165] : memref<8x1x32xf32, #tpu.memory_space<vmem>>, vector<1x1x32xf32>
    %178 = vector.shape_cast %177 : vector<1x1x32xf32> to vector<1x32xf32>
    %179 = vector.broadcast %178 : vector<1x32xf32> to vector<96x32xf32>
    %180 = arith.addf %176, %179 : vector<96x32xf32>
    %c2_166 = arith.constant 2 : index
    %c0_167 = arith.constant 0 : index
    %c0_168 = arith.constant 0 : index
    %181 = vector.load %arg4[%c2_166, %c0_167, %c0_168] : memref<8x1x32xf32, #tpu.memory_space<vmem>>, vector<1x1x32xf32>
    %182 = vector.shape_cast %181 : vector<1x1x32xf32> to vector<1x32xf32>
    %183 = vector.broadcast %182 : vector<1x32xf32> to vector<96x32xf32>
    %184 = arith.mulf %180, %183 : vector<96x32xf32>
    %185 = arith.extf %133 : vector<96x32xbf16> to vector<96x32xf32>
    %186 = arith.addf %184, %185 : vector<96x32xf32>
    %cst_169 = arith.constant 0.000000e+00 : f32
    %187 = vector.broadcast %cst_169 : f32 to vector<96x32xf32>
    %188 = arith.cmpf oge, %186, %187 : vector<96x32xf32>
    %cst_170 = arith.constant 2.000000e-01 : f32
    %189 = vector.broadcast %cst_170 : f32 to vector<96x32xf32>
    %190 = arith.mulf %189, %186 : vector<96x32xf32>
    %191 = arith.select %188, %186, %190 : vector<96x32xi1>, vector<96x32xf32>
    %192 = arith.truncf %191 : vector<96x32xf32> to vector<96x32xbf16>
    %193 = vector.broadcast %6 : vector<96x1xbf16> to vector<96x32xbf16>
    %194 = arith.mulf %192, %193 : vector<96x32xbf16>
    %c16_171 = arith.constant 16 : index
    %c0_172 = arith.constant 0 : index
    %195 = vector.load %arg7[%c16_171, %c0_172] : memref<128x32xbf16, #tpu.memory_space<vmem>>, vector<96x32xbf16>
    tpu.vector_store %arg7[%c16_171, %c0_172], %194 {strides = array<i32>} : memref<128x32xbf16, #tpu.memory_space<vmem>>, vector<96x32xbf16>,
    %c16_173 = arith.constant 16 : index
    %c0_174 = arith.constant 0 : index
    %196 = vector.load %arg7[%c16_173, %c0_174] : memref<128x32xbf16, #tpu.memory_space<vmem>>, vector<96x32xbf16>
    %c31 = arith.constant 31 : index
    %c0_175 = arith.constant 0 : index
    %c0_176 = arith.constant 0 : index
    %197 = vector.load %arg2[%c31, %c0_175, %c0_176] : memref<72x32x32xbf16, #tpu.memory_space<vmem>>, vector<1x32x32xbf16>
    %198 = vector.shape_cast %197 : vector<1x32x32xbf16> to vector<32x32xbf16>
    %cst_177 = arith.constant dense<0.000000e+00> : vector<96x32xf32>
    %199 = tpu.matmul %196, %198, %cst_177 {dimension_numbers = #tpu.dot_dimension_numbers<[1], [0], [0], [1], [0, 0, 1, 1], [], []>} : vector<96x32xbf16>, vector<32x32xbf16>, vector<96x32xf32> -> vector<96x32xf32>
    %c7_178 = arith.constant 7 : index
    %c0_179 = arith.constant 0 : index
    %200 = vector.load %arg7[%c7_178, %c0_179] : memref<128x32xbf16, #tpu.memory_space<vmem>>, vector<96x32xbf16>
    %c27 = arith.constant 27 : index
    %c0_180 = arith.constant 0 : index
    %c0_181 = arith.constant 0 : index
    %201 = vector.load %arg2[%c27, %c0_180, %c0_181] : memref<72x32x32xbf16, #tpu.memory_space<vmem>>, vector<1x32x32xbf16>
    %202 = vector.shape_cast %201 : vector<1x32x32xbf16> to vector<32x32xbf16>
    %cst_182 = arith.constant dense<0.000000e+00> : vector<96x32xf32>
    %203 = tpu.matmul %200, %202, %cst_182 {dimension_numbers = #tpu.dot_dimension_numbers<[1], [0], [0], [1], [0, 0, 1, 1], [], []>} : vector<96x32xbf16>, vector<32x32xbf16>, vector<96x32xf32> -> vector<96x32xf32>
    %204 = arith.addf %199, %203 : vector<96x32xf32>
    %c8_183 = arith.constant 8 : index
    %c0_184 = arith.constant 0 : index
    %205 = vector.load %arg7[%c8_183, %c0_184] : memref<128x32xbf16, #tpu.memory_space<vmem>>, vector<96x32xbf16>
    %c28 = arith.constant 28 : index
    %c0_185 = arith.constant 0 : index
    %c0_186 = arith.constant 0 : index
    %206 = vector.load %arg2[%c28, %c0_185, %c0_186] : memref<72x32x32xbf16, #tpu.memory_space<vmem>>, vector<1x32x32xbf16>
    %207 = vector.shape_cast %206 : vector<1x32x32xbf16> to vector<32x32xbf16>
    %cst_187 = arith.constant dense<0.000000e+00> : vector<96x32xf32>
    %208 = tpu.matmul %205, %207, %cst_187 {dimension_numbers = #tpu.dot_dimension_numbers<[1], [0], [0], [1], [0, 0, 1, 1], [], []>} : vector<96x32xbf16>, vector<32x32xbf16>, vector<96x32xf32> -> vector<96x32xf32>
    %209 = arith.addf %204, %208 : vector<96x32xf32>
    %c9_188 = arith.constant 9 : index
    %c0_189 = arith.constant 0 : index
    %210 = vector.load %arg7[%c9_188, %c0_189] : memref<128x32xbf16, #tpu.memory_space<vmem>>, vector<96x32xbf16>
    %c29 = arith.constant 29 : index
    %c0_190 = arith.constant 0 : index
    %c0_191 = arith.constant 0 : index
    %211 = vector.load %arg2[%c29, %c0_190, %c0_191] : memref<72x32x32xbf16, #tpu.memory_space<vmem>>, vector<1x32x32xbf16>
    %212 = vector.shape_cast %211 : vector<1x32x32xbf16> to vector<32x32xbf16>
    %cst_192 = arith.constant dense<0.000000e+00> : vector<96x32xf32>
    %213 = tpu.matmul %210, %212, %cst_192 {dimension_numbers = #tpu.dot_dimension_numbers<[1], [0], [0], [1], [0, 0, 1, 1], [], []>} : vector<96x32xbf16>, vector<32x32xbf16>, vector<96x32xf32> -> vector<96x32xf32>
    %214 = arith.addf %209, %213 : vector<96x32xf32>
    %c15_193 = arith.constant 15 : index
    %c0_194 = arith.constant 0 : index
    %215 = vector.load %arg7[%c15_193, %c0_194] : memref<128x32xbf16, #tpu.memory_space<vmem>>, vector<96x32xbf16>
    %c30 = arith.constant 30 : index
    %c0_195 = arith.constant 0 : index
    %c0_196 = arith.constant 0 : index
    %216 = vector.load %arg2[%c30, %c0_195, %c0_196] : memref<72x32x32xbf16, #tpu.memory_space<vmem>>, vector<1x32x32xbf16>
    %217 = vector.shape_cast %216 : vector<1x32x32xbf16> to vector<32x32xbf16>
    %cst_197 = arith.constant dense<0.000000e+00> : vector<96x32xf32>
    %218 = tpu.matmul %215, %217, %cst_197 {dimension_numbers = #tpu.dot_dimension_numbers<[1], [0], [0], [1], [0, 0, 1, 1], [], []>} : vector<96x32xbf16>, vector<32x32xbf16>, vector<96x32xf32> -> vector<96x32xf32>
    %219 = arith.addf %214, %218 : vector<96x32xf32>
    %c17_198 = arith.constant 17 : index
    %c0_199 = arith.constant 0 : index
    %220 = vector.load %arg7[%c17_198, %c0_199] : memref<128x32xbf16, #tpu.memory_space<vmem>>, vector<96x32xbf16>
    %c32 = arith.constant 32 : index
    %c0_200 = arith.constant 0 : index
    %c0_201 = arith.constant 0 : index
    %221 = vector.load %arg2[%c32, %c0_200, %c0_201] : memref<72x32x32xbf16, #tpu.memory_space<vmem>>, vector<1x32x32xbf16>
    %222 = vector.shape_cast %221 : vector<1x32x32xbf16> to vector<32x32xbf16>
    %cst_202 = arith.constant dense<0.000000e+00> : vector<96x32xf32>
    %223 = tpu.matmul %220, %222, %cst_202 {dimension_numbers = #tpu.dot_dimension_numbers<[1], [0], [0], [1], [0, 0, 1, 1], [], []>} : vector<96x32xbf16>, vector<32x32xbf16>, vector<96x32xf32> -> vector<96x32xf32>
    %224 = arith.addf %219, %223 : vector<96x32xf32>
    %c23_203 = arith.constant 23 : index
    %c0_204 = arith.constant 0 : index
    %225 = vector.load %arg7[%c23_203, %c0_204] : memref<128x32xbf16, #tpu.memory_space<vmem>>, vector<96x32xbf16>
    %c33 = arith.constant 33 : index
    %c0_205 = arith.constant 0 : index
    %c0_206 = arith.constant 0 : index
    %226 = vector.load %arg2[%c33, %c0_205, %c0_206] : memref<72x32x32xbf16, #tpu.memory_space<vmem>>, vector<1x32x32xbf16>
    %227 = vector.shape_cast %226 : vector<1x32x32xbf16> to vector<32x32xbf16>
    %cst_207 = arith.constant dense<0.000000e+00> : vector<96x32xf32>
    %228 = tpu.matmul %225, %227, %cst_207 {dimension_numbers = #tpu.dot_dimension_numbers<[1], [0], [0], [1], [0, 0, 1, 1], [], []>} : vector<96x32xbf16>, vector<32x32xbf16>, vector<96x32xf32> -> vector<96x32xf32>
    %229 = arith.addf %224, %228 : vector<96x32xf32>
    %c24_208 = arith.constant 24 : index
    %c0_209 = arith.constant 0 : index
    %230 = vector.load %arg7[%c24_208, %c0_209] : memref<128x32xbf16, #tpu.memory_space<vmem>>, vector<96x32xbf16>
    %c34 = arith.constant 34 : index
    %c0_210 = arith.constant 0 : index
    %c0_211 = arith.constant 0 : index
    %231 = vector.load %arg2[%c34, %c0_210, %c0_211] : memref<72x32x32xbf16, #tpu.memory_space<vmem>>, vector<1x32x32xbf16>
    %232 = vector.shape_cast %231 : vector<1x32x32xbf16> to vector<32x32xbf16>
    %cst_212 = arith.constant dense<0.000000e+00> : vector<96x32xf32>
    %233 = tpu.matmul %230, %232, %cst_212 {dimension_numbers = #tpu.dot_dimension_numbers<[1], [0], [0], [1], [0, 0, 1, 1], [], []>} : vector<96x32xbf16>, vector<32x32xbf16>, vector<96x32xf32> -> vector<96x32xf32>
    %234 = arith.addf %229, %233 : vector<96x32xf32>
    %c25_213 = arith.constant 25 : index
    %c0_214 = arith.constant 0 : index
    %235 = vector.load %arg7[%c25_213, %c0_214] : memref<128x32xbf16, #tpu.memory_space<vmem>>, vector<96x32xbf16>
    %c35 = arith.constant 35 : index
    %c0_215 = arith.constant 0 : index
    %c0_216 = arith.constant 0 : index
    %236 = vector.load %arg2[%c35, %c0_215, %c0_216] : memref<72x32x32xbf16, #tpu.memory_space<vmem>>, vector<1x32x32xbf16>
    %237 = vector.shape_cast %236 : vector<1x32x32xbf16> to vector<32x32xbf16>
    %cst_217 = arith.constant dense<0.000000e+00> : vector<96x32xf32>
    %238 = tpu.matmul %235, %237, %cst_217 {dimension_numbers = #tpu.dot_dimension_numbers<[1], [0], [0], [1], [0, 0, 1, 1], [], []>} : vector<96x32xbf16>, vector<32x32xbf16>, vector<96x32xf32> -> vector<96x32xf32>
    %239 = arith.addf %234, %238 : vector<96x32xf32>
    %c3_218 = arith.constant 3 : index
    %c0_219 = arith.constant 0 : index
    %c0_220 = arith.constant 0 : index
    %240 = vector.load %arg3[%c3_218, %c0_219, %c0_220] : memref<8x1x32xf32, #tpu.memory_space<vmem>>, vector<1x1x32xf32>
    %241 = vector.shape_cast %240 : vector<1x1x32xf32> to vector<1x32xf32>
    %242 = vector.broadcast %241 : vector<1x32xf32> to vector<96x32xf32>
    %243 = arith.addf %239, %242 : vector<96x32xf32>
    %c3_221 = arith.constant 3 : index
    %c0_222 = arith.constant 0 : index
    %c0_223 = arith.constant 0 : index
    %244 = vector.load %arg4[%c3_221, %c0_222, %c0_223] : memref<8x1x32xf32, #tpu.memory_space<vmem>>, vector<1x1x32xf32>
    %245 = vector.shape_cast %244 : vector<1x1x32xf32> to vector<1x32xf32>
    %246 = vector.broadcast %245 : vector<1x32xf32> to vector<96x32xf32>
    %247 = arith.mulf %243, %246 : vector<96x32xf32>
    %248 = arith.extf %196 : vector<96x32xbf16> to vector<96x32xf32>
    %249 = arith.addf %247, %248 : vector<96x32xf32>
    %cst_224 = arith.constant 0.000000e+00 : f32
    %250 = vector.broadcast %cst_224 : f32 to vector<96x32xf32>
    %251 = arith.cmpf oge, %249, %250 : vector<96x32xf32>
    %cst_225 = arith.constant 2.000000e-01 : f32
    %252 = vector.broadcast %cst_225 : f32 to vector<96x32xf32>
    %253 = arith.mulf %252, %249 : vector<96x32xf32>
    %254 = arith.select %251, %249, %253 : vector<96x32xi1>, vector<96x32xf32>
    %255 = arith.truncf %254 : vector<96x32xf32> to vector<96x32xbf16>
    %256 = vector.broadcast %6 : vector<96x1xbf16> to vector<96x32xbf16>
    %257 = arith.mulf %255, %256 : vector<96x32xbf16>
    %c16_226 = arith.constant 16 : index
    %c0_227 = arith.constant 0 : index
    %258 = vector.load %arg7[%c16_226, %c0_227] : memref<128x32xbf16, #tpu.memory_space<vmem>>, vector<96x32xbf16>
    tpu.vector_store %arg7[%c16_226, %c0_227], %257 {strides = array<i32>} : memref<128x32xbf16, #tpu.memory_space<vmem>>, vector<96x32xbf16>,
    %c16_228 = arith.constant 16 : index
    %c0_229 = arith.constant 0 : index
    %259 = vector.load %arg7[%c16_228, %c0_229] : memref<128x32xbf16, #tpu.memory_space<vmem>>, vector<96x32xbf16>
    %c40 = arith.constant 40 : index
    %c0_230 = arith.constant 0 : index
    %c0_231 = arith.constant 0 : index
    %260 = vector.load %arg2[%c40, %c0_230, %c0_231] : memref<72x32x32xbf16, #tpu.memory_space<vmem>>, vector<1x32x32xbf16>
    %261 = vector.shape_cast %260 : vector<1x32x32xbf16> to vector<32x32xbf16>
    %cst_232 = arith.constant dense<0.000000e+00> : vector<96x32xf32>
    %262 = tpu.matmul %259, %261, %cst_232 {dimension_numbers = #tpu.dot_dimension_numbers<[1], [0], [0], [1], [0, 0, 1, 1], [], []>} : vector<96x32xbf16>, vector<32x32xbf16>, vector<96x32xf32> -> vector<96x32xf32>
    %c7_233 = arith.constant 7 : index
    %c0_234 = arith.constant 0 : index
    %263 = vector.load %arg7[%c7_233, %c0_234] : memref<128x32xbf16, #tpu.memory_space<vmem>>, vector<96x32xbf16>
    %c36 = arith.constant 36 : index
    %c0_235 = arith.constant 0 : index
    %c0_236 = arith.constant 0 : index
    %264 = vector.load %arg2[%c36, %c0_235, %c0_236] : memref<72x32x32xbf16, #tpu.memory_space<vmem>>, vector<1x32x32xbf16>
    %265 = vector.shape_cast %264 : vector<1x32x32xbf16> to vector<32x32xbf16>
    %cst_237 = arith.constant dense<0.000000e+00> : vector<96x32xf32>
    %266 = tpu.matmul %263, %265, %cst_237 {dimension_numbers = #tpu.dot_dimension_numbers<[1], [0], [0], [1], [0, 0, 1, 1], [], []>} : vector<96x32xbf16>, vector<32x32xbf16>, vector<96x32xf32> -> vector<96x32xf32>
    %267 = arith.addf %262, %266 : vector<96x32xf32>
    %c8_238 = arith.constant 8 : index
    %c0_239 = arith.constant 0 : index
    %268 = vector.load %arg7[%c8_238, %c0_239] : memref<128x32xbf16, #tpu.memory_space<vmem>>, vector<96x32xbf16>
    %c37 = arith.constant 37 : index
    %c0_240 = arith.constant 0 : index
    %c0_241 = arith.constant 0 : index
    %269 = vector.load %arg2[%c37, %c0_240, %c0_241] : memref<72x32x32xbf16, #tpu.memory_space<vmem>>, vector<1x32x32xbf16>
    %270 = vector.shape_cast %269 : vector<1x32x32xbf16> to vector<32x32xbf16>
    %cst_242 = arith.constant dense<0.000000e+00> : vector<96x32xf32>
    %271 = tpu.matmul %268, %270, %cst_242 {dimension_numbers = #tpu.dot_dimension_numbers<[1], [0], [0], [1], [0, 0, 1, 1], [], []>} : vector<96x32xbf16>, vector<32x32xbf16>, vector<96x32xf32> -> vector<96x32xf32>
    %272 = arith.addf %267, %271 : vector<96x32xf32>
    %c9_243 = arith.constant 9 : index
    %c0_244 = arith.constant 0 : index
    %273 = vector.load %arg7[%c9_243, %c0_244] : memref<128x32xbf16, #tpu.memory_space<vmem>>, vector<96x32xbf16>
    %c38 = arith.constant 38 : index
    %c0_245 = arith.constant 0 : index
    %c0_246 = arith.constant 0 : index
    %274 = vector.load %arg2[%c38, %c0_245, %c0_246] : memref<72x32x32xbf16, #tpu.memory_space<vmem>>, vector<1x32x32xbf16>
    %275 = vector.shape_cast %274 : vector<1x32x32xbf16> to vector<32x32xbf16>
    %cst_247 = arith.constant dense<0.000000e+00> : vector<96x32xf32>
    %276 = tpu.matmul %273, %275, %cst_247 {dimension_numbers = #tpu.dot_dimension_numbers<[1], [0], [0], [1], [0, 0, 1, 1], [], []>} : vector<96x32xbf16>, vector<32x32xbf16>, vector<96x32xf32> -> vector<96x32xf32>
    %277 = arith.addf %272, %276 : vector<96x32xf32>
    %c15_248 = arith.constant 15 : index
    %c0_249 = arith.constant 0 : index
    %278 = vector.load %arg7[%c15_248, %c0_249] : memref<128x32xbf16, #tpu.memory_space<vmem>>, vector<96x32xbf16>
    %c39 = arith.constant 39 : index
    %c0_250 = arith.constant 0 : index
    %c0_251 = arith.constant 0 : index
    %279 = vector.load %arg2[%c39, %c0_250, %c0_251] : memref<72x32x32xbf16, #tpu.memory_space<vmem>>, vector<1x32x32xbf16>
    %280 = vector.shape_cast %279 : vector<1x32x32xbf16> to vector<32x32xbf16>
    %cst_252 = arith.constant dense<0.000000e+00> : vector<96x32xf32>
    %281 = tpu.matmul %278, %280, %cst_252 {dimension_numbers = #tpu.dot_dimension_numbers<[1], [0], [0], [1], [0, 0, 1, 1], [], []>} : vector<96x32xbf16>, vector<32x32xbf16>, vector<96x32xf32> -> vector<96x32xf32>
    %282 = arith.addf %277, %281 : vector<96x32xf32>
    %c17_253 = arith.constant 17 : index
    %c0_254 = arith.constant 0 : index
    %283 = vector.load %arg7[%c17_253, %c0_254] : memref<128x32xbf16, #tpu.memory_space<vmem>>, vector<96x32xbf16>
    %c41 = arith.constant 41 : index
    %c0_255 = arith.constant 0 : index
    %c0_256 = arith.constant 0 : index
    %284 = vector.load %arg2[%c41, %c0_255, %c0_256] : memref<72x32x32xbf16, #tpu.memory_space<vmem>>, vector<1x32x32xbf16>
    %285 = vector.shape_cast %284 : vector<1x32x32xbf16> to vector<32x32xbf16>
    %cst_257 = arith.constant dense<0.000000e+00> : vector<96x32xf32>
    %286 = tpu.matmul %283, %285, %cst_257 {dimension_numbers = #tpu.dot_dimension_numbers<[1], [0], [0], [1], [0, 0, 1, 1], [], []>} : vector<96x32xbf16>, vector<32x32xbf16>, vector<96x32xf32> -> vector<96x32xf32>
    %287 = arith.addf %282, %286 : vector<96x32xf32>
    %c23_258 = arith.constant 23 : index
    %c0_259 = arith.constant 0 : index
    %288 = vector.load %arg7[%c23_258, %c0_259] : memref<128x32xbf16, #tpu.memory_space<vmem>>, vector<96x32xbf16>
    %c42 = arith.constant 42 : index
    %c0_260 = arith.constant 0 : index
    %c0_261 = arith.constant 0 : index
    %289 = vector.load %arg2[%c42, %c0_260, %c0_261] : memref<72x32x32xbf16, #tpu.memory_space<vmem>>, vector<1x32x32xbf16>
    %290 = vector.shape_cast %289 : vector<1x32x32xbf16> to vector<32x32xbf16>
    %cst_262 = arith.constant dense<0.000000e+00> : vector<96x32xf32>
    %291 = tpu.matmul %288, %290, %cst_262 {dimension_numbers = #tpu.dot_dimension_numbers<[1], [0], [0], [1], [0, 0, 1, 1], [], []>} : vector<96x32xbf16>, vector<32x32xbf16>, vector<96x32xf32> -> vector<96x32xf32>
    %292 = arith.addf %287, %291 : vector<96x32xf32>
    %c24_263 = arith.constant 24 : index
    %c0_264 = arith.constant 0 : index
    %293 = vector.load %arg7[%c24_263, %c0_264] : memref<128x32xbf16, #tpu.memory_space<vmem>>, vector<96x32xbf16>
    %c43 = arith.constant 43 : index
    %c0_265 = arith.constant 0 : index
    %c0_266 = arith.constant 0 : index
    %294 = vector.load %arg2[%c43, %c0_265, %c0_266] : memref<72x32x32xbf16, #tpu.memory_space<vmem>>, vector<1x32x32xbf16>
    %295 = vector.shape_cast %294 : vector<1x32x32xbf16> to vector<32x32xbf16>
    %cst_267 = arith.constant dense<0.000000e+00> : vector<96x32xf32>
    %296 = tpu.matmul %293, %295, %cst_267 {dimension_numbers = #tpu.dot_dimension_numbers<[1], [0], [0], [1], [0, 0, 1, 1], [], []>} : vector<96x32xbf16>, vector<32x32xbf16>, vector<96x32xf32> -> vector<96x32xf32>
    %297 = arith.addf %292, %296 : vector<96x32xf32>
    %c25_268 = arith.constant 25 : index
    %c0_269 = arith.constant 0 : index
    %298 = vector.load %arg7[%c25_268, %c0_269] : memref<128x32xbf16, #tpu.memory_space<vmem>>, vector<96x32xbf16>
    %c44 = arith.constant 44 : index
    %c0_270 = arith.constant 0 : index
    %c0_271 = arith.constant 0 : index
    %299 = vector.load %arg2[%c44, %c0_270, %c0_271] : memref<72x32x32xbf16, #tpu.memory_space<vmem>>, vector<1x32x32xbf16>
    %300 = vector.shape_cast %299 : vector<1x32x32xbf16> to vector<32x32xbf16>
    %cst_272 = arith.constant dense<0.000000e+00> : vector<96x32xf32>
    %301 = tpu.matmul %298, %300, %cst_272 {dimension_numbers = #tpu.dot_dimension_numbers<[1], [0], [0], [1], [0, 0, 1, 1], [], []>} : vector<96x32xbf16>, vector<32x32xbf16>, vector<96x32xf32> -> vector<96x32xf32>
    %302 = arith.addf %297, %301 : vector<96x32xf32>
    %c4_273 = arith.constant 4 : index
    %c0_274 = arith.constant 0 : index
    %c0_275 = arith.constant 0 : index
    %303 = vector.load %arg3[%c4_273, %c0_274, %c0_275] : memref<8x1x32xf32, #tpu.memory_space<vmem>>, vector<1x1x32xf32>
    %304 = vector.shape_cast %303 : vector<1x1x32xf32> to vector<1x32xf32>
    %305 = vector.broadcast %304 : vector<1x32xf32> to vector<96x32xf32>
    %306 = arith.addf %302, %305 : vector<96x32xf32>
    %c4_276 = arith.constant 4 : index
    %c0_277 = arith.constant 0 : index
    %c0_278 = arith.constant 0 : index
    %307 = vector.load %arg4[%c4_276, %c0_277, %c0_278] : memref<8x1x32xf32, #tpu.memory_space<vmem>>, vector<1x1x32xf32>
    %308 = vector.shape_cast %307 : vector<1x1x32xf32> to vector<1x32xf32>
    %309 = vector.broadcast %308 : vector<1x32xf32> to vector<96x32xf32>
    %310 = arith.mulf %306, %309 : vector<96x32xf32>
    %311 = arith.extf %259 : vector<96x32xbf16> to vector<96x32xf32>
    %312 = arith.addf %310, %311 : vector<96x32xf32>
    %cst_279 = arith.constant 0.000000e+00 : f32
    %313 = vector.broadcast %cst_279 : f32 to vector<96x32xf32>
    %314 = arith.cmpf oge, %312, %313 : vector<96x32xf32>
    %cst_280 = arith.constant 2.000000e-01 : f32
    %315 = vector.broadcast %cst_280 : f32 to vector<96x32xf32>
    %316 = arith.mulf %315, %312 : vector<96x32xf32>
    %317 = arith.select %314, %312, %316 : vector<96x32xi1>, vector<96x32xf32>
    %318 = arith.truncf %317 : vector<96x32xf32> to vector<96x32xbf16>
    %319 = vector.broadcast %6 : vector<96x1xbf16> to vector<96x32xbf16>
    %320 = arith.mulf %318, %319 : vector<96x32xbf16>
    %c16_281 = arith.constant 16 : index
    %c0_282 = arith.constant 0 : index
    %321 = vector.load %arg7[%c16_281, %c0_282] : memref<128x32xbf16, #tpu.memory_space<vmem>>, vector<96x32xbf16>
    tpu.vector_store %arg7[%c16_281, %c0_282], %320 {strides = array<i32>} : memref<128x32xbf16, #tpu.memory_space<vmem>>, vector<96x32xbf16>,
    %c16_283 = arith.constant 16 : index
    %c0_284 = arith.constant 0 : index
    %322 = vector.load %arg7[%c16_283, %c0_284] : memref<128x32xbf16, #tpu.memory_space<vmem>>, vector<96x32xbf16>
    %c49 = arith.constant 49 : index
    %c0_285 = arith.constant 0 : index
    %c0_286 = arith.constant 0 : index
    %323 = vector.load %arg2[%c49, %c0_285, %c0_286] : memref<72x32x32xbf16, #tpu.memory_space<vmem>>, vector<1x32x32xbf16>
    %324 = vector.shape_cast %323 : vector<1x32x32xbf16> to vector<32x32xbf16>
    %cst_287 = arith.constant dense<0.000000e+00> : vector<96x32xf32>
    %325 = tpu.matmul %322, %324, %cst_287 {dimension_numbers = #tpu.dot_dimension_numbers<[1], [0], [0], [1], [0, 0, 1, 1], [], []>} : vector<96x32xbf16>, vector<32x32xbf16>, vector<96x32xf32> -> vector<96x32xf32>
    %c7_288 = arith.constant 7 : index
    %c0_289 = arith.constant 0 : index
    %326 = vector.load %arg7[%c7_288, %c0_289] : memref<128x32xbf16, #tpu.memory_space<vmem>>, vector<96x32xbf16>
    %c45 = arith.constant 45 : index
    %c0_290 = arith.constant 0 : index
    %c0_291 = arith.constant 0 : index
    %327 = vector.load %arg2[%c45, %c0_290, %c0_291] : memref<72x32x32xbf16, #tpu.memory_space<vmem>>, vector<1x32x32xbf16>
    %328 = vector.shape_cast %327 : vector<1x32x32xbf16> to vector<32x32xbf16>
    %cst_292 = arith.constant dense<0.000000e+00> : vector<96x32xf32>
    %329 = tpu.matmul %326, %328, %cst_292 {dimension_numbers = #tpu.dot_dimension_numbers<[1], [0], [0], [1], [0, 0, 1, 1], [], []>} : vector<96x32xbf16>, vector<32x32xbf16>, vector<96x32xf32> -> vector<96x32xf32>
    %330 = arith.addf %325, %329 : vector<96x32xf32>
    %c8_293 = arith.constant 8 : index
    %c0_294 = arith.constant 0 : index
    %331 = vector.load %arg7[%c8_293, %c0_294] : memref<128x32xbf16, #tpu.memory_space<vmem>>, vector<96x32xbf16>
    %c46 = arith.constant 46 : index
    %c0_295 = arith.constant 0 : index
    %c0_296 = arith.constant 0 : index
    %332 = vector.load %arg2[%c46, %c0_295, %c0_296] : memref<72x32x32xbf16, #tpu.memory_space<vmem>>, vector<1x32x32xbf16>
    %333 = vector.shape_cast %332 : vector<1x32x32xbf16> to vector<32x32xbf16>
    %cst_297 = arith.constant dense<0.000000e+00> : vector<96x32xf32>
    %334 = tpu.matmul %331, %333, %cst_297 {dimension_numbers = #tpu.dot_dimension_numbers<[1], [0], [0], [1], [0, 0, 1, 1], [], []>} : vector<96x32xbf16>, vector<32x32xbf16>, vector<96x32xf32> -> vector<96x32xf32>
    %335 = arith.addf %330, %334 : vector<96x32xf32>
    %c9_298 = arith.constant 9 : index
    %c0_299 = arith.constant 0 : index
    %336 = vector.load %arg7[%c9_298, %c0_299] : memref<128x32xbf16, #tpu.memory_space<vmem>>, vector<96x32xbf16>
    %c47 = arith.constant 47 : index
    %c0_300 = arith.constant 0 : index
    %c0_301 = arith.constant 0 : index
    %337 = vector.load %arg2[%c47, %c0_300, %c0_301] : memref<72x32x32xbf16, #tpu.memory_space<vmem>>, vector<1x32x32xbf16>
    %338 = vector.shape_cast %337 : vector<1x32x32xbf16> to vector<32x32xbf16>
    %cst_302 = arith.constant dense<0.000000e+00> : vector<96x32xf32>
    %339 = tpu.matmul %336, %338, %cst_302 {dimension_numbers = #tpu.dot_dimension_numbers<[1], [0], [0], [1], [0, 0, 1, 1], [], []>} : vector<96x32xbf16>, vector<32x32xbf16>, vector<96x32xf32> -> vector<96x32xf32>
    %340 = arith.addf %335, %339 : vector<96x32xf32>
    %c15_303 = arith.constant 15 : index
    %c0_304 = arith.constant 0 : index
    %341 = vector.load %arg7[%c15_303, %c0_304] : memref<128x32xbf16, #tpu.memory_space<vmem>>, vector<96x32xbf16>
    %c48 = arith.constant 48 : index
    %c0_305 = arith.constant 0 : index
    %c0_306 = arith.constant 0 : index
    %342 = vector.load %arg2[%c48, %c0_305, %c0_306] : memref<72x32x32xbf16, #tpu.memory_space<vmem>>, vector<1x32x32xbf16>
    %343 = vector.shape_cast %342 : vector<1x32x32xbf16> to vector<32x32xbf16>
    %cst_307 = arith.constant dense<0.000000e+00> : vector<96x32xf32>
    %344 = tpu.matmul %341, %343, %cst_307 {dimension_numbers = #tpu.dot_dimension_numbers<[1], [0], [0], [1], [0, 0, 1, 1], [], []>} : vector<96x32xbf16>, vector<32x32xbf16>, vector<96x32xf32> -> vector<96x32xf32>
    %345 = arith.addf %340, %344 : vector<96x32xf32>
    %c17_308 = arith.constant 17 : index
    %c0_309 = arith.constant 0 : index
    %346 = vector.load %arg7[%c17_308, %c0_309] : memref<128x32xbf16, #tpu.memory_space<vmem>>, vector<96x32xbf16>
    %c50 = arith.constant 50 : index
    %c0_310 = arith.constant 0 : index
    %c0_311 = arith.constant 0 : index
    %347 = vector.load %arg2[%c50, %c0_310, %c0_311] : memref<72x32x32xbf16, #tpu.memory_space<vmem>>, vector<1x32x32xbf16>
    %348 = vector.shape_cast %347 : vector<1x32x32xbf16> to vector<32x32xbf16>
    %cst_312 = arith.constant dense<0.000000e+00> : vector<96x32xf32>
    %349 = tpu.matmul %346, %348, %cst_312 {dimension_numbers = #tpu.dot_dimension_numbers<[1], [0], [0], [1], [0, 0, 1, 1], [], []>} : vector<96x32xbf16>, vector<32x32xbf16>, vector<96x32xf32> -> vector<96x32xf32>
    %350 = arith.addf %345, %349 : vector<96x32xf32>
    %c23_313 = arith.constant 23 : index
    %c0_314 = arith.constant 0 : index
    %351 = vector.load %arg7[%c23_313, %c0_314] : memref<128x32xbf16, #tpu.memory_space<vmem>>, vector<96x32xbf16>
    %c51 = arith.constant 51 : index
    %c0_315 = arith.constant 0 : index
    %c0_316 = arith.constant 0 : index
    %352 = vector.load %arg2[%c51, %c0_315, %c0_316] : memref<72x32x32xbf16, #tpu.memory_space<vmem>>, vector<1x32x32xbf16>
    %353 = vector.shape_cast %352 : vector<1x32x32xbf16> to vector<32x32xbf16>
    %cst_317 = arith.constant dense<0.000000e+00> : vector<96x32xf32>
    %354 = tpu.matmul %351, %353, %cst_317 {dimension_numbers = #tpu.dot_dimension_numbers<[1], [0], [0], [1], [0, 0, 1, 1], [], []>} : vector<96x32xbf16>, vector<32x32xbf16>, vector<96x32xf32> -> vector<96x32xf32>
    %355 = arith.addf %350, %354 : vector<96x32xf32>
    %c24_318 = arith.constant 24 : index
    %c0_319 = arith.constant 0 : index
    %356 = vector.load %arg7[%c24_318, %c0_319] : memref<128x32xbf16, #tpu.memory_space<vmem>>, vector<96x32xbf16>
    %c52 = arith.constant 52 : index
    %c0_320 = arith.constant 0 : index
    %c0_321 = arith.constant 0 : index
    %357 = vector.load %arg2[%c52, %c0_320, %c0_321] : memref<72x32x32xbf16, #tpu.memory_space<vmem>>, vector<1x32x32xbf16>
    %358 = vector.shape_cast %357 : vector<1x32x32xbf16> to vector<32x32xbf16>
    %cst_322 = arith.constant dense<0.000000e+00> : vector<96x32xf32>
    %359 = tpu.matmul %356, %358, %cst_322 {dimension_numbers = #tpu.dot_dimension_numbers<[1], [0], [0], [1], [0, 0, 1, 1], [], []>} : vector<96x32xbf16>, vector<32x32xbf16>, vector<96x32xf32> -> vector<96x32xf32>
    %360 = arith.addf %355, %359 : vector<96x32xf32>
    %c25_323 = arith.constant 25 : index
    %c0_324 = arith.constant 0 : index
    %361 = vector.load %arg7[%c25_323, %c0_324] : memref<128x32xbf16, #tpu.memory_space<vmem>>, vector<96x32xbf16>
    %c53 = arith.constant 53 : index
    %c0_325 = arith.constant 0 : index
    %c0_326 = arith.constant 0 : index
    %362 = vector.load %arg2[%c53, %c0_325, %c0_326] : memref<72x32x32xbf16, #tpu.memory_space<vmem>>, vector<1x32x32xbf16>
    %363 = vector.shape_cast %362 : vector<1x32x32xbf16> to vector<32x32xbf16>
    %cst_327 = arith.constant dense<0.000000e+00> : vector<96x32xf32>
    %364 = tpu.matmul %361, %363, %cst_327 {dimension_numbers = #tpu.dot_dimension_numbers<[1], [0], [0], [1], [0, 0, 1, 1], [], []>} : vector<96x32xbf16>, vector<32x32xbf16>, vector<96x32xf32> -> vector<96x32xf32>
    %365 = arith.addf %360, %364 : vector<96x32xf32>
    %c5_328 = arith.constant 5 : index
    %c0_329 = arith.constant 0 : index
    %c0_330 = arith.constant 0 : index
    %366 = vector.load %arg3[%c5_328, %c0_329, %c0_330] : memref<8x1x32xf32, #tpu.memory_space<vmem>>, vector<1x1x32xf32>
    %367 = vector.shape_cast %366 : vector<1x1x32xf32> to vector<1x32xf32>
    %368 = vector.broadcast %367 : vector<1x32xf32> to vector<96x32xf32>
    %369 = arith.addf %365, %368 : vector<96x32xf32>
    %c5_331 = arith.constant 5 : index
    %c0_332 = arith.constant 0 : index
    %c0_333 = arith.constant 0 : index
    %370 = vector.load %arg4[%c5_331, %c0_332, %c0_333] : memref<8x1x32xf32, #tpu.memory_space<vmem>>, vector<1x1x32xf32>
    %371 = vector.shape_cast %370 : vector<1x1x32xf32> to vector<1x32xf32>
    %372 = vector.broadcast %371 : vector<1x32xf32> to vector<96x32xf32>
    %373 = arith.mulf %369, %372 : vector<96x32xf32>
    %374 = arith.extf %322 : vector<96x32xbf16> to vector<96x32xf32>
    %375 = arith.addf %373, %374 : vector<96x32xf32>
    %cst_334 = arith.constant 0.000000e+00 : f32
    %376 = vector.broadcast %cst_334 : f32 to vector<96x32xf32>
    %377 = arith.cmpf oge, %375, %376 : vector<96x32xf32>
    %cst_335 = arith.constant 2.000000e-01 : f32
    %378 = vector.broadcast %cst_335 : f32 to vector<96x32xf32>
    %379 = arith.mulf %378, %375 : vector<96x32xf32>
    %380 = arith.select %377, %375, %379 : vector<96x32xi1>, vector<96x32xf32>
    %381 = arith.truncf %380 : vector<96x32xf32> to vector<96x32xbf16>
    %382 = vector.broadcast %6 : vector<96x1xbf16> to vector<96x32xbf16>
    %383 = arith.mulf %381, %382 : vector<96x32xbf16>
    %c16_336 = arith.constant 16 : index
    %c0_337 = arith.constant 0 : index
    %384 = vector.load %arg7[%c16_336, %c0_337] : memref<128x32xbf16, #tpu.memory_space<vmem>>, vector<96x32xbf16>
    tpu.vector_store %arg7[%c16_336, %c0_337], %383 {strides = array<i32>} : memref<128x32xbf16, #tpu.memory_space<vmem>>, vector<96x32xbf16>,
    %c16_338 = arith.constant 16 : index
    %c0_339 = arith.constant 0 : index
    %385 = vector.load %arg7[%c16_338, %c0_339] : memref<128x32xbf16, #tpu.memory_space<vmem>>, vector<96x32xbf16>
    %c58 = arith.constant 58 : index
    %c0_340 = arith.constant 0 : index
    %c0_341 = arith.constant 0 : index
    %386 = vector.load %arg2[%c58, %c0_340, %c0_341] : memref<72x32x32xbf16, #tpu.memory_space<vmem>>, vector<1x32x32xbf16>
    %387 = vector.shape_cast %386 : vector<1x32x32xbf16> to vector<32x32xbf16>
    %cst_342 = arith.constant dense<0.000000e+00> : vector<96x32xf32>
    %388 = tpu.matmul %385, %387, %cst_342 {dimension_numbers = #tpu.dot_dimension_numbers<[1], [0], [0], [1], [0, 0, 1, 1], [], []>} : vector<96x32xbf16>, vector<32x32xbf16>, vector<96x32xf32> -> vector<96x32xf32>
    %c7_343 = arith.constant 7 : index
    %c0_344 = arith.constant 0 : index
    %389 = vector.load %arg7[%c7_343, %c0_344] : memref<128x32xbf16, #tpu.memory_space<vmem>>, vector<96x32xbf16>
    %c54 = arith.constant 54 : index
    %c0_345 = arith.constant 0 : index
    %c0_346 = arith.constant 0 : index
    %390 = vector.load %arg2[%c54, %c0_345, %c0_346] : memref<72x32x32xbf16, #tpu.memory_space<vmem>>, vector<1x32x32xbf16>
    %391 = vector.shape_cast %390 : vector<1x32x32xbf16> to vector<32x32xbf16>
    %cst_347 = arith.constant dense<0.000000e+00> : vector<96x32xf32>
    %392 = tpu.matmul %389, %391, %cst_347 {dimension_numbers = #tpu.dot_dimension_numbers<[1], [0], [0], [1], [0, 0, 1, 1], [], []>} : vector<96x32xbf16>, vector<32x32xbf16>, vector<96x32xf32> -> vector<96x32xf32>
    %393 = arith.addf %388, %392 : vector<96x32xf32>
    %c8_348 = arith.constant 8 : index
    %c0_349 = arith.constant 0 : index
    %394 = vector.load %arg7[%c8_348, %c0_349] : memref<128x32xbf16, #tpu.memory_space<vmem>>, vector<96x32xbf16>
    %c55 = arith.constant 55 : index
    %c0_350 = arith.constant 0 : index
    %c0_351 = arith.constant 0 : index
    %395 = vector.load %arg2[%c55, %c0_350, %c0_351] : memref<72x32x32xbf16, #tpu.memory_space<vmem>>, vector<1x32x32xbf16>
    %396 = vector.shape_cast %395 : vector<1x32x32xbf16> to vector<32x32xbf16>
    %cst_352 = arith.constant dense<0.000000e+00> : vector<96x32xf32>
    %397 = tpu.matmul %394, %396, %cst_352 {dimension_numbers = #tpu.dot_dimension_numbers<[1], [0], [0], [1], [0, 0, 1, 1], [], []>} : vector<96x32xbf16>, vector<32x32xbf16>, vector<96x32xf32> -> vector<96x32xf32>
    %398 = arith.addf %393, %397 : vector<96x32xf32>
    %c9_353 = arith.constant 9 : index
    %c0_354 = arith.constant 0 : index
    %399 = vector.load %arg7[%c9_353, %c0_354] : memref<128x32xbf16, #tpu.memory_space<vmem>>, vector<96x32xbf16>
    %c56 = arith.constant 56 : index
    %c0_355 = arith.constant 0 : index
    %c0_356 = arith.constant 0 : index
    %400 = vector.load %arg2[%c56, %c0_355, %c0_356] : memref<72x32x32xbf16, #tpu.memory_space<vmem>>, vector<1x32x32xbf16>
    %401 = vector.shape_cast %400 : vector<1x32x32xbf16> to vector<32x32xbf16>
    %cst_357 = arith.constant dense<0.000000e+00> : vector<96x32xf32>
    %402 = tpu.matmul %399, %401, %cst_357 {dimension_numbers = #tpu.dot_dimension_numbers<[1], [0], [0], [1], [0, 0, 1, 1], [], []>} : vector<96x32xbf16>, vector<32x32xbf16>, vector<96x32xf32> -> vector<96x32xf32>
    %403 = arith.addf %398, %402 : vector<96x32xf32>
    %c15_358 = arith.constant 15 : index
    %c0_359 = arith.constant 0 : index
    %404 = vector.load %arg7[%c15_358, %c0_359] : memref<128x32xbf16, #tpu.memory_space<vmem>>, vector<96x32xbf16>
    %c57 = arith.constant 57 : index
    %c0_360 = arith.constant 0 : index
    %c0_361 = arith.constant 0 : index
    %405 = vector.load %arg2[%c57, %c0_360, %c0_361] : memref<72x32x32xbf16, #tpu.memory_space<vmem>>, vector<1x32x32xbf16>
    %406 = vector.shape_cast %405 : vector<1x32x32xbf16> to vector<32x32xbf16>
    %cst_362 = arith.constant dense<0.000000e+00> : vector<96x32xf32>
    %407 = tpu.matmul %404, %406, %cst_362 {dimension_numbers = #tpu.dot_dimension_numbers<[1], [0], [0], [1], [0, 0, 1, 1], [], []>} : vector<96x32xbf16>, vector<32x32xbf16>, vector<96x32xf32> -> vector<96x32xf32>
    %408 = arith.addf %403, %407 : vector<96x32xf32>
    %c17_363 = arith.constant 17 : index
    %c0_364 = arith.constant 0 : index
    %409 = vector.load %arg7[%c17_363, %c0_364] : memref<128x32xbf16, #tpu.memory_space<vmem>>, vector<96x32xbf16>
    %c59 = arith.constant 59 : index
    %c0_365 = arith.constant 0 : index
    %c0_366 = arith.constant 0 : index
    %410 = vector.load %arg2[%c59, %c0_365, %c0_366] : memref<72x32x32xbf16, #tpu.memory_space<vmem>>, vector<1x32x32xbf16>
    %411 = vector.shape_cast %410 : vector<1x32x32xbf16> to vector<32x32xbf16>
    %cst_367 = arith.constant dense<0.000000e+00> : vector<96x32xf32>
    %412 = tpu.matmul %409, %411, %cst_367 {dimension_numbers = #tpu.dot_dimension_numbers<[1], [0], [0], [1], [0, 0, 1, 1], [], []>} : vector<96x32xbf16>, vector<32x32xbf16>, vector<96x32xf32> -> vector<96x32xf32>
    %413 = arith.addf %408, %412 : vector<96x32xf32>
    %c23_368 = arith.constant 23 : index
    %c0_369 = arith.constant 0 : index
    %414 = vector.load %arg7[%c23_368, %c0_369] : memref<128x32xbf16, #tpu.memory_space<vmem>>, vector<96x32xbf16>
    %c60 = arith.constant 60 : index
    %c0_370 = arith.constant 0 : index
    %c0_371 = arith.constant 0 : index
    %415 = vector.load %arg2[%c60, %c0_370, %c0_371] : memref<72x32x32xbf16, #tpu.memory_space<vmem>>, vector<1x32x32xbf16>
    %416 = vector.shape_cast %415 : vector<1x32x32xbf16> to vector<32x32xbf16>
    %cst_372 = arith.constant dense<0.000000e+00> : vector<96x32xf32>
    %417 = tpu.matmul %414, %416, %cst_372 {dimension_numbers = #tpu.dot_dimension_numbers<[1], [0], [0], [1], [0, 0, 1, 1], [], []>} : vector<96x32xbf16>, vector<32x32xbf16>, vector<96x32xf32> -> vector<96x32xf32>
    %418 = arith.addf %413, %417 : vector<96x32xf32>
    %c24_373 = arith.constant 24 : index
    %c0_374 = arith.constant 0 : index
    %419 = vector.load %arg7[%c24_373, %c0_374] : memref<128x32xbf16, #tpu.memory_space<vmem>>, vector<96x32xbf16>
    %c61 = arith.constant 61 : index
    %c0_375 = arith.constant 0 : index
    %c0_376 = arith.constant 0 : index
    %420 = vector.load %arg2[%c61, %c0_375, %c0_376] : memref<72x32x32xbf16, #tpu.memory_space<vmem>>, vector<1x32x32xbf16>
    %421 = vector.shape_cast %420 : vector<1x32x32xbf16> to vector<32x32xbf16>
    %cst_377 = arith.constant dense<0.000000e+00> : vector<96x32xf32>
    %422 = tpu.matmul %419, %421, %cst_377 {dimension_numbers = #tpu.dot_dimension_numbers<[1], [0], [0], [1], [0, 0, 1, 1], [], []>} : vector<96x32xbf16>, vector<32x32xbf16>, vector<96x32xf32> -> vector<96x32xf32>
    %423 = arith.addf %418, %422 : vector<96x32xf32>
    %c25_378 = arith.constant 25 : index
    %c0_379 = arith.constant 0 : index
    %424 = vector.load %arg7[%c25_378, %c0_379] : memref<128x32xbf16, #tpu.memory_space<vmem>>, vector<96x32xbf16>
    %c62 = arith.constant 62 : index
    %c0_380 = arith.constant 0 : index
    %c0_381 = arith.constant 0 : index
    %425 = vector.load %arg2[%c62, %c0_380, %c0_381] : memref<72x32x32xbf16, #tpu.memory_space<vmem>>, vector<1x32x32xbf16>
    %426 = vector.shape_cast %425 : vector<1x32x32xbf16> to vector<32x32xbf16>
    %cst_382 = arith.constant dense<0.000000e+00> : vector<96x32xf32>
    %427 = tpu.matmul %424, %426, %cst_382 {dimension_numbers = #tpu.dot_dimension_numbers<[1], [0], [0], [1], [0, 0, 1, 1], [], []>} : vector<96x32xbf16>, vector<32x32xbf16>, vector<96x32xf32> -> vector<96x32xf32>
    %428 = arith.addf %423, %427 : vector<96x32xf32>
    %c6_383 = arith.constant 6 : index
    %c0_384 = arith.constant 0 : index
    %c0_385 = arith.constant 0 : index
    %429 = vector.load %arg3[%c6_383, %c0_384, %c0_385] : memref<8x1x32xf32, #tpu.memory_space<vmem>>, vector<1x1x32xf32>
    %430 = vector.shape_cast %429 : vector<1x1x32xf32> to vector<1x32xf32>
    %431 = vector.broadcast %430 : vector<1x32xf32> to vector<96x32xf32>
    %432 = arith.addf %428, %431 : vector<96x32xf32>
    %c6_386 = arith.constant 6 : index
    %c0_387 = arith.constant 0 : index
    %c0_388 = arith.constant 0 : index
    %433 = vector.load %arg4[%c6_386, %c0_387, %c0_388] : memref<8x1x32xf32, #tpu.memory_space<vmem>>, vector<1x1x32xf32>
    %434 = vector.shape_cast %433 : vector<1x1x32xf32> to vector<1x32xf32>
    %435 = vector.broadcast %434 : vector<1x32xf32> to vector<96x32xf32>
    %436 = arith.mulf %432, %435 : vector<96x32xf32>
    %437 = arith.extf %385 : vector<96x32xbf16> to vector<96x32xf32>
    %438 = arith.addf %436, %437 : vector<96x32xf32>
    %cst_389 = arith.constant 0.000000e+00 : f32
    %439 = vector.broadcast %cst_389 : f32 to vector<96x32xf32>
    %440 = arith.cmpf oge, %438, %439 : vector<96x32xf32>
    %cst_390 = arith.constant 2.000000e-01 : f32
    %441 = vector.broadcast %cst_390 : f32 to vector<96x32xf32>
    %442 = arith.mulf %441, %438 : vector<96x32xf32>
    %443 = arith.select %440, %438, %442 : vector<96x32xi1>, vector<96x32xf32>
    %444 = arith.truncf %443 : vector<96x32xf32> to vector<96x32xbf16>
    %445 = vector.broadcast %6 : vector<96x1xbf16> to vector<96x32xbf16>
    %446 = arith.mulf %444, %445 : vector<96x32xbf16>
    %c16_391 = arith.constant 16 : index
    %c0_392 = arith.constant 0 : index
    %447 = vector.load %arg7[%c16_391, %c0_392] : memref<128x32xbf16, #tpu.memory_space<vmem>>, vector<96x32xbf16>
    tpu.vector_store %arg7[%c16_391, %c0_392], %446 {strides = array<i32>} : memref<128x32xbf16, #tpu.memory_space<vmem>>, vector<96x32xbf16>,
    %c16_393 = arith.constant 16 : index
    %c0_394 = arith.constant 0 : index
    %448 = vector.load %arg7[%c16_393, %c0_394] : memref<128x32xbf16, #tpu.memory_space<vmem>>, vector<96x32xbf16>
    %c67 = arith.constant 67 : index
    %c0_395 = arith.constant 0 : index
    %c0_396 = arith.constant 0 : index
    %449 = vector.load %arg2[%c67, %c0_395, %c0_396] : memref<72x32x32xbf16, #tpu.memory_space<vmem>>, vector<1x32x32xbf16>
    %450 = vector.shape_cast %449 : vector<1x32x32xbf16> to vector<32x32xbf16>
    %cst_397 = arith.constant dense<0.000000e+00> : vector<96x32xf32>
    %451 = tpu.matmul %448, %450, %cst_397 {dimension_numbers = #tpu.dot_dimension_numbers<[1], [0], [0], [1], [0, 0, 1, 1], [], []>} : vector<96x32xbf16>, vector<32x32xbf16>, vector<96x32xf32> -> vector<96x32xf32>
    %c7_398 = arith.constant 7 : index
    %c0_399 = arith.constant 0 : index
    %452 = vector.load %arg7[%c7_398, %c0_399] : memref<128x32xbf16, #tpu.memory_space<vmem>>, vector<96x32xbf16>
    %c63 = arith.constant 63 : index
    %c0_400 = arith.constant 0 : index
    %c0_401 = arith.constant 0 : index
    %453 = vector.load %arg2[%c63, %c0_400, %c0_401] : memref<72x32x32xbf16, #tpu.memory_space<vmem>>, vector<1x32x32xbf16>
    %454 = vector.shape_cast %453 : vector<1x32x32xbf16> to vector<32x32xbf16>
    %cst_402 = arith.constant dense<0.000000e+00> : vector<96x32xf32>
    %455 = tpu.matmul %452, %454, %cst_402 {dimension_numbers = #tpu.dot_dimension_numbers<[1], [0], [0], [1], [0, 0, 1, 1], [], []>} : vector<96x32xbf16>, vector<32x32xbf16>, vector<96x32xf32> -> vector<96x32xf32>
    %456 = arith.addf %451, %455 : vector<96x32xf32>
    %c8_403 = arith.constant 8 : index
    %c0_404 = arith.constant 0 : index
    %457 = vector.load %arg7[%c8_403, %c0_404] : memref<128x32xbf16, #tpu.memory_space<vmem>>, vector<96x32xbf16>
    %c64 = arith.constant 64 : index
    %c0_405 = arith.constant 0 : index
    %c0_406 = arith.constant 0 : index
    %458 = vector.load %arg2[%c64, %c0_405, %c0_406] : memref<72x32x32xbf16, #tpu.memory_space<vmem>>, vector<1x32x32xbf16>
    %459 = vector.shape_cast %458 : vector<1x32x32xbf16> to vector<32x32xbf16>
    %cst_407 = arith.constant dense<0.000000e+00> : vector<96x32xf32>
    %460 = tpu.matmul %457, %459, %cst_407 {dimension_numbers = #tpu.dot_dimension_numbers<[1], [0], [0], [1], [0, 0, 1, 1], [], []>} : vector<96x32xbf16>, vector<32x32xbf16>, vector<96x32xf32> -> vector<96x32xf32>
    %461 = arith.addf %456, %460 : vector<96x32xf32>
    %c9_408 = arith.constant 9 : index
    %c0_409 = arith.constant 0 : index
    %462 = vector.load %arg7[%c9_408, %c0_409] : memref<128x32xbf16, #tpu.memory_space<vmem>>, vector<96x32xbf16>
    %c65 = arith.constant 65 : index
    %c0_410 = arith.constant 0 : index
    %c0_411 = arith.constant 0 : index
    %463 = vector.load %arg2[%c65, %c0_410, %c0_411] : memref<72x32x32xbf16, #tpu.memory_space<vmem>>, vector<1x32x32xbf16>
    %464 = vector.shape_cast %463 : vector<1x32x32xbf16> to vector<32x32xbf16>
    %cst_412 = arith.constant dense<0.000000e+00> : vector<96x32xf32>
    %465 = tpu.matmul %462, %464, %cst_412 {dimension_numbers = #tpu.dot_dimension_numbers<[1], [0], [0], [1], [0, 0, 1, 1], [], []>} : vector<96x32xbf16>, vector<32x32xbf16>, vector<96x32xf32> -> vector<96x32xf32>
    %466 = arith.addf %461, %465 : vector<96x32xf32>
    %c15_413 = arith.constant 15 : index
    %c0_414 = arith.constant 0 : index
    %467 = vector.load %arg7[%c15_413, %c0_414] : memref<128x32xbf16, #tpu.memory_space<vmem>>, vector<96x32xbf16>
    %c66 = arith.constant 66 : index
    %c0_415 = arith.constant 0 : index
    %c0_416 = arith.constant 0 : index
    %468 = vector.load %arg2[%c66, %c0_415, %c0_416] : memref<72x32x32xbf16, #tpu.memory_space<vmem>>, vector<1x32x32xbf16>
    %469 = vector.shape_cast %468 : vector<1x32x32xbf16> to vector<32x32xbf16>
    %cst_417 = arith.constant dense<0.000000e+00> : vector<96x32xf32>
    %470 = tpu.matmul %467, %469, %cst_417 {dimension_numbers = #tpu.dot_dimension_numbers<[1], [0], [0], [1], [0, 0, 1, 1], [], []>} : vector<96x32xbf16>, vector<32x32xbf16>, vector<96x32xf32> -> vector<96x32xf32>
    %471 = arith.addf %466, %470 : vector<96x32xf32>
    %c17_418 = arith.constant 17 : index
    %c0_419 = arith.constant 0 : index
    %472 = vector.load %arg7[%c17_418, %c0_419] : memref<128x32xbf16, #tpu.memory_space<vmem>>, vector<96x32xbf16>
    %c68 = arith.constant 68 : index
    %c0_420 = arith.constant 0 : index
    %c0_421 = arith.constant 0 : index
    %473 = vector.load %arg2[%c68, %c0_420, %c0_421] : memref<72x32x32xbf16, #tpu.memory_space<vmem>>, vector<1x32x32xbf16>
    %474 = vector.shape_cast %473 : vector<1x32x32xbf16> to vector<32x32xbf16>
    %cst_422 = arith.constant dense<0.000000e+00> : vector<96x32xf32>
    %475 = tpu.matmul %472, %474, %cst_422 {dimension_numbers = #tpu.dot_dimension_numbers<[1], [0], [0], [1], [0, 0, 1, 1], [], []>} : vector<96x32xbf16>, vector<32x32xbf16>, vector<96x32xf32> -> vector<96x32xf32>
    %476 = arith.addf %471, %475 : vector<96x32xf32>
    %c23_423 = arith.constant 23 : index
    %c0_424 = arith.constant 0 : index
    %477 = vector.load %arg7[%c23_423, %c0_424] : memref<128x32xbf16, #tpu.memory_space<vmem>>, vector<96x32xbf16>
    %c69 = arith.constant 69 : index
    %c0_425 = arith.constant 0 : index
    %c0_426 = arith.constant 0 : index
    %478 = vector.load %arg2[%c69, %c0_425, %c0_426] : memref<72x32x32xbf16, #tpu.memory_space<vmem>>, vector<1x32x32xbf16>
    %479 = vector.shape_cast %478 : vector<1x32x32xbf16> to vector<32x32xbf16>
    %cst_427 = arith.constant dense<0.000000e+00> : vector<96x32xf32>
    %480 = tpu.matmul %477, %479, %cst_427 {dimension_numbers = #tpu.dot_dimension_numbers<[1], [0], [0], [1], [0, 0, 1, 1], [], []>} : vector<96x32xbf16>, vector<32x32xbf16>, vector<96x32xf32> -> vector<96x32xf32>
    %481 = arith.addf %476, %480 : vector<96x32xf32>
    %c24_428 = arith.constant 24 : index
    %c0_429 = arith.constant 0 : index
    %482 = vector.load %arg7[%c24_428, %c0_429] : memref<128x32xbf16, #tpu.memory_space<vmem>>, vector<96x32xbf16>
    %c70 = arith.constant 70 : index
    %c0_430 = arith.constant 0 : index
    %c0_431 = arith.constant 0 : index
    %483 = vector.load %arg2[%c70, %c0_430, %c0_431] : memref<72x32x32xbf16, #tpu.memory_space<vmem>>, vector<1x32x32xbf16>
    %484 = vector.shape_cast %483 : vector<1x32x32xbf16> to vector<32x32xbf16>
    %cst_432 = arith.constant dense<0.000000e+00> : vector<96x32xf32>
    %485 = tpu.matmul %482, %484, %cst_432 {dimension_numbers = #tpu.dot_dimension_numbers<[1], [0], [0], [1], [0, 0, 1, 1], [], []>} : vector<96x32xbf16>, vector<32x32xbf16>, vector<96x32xf32> -> vector<96x32xf32>
    %486 = arith.addf %481, %485 : vector<96x32xf32>
    %c25_433 = arith.constant 25 : index
    %c0_434 = arith.constant 0 : index
    %487 = vector.load %arg7[%c25_433, %c0_434] : memref<128x32xbf16, #tpu.memory_space<vmem>>, vector<96x32xbf16>
    %c71 = arith.constant 71 : index
    %c0_435 = arith.constant 0 : index
    %c0_436 = arith.constant 0 : index
    %488 = vector.load %arg2[%c71, %c0_435, %c0_436] : memref<72x32x32xbf16, #tpu.memory_space<vmem>>, vector<1x32x32xbf16>
    %489 = vector.shape_cast %488 : vector<1x32x32xbf16> to vector<32x32xbf16>
    %cst_437 = arith.constant dense<0.000000e+00> : vector<96x32xf32>
    %490 = tpu.matmul %487, %489, %cst_437 {dimension_numbers = #tpu.dot_dimension_numbers<[1], [0], [0], [1], [0, 0, 1, 1], [], []>} : vector<96x32xbf16>, vector<32x32xbf16>, vector<96x32xf32> -> vector<96x32xf32>
    %491 = arith.addf %486, %490 : vector<96x32xf32>
    %c7_438 = arith.constant 7 : index
    %c0_439 = arith.constant 0 : index
    %c0_440 = arith.constant 0 : index
    %492 = vector.load %arg3[%c7_438, %c0_439, %c0_440] : memref<8x1x32xf32, #tpu.memory_space<vmem>>, vector<1x1x32xf32>
    %493 = vector.shape_cast %492 : vector<1x1x32xf32> to vector<1x32xf32>
    %494 = vector.broadcast %493 : vector<1x32xf32> to vector<96x32xf32>
    %495 = arith.addf %491, %494 : vector<96x32xf32>
    %c7_441 = arith.constant 7 : index
    %c0_442 = arith.constant 0 : index
    %c0_443 = arith.constant 0 : index
    %496 = vector.load %arg4[%c7_441, %c0_442, %c0_443] : memref<8x1x32xf32, #tpu.memory_space<vmem>>, vector<1x1x32xf32>
    %497 = vector.shape_cast %496 : vector<1x1x32xf32> to vector<1x32xf32>
    %498 = vector.broadcast %497 : vector<1x32xf32> to vector<96x32xf32>
    %499 = arith.mulf %495, %498 : vector<96x32xf32>
    %500 = arith.extf %448 : vector<96x32xbf16> to vector<96x32xf32>
    %501 = arith.addf %499, %500 : vector<96x32xf32>
    %cst_444 = arith.constant 0.000000e+00 : f32
    %502 = vector.broadcast %cst_444 : f32 to vector<96x32xf32>
    %503 = arith.cmpf oge, %501, %502 : vector<96x32xf32>
    %cst_445 = arith.constant 2.000000e-01 : f32
    %504 = vector.broadcast %cst_445 : f32 to vector<96x32xf32>
    %505 = arith.mulf %504, %501 : vector<96x32xf32>
    %506 = arith.select %503, %501, %505 : vector<96x32xi1>, vector<96x32xf32>
    %507 = arith.truncf %506 : vector<96x32xf32> to vector<96x32xbf16>
    %508 = vector.broadcast %6 : vector<96x1xbf16> to vector<96x32xbf16>
    %509 = arith.mulf %507, %508 : vector<96x32xbf16>
    %c16_446 = arith.constant 16 : index
    %c0_447 = arith.constant 0 : index
    %510 = vector.load %arg7[%c16_446, %c0_447] : memref<128x32xbf16, #tpu.memory_space<vmem>>, vector<96x32xbf16>
    tpu.vector_store %arg7[%c16_446, %c0_447], %509 {strides = array<i32>} : memref<128x32xbf16, #tpu.memory_space<vmem>>, vector<96x32xbf16>,
    %c16_i32_448 = arith.constant 16 : i32
    %c0_i32_449 = arith.constant 0 : i32
    %511 = tpu.memref_slice %arg7[%c16_i32_448, %c0_i32_449] : memref<128x32xbf16, #tpu.memory_space<vmem>> -> memref<96x32xbf16, #tpu.memory_space<vmem>>
    tpu.enqueue_dma source(%511 : memref<96x32xbf16, #tpu.memory_space<vmem>>) target(%arg6 : memref<96x32xbf16, #tpu.memory_space<any>>) target_semaphore(%arg8 : memref<!tpu.dma_semaphore, #tpu.memory_space<semaphore_mem>>)
    %c16_i32_450 = arith.constant 16 : i32
    %c0_i32_451 = arith.constant 0 : i32
    %512 = tpu.memref_slice %arg7[%c16_i32_450, %c0_i32_451] : memref<128x32xbf16, #tpu.memory_space<vmem>> -> memref<96x32xbf16, #tpu.memory_space<vmem>>
    tpu.wait_dma2 semaphore(%arg8 : memref<!tpu.dma_semaphore, #tpu.memory_space<semaphore_mem>>) src(%512 : memref<96x32xbf16, #tpu.memory_space<vmem>>) dst(%arg6 : memref<96x32xbf16, #tpu.memory_space<any>>)
    return
  }
  func.func @transform_1(%arg0: i32) -> (i32, i32, i32) {
    %c0_i32 = arith.constant 0 : i32
    %c0_i32_0 = arith.constant 0 : i32
    %c0_i32_1 = arith.constant 0 : i32
    %c0_i32_2 = arith.constant 0 : i32
    return %c0_i32, %c0_i32_0, %c0_i32_1 : i32, i32, i32
  }
  func.func @transform_2(%arg0: i32) -> (i32, i32, i32) {
    %c0_i32 = arith.constant 0 : i32
    %c0_i32_0 = arith.constant 0 : i32
    %c0_i32_1 = arith.constant 0 : i32
    %c0_i32_2 = arith.constant 0 : i32
    return %c0_i32, %c0_i32_0, %c0_i32_1 : i32, i32, i32
  }
  func.func @transform_3(%arg0: i32) -> (i32, i32, i32) {
    %c0_i32 = arith.constant 0 : i32
    %c0_i32_0 = arith.constant 0 : i32
    %c0_i32_1 = arith.constant 0 : i32
    %c0_i32_2 = arith.constant 0 : i32
    return %c0_i32, %c0_i32_0, %c0_i32_1 : i32, i32, i32
  }
  func.func @transform_4(%arg0: i32) -> (i32, i32) {
    %c0_i32 = arith.constant 0 : i32
    %c0_i32_0 = arith.constant 0 : i32
    %c0_i32_1 = arith.constant 0 : i32
    return %c0_i32, %c0_i32_0 : i32, i32
  }
}

module attributes {stable_mosaic.version = 11 : i64} {
  func.func @_matmul_bias_act_kernel(%arg0: i32, %arg1: memref<32x288xbf16, #tpu.memory_space<vmem>>, %arg2: memref<288x96xbf16, #tpu.memory_space<vmem>>, %arg3: memref<1x96xf32, #tpu.memory_space<vmem>>, %arg4: memref<32x96xf32, #tpu.memory_space<vmem>>) attributes {dimension_semantics = [#tpu.dimension_semantics<parallel>], iteration_bounds = array<i64: 1>, scalar_prefetch = 0 : i64, scratch_operands = 0 : i64, tpu.core_type = #tpu.core_type<tc>, window_params = [{transform_indices = @transform_0, window_bounds = array<i64: 32, 288>}, {pipeline_mode = #tpu.pipeline_mode<synchronous>, transform_indices = @transform_1, window_bounds = array<i64: 288, 96>}, {pipeline_mode = #tpu.pipeline_mode<synchronous>, transform_indices = @transform_2, window_bounds = array<i64: 1, 96>}, {transform_indices = @transform_3, window_bounds = array<i64: 32, 96>}]} {
    %c0 = arith.constant 0 : index
    %c0_0 = arith.constant 0 : index
    %0 = vector.load %arg1[%c0, %c0_0] : memref<32x288xbf16, #tpu.memory_space<vmem>>, vector<32x288xbf16>
    %c0_1 = arith.constant 0 : index
    %c0_2 = arith.constant 0 : index
    %1 = vector.load %arg2[%c0_1, %c0_2] : memref<288x96xbf16, #tpu.memory_space<vmem>>, vector<288x96xbf16>
    %cst = arith.constant dense<0.000000e+00> : vector<32x96xf32>
    %2 = tpu.matmul %0, %1, %cst {dimension_numbers = #tpu.dot_dimension_numbers<[1], [0], [0], [1], [0, 0, 1, 1], [], []>} : vector<32x288xbf16>, vector<288x96xbf16>, vector<32x96xf32> -> vector<32x96xf32>
    %c0_3 = arith.constant 0 : index
    %c0_4 = arith.constant 0 : index
    %3 = vector.load %arg3[%c0_3, %c0_4] : memref<1x96xf32, #tpu.memory_space<vmem>>, vector<1x96xf32>
    %4 = vector.broadcast %3 : vector<1x96xf32> to vector<32x96xf32>
    %5 = arith.addf %2, %4 : vector<32x96xf32>
    %c0_5 = arith.constant 0 : index
    %c0_6 = arith.constant 0 : index
    %6 = vector.load %arg4[%c0_5, %c0_6] : memref<32x96xf32, #tpu.memory_space<vmem>>, vector<32x96xf32>
    tpu.vector_store %arg4[%c0_5, %c0_6], %5 {strides = array<i32>} : memref<32x96xf32, #tpu.memory_space<vmem>>, vector<32x96xf32>,
    return
  }
  func.func @transform_0(%arg0: i32) -> (i32, i32) {
    %c0_i32 = arith.constant 0 : i32
    %c0_i32_0 = arith.constant 0 : i32
    return %arg0, %c0_i32 : i32, i32
  }
  func.func @transform_1(%arg0: i32) -> (i32, i32) {
    %c0_i32 = arith.constant 0 : i32
    %c0_i32_0 = arith.constant 0 : i32
    %c0_i32_1 = arith.constant 0 : i32
    return %c0_i32, %c0_i32_0 : i32, i32
  }
  func.func @transform_2(%arg0: i32) -> (i32, i32) {
    %c0_i32 = arith.constant 0 : i32
    %c0_i32_0 = arith.constant 0 : i32
    %c0_i32_1 = arith.constant 0 : i32
    return %c0_i32, %c0_i32_0 : i32, i32
  }
  func.func @transform_3(%arg0: i32) -> (i32, i32) {
    %c0_i32 = arith.constant 0 : i32
    %c0_i32_0 = arith.constant 0 : i32
    return %arg0, %c0_i32 : i32, i32
  }
}

</mosaic_0001>

<bundles_post_ra>
// kernel: _lambda_.4
= control target key start
LH: loop header
LB: loop body
LE: loop exit
PB: predicated region body
PF: predicated region fallthrough
CT: control target
= control target key end

     0   :  { %vm114_vm0 = vcmask 588800   ;;  %vm139_vm1 = vcmask 1043456   ;;  %vm352_vm2 = vcmask 125952   ;;  %s643_s1 = inlined_call_operand.vmem [shape: bf16[72,16], index: 1, kind: input, shape index: {}]   ;;  %s644_s0 = inlined_call_operand.vmem [shape: bf16[128,72], index: 0, kind: input, shape index: {}]   ;;  %s645_s2 = inlined_call_operand.vmem [shape: f32[1,16], index: 2, kind: input, shape index: {}]   ;;  %s646_s3 = inlined_call_operand.vmem [shape: bf16[128,16], index: 3, kind: output, shape index: {}]  }
   0x1   :  { %v478_v0 = vld [vmem:[%s643_s1] sm:$0xff]   ;;  %v479_v1 = vld [vmem:[%s643_s1 + $0x8] sm:$0xff]   ;;  %v480_v2 = vld [vmem:[%s643_s1 + $0x10] sm:$0xff]  }
   0x2   :  { %440 = vmatprep.subr.bf16.mxu0 %v478_v0  ;;  %466 = vmatprep.subr.bf16.mxu1 %v478_v0  ;;  %v483_v3 = vld [vmem:[%s644_s0] sm:$0xff]   ;;  %v481_v5 = vld [vmem:[%s643_s1 + $0x18] sm:$0xff]   ;;  %v485_v8 = vld [vmem:[%s644_s0 + $0x8] sm:$0xff]  }
   0x3   :  { %441 = vmatpush3.bf16.msra.mxu0 %v478_v0  ;;  %471 = vmatpush3.bf16.msra.mxu1 %v478_v0  ;;  %v484_v4 = vld [vmem:[%s644_s0 + $0x20] sm:$0xff]   ;;  %v486_v9 = vld [vmem:[%s644_s0 + $0x28] sm:$0xff]   ;;  %v487_v10 = vld [vmem:[%s644_s0 + $0x10] sm:$0xff]  }
   0x4   :  { %442 = vmatprep.subr.bf16.mxu0 %v479_v1  ;;  %467 = vmatprep.subr.bf16.mxu1 %v479_v1  ;;  %v482_v6 = vld [vmem:[%s643_s1 + $0x20] ss:$0 sps:$4 sm:$0xff]   ;;  %v488_v11 = vld [vmem:[%s644_s0 + $0x30] sm:$0xff]   ;;  %v489_v12 = vld [vmem:[%s644_s0 + $0x18] sm:$0xff]  }
   0x5   :  { %450 = vmatprep.mubr.msk.bf16.mxu0 %vm114_vm0, %v483_v3  ;;  %458 = vmatprep.mubr.msk.bf16.mxu1 %vm114_vm0, %v484_v4  ;;  %v141_v7 = vsel %vm139_vm1, %v482_v6, 0  ;;  %v490_v13 = vld [vmem:[%s644_s0 + $0x38] sm:$0xff]   ;;  %v561_v14 = vld [vmem:[%s645_s2] ss:$0 sm:$0xff] }
   0x7   :  { %443 = vmatpush3.bf16.msra.mxu0 %v479_v1  ;;  %472 = vmatpush3.bf16.msra.mxu1 %v479_v1 }
   0x8   :  { %444 = vmatprep.subr.bf16.mxu0 %v480_v2  ;;  %468 = vmatprep.subr.bf16.mxu1 %v480_v2 }
   0xb   :  { %445 = vmatpush3.bf16.msra.mxu0 %v480_v2  ;;  %473 = vmatpush3.bf16.msra.mxu1 %v480_v2 }
   0xc   :  { %446 = vmatprep.subr.bf16.mxu0 %v481_v5  ;;  %469 = vmatprep.subr.bf16.mxu1 %v481_v5 }
   0xf   :  { %447 = vmatpush3.bf16.msra.mxu0 %v481_v5  ;;  %474 = vmatpush3.bf16.msra.mxu1 %v481_v5 }
  0x10   :  { %476 = vmatprep.subr.msk.bf16.mxu0 %vm139_vm1, %v482_v6  ;;  %477 = vmatprep.subr.msk.bf16.mxu1 %vm139_vm1, %v482_v6 }
  0x13   :  { %449 = vmatpush3.bf16.msra.mxu0 %v141_v7  ;;  %475 = vmatpush3.bf16.msra.mxu1 %v141_v7 }
  0x16   :  { %451 = vmatmul.mubr.msk.bf16.vlgmr.msra.gmra.mrb[0].mxu0 %vm114_vm0, %v485_v8  ;;  %459 = vmatmul.mubr.msk.bf16.vlgmr.msra.gmra.mrb[0].mxu1 %vm114_vm0, %v486_v9 }
  0x17   :  { %454 = vmatprep.mubr.msk.bf16.mxu0 %vm114_vm0, %v487_v10  ;;  %462 = vmatprep.mubr.msk.bf16.mxu1 %vm114_vm0, %v488_v11 }
  0x1e   :  { %455 = vmatmul.mubr.msk.bf16.gmra.mrb[4].mxu0 %vm114_vm0, %v489_v12  ;;  %463 = vmatmul.mubr.msk.bf16.gmra.mrb[4].mxu1 %vm114_vm0, %v490_v13 }
  0xe9   :  { %v452_v15 = vpop.f32.mrb[0].mxu0  ;;  %v460_v16 = vpop.f32.mrb[0].mxu1 }
  0xea   :  { %v186_v17 = vadd.f32 %v452_v15, %v561_v14  ;;  %v218_v18 = vadd.f32 %v460_v16, %v561_v14  ;;  %v177_v19 = vpop.f32.mrb[1].mxu0  ;;  %v209_v20 = vpop.f32.mrb[1].mxu1 }
  0xeb   :  { %v178_v21 = vadd.f32 %v561_v14, %v177_v19  ;;  %v210_v22 = vadd.f32 %v561_v14, %v209_v20  ;;  %v453_v23 = vpop.f32.mrb[2].mxu0  ;;  %v461_v24 = vpop.f32.mrb[2].mxu1 }
  0xec   :  { %vm242_vm3 = vcmp.ge.f32.partialorder %v186_v17, 0.0  ;;  %v258_v25 = vmul.f32 0.2, %v186_v17  ;;  %vm250_vm4 = vcmp.ge.f32.partialorder %v218_v18, 0.0  ;;  %v266_v26 = vmul.f32 0.2, %v218_v18 }
  0xed   :  { %vm240_vm5 = vcmp.ge.f32.partialorder %v178_v21, 0.0  ;;  %v256_v27 = vmul.f32 0.2, %v178_v21  ;;  %vm248_vm6 = vcmp.ge.f32.partialorder %v210_v22, 0.0  ;;  %v264_v28 = vmul.f32 0.2, %v210_v22 }
  0xee   :  { %v274_v29 = vsel %vm242_vm3, %v186_v17, %v258_v25  ;;  %v282_v30 = vsel %vm250_vm4, %v218_v18, %v266_v26  ;;  %v189_v31 = vadd.f32 %v453_v23, %v561_v14  ;;  %v221_v32 = vadd.f32 %v461_v24, %v561_v14  ;;  %v180_v33 = vpop.f32.mrb[3].mxu0  ;;  %v212_v34 = vpop.f32.mrb[3].mxu1 }
  0xef   :  { %v413_v35 = vpack.c.bf16 %v274_v29, %v274_v29  ;;  %v421_v36 = vpack.c.bf16 %v282_v30, %v282_v30  ;;  %v272_v37 = vsel %vm240_vm5, %v178_v21, %v256_v27  ;;  %v280_v38 = vsel %vm248_vm6, %v210_v22, %v264_v28 }
  0xf0   :  { %v411_v39 = vpack.c.bf16 %v272_v37, %v272_v37  ;;  %v419_v40 = vpack.c.bf16 %v280_v38, %v280_v38  ;;  %vm243_vm7 = vcmp.ge.f32.partialorder %v189_v31, 0.0  ;;  %v259_v41 = vmul.f32 0.2, %v189_v31 }
  0xf1   :  { %355 = vst.msk [vmem:[%s646_s3 + $0x8] sm:$0xf] %vm352_vm2, %v413_v35  ;;  %363 = vst.msk [vmem:[%s646_s3 + $0x28] sm:$0xf] %vm352_vm2, %v421_v36  ;;  %vm251_vm8 = vcmp.ge.f32.partialorder %v221_v32, 0.0  ;;  %v181_v43 = vadd.f32 %v561_v14, %v180_v33  ;;  %v213_v44 = vadd.f32 %v561_v14, %v212_v34  ;;  %v456_v45 = vpop.f32.mrb[4].mxu0 }
  0xf2   :  { %v267_v42 = vmul.f32 0.2, %v221_v32  ;;  %v464_v46 = vpop.f32.mrb[4].mxu1  ;;  %353 = vst.msk [vmem:[%s646_s3] sm:$0xf] %vm352_vm2, %v411_v39  ;;  %v275_v47 = vsel %vm243_vm7, %v189_v31, %v259_v41  ;;  %v202_v48 = vadd.f32 %v456_v45, %v561_v14  ;;  %v193_v50 = vpop.f32.mrb[5].mxu0 }
  0xf3   :  { %361 = vst.msk [vmem:[%s646_s3 + $0x20] sm:$0xf] %vm352_vm2, %v419_v40  ;;  %v234_v49 = vadd.f32 %v464_v46, %v561_v14  ;;  %v225_v51 = vpop.f32.mrb[5].mxu1  ;;  %v414_v52 = vpack.c.bf16 %v275_v47, %v275_v47  ;;  %vm241_vm9 = vcmp.ge.f32.partialorder %v181_v43, 0.0  ;;  %v257_v54 = vmul.f32 0.2, %v181_v43 }
  0xf4   :  { %v283_v53 = vsel %vm251_vm8, %v221_v32, %v267_v42  ;;  %v457_v55 = vpop.f32.mrb[6].mxu0  ;;  %v465_v56 = vpop.f32.mrb[6].mxu1  ;;  %vm249_vm10 = vcmp.ge.f32.partialorder %v213_v44, 0.0  ;;  %v265_v58 = vmul.f32 0.2, %v213_v44  ;;  %vm246_vm11 = vcmp.ge.f32.partialorder %v202_v48, 0.0 }
  0xf5   :  { %v422_v57 = vpack.c.bf16 %v283_v53, %v283_v53  ;;  %v196_v59 = vpop.f32.mrb[7].mxu0  ;;  %v228_v60 = vpop.f32.mrb[7].mxu1  ;;  %356 = vst.msk [vmem:[%s646_s3 + $0xc] sm:$0xf] %vm352_vm2, %v414_v52  ;;  %v273_v61 = vsel %vm241_vm9, %v181_v43, %v257_v54  ;;  %v262_v62 = vmul.f32 0.2, %v202_v48  ;;  %v194_v2 = vadd.f32 %v561_v14, %v193_v50 }
  0xf6   :  { %vm254_vm12 = vcmp.ge.f32.partialorder %v234_v49, 0.0  ;;  %v270_v63 = vmul.f32 0.2, %v234_v49  ;;  %v412_v0 = vpack.c.bf16 %v273_v61, %v273_v61  ;;  %v281_v1 = vsel %vm249_vm10, %v213_v44, %v265_v58 }
  0xf7   :  { %364 = vst.msk [vmem:[%s646_s3 + $0x2c] sm:$0xf] %vm352_vm2, %v422_v57  ;;  %v226_v3 = vadd.f32 %v561_v14, %v225_v51  ;;  %v420_v4 = vpack.c.bf16 %v281_v1, %v281_v1  ;;  %v278_v5 = vsel %vm246_vm11, %v202_v48, %v262_v62  ;;  %v205_v7 = vadd.f32 %v457_v55, %v561_v14 }
  0xf8   :  { %v286_v6 = vsel %vm254_vm12, %v234_v49, %v270_v63  ;;  %354 = vst.msk [vmem:[%s646_s3 + $0x4] sm:$0xf] %vm352_vm2, %v412_v0  ;;  %v417_v8 = vpack.c.bf16 %v278_v5, %v278_v5  ;;  %vm244_vm13 = vcmp.ge.f32.partialorder %v194_v2, 0.0  ;;  %v260_v10 = vmul.f32 0.2, %v194_v2 }
  0xf9   :  { %v425_v9 = vpack.c.bf16 %v286_v6, %v286_v6  ;;  %362 = vst.msk [vmem:[%s646_s3 + $0x24] sm:$0xf] %vm352_vm2, %v420_v4  ;;  %vm252_vm14 = vcmp.ge.f32.partialorder %v226_v3, 0.0  ;;  %v268_v11 = vmul.f32 0.2, %v226_v3  ;;  %vm247_vm15 = vcmp.ge.f32.partialorder %v205_v7, 0.0 }
  0xfa   :  { %v263_v12 = vmul.f32 0.2, %v205_v7  ;;  %359 = vst.msk [vmem:[%s646_s3 + $0x18] sm:$0xf] %vm352_vm2, %v417_v8  ;;  %v276_v13 = vsel %vm244_vm13, %v194_v2, %v260_v10  ;;  %v237_v15 = vadd.f32 %v465_v56, %v561_v14  ;;  %v197_v16 = vadd.f32 %v561_v14, %v196_v59 }
  0xfb   :  { %367 = vst.msk [vmem:[%s646_s3 + $0x38] sm:$0xf] %vm352_vm2, %v425_v9  ;;  %v229_v17 = vadd.f32 %v561_v14, %v228_v60  ;;  %v415_v18 = vpack.c.bf16 %v276_v13, %v276_v13  ;;  %v284_v19 = vsel %vm252_vm14, %v226_v3, %v268_v11 }
  0xfc   :  { %v279_v20 = vsel %vm247_vm15, %v205_v7, %v263_v12  ;;  %v423_v21 = vpack.c.bf16 %v284_v19, %v284_v19  ;;  %vm255_vm0 = vcmp.ge.f32.partialorder %v237_v15, 0.0  ;;  %v271_v23 = vmul.f32 0.2, %v237_v15 }
  0xfd   :  { %v418_v22 = vpack.c.bf16 %v279_v20, %v279_v20  ;;  %357 = vst.msk [vmem:[%s646_s3 + $0x10] sm:$0xf] %vm352_vm2, %v415_v18  ;;  %vm245_vm1 = vcmp.ge.f32.partialorder %v197_v16, 0.0  ;;  %v261_v24 = vmul.f32 0.2, %v197_v16  ;;  %vm253_vm3 = vcmp.ge.f32.partialorder %v229_v17, 0.0 }
  0xfe   :  { %v269_v25 = vmul.f32 0.2, %v229_v17  ;;  %365 = vst.msk [vmem:[%s646_s3 + $0x30] sm:$0xf] %vm352_vm2, %v423_v21  ;;  %v287_v14 = vsel %vm255_vm0, %v237_v15, %v271_v23 }
  0xff   :  { %360 = vst.msk [vmem:[%s646_s3 + $0x1c] sm:$0xf] %vm352_vm2, %v418_v22  ;;  %v426_v26 = vpack.c.bf16 %v287_v14, %v287_v14  ;;  %v277_v27 = vsel %vm245_vm1, %v197_v16, %v261_v24 }
 0x100   :  { %v285_v28 = vsel %vm253_vm3, %v229_v17, %v269_v25  ;;  %v416_v29 = vpack.c.bf16 %v277_v27, %v277_v27 }
 0x101   :  { %v424_v30 = vpack.c.bf16 %v285_v28, %v285_v28  ;;  %368 = vst.msk [vmem:[%s646_s3 + $0x3c] sm:$0xf] %vm352_vm2, %v426_v26 }
 0x102   :  { %358 = vst.msk [vmem:[%s646_s3 + $0x14] sm:$0xf] %vm352_vm2, %v416_v29 }
 0x103   :  { %366 = vst.msk [vmem:[%s646_s3 + $0x34] sm:$0xf] %vm352_vm2, %v424_v30 }

// kernel: _lambda_.5
= control target key start
LH: loop header
LB: loop body
LE: loop exit
PB: predicated region body
PF: predicated region fallthrough
CT: control target
= control target key end

     0   :  { %v267_v0 = vmov 0   ;;  %vm116_vm0 = vcmask 130048   ;;  %vm200_vm3 = vcmask 257024   ;;  %s342_s1 = inlined_call_operand.vmem [shape: bf16[144,32], index: 1, kind: input, shape index: {}]   ;;  %s343_s0 = inlined_call_operand.vmem [shape: bf16[32,144], index: 0, kind: input, shape index: {}]   ;;  %s344_s2 = inlined_call_operand.vmem [shape: f32[1,32], index: 2, kind: input, shape index: {}]   ;;  %s345_s3 = inlined_call_operand.vmem [shape: bf16[32,32], index: 3, kind: output, shape index: {}]  }
   0x1   :  { %123 = vmatprep.subr.bf16.mxu0 %v267_v0  ;;  %233 = vmatprep.subr.bf16.mxu1 %v267_v0  ;;  %v252_v1 = vld [vmem:[%s342_s1] sm:$0xff]   ;;  %v253_v2 = vld [vmem:[%s342_s1 + $0x8] sm:$0xff]   ;;  %v254_v3 = vld [vmem:[%s342_s1 + $0x10] sm:$0xff]  }
   0x2   :  { %124 = vmatpush1.bf16.msra.mxu0 %v252_v1  ;;  %242 = vmatpush1.bf16.msra.mxu1 %v252_v1  ;;  %v255_v4 = vld [vmem:[%s342_s1 + $0x18] sm:$0xff]   ;;  %v263_v5 = vld [vmem:[%s343_s0 + $0x4] ss:$8 sps:$4 sm:$0xff]   ;;  %v258_v9 = vld [vmem:[%s342_s1 + $0x30] sm:$0xff]  }
   0x3   :  { %125 = vmatprep.subr.bf16.mxu0 %v267_v0  ;;  %234 = vmatprep.subr.bf16.mxu1 %v267_v0  ;;  %v266_v6 = vld [vmem:[%s343_s0 + $0x14] ss:$8 sps:$4 sm:$0xff]   ;;  %v256_v7 = vld [vmem:[%s342_s1 + $0x20] sm:$0xff]   ;;  %v257_v8 = vld [vmem:[%s342_s1 + $0x28] sm:$0xff]  }
   0x4   :  { %223 = vmatprep.mubr.msk.bf16.mxu0 %vm116_vm0, %v263_v5  ;;  %224 = vmatprep.mubr.msk.bf16.mxu1 %vm116_vm0, %v266_v6  ;;  %v259_v10 = vld [vmem:[%s342_s1 + $0x38] sm:$0xff]   ;;  %v260_v11 = vld [vmem:[%s342_s1 + $0x40] sm:$0xff]  }
   0x5   :  { %v261_v12 = vld [vmem:[%s343_s0] ss:$8 sps:$4 sm:$0xff]   ;;  %v264_v13 = vld [vmem:[%s343_s0 + $0x10] ss:$8 sps:$4 sm:$0xff]  }
   0x6   :  { %126 = vmatpush1.bf16.msra.mxu0 %v253_v2  ;;  %243 = vmatpush1.bf16.msra.mxu1 %v253_v2  ;;  %v209_v14 = vld [vmem:[%s344_s2] ss:$0 sm:$0xff] }
   0x7   :  { %127 = vmatprep.subr.bf16.mxu0 %v267_v0  ;;  %235 = vmatprep.subr.bf16.mxu1 %v267_v0 }
   0xa   :  { %128 = vmatpush1.bf16.msra.mxu0 %v254_v3  ;;  %244 = vmatpush1.bf16.msra.mxu1 %v254_v3 }
   0xb   :  { %129 = vmatprep.subr.bf16.mxu0 %v267_v0  ;;  %236 = vmatprep.subr.bf16.mxu1 %v267_v0 }
   0xe   :  { %130 = vmatpush1.bf16.msra.mxu0 %v255_v4  ;;  %245 = vmatpush1.bf16.msra.mxu1 %v255_v4 }
   0xf   :  { %131 = vmatprep.subr.bf16.mxu0 %v267_v0  ;;  %237 = vmatprep.subr.bf16.mxu1 %v267_v0 }
  0x12   :  { %132 = vmatpush1.bf16.msra.mxu0 %v256_v7  ;;  %246 = vmatpush1.bf16.msra.mxu1 %v256_v7 }
  0x13   :  { %133 = vmatprep.subr.bf16.mxu0 %v267_v0  ;;  %238 = vmatprep.subr.bf16.mxu1 %v267_v0 }
  0x16   :  { %134 = vmatpush1.bf16.msra.mxu0 %v257_v8  ;;  %247 = vmatpush1.bf16.msra.mxu1 %v257_v8 }
  0x17   :  { %135 = vmatprep.subr.bf16.mxu0 %v267_v0  ;;  %239 = vmatprep.subr.bf16.mxu1 %v267_v0 }
  0x1a   :  { %136 = vmatpush1.bf16.msra.mxu0 %v258_v9  ;;  %248 = vmatpush1.bf16.msra.mxu1 %v258_v9 }
  0x1b   :  { %137 = vmatprep.subr.bf16.mxu0 %v267_v0  ;;  %240 = vmatprep.subr.bf16.mxu1 %v267_v0 }
  0x1e   :  { %138 = vmatpush1.bf16.msra.mxu0 %v259_v10  ;;  %249 = vmatpush1.bf16.msra.mxu1 %v259_v10 }
  0x1f   :  { %139 = vmatprep.subr.bf16.mxu0 %v267_v0  ;;  %241 = vmatprep.subr.bf16.mxu1 %v267_v0 }
  0x22   :  { %140 = vmatpush1.bf16.msra.mxu0 %v260_v11  ;;  %250 = vmatpush1.bf16.msra.mxu1 %v260_v11 }
  0x25   :  { %156 = vmatmul.mubr.bf16.vlgmr.msra.gmra.mrb[0].mxu0 %v261_v12  ;;  %164 = vmatmul.mubr.bf16.vlgmr.msra.gmra.mrb[0].mxu1 %v264_v13 }
  0xf8   :  { %v157_v15 = vpop.f32.mrb[0].mxu0  ;;  %v165_v16 = vpop.f32.mrb[0].mxu1 }
  0xf9   :  { %v158_v17 = vadd.f32 %v209_v14, %v157_v15  ;;  %v166_v18 = vadd.f32 %v209_v14, %v165_v16  ;;  %v159_v19 = vpop.f32.mrb[1].mxu0  ;;  %v167_v20 = vpop.f32.mrb[1].mxu1 }
  0xfa   :  { %v160_v21 = vpop.f32.mrb[2].mxu0  ;;  %v168_v22 = vpop.f32.mrb[2].mxu1 }
  0xfb   :  { %vm172_vm1 = vcmp.ge.f32.partialorder %v158_v17, 0.0  ;;  %v176_v23 = vmul.f32 0.2, %v158_v17  ;;  %vm174_vm2 = vcmp.ge.f32.partialorder %v166_v18, 0.0  ;;  %v178_v24 = vmul.f32 0.2, %v166_v18 }
  0xfc   :  { %v161_v25 = vadd.f32 %v209_v14, %v160_v21  ;;  %v169_v26 = vadd.f32 %v209_v14, %v168_v22  ;;  %v162_v27 = vpop.f32.mrb[3].mxu0  ;;  %v170_v28 = vpop.f32.mrb[3].mxu1 }
  0xfd   :  { %v180_v29 = vsel %vm172_vm1, %v158_v17, %v176_v23  ;;  %v182_v30 = vsel %vm174_vm2, %v166_v18, %v178_v24 }
  0xfe   :  { %v229_v31 = vpack.c.bf16 %v180_v29, %v180_v29  ;;  %v231_v32 = vpack.c.bf16 %v182_v30, %v182_v30  ;;  %vm173_vm4 = vcmp.ge.f32.partialorder %v161_v25, 0.0  ;;  %v177_v33 = vmul.f32 0.2, %v161_v25 }
  0xff   :  { %vm175_vm5 = vcmp.ge.f32.partialorder %v169_v26, 0.0  ;;  %v179_v34 = vmul.f32 0.2, %v169_v26 }
 0x100   :  { %201 = vst.msk [vmem:[%s345_s3] sm:$0xf] %vm200_vm3, %v229_v31  ;;  %203 = vst.msk [vmem:[%s345_s3 + $0x8] sm:$0xf] %vm200_vm3, %v231_v32  ;;  %v181_v35 = vsel %vm173_vm4, %v161_v25, %v177_v33 }
 0x101   :  { %v230_v36 = vpack.c.bf16 %v181_v35, %v181_v35  ;;  %v183_v37 = vsel %vm175_vm5, %v169_v26, %v179_v34 }
 0x102   :  { %v232_v38 = vpack.c.bf16 %v183_v37, %v183_v37 }
 0x103   :  { %202 = vst.msk [vmem:[%s345_s3 + $0x4] sm:$0xf] %vm200_vm3, %v230_v36 }
 0x104   :  { %204 = vst.msk [vmem:[%s345_s3 + $0xc] sm:$0xf] %vm200_vm3, %v232_v38 }

// kernel: tile.8
= control target key start
LH: loop header
LB: loop body
LE: loop exit
PB: predicated region body
PF: predicated region fallthrough
CT: control target
= control target key end

     0   :  { %s22_s0 = inlined_call_operand.vmem [shape: f32[24], index: 0, kind: input, shape index: {}]   ;;  %s23_s1 = inlined_call_operand.vmem [shape: f32[4,24], index: 1, kind: output, shape index: {}]  }
   0x1   :  { %v4_v0 = vld [vmem:[%s22_s0] ss:$0 sm:$0xff] }
   0x2   :  { %5 = vst [vmem:[%s23_s1] sm:$0xf] %v4_v0 }

// kernel: tile.9
= control target key start
LH: loop header
LB: loop body
LE: loop exit
PB: predicated region body
PF: predicated region fallthrough
CT: control target
= control target key end

     0   :  { %vm7_vm0 = vcmask 195584   ;;  %s37_s8 = smov 24   ;;  %s38_s9 = smov 48   ;;  %vm13_vm1 = vcmask 785984   ;;  %vm19_vm2 = vcmask 589184   ;;  %vm25_vm3 = vcmask 392384   ;;  %s55_s0 = inlined_call_operand.vmem [shape: f32[4,24], index: 0, kind: input, shape index: {}]   ;;  %s56_s1 = inlined_call_operand.vmem [shape: f32[1,96], index: 1, kind: output, shape index: {}]  }
   0x1   :  { %v4_v0 = vld [vmem:[%s55_s0] sm:$0xf]  ;;  %s36_s0 = smov 72  }
   0x2   :  { %5 = vst [vmem:[#allocation1] sm:$0xf] %v4_v0 }
   0x9   :  { %v10_v1 = vld [vmem:[#allocation1 + $0x3] sm:$0x1]   ;;  %v22_v2 = vld [vmem:[#allocation1 + $0x1] sm:$0x1]   ;;  %v6_v3 = vld [vmem:[#allocation1] sm:$0x1]  }
   0xa   :  { %11 = vrot.lane.b32.xlu0 %v10_v1, %s36_s0  ;;  %23 = vrot.lane.b32.xlu1 %v22_v2, %s37_s8  ;;  %v16_v4 = vld [vmem:[#allocation1 + $0x2] sm:$0x1]   ;;  %8 = vst.msk [vmem:[#allocation0] sm:$0x1] %vm7_vm0, %v6_v3  }
   0xe   :  { %17 = vrot.lane.b32.xlu0 %v16_v4, %s38_s9 }
  0x7c   :  { %v12_v5 = vpop.permute.xlu0 %11   ;;  %v24_v6 = vpop.permute.xlu1 %23  }
  0x7d   :  { %14 = vst.msk [vmem:[#allocation0] sm:$0x1] %vm13_vm1, %v12_v5  }
  0x80   :  { %v18_v7 = vpop.permute.xlu0 %17  }
  0x81   :  { %20 = vst.msk [vmem:[#allocation0] sm:$0x1] %vm19_vm2, %v18_v7  }
  0x82   :  { %26 = vst.msk [vmem:[#allocation0] sm:$0x1] %vm25_vm3, %v24_v6  }
  0x89   :  { %v30_v8 = vld [vmem:[#allocation0] sm:$0x1] }
  0x8a   :  { %32 = vst [vmem:[%s56_s1] sm:$0x1] %v30_v8 }

// kernel: _lambda_.7
= control target key start
LH: loop header
LB: loop body
LE: loop exit
PB: predicated region body
PF: predicated region fallthrough
CT: control target
= control target key end

     0   :  { %vm204_vm0 = vcmask 261120   ;;  %vm309_vm1 = vcmask 785408   ;;  %s522_s1 = inlined_call_operand.vmem [shape: bf16[288,96], index: 1, kind: input, shape index: {}]   ;;  %s523_s0 = inlined_call_operand.vmem [shape: bf16[32,288], index: 0, kind: input, shape index: {}]   ;;  %s524_s2 = inlined_call_operand.vmem [shape: f32[1,96], index: 2, kind: input, shape index: {}]   ;;  %s525_s3 = inlined_call_operand.vmem [shape: f32[32,96], index: 3, kind: output, shape index: {}]  }
   0x1   :  { %v385_v0 = vld [vmem:[%s522_s1 + $0x40] sm:$0xff]   ;;  %v387_v2 = vld [vmem:[%s522_s1 + $0x48] sm:$0xff]   ;;  %v389_v4 = vld [vmem:[%s522_s1 + $0x50] sm:$0xff]  }
   0x2   :  { %v386_v1 = vld [vmem:[%s522_s1] sm:$0xff]   ;;  %345 = vmatprep.subr.bf16.mxu0 %v385_v0  ;;  %v388_v3 = vld [vmem:[%s522_s1 + $0x8] sm:$0xff]   ;;  %v390_v5 = vld [vmem:[%s522_s1 + $0x10] sm:$0xff]  }
   0x3   :  { %346 = vmatpush3.bf16.msra.mxu0 %v386_v1  ;;  %v391_v6 = vld [vmem:[%s522_s1 + $0x58] sm:$0xff]   ;;  %v393_v8 = vld [vmem:[%s522_s1 + $0x60] sm:$0xff]   ;;  %v395_v11 = vld [vmem:[%s522_s1 + $0x68] sm:$0xff]  }
   0x4   :  { %347 = vmatprep.subr.bf16.mxu0 %v387_v2  ;;  %v392_v7 = vld [vmem:[%s522_s1 + $0x18] sm:$0xff]   ;;  %v394_v9 = vld [vmem:[%s522_s1 + $0x20] sm:$0xff]   ;;  %v396_v12 = vld [vmem:[%s522_s1 + $0x28] sm:$0xff]  }
   0x5   :  { %v400_v10 = vld [vmem:[%s522_s1 + $0x80] sm:$0xff]   ;;  %v397_v13 = vld [vmem:[%s522_s1 + $0x70] sm:$0xff]   ;;  %v405_v15 = vld [vmem:[%s522_s1 + $0x88] sm:$0xff]  }
   0x6   :  { %377 = vmatprep.subr.bf16.mxu1 %v400_v10  ;;  %v404_v14 = vld [vmem:[%s523_s0 + $0x4] ss:$12 sps:$4 sm:$0xff]   ;;  %v406_v16 = vld [vmem:[%s523_s0 + $0x8] ss:$12 sps:$4 sm:$0xff]   ;;  %v407_v17 = vld [vmem:[%s523_s0 + $0x20] ss:$12 sps:$4 sm:$0xff]  }
   0x7   :  { %348 = vmatpush3.bf16.msra.mxu0 %v388_v3  ;;  %378 = vmatpush3.bf16.msra.mxu1 %v400_v10  ;;  %v398_v18 = vld [vmem:[%s522_s1 + $0x30] sm:$0xff]   ;;  %v399_v19 = vld [vmem:[%s522_s1 + $0x78] sm:$0xff]   ;;  %v402_v21 = vld [vmem:[%s523_s0] ss:$12 sps:$4 sm:$0xff]  }
   0x8   :  { %349 = vmatprep.subr.bf16.mxu0 %v389_v4  ;;  %243 = vmatprep.mubr.bf16.mxu0 %v404_v14  ;;  %v401_v20 = vld [vmem:[%s522_s1 + $0x38] sm:$0xff]   ;;  %v318_v30 = vld [vmem:[%s524_s2] ss:$0 sm:$0xff] }
   0x9   :  { %379 = vmatprep.subr.bf16.mxu1 %v405_v15  ;;  %381 = vmatprep.mubr.msk.bf16.mxu1 %vm204_vm0, %v406_v16  ;;  %v408_v22 = vld [vmem:[%s523_s0 + $0x1c] ss:$12 sps:$4 sm:$0xff]   ;;  %v410_v23 = vld [vmem:[%s523_s0 + $0x18] ss:$12 sps:$4 sm:$0xff]  }
   0xb   :  { %350 = vmatpush3.bf16.msra.mxu0 %v390_v5  ;;  %380 = vmatpush3.bf16.msra.mxu1 %v405_v15 }
   0xc   :  { %351 = vmatprep.subr.bf16.mxu0 %v391_v6 }
   0xe   :  { %382 = vmatmul.mubr.msk.bf16.vlgmr.msra.gmra.mrb[0].mxu1 %vm204_vm0, %v407_v17 }
   0xf   :  { %352 = vmatpush3.bf16.msra.mxu0 %v392_v7 }
  0x10   :  { %353 = vmatprep.subr.bf16.mxu0 %v393_v8 }
  0x13   :  { %354 = vmatpush3.bf16.msra.mxu0 %v394_v9 }
  0x14   :  { %355 = vmatprep.subr.bf16.mxu0 %v395_v11 }
  0x17   :  { %356 = vmatpush3.bf16.msra.mxu0 %v396_v12 }
  0x18   :  { %357 = vmatprep.subr.bf16.mxu0 %v397_v13 }
  0x1b   :  { %358 = vmatpush3.bf16.msra.mxu0 %v398_v18 }
  0x1c   :  { %359 = vmatprep.subr.bf16.mxu0 %v399_v19 }
  0x1f   :  { %360 = vmatpush3.bf16.msra.mxu0 %v401_v20 }
  0x22   :  { %244 = vmatmul.mubr.bf16.vlgmr.msra.gmra.mrb[0].mxu0 %v402_v21 }
  0x23   :  { %251 = vmatprep.mubr.bf16.mxu0 %v408_v22 }
  0x2a   :  { %252 = vmatmul.mubr.bf16.gmra.mrb[4].mxu0 %v410_v23 }
  0xe1   :  { %v383_v24 = vpop.f32.mrb[0].mxu1 }
  0xe2   :  { %v294_v25 = vpop.f32.mrb[1].mxu1 }
  0xe3   :  { %v384_v26 = vpop.f32.mrb[2].mxu1 }
  0xe4   :  { %v297_v27 = vpop.f32.mrb[3].mxu1 }
  0xf5   :  { %v361_v28 = vpop.f32.mrb[0].mxu0 }
  0xf6   :  { %v362_v29 = vpop.f32.mrb[1].mxu0 }
  0xf7   :  { %v363_v31 = vadd.f32 %v362_v29, %v361_v28  ;;  %v364_v32 = vpop.f32.mrb[2].mxu0 }
  0xf8   :  { %v365_v33 = vpop.f32.mrb[3].mxu0 }
  0xf9   :  { %v366_v34 = vadd.f32 %v365_v33, %v364_v32  ;;  %v246_v35 = vadd.f32 %v363_v31, %v318_v30 }
  0xfb   :  { %v295_v36 = vadd.f32 %v294_v25, %v246_v35  ;;  %v249_v37 = vadd.f32 %v366_v34, %v318_v30 }
  0xfd   :  { %310 = vst.msk [vmem:[%s525_s3] sm:$0xff] %vm309_vm1, %v295_v36  ;;  %v298_v38 = vadd.f32 %v297_v27, %v249_v37  ;;  %v367_v39 = vpop.f32.mrb[4].mxu0 }
  0xfe   :  { %v368_v40 = vpop.f32.mrb[5].mxu0 }
  0xff   :  { %311 = vst.msk [vmem:[%s525_s3 + $0x8] sm:$0xff] %vm309_vm1, %v298_v38  ;;  %v369_v41 = vadd.f32 %v368_v40, %v367_v39  ;;  %v370_v42 = vpop.f32.mrb[6].mxu0 }
 0x100   :  { %v371_v43 = vpop.f32.mrb[7].mxu0 }
 0x101   :  { %v254_v44 = vadd.f32 %v369_v41, %v318_v30  ;;  %v372_v45 = vadd.f32 %v371_v43, %v370_v42 }
 0x103   :  { %v303_v46 = vadd.f32 %v383_v24, %v254_v44  ;;  %v257_v47 = vadd.f32 %v372_v45, %v318_v30 }
 0x105   :  { %312 = vst.msk [vmem:[%s525_s3 + $0x10] sm:$0xff] %vm309_vm1, %v303_v46  ;;  %v306_v48 = vadd.f32 %v384_v26, %v257_v47 }
 0x107   :  { %313 = vst.msk [vmem:[%s525_s3 + $0x18] sm:$0xff] %vm309_vm1, %v306_v48 }

// kernel: _lambda_.6
= control target key start
LH: loop header
LB: loop body
LE: loop exit
PB: predicated region body
PF: predicated region fallthrough
CT: control target
= control target key end

     0   :  { %vm19_vm0 = vcmask 261120   ;;  %v16331_v0 = vmov 0   ;;  %s20008_s1 = inlined_call_operand.vmem [shape: bf16[72,32,32], index: 1, kind: input, shape index: {}]   ;;  %s20009_s2 = inlined_call_operand.vmem [shape: f32[8,1,32], index: 2, kind: input, shape index: {}]   ;;  %s20010_s3 = inlined_call_operand.vmem [shape: f32[8,1,32], index: 3, kind: input, shape index: {}]   ;;  %s20011_s4 = inlined_call_operand.vmem [shape: bf16[96,1], index: 4, kind: input, shape index: {}]   ;;  %s20012_s5 = inlined_call_operand.vmem [shape: bf16[96,32], index: 5, kind: output, shape index: {}]   ;;  %s20013_s0 = inlined_call_operand.vmem [shape: bf16[96,32], index: 0, kind: input, shape index: {}]  }
   0x1   :  { %20 = vst.msk [vmem:[#allocation2] sm:$0xff] %vm19_vm0, %v16331_v0  ;;  %21 = vst.msk [vmem:[#allocation2 + $0x38] sm:$0xff] %vm19_vm0, %v16331_v0  ;;  %v55_v1 = vld [vmem:[%s20013_s0] sm:$0xff]  ;;  %v57_v2 = vld [vmem:[%s20013_s0 + $0x8] sm:$0xff] }
   0x2   :  { %v59_v3 = vld [vmem:[%s20013_s0 + $0x10] sm:$0xff]  ;;  %56 = vst [vmem:[#allocation2 + $0x8] sm:$0xff] %v55_v1  ;;  %58 = vst [vmem:[#allocation2 + $0x10] sm:$0xff] %v57_v2  ;;  %v61_v4 = vld [vmem:[%s20013_s0 + $0x18] sm:$0xff] }
   0x3   :  { %60 = vst [vmem:[#allocation2 + $0x18] sm:$0xff] %v59_v3  ;;  %v63_v5 = vld [vmem:[%s20013_s0 + $0x20] sm:$0xff]  ;;  %v65_v6 = vld [vmem:[%s20013_s0 + $0x28] sm:$0xff]  ;;  %62 = vst [vmem:[#allocation2 + $0x20] sm:$0xff] %v61_v4 }
   0x4   :  { %64 = vst [vmem:[#allocation2 + $0x28] sm:$0xff] %v63_v5  ;;  %66 = vst [vmem:[#allocation2 + $0x30] sm:$0xff] %v65_v6 }
   0x5   :  { %74 = vsyncadd [#allocation3], 768 }
   0x6   :  { %16327 = dma.done.wait [#allocation3], 768 }
   0x7   :  { %16328 = vsyncadd [#allocation3], 4294966528  ;;  %16177 = vset.pattern.permute.xlu1 %v16331_v0  ;;  %16176 = vset.pattern.permute.xlu0 %v16331_v0  ;;  %v16178_v7 = vld [vmem:[%s20008_s1] sm:$0xff]   ;;  %v16179_v8 = vld [vmem:[%s20008_s1 + $0x8] sm:$0xff]   ;;  %vm108_vm1 = vsmask.f32 4352 }
   0x8   :  { %14254 = vmatprep.subr.bf16.mxu0 %v16178_v7  ;;  %v102_v10 = vld [vmem:[#allocation2] sm:$0xf8]  ;;  %v16181_v42 = vld [vmem:[%s20008_s1 + $0x48] sm:$0xff]   ;;  %v16467_v53 = vld [vmem:[%s20008_s1 + $0x10] sm:$0xff]   ;;  %vm544_vm2 = vsmask.f32 3328 }
   0x9   :  { %v16389_v9 = vld [vmem:[#allocation2 + $0x8] sm:$0xff]  ;;  %v16391_v11 = vld [vmem:[#allocation2 + $0x10] sm:$0xff]  ;;  %14255 = vmatpush3.bf16.msra.mxu0 %v16178_v7  ;;  %v110_v12 = vshrl.u32 %v102_v10, 16  ;;  %v113_v13 = vshll.u32 %v102_v10, 16  ;;  %v16180_v18 = vld [vmem:[%s20008_s1 + $0x40] sm:$0xff]   ;;  %vm401_vm5 = vcmask 1043456  }
   0xa   :  { %v16394_v14 = vshrl.u32 %v16389_v9, 16  ;;  %v16397_v15 = vshll.u32 %v16389_v9, 16  ;;  %14256 = vmatprep.subr.bf16.mxu0 %v16179_v8  ;;  %v16400_v16 = vshrl.u32 %v16391_v11, 16  ;;  %v16403_v17 = vshll.u32 %v16391_v11, 16  ;;  %v16408_v19 = vld [vmem:[#allocation2 + $0x18] sm:$0xff]  ;;  %v16412_v24 = vld [vmem:[#allocation2 + $0x20] sm:$0xff] }
   0xb   :  { %v112_v20 = vrot.slane %v110_v12, 3  ;;  %v115_v21 = vrot.slane %v113_v13, 4  ;;  %v16417_v27 = vshrl.u32 %v16408_v19, 16  ;;  %v16420_v28 = vshll.u32 %v16408_v19, 16  ;;  %v16428_v33 = vld [vmem:[#allocation2 + $0x28] sm:$0xff] }
   0xc   :  { %v120_v22 = vrot.slane %v16394_v14, 3  ;;  %v123_v23 = vrot.slane %v16397_v15, 4  ;;  %v129_v25 = vrot.slane %v16400_v16, 3  ;;  %v132_v26 = vrot.slane %v16403_v17, 4  ;;  %v16437_v38 = vld [vmem:[#allocation2 + $0x30] sm:$0xf] }
   0xd   :  { %14257 = vmatpush3.bf16.msra.mxu0 %v16179_v8  ;;  %v116_v29 = vor.u32 %v115_v21, %v112_v20  ;;  %v16423_v31 = vshrl.u32 %v16412_v24, 16  ;;  %v16426_v32 = vshll.u32 %v16412_v24, 16  ;;  %v138_v35 = vrot.slane %v16417_v27, 3 }
   0xe   :  { %v124_v30 = vor.u32 %v123_v23, %v120_v22  ;;  %v16430_v34 = vor.u32 %v132_v26, %v129_v25  ;;  %14270 = vmatprep.subr.bf16.mxu0 %v16180_v18  ;;  %v141_v36 = vrot.slane %v16420_v28, 4  ;;  %v16435_v37 = vshrl.u32 %v16428_v33, 16 }
   0xf   :  { %v147_v40 = vrot.slane %v16423_v31, 3  ;;  %v150_v41 = vrot.slane %v16426_v32, 4  ;;  %v16446_v43 = vshll.u32 %v16428_v33, 16  ;;  %v163_v48 = vshrl.u32 %v16437_v38, 16 }
  0x10   :  { %v125_v39 = vsel %vm108_vm1, %v116_v29, %v124_v30  ;;  %v134_v44 = vsel %vm108_vm1, %v124_v30, %v16430_v34  ;;  %v142_v45 = vor.u32 %v141_v36, %v138_v35  ;;  %v156_v46 = vrot.slane %v16435_v37, 3 }
  0x11   :  { %14258 = vmatprep.mubr.msk.bf16.mxu0 %vm19_vm0, %v125_v39  ;;  %v159_v47 = vrot.slane %v16446_v43, 4  ;;  %v166_v49 = vshll.u32 %v16437_v38, 16  ;;  %v151_v51 = vor.u32 %v150_v41, %v147_v40  ;;  %v165_v54 = vrot.slane %v163_v48, 3 }
  0x12   :  { %14259 = vmatmul.mubr.msk.bf16.vlgmr.msra.gmra.mrb[0].mxu0 %vm19_vm0, %v134_v44  ;;  %v16458_v50 = vsel %vm108_vm1, %v16430_v34, %v142_v45  ;;  %v553_v58 = vrot.slane %v16394_v14, 4  ;;  %v554_v59 = vrot.slane %v16397_v15, 5  ;;  %v557_v60 = vrot.slane %v16400_v16, 4 }
  0x13   :  { %14271 = vmatpush3.bf16.msra.mxu0 %v16180_v18  ;;  %14262 = vmatprep.mubr.msk.bf16.mxu0 %vm19_vm0, %v16458_v50  ;;  %v16462_v52 = vor.u32 %v159_v47, %v156_v46  ;;  %v168_v55 = vrot.slane %v166_v49, 4  ;;  %v16470_v56 = vsel %vm108_vm1, %v142_v45, %v151_v51  ;;  %v558_v61 = vrot.slane %v16403_v17, 5 }
  0x14   :  { %14272 = vmatprep.subr.bf16.mxu0 %v16181_v42  ;;  %v561_v63 = vrot.slane %v16417_v27, 4  ;;  %v562_v0 = vrot.slane %v16420_v28, 5  ;;  %v565_v1 = vrot.slane %v16423_v31, 4  ;;  %v16488_v2 = vor.u32 %v554_v59, %v553_v58 }
  0x15   :  { %v16474_v57 = vsel %vm108_vm1, %v151_v51, %v16462_v52  ;;  %v169_v62 = vor.u32 %v168_v55, %v165_v54  ;;  %v16490_v3 = vor.u32 %v558_v61, %v557_v60  ;;  %v566_v4 = vrot.slane %v16426_v32, 5  ;;  %v16183_v55 = vld [vmem:[%s20008_s1 + $0x18] sm:$0xff]  }
  0x16   :  { %v569_v5 = vrot.slane %v16435_v37, 4  ;;  %v563_v6 = vor.u32 %v562_v0, %v561_v63  ;;  %v570_v7 = vrot.slane %v16446_v43, 5  ;;  %vm711_vm3 = vsmask.f32 256  ;;  %v16592_v0 = vld [vmem:[#allocation2 + $0x30] sm:$0xff] }
  0x17   :  { %14273 = vmatpush3.bf16.msra.mxu0 %v16181_v42  ;;  %v16498_v8 = vsel %vm544_vm2, %v16488_v2, %v16490_v3  ;;  %v567_v10 = vor.u32 %v566_v4, %v565_v1  ;;  %v170_v18 = vsel %vm108_vm1, %v16462_v52, %v169_v62  ;;  %v716_v21 = vrot.slane %v16394_v14, 7 }
  0x18   :  { %14286 = vmatprep.subr.bf16.mxu0 %v16467_v53  ;;  %v16502_v12 = vsel %vm544_vm2, %v16490_v3, %v563_v6  ;;  %v16504_v13 = vor.u32 %v570_v7, %v569_v5  ;;  %v719_v23 = vrot.slane %v16400_v16, 7  ;;  %v722_v25 = vrot.slane %v16417_v27, 7  ;;  %v16186_v5 = vld [vmem:[%s20008_s1 + $0x30] sm:$0xff]  }
  0x19   :  { %v16509_v20 = vsel %vm544_vm2, %v563_v6, %v567_v10  ;;  %v725_v26 = vrot.slane %v16423_v31, 7  ;;  %v16520_v29 = vor.u32 %v716_v21, %v16397_v15  ;;  %v728_v30 = vrot.slane %v16435_v37, 7 }
  0x1a   :  { %14263 = vmatmul.mubr.msk.bf16.gmra.mrb[4].mxu0 %vm19_vm0, %v16470_v56  ;;  %v16514_v22 = vsel %vm544_vm2, %v567_v10, %v16504_v13  ;;  %v720_v35 = vor.u32 %v719_v23, %v16403_v17  ;;  %v723_v36 = vor.u32 %v722_v25, %v16420_v28  ;;  %vm873_vm4 = vsmask.f32 7424  ;;  %v538_v10 = vld [vmem:[#allocation2 + $0x30] sm:$0x1f] }
  0x1b   :  { %14266 = vmatprep.mubr.msk.bf16.mxu0 %vm19_vm0, %v16474_v57  ;;  %v726_v39 = vor.u32 %v725_v26, %v16426_v32  ;;  %v729_v40 = vor.u32 %v728_v30, %v16446_v43  ;;  %v879_v45 = vrot.slane %v16397_v15, 1  ;;  %v884_v47 = vrot.slane %v16403_v17, 1 }
  0x1c   :  { %v16533_v41 = vsel %vm711_vm3, %v716_v21, %v720_v35  ;;  %v16536_v42 = vsel %vm711_vm3, %v719_v23, %v723_v36  ;;  %v892_v48 = vrot.slane %v16420_v28, 1  ;;  %v900_v51 = vrot.slane %v16426_v32, 1 }
  0x1d   :  { %v16539_v44 = vsel %vm711_vm3, %v722_v25, %v726_v39  ;;  %v16543_v46 = vsel %vm711_vm3, %v725_v26, %v729_v40  ;;  %v880_v49 = vor.u32 %v879_v45, %v16394_v14  ;;  %v908_v54 = vrot.slane %v16446_v43, 1  ;;  %v16187_v40 = vld [vmem:[%s20008_s1 + $0x38] sm:$0xff]   ;;  %v705_v45 = vld [vmem:[#allocation2] sm:$0x80] }
  0x1e   :  { %v888_v58 = vor.u32 %v884_v47, %v16400_v16  ;;  %v896_v15 = vor.u32 %v892_v48, %v16417_v27  ;;  %v904_v17 = vor.u32 %v900_v51, %v16423_v31  ;;  %v388_v27 = vld [vmem:[#allocation2] sm:$0xf0]  ;;  %v403_v60 = vrot.slane %v16389_v9, 4 }
  0x1f   :  { %v16556_v59 = vsel %vm873_vm4, %v880_v49, %v884_v47  ;;  %v16560_v28 = vor.u32 %v908_v54, %v16435_v37  ;;  %v16184_v31 = vld [vmem:[%s20008_s1 + $0x20] sm:$0xff]   ;;  %v402_v43 = vrot.slane %v388_v27, 4  ;;  %v407_v61 = vrot.slane %v16408_v19, 4  ;;  %v16188_v49 = vld [vmem:[%s20008_s1 + $0x50] sm:$0xff]  }
  0x20   :  { %v16563_v14 = vsel %vm873_vm4, %v888_v58, %v892_v48  ;;  %v16566_v32 = vsel %vm873_vm4, %v896_v15, %v900_v51  ;;  %v16571_v16 = vsel %vm873_vm4, %v904_v17, %v908_v54  ;;  %v409_v62 = vrot.slane %v16412_v24, 4  ;;  %v81_v58 = vld [vmem:[%s20011_s4 + $0x8] sm:$0xf]  ;;  %v79_v15 = vld [vmem:[%s20011_s4] sm:$0xf] }
  0x21   :  { %v16590_v63 = vrot.slane %v16428_v33, 4  ;;  %v546_v1 = vshrl.u32 %v388_v27, 16  ;;  %v413_v4 = vrot.slane %v16437_v38, 4  ;;  %v574_v38 = vshrl.u32 %v538_v10, 16  ;;  %1661 = vperm.xlu1 %16177, %v81_v58   ;;  %1637 = vperm.xlu0 %16176, %v79_v15  }
  0x22   :  { %14267 = vmatmul.mubr.msk.bf16.gmra.mrb[8].mxu0 %vm19_vm0, %v170_v18  ;;  %v16615_v18 = vsel %vm401_vm5, %v407_v61, %v409_v62  ;;  %v577_v23 = vshll.u32 %v538_v10, 16  ;;  %v16626_v26 = vshrl.u32 %v16592_v0, 16  ;;  %v16629_v35 = vshll.u32 %v16592_v0, 16  ;;  %v1049_v10 = vld [vmem:[#allocation2 + $0x8] sm:$0xf8] }
  0x23   :  { %14274 = vmatprep.mubr.msk.bf16.mxu0 %vm19_vm0, %v16389_v9  ;;  %v404_v9 = vsel %vm401_vm5, %v402_v43, %v403_v60  ;;  %v548_v6 = vrot.slane %v546_v1, 4  ;;  %v16619_v21 = vsel %vm401_vm5, %v409_v62, %v16590_v63  ;;  %v414_v36 = vsel %vm401_vm5, %v16590_v63, %v413_v4  ;;  %v80_v43 = vld [vmem:[%s20011_s4 + $0x4] sm:$0xf] }
  0x24   :  { %v1395_v47 = vrot.slane %v16626_v26, 4  ;;  %v1396_v48 = vrot.slane %v16629_v35, 5  ;;  %v576_v54 = vrot.slane %v574_v38, 4  ;;  %v16190_v4 = vld [vmem:[%s20008_s1 + $0x60] sm:$0xff]   ;;  %v916_v37 = vrot.slane %v16629_v35, 1 }
  0x25   :  { %1649 = vperm.xlu0 %16176, %v80_v43  }
  0x26   :  { %v16649_v51 = vor.u32 %v1396_v48, %v1395_v47  ;;  %v1081_v47 = vrot.slane %v16629_v35, 4  ;;  %v1050_v48 = vld [vmem:[#allocation2 + $0x38] sm:$0xf] }
  0x2a   :  { %14275 = vmatmul.mubr.msk.bf16.vlgmr.msra.gmra.mrb[0].mxu0 %vm19_vm0, %v16391_v11 }
  0x2b   :  { %14287 = vmatpush3.bf16.msra.mxu0 %v16467_v53  ;;  %14278 = vmatprep.mubr.msk.bf16.mxu0 %vm19_vm0, %v16408_v19  ;;  %v16583_v53 = vrot.slane %v16391_v11, 4  ;;  %v549_v11 = vshll.u32 %v388_v27, 16  ;;  %v16185_v19 = vld [vmem:[%s20008_s1 + $0x28] sm:$0xff]  }
  0x2c   :  { %14288 = vmatprep.subr.bf16.mxu0 %v16183_v55 }
  0x2d   :  { %v551_v7 = vrot.slane %v549_v11, 5  ;;  %v86_v11 = vld [vmem:[%s20011_s4 + $0x1c] sm:$0xf] }
  0x2f   :  { %14289 = vmatpush3.bf16.msra.mxu0 %v16183_v55  ;;  %v552_v25 = vor.u32 %v551_v7, %v548_v6  ;;  %v579_v55 = vrot.slane %v577_v23, 5  ;;  %v89_v6 = vld [vmem:[%s20011_s4 + $0x28] sm:$0xf]  ;;  %v917_v23 = vsel %vm873_vm4, %v16560_v28, %v916_v37  ;;  %v16193_v28 = vld [vmem:[%s20008_s1 + $0x78] sm:$0xff]  }
  0x30   :  { %14302 = vmatprep.subr.bf16.mxu0 %v16184_v31  ;;  %v16191_v7 = vld [vmem:[%s20008_s1 + $0x68] sm:$0xff]  }
  0x31   :  { %v556_v39 = vsel %vm544_vm2, %v552_v25, %v16488_v2  ;;  %v713_v2 = vshrl.u32 %v705_v45, 16  ;;  %v580_v17 = vor.u32 %v579_v55, %v576_v54  ;;  %v16194_v54 = vld [vmem:[%s20008_s1 + $0x80] sm:$0xff]  }
  0x32   :  { %14279 = vmatmul.mubr.msk.bf16.gmra.mrb[4].mxu0 %vm19_vm0, %v16412_v24  ;;  %v406_v24 = vsel %vm401_vm5, %v403_v60, %v16583_v53  ;;  %v733_v60 = vrot.slane %v16626_v26, 7 }
  0x33   :  { %14282 = vmatprep.mubr.msk.bf16.mxu0 %vm19_vm0, %v16428_v33  ;;  %v16605_v33 = vsel %vm401_vm5, %v16583_v53, %v407_v61  ;;  %v715_v27 = vrot.slane %v713_v2, 7  ;;  %v84_v61 = vld [vmem:[%s20011_s4 + $0x14] sm:$0xf]  ;;  %v581_v62 = vsel %vm544_vm2, %v16504_v13, %v580_v17  ;;  %v1088_v2 = vshll.u32 %v1050_v48, 16 }
  0x35   :  { %v718_v1 = vsel %vm711_vm3, %v715_v27, %v16520_v29  ;;  %v88_v29 = vld [vmem:[%s20011_s4 + $0x24] sm:$0xf]  ;;  %v1090_v55 = vrot.slane %v1088_v2, 4 }
  0x3a   :  { %14283 = vmatmul.mubr.msk.bf16.gmra.mrb[8].mxu0 %vm19_vm0, %v16592_v0 }
  0x3b   :  { %14290 = vmatprep.mubr.msk.bf16.mxu0 %vm19_vm0, %v404_v9  ;;  %v83_v9 = vld [vmem:[%s20011_s4 + $0x10] sm:$0xf] }
  0x3c   :  { %1685 = vperm.xlu0 %16176, %v83_v9   ;;  %v1365_v9 = vld [vmem:[#allocation2 + $0x38] sm:$0x1f] }
  0x42   :  { %14291 = vmatmul.mubr.msk.bf16.vlgmr.msra.gmra.mrb[0].mxu0 %vm19_vm0, %v406_v24  ;;  %v87_v24 = vld [vmem:[%s20011_s4 + $0x20] sm:$0xf] }
  0x43   :  { %14303 = vmatpush3.bf16.msra.mxu0 %v16184_v31  ;;  %14294 = vmatprep.mubr.msk.bf16.mxu0 %vm19_vm0, %v16605_v33  ;;  %v82_v31 = vld [vmem:[%s20011_s4 + $0xc] sm:$0xf] }
  0x44   :  { %14304 = vmatprep.subr.bf16.mxu0 %v16185_v19  ;;  %1673 = vperm.xlu1 %16177, %v82_v31  }
  0x47   :  { %14305 = vmatpush3.bf16.msra.mxu0 %v16185_v19  ;;  %v16189_v19 = vld [vmem:[%s20008_s1 + $0x58] sm:$0xff]  }
  0x48   :  { %14318 = vmatprep.subr.bf16.mxu0 %v16186_v5  ;;  %1697 = vperm.xlu1 %16177, %v84_v61  }
  0x4a   :  { %14295 = vmatmul.mubr.msk.bf16.gmra.mrb[4].mxu0 %vm19_vm0, %v16615_v18 }
  0x4b   :  { %14298 = vmatprep.mubr.msk.bf16.mxu0 %vm19_vm0, %v16619_v21 }
  0x4c   :  { %1721 = vperm.xlu1 %16177, %v86_v11  }
  0x50   :  { %1745 = vperm.xlu1 %16177, %v88_v29  }
  0x52   :  { %14299 = vmatmul.mubr.msk.bf16.gmra.mrb[8].mxu0 %vm19_vm0, %v414_v36 }
  0x53   :  { %14306 = vmatprep.mubr.msk.bf16.mxu0 %vm19_vm0, %v556_v39 }
  0x5a   :  { %14307 = vmatmul.mubr.msk.bf16.vlgmr.msra.gmra.mrb[0].mxu0 %vm19_vm0, %v16498_v8  ;;  %v16654_v8 = vsel %vm544_vm2, %v16504_v13, %v16649_v51  ;;  %v85_v13 = vld [vmem:[%s20011_s4 + $0x18] sm:$0xf] }
  0x5b   :  { %14319 = vmatpush3.bf16.msra.mxu0 %v16186_v5  ;;  %14310 = vmatprep.mubr.msk.bf16.mxu0 %vm19_vm0, %v16502_v12  ;;  %v90_v5 = vld [vmem:[%s20011_s4 + $0x2c] sm:$0xf] }
  0x5c   :  { %14320 = vmatprep.subr.bf16.mxu0 %v16187_v40  ;;  %1709 = vperm.xlu0 %16176, %v85_v13  }
  0x5d   :  { %1769 = vperm.xlu1 %16177, %v90_v5   ;;  %v16332_v5 = vmov 839922192  }
  0x5f   :  { %14321 = vmatpush3.bf16.msra.mxu0 %v16187_v40 }
  0x60   :  { %14334 = vmatprep.subr.bf16.mxu0 %v16188_v49  ;;  %1733 = vperm.xlu0 %16176, %v87_v24  }
  0x62   :  { %14311 = vmatmul.mubr.msk.bf16.gmra.mrb[4].mxu0 %vm19_vm0, %v16509_v20 }
  0x63   :  { %14314 = vmatprep.mubr.msk.bf16.mxu0 %vm19_vm0, %v16514_v22 }
  0x64   :  { %1757 = vperm.xlu0 %16176, %v89_v6   ;;  %v1641_v6 = vunpack.c.l.s4 %v16332_v5 }
  0x6a   :  { %14315 = vmatmul.mubr.msk.bf16.gmra.mrb[8].mxu0 %vm19_vm0, %v581_v62 }
  0x6b   :  { %14322 = vmatprep.mubr.msk.bf16.mxu0 %vm19_vm0, %v718_v1 }
  0x72   :  { %14323 = vmatmul.mubr.msk.bf16.vlgmr.msra.gmra.mrb[0].mxu0 %vm19_vm0, %v16533_v41  ;;  %v736_v41 = vor.u32 %v16629_v35, %v733_v60 }
  0x73   :  { %14335 = vmatpush3.bf16.msra.mxu0 %v16188_v49  ;;  %14326 = vmatprep.mubr.msk.bf16.mxu0 %vm19_vm0, %v16536_v42 }
  0x74   :  { %14336 = vmatprep.subr.bf16.mxu0 %v16189_v19  ;;  %v737_v42 = vsel %vm711_vm3, %v728_v30, %v736_v41  ;;  %v867_v30 = vld [vmem:[#allocation2 + $0x38] sm:$0x1]  ;;  %v1643_v41 = vlaneseq }
  0x75   :  { %v922_v38 = vshll.u32 %v867_v30, 16 }
  0x77   :  { %14337 = vmatpush3.bf16.msra.mxu0 %v16189_v19  ;;  %v924_v36 = vrot.slane %v922_v38, 1 }
  0x78   :  { %14350 = vmatprep.subr.bf16.mxu0 %v16190_v4 }
  0x7a   :  { %14327 = vmatmul.mubr.msk.bf16.gmra.mrb[4].mxu0 %vm19_vm0, %v16539_v44  ;;  %v1057_v44 = vshrl.u32 %v1049_v10, 16 }
  0x7b   :  { %14330 = vmatprep.mubr.msk.bf16.mxu0 %vm19_vm0, %v16543_v46  ;;  %v1060_v46 = vshll.u32 %v1049_v10, 16 }
  0x7d   :  { %v1062_v25 = vrot.slane %v1060_v46, 4 }
  0x82   :  { %14331 = vmatmul.mubr.msk.bf16.gmra.mrb[8].mxu0 %vm19_vm0, %v737_v42  ;;  %v1642_v42 = vunpack.c.0.s8 %v1641_v6 }
  0x83   :  { %14338 = vmatprep.mubr.msk.bf16.mxu0 %vm19_vm0, %v16556_v59  ;;  %v16192_v59 = vld [vmem:[%s20008_s1 + $0x70] sm:$0xff]  }
  0x8a   :  { %14339 = vmatmul.mubr.msk.bf16.vlgmr.msra.gmra.mrb[0].mxu0 %vm19_vm0, %v16563_v14  ;;  %v1059_v14 = vrot.slane %v1057_v44, 3 }
  0x8b   :  { %14351 = vmatpush3.bf16.msra.mxu0 %v16190_v4  ;;  %14342 = vmatprep.mubr.msk.bf16.mxu0 %vm19_vm0, %v16566_v32  ;;  %v920_v32 = vor.u32 %v916_v37, %v16626_v26 }
  0x8c   :  { %14352 = vmatprep.subr.bf16.mxu0 %v16191_v7  ;;  %v1063_v39 = vor.u32 %v1062_v25, %v1059_v14 }
  0x8d   :  { %v925_v40 = vsel %vm873_vm4, %v920_v32, %v924_v36 }
  0x8e   :  { %v1067_v45 = vsel %vm108_vm1, %v1063_v39, %v16430_v34  ;;  %v1085_v34 = vshrl.u32 %v1050_v48, 16 }
  0x8f   :  { %14353 = vmatpush3.bf16.msra.mxu0 %v16191_v7  ;;  %v1644_v7 = vshrl.u32 %v1643_v41, 7  ;;  %v1580_v41 = vunpack.c.h.bf16 %v16592_v0 }
  0x90   :  { %14366 = vmatprep.subr.bf16.mxu0 %v16192_v59 }
  0x91   :  { %v16809_v30 = vsub.s32 %v1642_v42, %v1644_v7 }
  0x92   :  { %14343 = vmatmul.mubr.msk.bf16.gmra.mrb[4].mxu0 %vm19_vm0, %v16571_v16  ;;  %v1080_v16 = vrot.slane %v16626_v26, 3  ;;  %v1087_v26 = vrot.slane %v1085_v34, 3 }
  0x93   :  { %14346 = vmatprep.mubr.msk.bf16.mxu0 %vm19_vm0, %v917_v23 }
  0x94   :  { %v1082_v49 = vor.u32 %v1081_v47, %v1080_v16  ;;  %v16835_v47 = vld [vmem:[%s20010_s3] ss:$0 sm:$0xff] }
  0x96   :  { %v1083_v35 = vsel %vm108_vm1, %v16462_v52, %v1082_v49  ;;  %v16195_v52 = vld [vmem:[%s20008_s1 + $0x88] sm:$0xff]  }
  0x9a   :  { %14347 = vmatmul.mubr.msk.bf16.gmra.mrb[8].mxu0 %vm19_vm0, %v925_v40  ;;  %v16826_v40 = vld [vmem:[%s20009_s2] ss:$0 sm:$0xff] }
  0x9b   :  { %14354 = vmatprep.mubr.msk.bf16.mxu0 %vm19_vm0, %v1067_v45 }
  0xa2   :  { %14355 = vmatmul.mubr.msk.bf16.vlgmr.msra.gmra.mrb[0].mxu0 %vm19_vm0, %v16458_v50  ;;  %v1216_v50 = vld [vmem:[#allocation2 + $0x8] sm:$0xf0] }
  0xa3   :  { %14367 = vmatpush3.bf16.msra.mxu0 %v16192_v59  ;;  %14358 = vmatprep.mubr.msk.bf16.mxu0 %vm19_vm0, %v16470_v56  ;;  %v1091_v56 = vor.u32 %v1090_v55, %v1087_v26  ;;  %v1229_v58 = vrot.slane %v1216_v50, 4  ;;  %v1372_v27 = vshrl.u32 %v1216_v50, 16 }
  0xa4   :  { %14368 = vmatprep.subr.bf16.mxu0 %v16193_v28 }
  0xa5   :  { %v1092_v15 = vsel %vm108_vm1, %v1082_v49, %v1091_v56  ;;  %v1231_v17 = vsel %vm401_vm5, %v1229_v58, %v16583_v53  ;;  %v1375_v53 = vshll.u32 %v1216_v50, 16  ;;  %v1374_v43 = vrot.slane %v1372_v27, 4  ;;  %v16323_v56 = vld [vmem:[#allocation2 + $0x8] sm:$0xff] }
  0xa6   :  { %v1569_v58 = vunpack.c.l.bf16 %v16323_v56 }
  0xa7   :  { %14369 = vmatpush3.bf16.msra.mxu0 %v16193_v28  ;;  %v1377_v60 = vrot.slane %v1375_v53, 5 }
  0xa8   :  { %14382 = vmatprep.subr.bf16.mxu0 %v16194_v54 }
  0xa9   :  { %v1378_v61 = vor.u32 %v1377_v60, %v1374_v43 }
  0xaa   :  { %14359 = vmatmul.mubr.msk.bf16.gmra.mrb[4].mxu0 %vm19_vm0, %v16474_v57  ;;  %v1238_v57 = vrot.slane %v16592_v0, 4 }
  0xab   :  { %14362 = vmatprep.mubr.msk.bf16.mxu0 %vm19_vm0, %v1083_v35  ;;  %v1382_v62 = vsel %vm544_vm2, %v1378_v61, %v16490_v3 }
  0xac   :  { %v1239_v31 = vsel %vm401_vm5, %v16590_v63, %v1238_v57  ;;  %v1400_v63 = vshrl.u32 %v1365_v9, 16 }
  0xae   :  { %v1402_v1 = vrot.slane %v1400_v63, 4 }
  0xb2   :  { %14363 = vmatmul.mubr.msk.bf16.gmra.mrb[8].mxu0 %vm19_vm0, %v1092_v15 }
  0xb3   :  { %14370 = vmatprep.mubr.msk.bf16.mxu0 %vm19_vm0, %v1231_v17 }
  0xba   :  { %14371 = vmatmul.mubr.msk.bf16.vlgmr.msra.gmra.mrb[0].mxu0 %vm19_vm0, %v16605_v33  ;;  %v1240_v33 = vrot.slane %v1050_v48, 4 }
  0xbb   :  { %14383 = vmatpush3.bf16.msra.mxu0 %v16194_v54  ;;  %14374 = vmatprep.mubr.msk.bf16.mxu0 %vm19_vm0, %v16615_v18  ;;  %v16322_v54 = vld [vmem:[#allocation2 + $0x10] sm:$0xff] }
  0xbc   :  { %14384 = vmatprep.subr.bf16.mxu0 %v16195_v52  ;;  %v1241_v18 = vsel %vm401_vm5, %v1238_v57, %v1240_v33  ;;  %v1571_v26 = vunpack.c.l.bf16 %v16322_v54  ;;  %v1572_v17 = vunpack.c.h.bf16 %v16322_v54 }
  0xbf   :  { %14385 = vmatpush3.bf16.msra.mxu0 %v16195_v52  ;;  %v1570_v52 = vunpack.c.h.bf16 %v16323_v56 }
  0xc2   :  { %14375 = vmatmul.mubr.msk.bf16.gmra.mrb[4].mxu0 %vm19_vm0, %v16619_v21  ;;  %v1403_v21 = vshll.u32 %v1365_v9, 16 }
  0xc3   :  { %14378 = vmatprep.mubr.msk.bf16.mxu0 %vm19_vm0, %v1239_v31 }
  0xc4   :  { %v1405_v11 = vrot.slane %v1403_v21, 5  ;;  %v16325_v21 = vld [vmem:[#allocation2 + $0x18] sm:$0xff] }
  0xc6   :  { %v1406_v3 = vor.u32 %v1405_v11, %v1402_v1  ;;  %v1573_v1 = vunpack.c.l.bf16 %v16325_v21 }
  0xc8   :  { %v1407_v13 = vsel %vm544_vm2, %v16649_v51, %v1406_v3  ;;  %v1662_v51 = vpop.permute.xlu1 %1661 }
  0xc9   :  { %v1670_v59 = vrot.slane %v1662_v51, %v16809_v30  ;;  %v1838_v51 = vld [vmem:[#allocation2] sm:$0xf8] }
  0xca   :  { %14379 = vmatmul.mubr.msk.bf16.gmra.mrb[8].mxu0 %vm19_vm0, %v1241_v18  ;;  %v16324_v18 = vld [vmem:[#allocation2 + $0x20] sm:$0xff] }
  0xcb   :  { %14386 = vmatprep.mubr.msk.bf16.mxu0 %vm19_vm0, %v1382_v62  ;;  %v1575_v62 = vunpack.c.l.bf16 %v16324_v18  ;;  %v1576_v11 = vunpack.c.h.bf16 %v16324_v18 }
  0xcc   :  { %v1674_v19 = vpop.permute.xlu1 %1673 }
  0xcd   :  { %v1682_v23 = vrot.slane %v1674_v19, %v16809_v30 }
  0xcf   :  { %v16828_v45 = vcombine.low %v1670_v59, %v1682_v23 }
  0xd0   :  { %v1698_v24 = vpop.permute.xlu1 %1697 }
  0xd1   :  { %v1706_v25 = vrot.slane %v1698_v24, %v16809_v30 }
  0xd2   :  { %14387 = vmatmul.mubr.msk.bf16.vlgmr.msra.gmra.mrb[0].mxu0 %vm19_vm0, %v16502_v12  ;;  %v16196_v12 = vld [vmem:[%s20008_s1 + $0x90] sm:$0xff]  }
  0xd3   :  { %14390 = vmatprep.mubr.msk.bf16.mxu0 %vm19_vm0, %v16509_v20  ;;  %14398 = vmatprep.subr.bf16.mxu1 %v16196_v12  ;;  %v16197_v20 = vld [vmem:[%s20008_s1 + $0x98] sm:$0xff]  }
  0xd4   :  { %14399 = vmatpush3.bf16.msra.mxu1 %v16196_v12  ;;  %v1722_v10 = vpop.permute.xlu1 %1721  ;;  %v1574_v12 = vunpack.c.h.bf16 %v16325_v21 }
  0xd5   :  { %14400 = vmatprep.subr.bf16.mxu1 %v16197_v20  ;;  %v1730_v36 = vrot.slane %v1722_v10, %v16809_v30 }
  0xd8   :  { %14401 = vmatpush3.bf16.msra.mxu1 %v16197_v20  ;;  %v16811_v44 = vpop.permute.xlu1 %1745  ;;  %v1579_v20 = vunpack.c.l.bf16 %v16592_v0 }
  0xd9   :  { %v1754_v31 = vrot.slane %v16811_v44, %v16809_v30 }
  0xda   :  { %14391 = vmatmul.mubr.msk.bf16.gmra.mrb[4].mxu0 %vm19_vm0, %v16514_v22  ;;  %v16806_v22 = vld [vmem:[%s20008_s1 + $0xd0] sm:$0xff]  }
  0xdb   :  { %14394 = vmatprep.mubr.msk.bf16.mxu0 %vm19_vm0, %v16654_v8  ;;  %14414 = vmatprep.subr.bf16.mxu1 %v16806_v22  ;;  %v1638_v8 = vpop.permute.xlu0 %1637 }
  0xdc   :  { %v1646_v38 = vrot.slane %v1638_v8, %v16809_v30  ;;  %v16837_v48 = vpop.permute.xlu1 %1769 }
  0xdd   :  { %v1778_v43 = vrot.slane %v16837_v48, %v16809_v30 }
  0xdf   :  { %v1650_v29 = vpop.permute.xlu0 %1649 }
  0xe0   :  { %v1658_v14 = vrot.slane %v1650_v29, %v16809_v30  ;;  %v16860_v29 = vld [vmem:[#allocation2 + $0x28] sm:$0xff] }
  0xe1   :  { %v1577_v24 = vunpack.c.l.bf16 %v16860_v29 }
  0xe2   :  { %14395 = vmatmul.mubr.msk.bf16.gmra.mrb[8].mxu0 %vm19_vm0, %v1407_v13  ;;  %v16830_v28 = vcombine.low %v1646_v38, %v1658_v14 }
  0xe3   :  { %v1686_v4 = vpop.permute.xlu0 %1685 }
  0xe4   :  { %v1694_v32 = vrot.slane %v1686_v4, %v16809_v30 }
  0xe6   :  { %v16839_v34 = vcombine.low %v1694_v32, %v1706_v25 }
  0xe7   :  { %v1710_v37 = vpop.permute.xlu0 %1709 }
  0xe8   :  { %v1718_v39 = vrot.slane %v1710_v37, %v16809_v30  ;;  %v1846_v37 = vshrl.u32 %v1838_v51, 16 }
  0xea   :  { %v16841_v2 = vcombine.low %v1718_v39, %v1730_v36 }
  0xeb   :  { %v16813_v46 = vpop.permute.xlu0 %1733 }
  0xef   :  { %v16844_v35 = vpop.permute.xlu0 %1757 }
  0xf0   :  { %v1766_v61 = vrot.slane %v16844_v35, %v16809_v30 }
 0x1a5   :  { %v14388_v16 = vpop.f32.mrb[0].mxu0 }
 0x1a6   :  { %v1540_v49 = vadd.f32 %v14388_v16, %v16826_v40  ;;  %v1472_v55 = vpop.f32.mrb[1].mxu0 }
 0x1a7   :  { %v1538_v50 = vadd.f32 %v16826_v40, %v1472_v55  ;;  %v14389_v15 = vpop.f32.mrb[2].mxu0 }
 0x1a8   :  { %v1559_v57 = vmul.f32 %v16835_v47, %v1540_v49  ;;  %v1541_v27 = vadd.f32 %v14389_v15, %v16826_v40  ;;  %v1475_v53 = vpop.f32.mrb[3].mxu0  ;;  %v1849_v15 = vshll.u32 %v1838_v51, 16 }
 0x1a9   :  { %v1557_v60 = vmul.f32 %v16835_v47, %v1538_v50  ;;  %v1539_v33 = vadd.f32 %v16826_v40, %v1475_v53 }
 0x1aa   :  { %v1583_v9 = vadd.f32 %v1571_v26, %v1559_v57  ;;  %v1560_v63 = vmul.f32 %v16835_v47, %v1541_v27  ;;  %v1578_v27 = vunpack.c.h.bf16 %v16860_v29 }
 0x1ab   :  { %v1581_v3 = vadd.f32 %v1569_v58, %v1557_v60  ;;  %v1558_v13 = vmul.f32 %v16835_v47, %v1539_v33 }
 0x1ac   :  { %vm1595_vm6 = vcmp.ge.f32.partialorder %v1583_v9, 0.0  ;;  %v1607_v8 = vmul.f32 0.2, %v1583_v9  ;;  %v1584_v19 = vadd.f32 %v1572_v17, %v1560_v63  ;;  %v16876_v63 = vrot.slane %v1846_v37, 3 }
 0x1ad   :  { %vm1593_vm7 = vcmp.ge.f32.partialorder %v1581_v3, 0.0  ;;  %v1605_v4 = vmul.f32 0.2, %v1581_v3  ;;  %v1582_v5 = vadd.f32 %v1570_v52, %v1558_v13  ;;  %v14392_v6 = vpop.f32.mrb[4].mxu0  ;;  %v16880_v13 = vrot.slane %v1849_v15, 4 }
 0x1ae   :  { %vm1596_vm8 = vcmp.ge.f32.partialorder %v1584_v19, 0.0  ;;  %v1608_v42 = vmul.f32 0.2, %v1584_v19  ;;  %v1544_v7 = vadd.f32 %v14392_v6, %v16826_v40  ;;  %v1488_v10 = vpop.f32.mrb[5].mxu0  ;;  %v1619_v59 = vsel %vm1595_vm6, %v1583_v9, %v1607_v8 }
 0x1af   :  { %vm1594_vm9 = vcmp.ge.f32.partialorder %v1582_v5, 0.0  ;;  %v1606_v38 = vmul.f32 0.2, %v1582_v5  ;;  %v1542_v23 = vadd.f32 %v16826_v40, %v1488_v10  ;;  %v14393_v14 = vpop.f32.mrb[6].mxu0  ;;  %v1617_v25 = vsel %vm1593_vm7, %v1581_v3, %v1605_v4 }
 0x1b0   :  { %v1620_v32 = vsel %vm1596_vm8, %v1584_v19, %v1608_v42  ;;  %v1563_v36 = vmul.f32 %v16835_v47, %v1544_v7  ;;  %v1545_v39 = vadd.f32 %v14393_v14, %v16826_v40  ;;  %v1491_v16 = vpop.f32.mrb[7].mxu0  ;;  %v1852_v29 = vor.u32 %v16880_v13, %v16876_v63 }
 0x1b1   :  { %v1630_v49 = vpack.c.bf16 %v1620_v32, %v1619_v59  ;;  %v1618_v54 = vsel %vm1594_vm9, %v1582_v5, %v1606_v38  ;;  %v1561_v26 = vmul.f32 %v16835_v47, %v1542_v23  ;;  %v1543_v55 = vadd.f32 %v16826_v40, %v1491_v16 }
 0x1b2   :  { %v1629_v50 = vpack.c.bf16 %v1618_v54, %v1617_v25  ;;  %v1587_v56 = vadd.f32 %v1575_v62, %v1563_v36  ;;  %v1564_v58 = vmul.f32 %v16835_v47, %v1545_v39  ;;  %v1742_v38 = vrot.slane %v16813_v46, %v16809_v30 }
 0x1b3   :  { %v1816_v17 = vmul.bf16 %v16828_v45, %v1630_v49  ;;  %v1585_v52 = vadd.f32 %v1573_v1, %v1561_v26  ;;  %v1562_v57 = vmul.f32 %v16835_v47, %v1543_v55  ;;  %v16899_v32 = vcombine.low %v1766_v61, %v1778_v43 }
 0x1b4   :  { %v1815_v53 = vmul.bf16 %v16830_v28, %v1629_v50  ;;  %vm1599_vm10 = vcmp.ge.f32.partialorder %v1587_v56, 0.0  ;;  %v1611_v60 = vmul.f32 0.2, %v1587_v56  ;;  %v1588_v33 = vadd.f32 %v1576_v11, %v1564_v58 }
 0x1b5   :  { %1822 = vst.msk [vmem:[#allocation2 + $0x10] sm:$0xff] %vm19_vm0, %v1816_v17  ;;  %vm1597_vm11 = vcmp.ge.f32.partialorder %v1585_v52, 0.0  ;;  %v1609_v18 = vmul.f32 0.2, %v1585_v52  ;;  %v1586_v62 = vadd.f32 %v1574_v12, %v1562_v57  ;;  %v14396_v9 = vpop.f32.mrb[8].mxu0  ;;  %v16934_v57 = vcombine.low %v1742_v38, %v1754_v31 }
 0x1b6   :  { %1821 = vst.msk [vmem:[#allocation2 + $0x8] sm:$0xff] %vm19_vm0, %v1815_v53  ;;  %vm1600_vm12 = vcmp.ge.f32.partialorder %v1588_v33, 0.0  ;;  %v1612_v21 = vmul.f32 0.2, %v1588_v33  ;;  %v1548_v1 = vadd.f32 %v14396_v9, %v16826_v40  ;;  %v1504_v3 = vpop.f32.mrb[9].mxu0  ;;  %v1623_v51 = vsel %vm1599_vm10, %v1587_v56, %v1611_v60 }
 0x1b7   :  { %vm1598_vm13 = vcmp.ge.f32.partialorder %v1586_v62, 0.0  ;;  %v1610_v11 = vmul.f32 0.2, %v1586_v62  ;;  %v1546_v8 = vadd.f32 %v16826_v40, %v1504_v3  ;;  %v14397_v19 = vpop.f32.mrb[10].mxu0  ;;  %v1621_v12 = vsel %vm1597_vm11, %v1585_v52, %v1609_v18  ;;  %v16199_v3 = vld [vmem:[%s20008_s1 + $0xd8] sm:$0xff]  }
 0x1b8   :  { %v1624_v4 = vsel %vm1600_vm12, %v1588_v33, %v1612_v21  ;;  %v1567_v5 = vmul.f32 %v16835_v47, %v1548_v1  ;;  %v1549_v6 = vadd.f32 %v14397_v19, %v16826_v40  ;;  %v1507_v42 = vpop.f32.mrb[11].mxu0 }
 0x1b9   :  { %v1632_v7 = vpack.c.bf16 %v1624_v4, %v1623_v51  ;;  %v1622_v10 = vsel %vm1598_vm13, %v1586_v62, %v1610_v11  ;;  %v1565_v37 = vmul.f32 %v16835_v47, %v1546_v8  ;;  %v1547_v59 = vadd.f32 %v16826_v40, %v1507_v42 }
 0x1ba   :  { %v1631_v23 = vpack.c.bf16 %v1622_v10, %v1621_v12  ;;  %v1591_v14 = vadd.f32 %v1579_v20, %v1567_v5  ;;  %v1568_v25 = vmul.f32 %v16835_v47, %v1549_v6  ;;  %v16981_v10 = vld [vmem:[%s20008_s1 + $0xa0] sm:$0xff]  }
 0x1bb   :  { %v1818_v36 = vmul.bf16 %v16841_v2, %v1632_v7  ;;  %v1589_v40 = vadd.f32 %v1577_v24, %v1565_v37  ;;  %v1566_v46 = vmul.f32 %v16835_v47, %v1547_v59 }
 0x1bc   :  { %v1817_v39 = vmul.bf16 %v16839_v34, %v1631_v23  ;;  %vm1603_vm14 = vcmp.ge.f32.partialorder %v1591_v14, 0.0  ;;  %v1615_v20 = vmul.f32 0.2, %v1591_v14  ;;  %v1592_v16 = vadd.f32 %v1580_v41, %v1568_v25  ;;  %v16908_v48 = vld [vmem:[#allocation2 + $0x10] sm:$0xff] }
 0x1bd   :  { %1824 = vst.msk [vmem:[#allocation2 + $0x20] sm:$0xff] %vm19_vm0, %v1818_v36  ;;  %v1613_v35 = vmul.f32 0.2, %v1589_v40  ;;  %v1590_v43 = vadd.f32 %v1578_v27, %v1566_v46  ;;  %v16911_v61 = vld [vmem:[#allocation2 + $0x8] sm:$0xff]  ;;  %v16916_v47 = vshrl.u32 %v16908_v48, 16  ;;  %vm1601_vm15 = vcmp.ge.f32.partialorder %v1589_v40, 0.0 }
 0x1be   :  { %1823 = vst.msk [vmem:[#allocation2 + $0x18] sm:$0xff] %vm19_vm0, %v1817_v39  ;;  %vm1604_vm6 = vcmp.ge.f32.partialorder %v1592_v16, 0.0  ;;  %v1616_v0 = vmul.f32 0.2, %v1592_v16  ;;  %v16920_v24 = vshrl.u32 %v16911_v61, 16  ;;  %v1627_v41 = vsel %vm1603_vm14, %v1591_v14, %v1615_v20 }
 0x1bf   :  { %vm1602_vm7 = vcmp.ge.f32.partialorder %v1590_v43, 0.0  ;;  %v1614_v49 = vmul.f32 0.2, %v1590_v43  ;;  %v16923_v54 = vshll.u32 %v16911_v61, 16  ;;  %v1865_v50 = vrot.slane %v16916_v47, 3 }
 0x1c0   :  { %v1628_v26 = vsel %vm1604_vm6, %v1592_v16, %v1616_v0  ;;  %v1856_v55 = vrot.slane %v16920_v24, 3  ;;  %v16928_v56 = vshll.u32 %v16908_v48, 16  ;;  %v1625_v58 = vsel %vm1601_vm15, %v1589_v40, %v1613_v35 }
 0x1c1   :  { %v1634_v15 = vpack.c.bf16 %v1628_v26, %v1627_v41  ;;  %v1626_v17 = vsel %vm1602_vm7, %v1590_v43, %v1614_v49  ;;  %v1859_v52 = vrot.slane %v16923_v54, 4  ;;  %v2287_v18 = vrot.slane %v16920_v24, 4 }
 0x1c2   :  { %v1633_v27 = vpack.c.bf16 %v1626_v17, %v1625_v58  ;;  %v1868_v53 = vrot.slane %v16928_v56, 4  ;;  %v2288_v62 = vrot.slane %v16923_v54, 5  ;;  %v2291_v13 = vrot.slane %v16916_v47, 4 }
 0x1c3   :  { %v1820_v60 = vmul.bf16 %v16899_v32, %v1634_v15  ;;  %v1860_v33 = vor.u32 %v1859_v52, %v1856_v55  ;;  %v2292_v5 = vrot.slane %v16928_v56, 5  ;;  %v2452_v0 = vrot.slane %v16916_v47, 7 }
 0x1c4   :  { %v1819_v9 = vmul.bf16 %v16934_v57, %v1633_v27  ;;  %v16941_v63 = vor.u32 %v1868_v53, %v1865_v50  ;;  %v16943_v21 = vld [vmem:[#allocation2 + $0x20] sm:$0xff]  ;;  %v16972_v4 = vor.u32 %v2288_v62, %v2287_v18 }
 0x1c5   :  { %1826 = vst.msk [vmem:[#allocation2 + $0x30] sm:$0xff] %vm19_vm0, %v1820_v60  ;;  %v1861_v30 = vsel %vm108_vm1, %v1852_v29, %v1860_v33  ;;  %v16947_v44 = vld [vmem:[#allocation2 + $0x18] sm:$0xff]  ;;  %v16950_v31 = vshrl.u32 %v16943_v21, 16  ;;  %v16953_v1 = vshll.u32 %v16943_v21, 16  ;;  %v16983_v37 = vor.u32 %v2292_v5, %v2291_v13 }
 0x1c6   :  { %1825 = vst.msk [vmem:[#allocation2 + $0x28] sm:$0xff] %vm19_vm0, %v1819_v9  ;;  %14402 = vmatprep.mubr.msk.bf16.mxu1 %vm19_vm0, %v1861_v30  ;;  %v1870_v51 = vsel %vm108_vm1, %v1860_v33, %v16941_v63  ;;  %v16964_v11 = vshrl.u32 %v16947_v44, 16  ;;  %v16967_v8 = vshll.u32 %v16947_v44, 16  ;;  %v2449_v29 = vrot.slane %v16920_v24, 7 }
 0x1c7   :  { %14403 = vmatmul.mubr.msk.bf16.vlgmr.msra.gmra.mrb[0].mxu1 %vm19_vm0, %v1870_v51  ;;  %v1883_v19 = vrot.slane %v16950_v31, 3  ;;  %v1886_v12 = vrot.slane %v16953_v1, 4  ;;  %v2300_v14 = vrot.slane %v16953_v1, 5  ;;  %v16992_v25 = vsel %vm544_vm2, %v16972_v4, %v16983_v37 }
 0x1c8   :  { %14415 = vmatpush3.bf16.msra.mxu1 %v16806_v22  ;;  %v1874_v6 = vrot.slane %v16964_v11, 3  ;;  %v1877_v42 = vrot.slane %v16967_v8, 4  ;;  %v2295_v59 = vrot.slane %v16964_v11, 4  ;;  %v2296_v23 = vrot.slane %v16967_v8, 5 }
 0x1c9   :  { %v1887_v7 = vor.u32 %v1886_v12, %v1883_v19  ;;  %14416 = vmatprep.subr.bf16.mxu1 %v16199_v3  ;;  %v2299_v22 = vrot.slane %v16950_v31, 4  ;;  %v2455_v55 = vrot.slane %v16964_v11, 7  ;;  %v17031_v18 = vor.u32 %v2449_v29, %v16923_v54 }
 0x1ca   :  { %v1878_v38 = vor.u32 %v1877_v42, %v1874_v6  ;;  %v2297_v39 = vor.u32 %v2296_v23, %v2295_v59  ;;  %v2453_v62 = vor.u32 %v2452_v0, %v16928_v56  ;;  %v2611_v59 = vrot.slane %v16923_v54, 1 }
 0x1cb   :  { %v2301_v20 = vor.u32 %v2300_v14, %v2299_v22  ;;  %v2456_v9 = vor.u32 %v2455_v55, %v16967_v8  ;;  %v2616_v22 = vrot.slane %v16928_v56, 1  ;;  %v2624_v14 = vrot.slane %v16967_v8, 1 }
 0x1cc   :  { %v16996_v36 = vsel %vm108_vm1, %v16941_v63, %v1878_v38  ;;  %v16999_v40 = vsel %vm108_vm1, %v1878_v38, %v1887_v7  ;;  %14417 = vmatpush3.bf16.msra.mxu1 %v16199_v3  ;;  %v17001_v46 = vld [vmem:[#allocation2 + $0x30] sm:$0xf]  ;;  %v17018_v26 = vsel %vm544_vm2, %v16983_v37, %v2297_v39  ;;  %v2458_v3 = vrot.slane %v16950_v31, 7 }
 0x1cd   :  { %14406 = vmatprep.mubr.msk.bf16.mxu1 %vm19_vm0, %v16996_v36  ;;  %v17005_v16 = vld [vmem:[#allocation2 + $0x28] sm:$0xff]  ;;  %v1899_v35 = vshrl.u32 %v17001_v46, 16  ;;  %v1902_v43 = vshll.u32 %v17001_v46, 16  ;;  %14430 = vmatprep.subr.bf16.mxu1 %v16981_v10  ;;  %v17024_v15 = vsel %vm544_vm2, %v2297_v39, %v2301_v20  ;;  %v17046_v12 = vsel %vm711_vm3, %v2449_v29, %v2453_v62  ;;  %v17062_v38 = vld [vmem:[#allocation2 + $0x30] sm:$0xff] }
 0x1ce   :  { %v17013_v41 = vshrl.u32 %v17005_v16, 16  ;;  %v1893_v49 = vshll.u32 %v17005_v16, 16  ;;  %v17055_v6 = vsel %vm711_vm3, %v2452_v0, %v2456_v9  ;;  %v2459_v42 = vor.u32 %v2458_v3, %v16953_v1 }
 0x1cf   :  { %14407 = vmatmul.mubr.msk.bf16.gmra.mrb[4].mxu1 %vm19_vm0, %v16999_v40  ;;  %v1901_v50 = vrot.slane %v1899_v35, 3  ;;  %v1904_v58 = vrot.slane %v1902_v43, 4  ;;  %v2632_v54 = vrot.slane %v16953_v1, 1  ;;  %v2620_v35 = vor.u32 %v2616_v22, %v16916_v47 }
 0x1d0   :  { %v1892_v17 = vrot.slane %v17013_v41, 3  ;;  %v1895_v52 = vrot.slane %v1893_v49, 4  ;;  %v2303_v53 = vrot.slane %v17013_v41, 4  ;;  %v2304_v60 = vrot.slane %v1893_v49, 5 }
 0x1d1   :  { %v1905_v27 = vor.u32 %v1904_v58, %v1901_v50  ;;  %v2461_v13 = vrot.slane %v17013_v41, 7  ;;  %v17065_v23 = vsel %vm711_vm3, %v2455_v55, %v2459_v42  ;;  %v2628_v43 = vor.u32 %v2624_v14, %v16964_v11  ;;  %v16202_v58 = vld [vmem:[%s20008_s1 + $0xb0] sm:$0xff]  }
 0x1d2   :  { %v17028_v33 = vor.u32 %v1895_v52, %v1892_v17  ;;  %v17035_v30 = vor.u32 %v2304_v60, %v2303_v53  ;;  %v2640_v29 = vrot.slane %v1893_v49, 1  ;;  %v17079_v0 = vshrl.u32 %v17062_v38, 16 }
 0x1d3   :  { %v2636_v8 = vor.u32 %v2632_v54, %v16950_v31  ;;  %v17086_v55 = vshll.u32 %v17062_v38, 16  ;;  %v17092_v1 = vsel %vm873_vm4, %v2628_v43, %v2632_v54  ;;  %v2138_v53 = vrot.slane %v16911_v61, 4 }
 0x1d4   :  { %v17041_v51 = vsel %vm108_vm1, %v1887_v7, %v17028_v33  ;;  %v1906_v19 = vsel %vm108_vm1, %v17028_v33, %v1905_v27  ;;  %v17052_v5 = vsel %vm544_vm2, %v2301_v20, %v17035_v30  ;;  %v2462_v7 = vor.u32 %v2461_v13, %v1893_v49  ;;  %v16201_v49 = vld [vmem:[%s20008_s1 + $0xa8] sm:$0xff]  }
 0x1d5   :  { %14410 = vmatprep.mubr.msk.bf16.mxu1 %vm19_vm0, %v17041_v51  ;;  %v2612_v20 = vor.u32 %v2611_v59, %v16920_v24  ;;  %v17089_v24 = vsel %vm873_vm4, %v2620_v35, %v2624_v14  ;;  %v17095_v47 = vor.u32 %v2640_v29, %v17013_v41  ;;  %v17098_v11 = vsel %vm873_vm4, %v2636_v8, %v2640_v29  ;;  %v16210_v41 = vld [vmem:[%s20008_s1 + $0x100] sm:$0xff]  }
 0x1d6   :  { %v17072_v39 = vsel %vm711_vm3, %v2458_v3, %v2462_v7  ;;  %v3127_v31 = vrot.slane %v17079_v0, 4  ;;  %v3128_v50 = vrot.slane %v17086_v55, 5  ;;  %v17130_v62 = vrot.slane %v16908_v48, 4  ;;  %v16203_v3 = vld [vmem:[%s20008_s1 + $0xb8] sm:$0xff]   ;;  %v16204_v7 = vld [vmem:[%s20008_s1 + $0xc0] sm:$0xff]  }
 0x1d7   :  { %14411 = vmatmul.mubr.msk.bf16.gmra.mrb[8].mxu1 %vm19_vm0, %v1906_v19  ;;  %v17082_v56 = vsel %vm873_vm4, %v2612_v20, %v2616_v22  ;;  %v2142_v9 = vrot.slane %v16947_v44, 4  ;;  %v2144_v59 = vrot.slane %v16943_v21, 4  ;;  %v17150_v22 = vrot.slane %v17005_v16, 4 }
 0x1d8   :  { %14418 = vmatprep.mubr.msk.bf16.mxu1 %vm19_vm0, %v16911_v61  ;;  %v17113_v17 = vor.u32 %v3128_v50, %v3127_v31  ;;  %v2141_v19 = vsel %vm401_vm5, %v2138_v53, %v17130_v62  ;;  %v2148_v8 = vrot.slane %v17001_v46, 4  ;;  %v16206_v46 = vld [vmem:[%s20008_s1 + $0xe0] sm:$0xff]  }
 0x1d9   :  { %v17141_v42 = vsel %vm401_vm5, %v17130_v62, %v2142_v9  ;;  %v17153_v54 = vsel %vm401_vm5, %v2142_v9, %v2144_v59  ;;  %v17159_v35 = vsel %vm401_vm5, %v2144_v59, %v17150_v22 }
 0x1da   :  { %v17118_v52 = vsel %vm544_vm2, %v17035_v30, %v17113_v17  ;;  %v2149_v31 = vsel %vm401_vm5, %v17150_v22, %v2148_v8 }
 0x1df   :  { %14419 = vmatmul.mubr.msk.bf16.vlgmr.msra.gmra.mrb[0].mxu1 %vm19_vm0, %v16908_v48 }
 0x1e0   :  { %14422 = vmatprep.mubr.msk.bf16.mxu1 %vm19_vm0, %v16947_v44  ;;  %14431 = vmatpush3.bf16.msra.mxu1 %v16981_v10  ;;  %v2124_v10 = vld [vmem:[#allocation2] sm:$0xf0] }
 0x1e1   :  { %14432 = vmatprep.subr.bf16.mxu1 %v16201_v49  ;;  %v2137_v27 = vrot.slane %v2124_v10, 4  ;;  %v2280_v14 = vshrl.u32 %v2124_v10, 16  ;;  %v2283_v20 = vshll.u32 %v2124_v10, 16  ;;  %v2273_v10 = vld [vmem:[#allocation2 + $0x30] sm:$0x1f] }
 0x1e3   :  { %v2139_v60 = vsel %vm401_vm5, %v2137_v27, %v2138_v53  ;;  %v2282_v43 = vrot.slane %v2280_v14, 4  ;;  %v2285_v29 = vrot.slane %v2283_v20, 5  ;;  %v2311_v27 = vshll.u32 %v2273_v10, 16  ;;  %v2439_v53 = vld [vmem:[#allocation2] sm:$0x80]  ;;  %v16207_v14 = vld [vmem:[%s20008_s1 + $0xe8] sm:$0xff]  }
 0x1e4   :  { %14433 = vmatpush3.bf16.msra.mxu1 %v16201_v49  ;;  %v16209_v20 = vld [vmem:[%s20008_s1 + $0xf8] sm:$0xff]  }
 0x1e5   :  { %14446 = vmatprep.subr.bf16.mxu1 %v16202_v58  ;;  %v2286_v49 = vor.u32 %v2285_v29, %v2282_v43  ;;  %v2313_v9 = vrot.slane %v2311_v27, 5  ;;  %v2648_v43 = vrot.slane %v17086_v55, 1 }
 0x1e7   :  { %14423 = vmatmul.mubr.msk.bf16.gmra.mrb[4].mxu1 %vm19_vm0, %v16943_v21  ;;  %v2290_v50 = vsel %vm544_vm2, %v2286_v49, %v16972_v4  ;;  %v2308_v4 = vshrl.u32 %v2273_v10, 16  ;;  %v2652_v49 = vor.u32 %v2648_v43, %v17079_v0 }
 0x1e8   :  { %14426 = vmatprep.mubr.msk.bf16.mxu1 %vm19_vm0, %v17005_v16 }
 0x1ef   :  { %14427 = vmatmul.mubr.msk.bf16.gmra.mrb[8].mxu1 %vm19_vm0, %v17062_v38 }
 0x1f0   :  { %14434 = vmatprep.mubr.msk.bf16.mxu1 %vm19_vm0, %v2139_v60  ;;  %v2310_v60 = vrot.slane %v2308_v4, 4  ;;  %v2782_v4 = vld [vmem:[#allocation2 + $0x38] sm:$0xf] }
 0x1f1   :  { %v2817_v27 = vshrl.u32 %v2782_v4, 16 }
 0x1f7   :  { %14435 = vmatmul.mubr.msk.bf16.vlgmr.msra.gmra.mrb[0].mxu1 %vm19_vm0, %v2141_v19 }
 0x1f8   :  { %14438 = vmatprep.mubr.msk.bf16.mxu1 %vm19_vm0, %v17141_v42  ;;  %14447 = vmatpush3.bf16.msra.mxu1 %v16202_v58  ;;  %v16205_v58 = vld [vmem:[%s20008_s1 + $0xc8] sm:$0xff]  }
 0x1f9   :  { %14448 = vmatprep.subr.bf16.mxu1 %v16203_v3 }
 0x1fc   :  { %14449 = vmatpush3.bf16.msra.mxu1 %v16203_v3  ;;  %v2314_v3 = vor.u32 %v2313_v9, %v2310_v60 }
 0x1fd   :  { %14462 = vmatprep.subr.bf16.mxu1 %v16204_v7 }
 0x1ff   :  { %14439 = vmatmul.mubr.msk.bf16.gmra.mrb[4].mxu1 %vm19_vm0, %v17153_v54 }
 0x200   :  { %14442 = vmatprep.mubr.msk.bf16.mxu1 %vm19_vm0, %v17159_v35 }
 0x207   :  { %14443 = vmatmul.mubr.msk.bf16.gmra.mrb[8].mxu1 %vm19_vm0, %v2149_v31 }
 0x208   :  { %14450 = vmatprep.mubr.msk.bf16.mxu1 %vm19_vm0, %v2290_v50 }
 0x20f   :  { %14451 = vmatmul.mubr.msk.bf16.vlgmr.msra.gmra.mrb[0].mxu1 %vm19_vm0, %v16992_v25  ;;  %v2446_v25 = vshrl.u32 %v2439_v53, 16  ;;  %v2820_v53 = vshll.u32 %v2782_v4, 16 }
 0x210   :  { %14454 = vmatprep.mubr.msk.bf16.mxu1 %vm19_vm0, %v17018_v26  ;;  %14463 = vmatpush3.bf16.msra.mxu1 %v16204_v7  ;;  %v2315_v7 = vsel %vm544_vm2, %v17035_v30, %v2314_v3  ;;  %v16208_v30 = vld [vmem:[%s20008_s1 + $0xf0] sm:$0xff]  }
 0x211   :  { %14464 = vmatprep.subr.bf16.mxu1 %v16205_v58  ;;  %v2448_v19 = vrot.slane %v2446_v25, 7  ;;  %v2822_v9 = vrot.slane %v2820_v53, 4  ;;  %v3307_v53 = vunpack.c.l.bf16 %v16947_v44 }
 0x213   :  { %v2451_v59 = vsel %vm711_vm3, %v2448_v19, %v17031_v18  ;;  %v2466_v18 = vrot.slane %v17079_v0, 7 }
 0x214   :  { %14465 = vmatpush3.bf16.msra.mxu1 %v16205_v58 }
 0x215   :  { %14478 = vmatprep.subr.bf16.mxu1 %v16206_v46 }
 0x217   :  { %14455 = vmatmul.mubr.msk.bf16.gmra.mrb[4].mxu1 %vm19_vm0, %v17024_v15 }
 0x218   :  { %14458 = vmatprep.mubr.msk.bf16.mxu1 %vm19_vm0, %v17052_v5 }
 0x21f   :  { %14459 = vmatmul.mubr.msk.bf16.gmra.mrb[8].mxu1 %vm19_vm0, %v2315_v7 }
 0x220   :  { %14466 = vmatprep.mubr.msk.bf16.mxu1 %vm19_vm0, %v2451_v59 }
 0x227   :  { %14467 = vmatmul.mubr.msk.bf16.vlgmr.msra.gmra.mrb[0].mxu1 %vm19_vm0, %v17046_v12  ;;  %v2469_v12 = vor.u32 %v17086_v55, %v2466_v18 }
 0x228   :  { %14470 = vmatprep.mubr.msk.bf16.mxu1 %vm19_vm0, %v17055_v6  ;;  %14479 = vmatpush3.bf16.msra.mxu1 %v16206_v46  ;;  %v2813_v46 = vrot.slane %v17086_v55, 4 }
 0x229   :  { %14480 = vmatprep.subr.bf16.mxu1 %v16207_v14  ;;  %v2470_v6 = vsel %vm711_vm3, %v2461_v13, %v2469_v12  ;;  %v2600_v13 = vld [vmem:[#allocation2 + $0x38] sm:$0x1] }
 0x22a   :  { %v2654_v29 = vshll.u32 %v2600_v13, 16  ;;  %v17305_v13 = vld [vmem:[%s20010_s3 + $0x1] ss:$0 sm:$0xff] }
 0x22c   :  { %14481 = vmatpush3.bf16.msra.mxu1 %v16207_v14  ;;  %v2656_v31 = vrot.slane %v2654_v29, 1 }
 0x22d   :  { %14494 = vmatprep.subr.bf16.mxu1 %v16208_v30 }
 0x22e   :  { %v2657_v58 = vsel %vm873_vm4, %v2652_v49, %v2656_v31 }
 0x22f   :  { %14471 = vmatmul.mubr.msk.bf16.gmra.mrb[4].mxu1 %vm19_vm0, %v17065_v23  ;;  %v2781_v23 = vld [vmem:[#allocation2 + $0x8] sm:$0xf8] }
 0x230   :  { %14474 = vmatprep.mubr.msk.bf16.mxu1 %vm19_vm0, %v17072_v39  ;;  %v2789_v39 = vshrl.u32 %v2781_v23, 16 }
 0x237   :  { %14475 = vmatmul.mubr.msk.bf16.gmra.mrb[8].mxu1 %vm19_vm0, %v2470_v6 }
 0x238   :  { %14482 = vmatprep.mubr.msk.bf16.mxu1 %vm19_vm0, %v17082_v56  ;;  %v2792_v56 = vshll.u32 %v2781_v23, 16 }
 0x23a   :  { %v2794_v8 = vrot.slane %v2792_v56, 4 }
 0x23f   :  { %14483 = vmatmul.mubr.msk.bf16.vlgmr.msra.gmra.mrb[0].mxu1 %vm19_vm0, %v17089_v24  ;;  %v2649_v24 = vsel %vm873_vm4, %v17095_v47, %v2648_v43  ;;  %v16211_v47 = vld [vmem:[%s20008_s1 + $0x108] sm:$0xff]  }
 0x240   :  { %14486 = vmatprep.mubr.msk.bf16.mxu1 %vm19_vm0, %v17092_v1  ;;  %14495 = vmatpush3.bf16.msra.mxu1 %v16208_v30  ;;  %v2791_v1 = vrot.slane %v2789_v39, 3 }
 0x241   :  { %14496 = vmatprep.subr.bf16.mxu1 %v16209_v20 }
 0x242   :  { %v2795_v50 = vor.u32 %v2794_v8, %v2791_v1  ;;  %v3305_v1 = vunpack.c.l.bf16 %v16908_v48 }
 0x244   :  { %14497 = vmatpush3.bf16.msra.mxu1 %v16209_v20  ;;  %v2799_v10 = vsel %vm108_vm1, %v2795_v50, %v16941_v63  ;;  %v16212_v63 = vld [vmem:[%s20008_s1 + $0x110] sm:$0xff]   ;;  %v3303_v50 = vunpack.c.l.bf16 %v16911_v61 }
 0x245   :  { %14510 = vmatprep.subr.bf16.mxu1 %v16210_v41 }
 0x247   :  { %14487 = vmatmul.mubr.msk.bf16.gmra.mrb[4].mxu1 %vm19_vm0, %v17098_v11  ;;  %v2812_v11 = vrot.slane %v17079_v0, 3 }
 0x248   :  { %14490 = vmatprep.mubr.msk.bf16.mxu1 %vm19_vm0, %v2649_v24 }
 0x249   :  { %v2814_v60 = vor.u32 %v2813_v46, %v2812_v11  ;;  %v3304_v46 = vunpack.c.h.bf16 %v16911_v61  ;;  %v3313_v61 = vunpack.c.l.bf16 %v17062_v38 }
 0x24b   :  { %v2815_v0 = vsel %vm108_vm1, %v17028_v33, %v2814_v60  ;;  %v2970_v33 = vrot.slane %v17062_v38, 4 }
 0x24f   :  { %14491 = vmatmul.mubr.msk.bf16.gmra.mrb[8].mxu1 %vm19_vm0, %v2657_v58  ;;  %v3306_v58 = vunpack.c.h.bf16 %v16908_v48 }
 0x250   :  { %14498 = vmatprep.mubr.msk.bf16.mxu1 %vm19_vm0, %v2799_v10 }
 0x257   :  { %14499 = vmatmul.mubr.msk.bf16.vlgmr.msra.gmra.mrb[0].mxu1 %vm19_vm0, %v16996_v36  ;;  %v2819_v36 = vrot.slane %v2817_v27, 3 }
 0x258   :  { %14502 = vmatprep.mubr.msk.bf16.mxu1 %vm19_vm0, %v16999_v40  ;;  %14511 = vmatpush3.bf16.msra.mxu1 %v16210_v41  ;;  %v2948_v40 = vld [vmem:[#allocation2 + $0x8] sm:$0xf0] }
 0x259   :  { %14512 = vmatprep.subr.bf16.mxu1 %v16211_v47  ;;  %v2823_v55 = vor.u32 %v2822_v9, %v2819_v36  ;;  %v2961_v25 = vrot.slane %v2948_v40, 4  ;;  %v3104_v7 = vshrl.u32 %v2948_v40, 16  ;;  %v3107_v59 = vshll.u32 %v2948_v40, 16  ;;  %v3392_v36 = vld [vmem:[#allocation2] sm:$0xf8] }
 0x25b   :  { %v2824_v3 = vsel %vm108_vm1, %v2814_v60, %v2823_v55  ;;  %v2963_v19 = vsel %vm401_vm5, %v2961_v25, %v17130_v62  ;;  %v2971_v62 = vsel %vm401_vm5, %v17150_v22, %v2970_v33  ;;  %v3106_v14 = vrot.slane %v3104_v7, 4 }
 0x25c   :  { %14513 = vmatpush3.bf16.msra.mxu1 %v16211_v47  ;;  %v3109_v30 = vrot.slane %v3107_v59, 5  ;;  %v3310_v60 = vunpack.c.h.bf16 %v16943_v21 }
 0x25d   :  { %14526 = vmatprep.subr.bf16.mxu1 %v16212_v63 }
 0x25e   :  { %v3110_v18 = vor.u32 %v3109_v30, %v3106_v14 }
 0x25f   :  { %14503 = vmatmul.mubr.msk.bf16.gmra.mrb[4].mxu1 %vm19_vm0, %v17041_v51  ;;  %v16213_v51 = vld [vmem:[%s20008_s1 + $0x118] sm:$0xff]  }
 0x260   :  { %14506 = vmatprep.mubr.msk.bf16.mxu1 %vm19_vm0, %v2815_v0  ;;  %v3114_v12 = vsel %vm544_vm2, %v3110_v18, %v16983_v37  ;;  %v3308_v0 = vunpack.c.h.bf16 %v16947_v44 }
 0x267   :  { %14507 = vmatmul.mubr.msk.bf16.gmra.mrb[8].mxu1 %vm19_vm0, %v2824_v3 }
 0x268   :  { %14514 = vmatprep.mubr.msk.bf16.mxu1 %vm19_vm0, %v2963_v19 }
 0x26f   :  { %14515 = vmatmul.mubr.msk.bf16.vlgmr.msra.gmra.mrb[0].mxu1 %vm19_vm0, %v17141_v42  ;;  %v2972_v42 = vrot.slane %v2782_v4, 4  ;;  %v3309_v4 = vunpack.c.l.bf16 %v16943_v21 }
 0x270   :  { %14518 = vmatprep.mubr.msk.bf16.mxu1 %vm19_vm0, %v17153_v54  ;;  %14527 = vmatpush3.bf16.msra.mxu1 %v16212_v63 }
 0x271   :  { %14528 = vmatprep.subr.bf16.mxu1 %v16213_v51  ;;  %v2973_v54 = vsel %vm401_vm5, %v2970_v33, %v2972_v42  ;;  %v3400_v33 = vshrl.u32 %v3392_v36, 16 }
 0x274   :  { %14529 = vmatpush3.bf16.msra.mxu1 %v16213_v51 }
 0x277   :  { %14519 = vmatmul.mubr.msk.bf16.gmra.mrb[4].mxu1 %vm19_vm0, %v17159_v35  ;;  %v3097_v35 = vld [vmem:[#allocation2 + $0x38] sm:$0x1f] }
 0x278   :  { %14522 = vmatprep.mubr.msk.bf16.mxu1 %vm19_vm0, %v2971_v62  ;;  %v3132_v22 = vshrl.u32 %v3097_v35, 16  ;;  %v3135_v6 = vshll.u32 %v3097_v35, 16 }
 0x27a   :  { %v3134_v20 = vrot.slane %v3132_v22, 4  ;;  %v3137_v23 = vrot.slane %v3135_v6, 5 }
 0x27c   :  { %v3138_v37 = vor.u32 %v3137_v23, %v3134_v20 }
 0x27e   :  { %v3139_v41 = vsel %vm544_vm2, %v17113_v17, %v3138_v37  ;;  %v17300_v17 = vld [vmem:[%s20009_s2 + $0x1] ss:$0 sm:$0xff]  ;;  %v3403_v37 = vshll.u32 %v3392_v36, 16 }
 0x27f   :  { %14523 = vmatmul.mubr.msk.bf16.gmra.mrb[8].mxu1 %vm19_vm0, %v2973_v54 }
 0x280   :  { %14530 = vmatprep.mubr.msk.bf16.mxu1 %vm19_vm0, %v3114_v12 }
 0x287   :  { %14531 = vmatmul.mubr.msk.bf16.vlgmr.msra.gmra.mrb[0].mxu1 %vm19_vm0, %v17018_v26  ;;  %v16214_v26 = vld [vmem:[%s20008_s1 + $0x120] sm:$0xff]  }
 0x288   :  { %14534 = vmatprep.mubr.msk.bf16.mxu1 %vm19_vm0, %v17024_v15  ;;  %14542 = vmatprep.subr.bf16.mxu0 %v16214_v26  ;;  %v16215_v15 = vld [vmem:[%s20008_s1 + $0x128] sm:$0xff]  }
 0x289   :  { %14543 = vmatpush3.bf16.msra.mxu0 %v16214_v26 }
 0x28a   :  { %14544 = vmatprep.subr.bf16.mxu0 %v16215_v15 }
 0x28d   :  { %14545 = vmatpush3.bf16.msra.mxu0 %v16215_v15 }
 0x28f   :  { %14535 = vmatmul.mubr.msk.bf16.gmra.mrb[4].mxu1 %vm19_vm0, %v17052_v5  ;;  %v17294_v5 = vld [vmem:[%s20008_s1 + $0x160] sm:$0xff]  }
 0x290   :  { %14538 = vmatprep.mubr.msk.bf16.mxu1 %vm19_vm0, %v17118_v52  ;;  %14558 = vmatprep.subr.bf16.mxu0 %v17294_v5 }
 0x297   :  { %14539 = vmatmul.mubr.msk.bf16.gmra.mrb[8].mxu1 %vm19_vm0, %v3139_v41 }
 0x35a   :  { %v14532_v52 = vpop.f32.mrb[0].mxu1 }
 0x35b   :  { %v3273_v39 = vadd.f32 %v14532_v52, %v17300_v17  ;;  %v3204_v56 = vpop.f32.mrb[1].mxu1  ;;  %v3311_v52 = vunpack.c.l.bf16 %v17005_v16 }
 0x35c   :  { %v3271_v43 = vadd.f32 %v17300_v17, %v3204_v56  ;;  %v14533_v29 = vpop.f32.mrb[2].mxu1 }
 0x35d   :  { %v3293_v24 = vmul.f32 %v17305_v13, %v3273_v39  ;;  %v3274_v8 = vadd.f32 %v14533_v29, %v17300_v17  ;;  %v3207_v49 = vpop.f32.mrb[3].mxu1 }
 0x35e   :  { %v3291_v31 = vmul.f32 %v17305_v13, %v3271_v43  ;;  %v3272_v10 = vadd.f32 %v17300_v17, %v3207_v49 }
 0x35f   :  { %v3317_v47 = vadd.f32 %v3305_v1, %v3293_v24  ;;  %v3294_v11 = vmul.f32 %v17305_v13, %v3274_v8  ;;  %v17336_v8 = vrot.slane %v3400_v33, 3 }
 0x360   :  { %v3315_v63 = vadd.f32 %v3303_v50, %v3291_v31  ;;  %v3292_v27 = vmul.f32 %v17305_v13, %v3272_v10 }
 0x361   :  { %vm3329_vm8 = vcmp.ge.f32.partialorder %v3317_v47, 0.0  ;;  %v3341_v9 = vmul.f32 0.2, %v3317_v47  ;;  %v3318_v48 = vadd.f32 %v3306_v58, %v3294_v11  ;;  %v17340_v58 = vrot.slane %v3403_v37, 4 }
 0x362   :  { %vm3327_vm9 = vcmp.ge.f32.partialorder %v3315_v63, 0.0  ;;  %v3339_v40 = vmul.f32 0.2, %v3315_v63  ;;  %v3316_v55 = vadd.f32 %v3304_v46, %v3292_v27  ;;  %v14536_v25 = vpop.f32.mrb[4].mxu1 }
 0x363   :  { %vm3330_vm10 = vcmp.ge.f32.partialorder %v3318_v48, 0.0  ;;  %v3342_v3 = vmul.f32 0.2, %v3318_v48  ;;  %v3277_v19 = vadd.f32 %v14536_v25, %v17300_v17  ;;  %v3220_v51 = vpop.f32.mrb[5].mxu1  ;;  %v3353_v7 = vsel %vm3329_vm8, %v3317_v47, %v3341_v9 }
 0x364   :  { %vm3328_vm11 = vcmp.ge.f32.partialorder %v3316_v55, 0.0  ;;  %v3340_v21 = vmul.f32 0.2, %v3316_v55  ;;  %v3275_v59 = vadd.f32 %v17300_v17, %v3220_v51  ;;  %v14537_v62 = vpop.f32.mrb[6].mxu1  ;;  %v3351_v14 = vsel %vm3327_vm9, %v3315_v63, %v3339_v40 }
 0x365   :  { %v3354_v44 = vsel %vm3330_vm10, %v3318_v48, %v3342_v3  ;;  %v3297_v30 = vmul.f32 %v17305_v13, %v3277_v19  ;;  %v3278_v42 = vadd.f32 %v14537_v62, %v17300_v17  ;;  %v3223_v18 = vpop.f32.mrb[7].mxu1  ;;  %v3314_v3 = vunpack.c.h.bf16 %v17062_v38 }
 0x366   :  { %v3364_v54 = vpack.c.bf16 %v3354_v44, %v3353_v7  ;;  %v3352_v12 = vsel %vm3328_vm11, %v3316_v55, %v3340_v21  ;;  %v3295_v35 = vmul.f32 %v17305_v13, %v3275_v59  ;;  %v3276_v22 = vadd.f32 %v17300_v17, %v3223_v18 }
 0x367   :  { %v3363_v6 = vpack.c.bf16 %v3352_v12, %v3351_v14  ;;  %v3321_v20 = vadd.f32 %v3309_v4, %v3297_v30  ;;  %v3298_v23 = vmul.f32 %v17305_v13, %v3278_v42  ;;  %v3312_v7 = vunpack.c.h.bf16 %v17005_v16 }
 0x368   :  { %v3370_v41 = vmul.bf16 %v16828_v45, %v3364_v54  ;;  %v3319_v26 = vadd.f32 %v3307_v53, %v3295_v35  ;;  %v3296_v15 = vmul.f32 %v17305_v13, %v3276_v22  ;;  %v3406_v38 = vor.u32 %v17340_v58, %v17336_v8  ;;  %v16217_v58 = vld [vmem:[%s20008_s1 + $0x168] sm:$0xff]  }
 0x369   :  { %v3369_v39 = vmul.bf16 %v16830_v28, %v3363_v6  ;;  %vm3333_vm12 = vcmp.ge.f32.partialorder %v3321_v20, 0.0  ;;  %v3345_v56 = vmul.f32 0.2, %v3321_v20  ;;  %v3322_v43 = vadd.f32 %v3310_v60, %v3298_v23 }
 0x36a   :  { %3376 = vst.msk [vmem:[#allocation2 + $0x10] sm:$0xff] %vm19_vm0, %v3370_v41  ;;  %vm3331_vm13 = vcmp.ge.f32.partialorder %v3319_v26, 0.0  ;;  %v3343_v29 = vmul.f32 0.2, %v3319_v26  ;;  %v3320_v24 = vadd.f32 %v3308_v0, %v3296_v15  ;;  %v14540_v1 = vpop.f32.mrb[8].mxu1 }
 0x36b   :  { %3375 = vst.msk [vmem:[#allocation2 + $0x8] sm:$0xff] %vm19_vm0, %v3369_v39  ;;  %vm3334_vm14 = vcmp.ge.f32.partialorder %v3322_v43, 0.0  ;;  %v3346_v49 = vmul.f32 0.2, %v3322_v43  ;;  %v3281_v31 = vadd.f32 %v14540_v1, %v17300_v17  ;;  %v3236_v50 = vpop.f32.mrb[9].mxu1  ;;  %v3357_v10 = vsel %vm3333_vm12, %v3321_v20, %v3345_v56 }
 0x36c   :  { %vm3332_vm15 = vcmp.ge.f32.partialorder %v3320_v24, 0.0  ;;  %v3344_v47 = vmul.f32 0.2, %v3320_v24  ;;  %v3279_v11 = vadd.f32 %v17300_v17, %v3236_v50  ;;  %v14541_v46 = vpop.f32.mrb[10].mxu1  ;;  %v3355_v4 = vsel %vm3331_vm13, %v3319_v26, %v3343_v29 }
 0x36d   :  { %v3358_v63 = vsel %vm3334_vm14, %v3322_v43, %v3346_v49  ;;  %v3301_v27 = vmul.f32 %v17305_v13, %v3281_v31  ;;  %v3282_v53 = vadd.f32 %v14541_v46, %v17300_v17  ;;  %v3239_v60 = vpop.f32.mrb[11].mxu1 }
 0x36e   :  { %v3366_v36 = vpack.c.bf16 %v3358_v63, %v3357_v10  ;;  %v3356_v9 = vsel %vm3332_vm15, %v3320_v24, %v3344_v47  ;;  %v3299_v48 = vmul.f32 %v17305_v13, %v3279_v11  ;;  %v3280_v0 = vadd.f32 %v17300_v17, %v3239_v60 }
 0x36f   :  { %v3365_v40 = vpack.c.bf16 %v3356_v9, %v3355_v4  ;;  %v3325_v55 = vadd.f32 %v3313_v61, %v3301_v27  ;;  %v3302_v25 = vmul.f32 %v17305_v13, %v3282_v53 }
 0x370   :  { %v3372_v19 = vmul.bf16 %v16841_v2, %v3366_v36  ;;  %v3323_v51 = vadd.f32 %v3311_v52, %v3299_v48  ;;  %v3300_v33 = vmul.f32 %v17305_v13, %v3280_v0  ;;  %v17422_v48 = vld [vmem:[%s20008_s1 + $0x130] sm:$0xff]  }
 0x371   :  { %v3371_v21 = vmul.bf16 %v16839_v34, %v3365_v40  ;;  %vm3337_vm6 = vcmp.ge.f32.partialorder %v3325_v55, 0.0  ;;  %v3349_v59 = vmul.f32 0.2, %v3325_v55  ;;  %v3326_v62 = vadd.f32 %v3314_v3, %v3302_v25  ;;  %v17354_v14 = vld [vmem:[#allocation2 + $0x10] sm:$0xff] }
 0x372   :  { %3378 = vst.msk [vmem:[#allocation2 + $0x20] sm:$0xff] %vm19_vm0, %v3372_v19  ;;  %v3347_v17 = vmul.f32 0.2, %v3323_v51  ;;  %v3324_v61 = vadd.f32 %v3312_v7, %v3300_v33  ;;  %v17357_v44 = vld [vmem:[#allocation2 + $0x8] sm:$0xff]  ;;  %v17362_v13 = vshrl.u32 %v17354_v14, 16  ;;  %vm3335_vm7 = vcmp.ge.f32.partialorder %v3323_v51, 0.0 }
 0x373   :  { %3377 = vst.msk [vmem:[#allocation2 + $0x18] sm:$0xff] %vm19_vm0, %v3371_v21  ;;  %vm3338_vm8 = vcmp.ge.f32.partialorder %v3326_v62, 0.0  ;;  %v3350_v16 = vmul.f32 0.2, %v3326_v62  ;;  %v17366_v30 = vshrl.u32 %v17357_v44, 16  ;;  %v3361_v42 = vsel %vm3337_vm6, %v3325_v55, %v3349_v59 }
 0x374   :  { %vm3336_vm9 = vcmp.ge.f32.partialorder %v3324_v61, 0.0  ;;  %v3348_v18 = vmul.f32 0.2, %v3324_v61  ;;  %v17369_v54 = vshll.u32 %v17357_v44, 16  ;;  %v3419_v22 = vrot.slane %v17362_v13, 3 }
 0x375   :  { %v3362_v12 = vsel %vm3338_vm8, %v3326_v62, %v3350_v16  ;;  %v3410_v35 = vrot.slane %v17366_v30, 3  ;;  %v17374_v6 = vshll.u32 %v17354_v14, 16  ;;  %v3359_v20 = vsel %vm3335_vm7, %v3323_v51, %v3347_v17 }
 0x376   :  { %v3368_v23 = vpack.c.bf16 %v3362_v12, %v3361_v42  ;;  %v3360_v37 = vsel %vm3336_vm9, %v3324_v61, %v3348_v18  ;;  %v3413_v41 = vrot.slane %v17369_v54, 4  ;;  %v3841_v56 = vrot.slane %v17366_v30, 4 }
 0x377   :  { %v3367_v26 = vpack.c.bf16 %v3360_v37, %v3359_v20  ;;  %v3422_v15 = vrot.slane %v17374_v6, 4  ;;  %v3842_v43 = vrot.slane %v17369_v54, 5  ;;  %v3845_v10 = vrot.slane %v17362_v13, 4 }
 0x378   :  { %v3374_v52 = vmul.bf16 %v16899_v32, %v3368_v23  ;;  %v3414_v39 = vor.u32 %v3413_v41, %v3410_v35  ;;  %v3846_v53 = vrot.slane %v17374_v6, 5  ;;  %v4006_v16 = vrot.slane %v17362_v13, 7 }
 0x379   :  { %v3373_v29 = vmul.bf16 %v16934_v57, %v3367_v26  ;;  %v17382_v24 = vor.u32 %v3422_v15, %v3419_v22  ;;  %v17384_v1 = vld [vmem:[#allocation2 + $0x20] sm:$0xff]  ;;  %v17413_v27 = vor.u32 %v3842_v43, %v3841_v56 }
 0x37a   :  { %3380 = vst.msk [vmem:[#allocation2 + $0x30] sm:$0xff] %vm19_vm0, %v3374_v52  ;;  %v3415_v8 = vsel %vm108_vm1, %v3406_v38, %v3414_v39  ;;  %v17388_v49 = vld [vmem:[#allocation2 + $0x18] sm:$0xff]  ;;  %v17391_v31 = vshrl.u32 %v17384_v1, 16  ;;  %v17394_v50 = vshll.u32 %v17384_v1, 16  ;;  %v17424_v0 = vor.u32 %v3846_v53, %v3845_v10 }
 0x37b   :  { %3379 = vst.msk [vmem:[#allocation2 + $0x28] sm:$0xff] %vm19_vm0, %v3373_v29  ;;  %14546 = vmatprep.mubr.msk.bf16.mxu0 %vm19_vm0, %v3415_v8  ;;  %v3424_v47 = vsel %vm108_vm1, %v3414_v39, %v17382_v24  ;;  %v17405_v11 = vshrl.u32 %v17388_v49, 16  ;;  %v17408_v46 = vshll.u32 %v17388_v49, 16  ;;  %v4003_v38 = vrot.slane %v17366_v30, 7 }
 0x37c   :  { %14547 = vmatmul.mubr.msk.bf16.vlgmr.msra.gmra.mrb[12].mxu0 %vm19_vm0, %v3424_v47  ;;  %v3437_v4 = vrot.slane %v17391_v31, 3  ;;  %v3440_v63 = vrot.slane %v17394_v50, 4  ;;  %v3854_v3 = vrot.slane %v17394_v50, 5  ;;  %v17433_v19 = vsel %vm544_vm2, %v17413_v27, %v17424_v0 }
 0x37d   :  { %14559 = vmatpush3.bf16.msra.mxu0 %v17294_v5  ;;  %v3428_v60 = vrot.slane %v17405_v11, 3  ;;  %v3431_v36 = vrot.slane %v17408_v46, 4  ;;  %v3849_v40 = vrot.slane %v17405_v11, 4  ;;  %v3850_v25 = vrot.slane %v17408_v46, 5 }
 0x37e   :  { %v3441_v9 = vor.u32 %v3440_v63, %v3437_v4  ;;  %14560 = vmatprep.subr.bf16.mxu0 %v16217_v58  ;;  %v3853_v5 = vrot.slane %v17391_v31, 4  ;;  %v4009_v35 = vrot.slane %v17405_v11, 7  ;;  %v17472_v56 = vor.u32 %v4003_v38, %v17369_v54 }
 0x37f   :  { %v3432_v55 = vor.u32 %v3431_v36, %v3428_v60  ;;  %v3851_v21 = vor.u32 %v3850_v25, %v3849_v40  ;;  %v4007_v43 = vor.u32 %v4006_v16, %v17374_v6  ;;  %v4165_v40 = vrot.slane %v17369_v54, 1 }
 0x380   :  { %v3855_v59 = vor.u32 %v3854_v3, %v3853_v5  ;;  %v4010_v29 = vor.u32 %v4009_v35, %v17408_v46  ;;  %v4170_v5 = vrot.slane %v17374_v6, 1  ;;  %v4178_v3 = vrot.slane %v17408_v46, 1 }
 0x381   :  { %v17437_v51 = vsel %vm108_vm1, %v17382_v24, %v3432_v55  ;;  %v17440_v33 = vsel %vm108_vm1, %v3432_v55, %v3441_v9  ;;  %14561 = vmatpush3.bf16.msra.mxu0 %v16217_v58  ;;  %v17442_v7 = vld [vmem:[#allocation2 + $0x30] sm:$0xf]  ;;  %v17459_v12 = vsel %vm544_vm2, %v17424_v0, %v3851_v21  ;;  %v4012_v58 = vrot.slane %v17391_v31, 7 }
 0x382   :  { %14550 = vmatprep.mubr.msk.bf16.mxu0 %vm19_vm0, %v17437_v51  ;;  %v17446_v62 = vld [vmem:[#allocation2 + $0x28] sm:$0xff]  ;;  %v3453_v17 = vshrl.u32 %v17442_v7, 16  ;;  %v3456_v61 = vshll.u32 %v17442_v7, 16  ;;  %14574 = vmatprep.subr.bf16.mxu0 %v17422_v48  ;;  %v17465_v23 = vsel %vm544_vm2, %v3851_v21, %v3855_v59  ;;  %v17487_v63 = vsel %vm711_vm3, %v4003_v38, %v4007_v43  ;;  %v17503_v55 = vld [vmem:[#allocation2 + $0x30] sm:$0xff] }
 0x383   :  { %v17454_v42 = vshrl.u32 %v17446_v62, 16  ;;  %v3447_v18 = vshll.u32 %v17446_v62, 16  ;;  %v17496_v60 = vsel %vm711_vm3, %v4006_v16, %v4010_v29  ;;  %v4013_v36 = vor.u32 %v4012_v58, %v17394_v50 }
 0x384   :  { %14551 = vmatmul.mubr.msk.bf16.gmra.mrb[16].mxu0 %vm19_vm0, %v17440_v33  ;;  %v3455_v22 = vrot.slane %v3453_v17, 3  ;;  %v3458_v20 = vrot.slane %v3456_v61, 4  ;;  %v4186_v54 = vrot.slane %v17394_v50, 1  ;;  %v4174_v17 = vor.u32 %v4170_v5, %v17362_v13 }
 0x385   :  { %v3446_v37 = vrot.slane %v17454_v42, 3  ;;  %v3449_v41 = vrot.slane %v3447_v18, 4  ;;  %v3857_v15 = vrot.slane %v17454_v42, 4  ;;  %v3858_v52 = vrot.slane %v3447_v18, 5 }
 0x386   :  { %v3459_v26 = vor.u32 %v3458_v20, %v3455_v22  ;;  %v4015_v10 = vrot.slane %v17454_v42, 7  ;;  %v17506_v25 = vsel %vm711_vm3, %v4009_v35, %v4013_v36  ;;  %v4182_v61 = vor.u32 %v4178_v3, %v17405_v11  ;;  %v16220_v20 = vld [vmem:[%s20008_s1 + $0x140] sm:$0xff]  }
 0x387   :  { %v17469_v39 = vor.u32 %v3449_v41, %v3446_v37  ;;  %v17476_v8 = vor.u32 %v3858_v52, %v3857_v15  ;;  %v4194_v38 = vrot.slane %v3447_v18, 1  ;;  %v17520_v16 = vshrl.u32 %v17503_v55, 16 }
 0x388   :  { %v4190_v46 = vor.u32 %v4186_v54, %v17391_v31  ;;  %v17527_v35 = vshll.u32 %v17503_v55, 16  ;;  %v17533_v50 = vsel %vm873_vm4, %v4182_v61, %v4186_v54  ;;  %v3692_v15 = vrot.slane %v17357_v44, 4 }
 0x389   :  { %v17482_v47 = vsel %vm108_vm1, %v3441_v9, %v17469_v39  ;;  %v3460_v4 = vsel %vm108_vm1, %v17469_v39, %v3459_v26  ;;  %v17493_v53 = vsel %vm544_vm2, %v3855_v59, %v17476_v8  ;;  %v4016_v9 = vor.u32 %v4015_v10, %v3447_v18  ;;  %v16219_v18 = vld [vmem:[%s20008_s1 + $0x138] sm:$0xff]  }
 0x38a   :  { %14554 = vmatprep.mubr.msk.bf16.mxu0 %vm19_vm0, %v17482_v47  ;;  %v4166_v59 = vor.u32 %v4165_v40, %v17366_v30  ;;  %v17530_v30 = vsel %vm873_vm4, %v4174_v17, %v4178_v3  ;;  %v17536_v13 = vor.u32 %v4194_v38, %v17454_v42  ;;  %v17539_v11 = vsel %vm873_vm4, %v4190_v46, %v4194_v38  ;;  %v16228_v42 = vld [vmem:[%s20008_s1 + $0x190] sm:$0xff]  }
 0x38b   :  { %v17513_v21 = vsel %vm711_vm3, %v4012_v58, %v4016_v9  ;;  %v4681_v31 = vrot.slane %v17520_v16, 4  ;;  %v4682_v22 = vrot.slane %v17527_v35, 5  ;;  %v17571_v43 = vrot.slane %v17354_v14, 4  ;;  %v16221_v58 = vld [vmem:[%s20008_s1 + $0x148] sm:$0xff]   ;;  %v16222_v9 = vld [vmem:[%s20008_s1 + $0x150] sm:$0xff]  }
 0x38c   :  { %14555 = vmatmul.mubr.msk.bf16.gmra.mrb[20].mxu0 %vm19_vm0, %v3460_v4  ;;  %v17523_v6 = vsel %vm873_vm4, %v4166_v59, %v4170_v5  ;;  %v3696_v29 = vrot.slane %v17388_v49, 4  ;;  %v3698_v40 = vrot.slane %v17384_v1, 4  ;;  %v17591_v5 = vrot.slane %v17446_v62, 4 }
 0x38d   :  { %14562 = vmatprep.mubr.msk.bf16.mxu0 %vm19_vm0, %v17357_v44  ;;  %v17554_v37 = vor.u32 %v4682_v22, %v4681_v31  ;;  %v3695_v4 = vsel %vm401_vm5, %v3692_v15, %v17571_v43  ;;  %v3702_v46 = vrot.slane %v17442_v7, 4  ;;  %v16224_v7 = vld [vmem:[%s20008_s1 + $0x170] sm:$0xff]  }
 0x38e   :  { %v17582_v36 = vsel %vm401_vm5, %v17571_v43, %v3696_v29  ;;  %v17594_v54 = vsel %vm401_vm5, %v3696_v29, %v3698_v40  ;;  %v17600_v17 = vsel %vm401_vm5, %v3698_v40, %v17591_v5 }
 0x38f   :  { %v17559_v41 = vsel %vm544_vm2, %v17476_v8, %v17554_v37  ;;  %v3703_v31 = vsel %vm401_vm5, %v17591_v5, %v3702_v46 }
 0x394   :  { %14563 = vmatmul.mubr.msk.bf16.vlgmr.msra.gmra.mrb[12].mxu0 %vm19_vm0, %v17354_v14 }
 0x395   :  { %14566 = vmatprep.mubr.msk.bf16.mxu0 %vm19_vm0, %v17388_v49  ;;  %14575 = vmatpush3.bf16.msra.mxu0 %v17422_v48  ;;  %v3678_v48 = vld [vmem:[#allocation2] sm:$0xf0] }
 0x396   :  { %14576 = vmatprep.subr.bf16.mxu0 %v16219_v18  ;;  %v3691_v26 = vrot.slane %v3678_v48, 4  ;;  %v3834_v3 = vshrl.u32 %v3678_v48, 16  ;;  %v3837_v59 = vshll.u32 %v3678_v48, 16  ;;  %v3827_v48 = vld [vmem:[#allocation2 + $0x30] sm:$0x1f] }
 0x398   :  { %v3693_v52 = vsel %vm401_vm5, %v3691_v26, %v3692_v15  ;;  %v3836_v61 = vrot.slane %v3834_v3, 4  ;;  %v3839_v38 = vrot.slane %v3837_v59, 5  ;;  %v3865_v26 = vshll.u32 %v3827_v48, 16  ;;  %v3993_v15 = vld [vmem:[#allocation2] sm:$0x80]  ;;  %v16225_v3 = vld [vmem:[%s20008_s1 + $0x178] sm:$0xff]  }
 0x399   :  { %14577 = vmatpush3.bf16.msra.mxu0 %v16219_v18  ;;  %v16227_v59 = vld [vmem:[%s20008_s1 + $0x188] sm:$0xff]  }
 0x39a   :  { %14590 = vmatprep.subr.bf16.mxu0 %v16220_v20  ;;  %v3840_v18 = vor.u32 %v3839_v38, %v3836_v61  ;;  %v3867_v29 = vrot.slane %v3865_v26, 5  ;;  %v4202_v61 = vrot.slane %v17527_v35, 1 }
 0x39c   :  { %14567 = vmatmul.mubr.msk.bf16.gmra.mrb[16].mxu0 %vm19_vm0, %v17384_v1  ;;  %v3844_v22 = vsel %vm544_vm2, %v3840_v18, %v17413_v27  ;;  %v3862_v27 = vshrl.u32 %v3827_v48, 16  ;;  %v4206_v18 = vor.u32 %v4202_v61, %v17520_v16 }
 0x39d   :  { %14570 = vmatprep.mubr.msk.bf16.mxu0 %vm19_vm0, %v17446_v62 }
 0x3a4   :  { %14571 = vmatmul.mubr.msk.bf16.gmra.mrb[20].mxu0 %vm19_vm0, %v17503_v55 }
 0x3a5   :  { %14578 = vmatprep.mubr.msk.bf16.mxu0 %vm19_vm0, %v3693_v52  ;;  %v3864_v52 = vrot.slane %v3862_v27, 4  ;;  %v4336_v27 = vld [vmem:[#allocation2 + $0x38] sm:$0xf] }
 0x3a6   :  { %v4371_v26 = vshrl.u32 %v4336_v27, 16 }
 0x3ac   :  { %14579 = vmatmul.mubr.msk.bf16.vlgmr.msra.gmra.mrb[12].mxu0 %vm19_vm0, %v3695_v4 }
 0x3ad   :  { %14582 = vmatprep.mubr.msk.bf16.mxu0 %vm19_vm0, %v17582_v36  ;;  %14591 = vmatpush3.bf16.msra.mxu0 %v16220_v20  ;;  %v16223_v20 = vld [vmem:[%s20008_s1 + $0x158] sm:$0xff]  }
 0x3ae   :  { %14592 = vmatprep.subr.bf16.mxu0 %v16221_v58 }
 0x3b1   :  { %14593 = vmatpush3.bf16.msra.mxu0 %v16221_v58  ;;  %v3868_v58 = vor.u32 %v3867_v29, %v3864_v52 }
 0x3b2   :  { %14606 = vmatprep.subr.bf16.mxu0 %v16222_v9 }
 0x3b4   :  { %14583 = vmatmul.mubr.msk.bf16.gmra.mrb[16].mxu0 %vm19_vm0, %v17594_v54 }
 0x3b5   :  { %14586 = vmatprep.mubr.msk.bf16.mxu0 %vm19_vm0, %v17600_v17 }
 0x3bc   :  { %14587 = vmatmul.mubr.msk.bf16.gmra.mrb[20].mxu0 %vm19_vm0, %v3703_v31 }
 0x3bd   :  { %14594 = vmatprep.mubr.msk.bf16.mxu0 %vm19_vm0, %v3844_v22 }
 0x3c4   :  { %14595 = vmatmul.mubr.msk.bf16.vlgmr.msra.gmra.mrb[12].mxu0 %vm19_vm0, %v17433_v19  ;;  %v4000_v19 = vshrl.u32 %v3993_v15, 16  ;;  %v4374_v15 = vshll.u32 %v4336_v27, 16 }
 0x3c5   :  { %14598 = vmatprep.mubr.msk.bf16.mxu0 %vm19_vm0, %v17459_v12  ;;  %14607 = vmatpush3.bf16.msra.mxu0 %v16222_v9  ;;  %v3869_v9 = vsel %vm544_vm2, %v17476_v8, %v3868_v58  ;;  %v16226_v8 = vld [vmem:[%s20008_s1 + $0x180] sm:$0xff]  }
 0x3c6   :  { %14608 = vmatprep.subr.bf16.mxu0 %v16223_v20  ;;  %v4002_v4 = vrot.slane %v4000_v19, 7  ;;  %v4376_v29 = vrot.slane %v4374_v15, 4  ;;  %v4861_v15 = vunpack.c.l.bf16 %v17388_v49 }
 0x3c8   :  { %v4005_v40 = vsel %vm711_vm3, %v4002_v4, %v17472_v56  ;;  %v4020_v56 = vrot.slane %v17520_v16, 7 }
 0x3c9   :  { %14609 = vmatpush3.bf16.msra.mxu0 %v16223_v20 }
 0x3ca   :  { %14622 = vmatprep.subr.bf16.mxu0 %v16224_v7 }
 0x3cc   :  { %14599 = vmatmul.mubr.msk.bf16.gmra.mrb[16].mxu0 %vm19_vm0, %v17465_v23 }
 0x3cd   :  { %14602 = vmatprep.mubr.msk.bf16.mxu0 %vm19_vm0, %v17493_v53 }
 0x3d4   :  { %14603 = vmatmul.mubr.msk.bf16.gmra.mrb[20].mxu0 %vm19_vm0, %v3869_v9 }
 0x3d5   :  { %14610 = vmatprep.mubr.msk.bf16.mxu0 %vm19_vm0, %v4005_v40 }
 0x3dc   :  { %14611 = vmatmul.mubr.msk.bf16.vlgmr.msra.gmra.mrb[12].mxu0 %vm19_vm0, %v17487_v63  ;;  %v4023_v63 = vor.u32 %v17527_v35, %v4020_v56 }
 0x3dd   :  { %14614 = vmatprep.mubr.msk.bf16.mxu0 %vm19_vm0, %v17496_v60  ;;  %14623 = vmatpush3.bf16.msra.mxu0 %v16224_v7  ;;  %v4367_v7 = vrot.slane %v17527_v35, 4 }
 0x3de   :  { %14624 = vmatprep.subr.bf16.mxu0 %v16225_v3  ;;  %v4024_v60 = vsel %vm711_vm3, %v4015_v10, %v4023_v63  ;;  %v4154_v10 = vld [vmem:[#allocation2 + $0x38] sm:$0x1] }
 0x3df   :  { %v4208_v38 = vshll.u32 %v4154_v10, 16  ;;  %v17746_v10 = vld [vmem:[%s20010_s3 + $0x2] ss:$0 sm:$0xff] }
 0x3e1   :  { %14625 = vmatpush3.bf16.msra.mxu0 %v16225_v3  ;;  %v4210_v31 = vrot.slane %v4208_v38, 1 }
 0x3e2   :  { %14638 = vmatprep.subr.bf16.mxu0 %v16226_v8 }
 0x3e3   :  { %v4211_v20 = vsel %vm873_vm4, %v4206_v18, %v4210_v31 }
 0x3e4   :  { %14615 = vmatmul.mubr.msk.bf16.gmra.mrb[16].mxu0 %vm19_vm0, %v17506_v25  ;;  %v4335_v25 = vld [vmem:[#allocation2 + $0x8] sm:$0xf8] }
 0x3e5   :  { %14618 = vmatprep.mubr.msk.bf16.mxu0 %vm19_vm0, %v17513_v21  ;;  %v4343_v21 = vshrl.u32 %v4335_v25, 16 }
 0x3ec   :  { %14619 = vmatmul.mubr.msk.bf16.gmra.mrb[20].mxu0 %vm19_vm0, %v4024_v60 }
 0x3ed   :  { %14626 = vmatprep.mubr.msk.bf16.mxu0 %vm19_vm0, %v17523_v6  ;;  %v4346_v6 = vshll.u32 %v4335_v25, 16 }
 0x3ef   :  { %v4348_v46 = vrot.slane %v4346_v6, 4 }
 0x3f4   :  { %14627 = vmatmul.mubr.msk.bf16.vlgmr.msra.gmra.mrb[12].mxu0 %vm19_vm0, %v17530_v30  ;;  %v4203_v30 = vsel %vm873_vm4, %v17536_v13, %v4202_v61  ;;  %v16229_v13 = vld [vmem:[%s20008_s1 + $0x198] sm:$0xff]  }
 0x3f5   :  { %14630 = vmatprep.mubr.msk.bf16.mxu0 %vm19_vm0, %v17533_v50  ;;  %14639 = vmatpush3.bf16.msra.mxu0 %v16226_v8  ;;  %v4345_v50 = vrot.slane %v4343_v21, 3 }
 0x3f6   :  { %14640 = vmatprep.subr.bf16.mxu0 %v16227_v59 }
 0x3f7   :  { %v4349_v22 = vor.u32 %v4348_v46, %v4345_v50  ;;  %v4859_v50 = vunpack.c.l.bf16 %v17354_v14 }
 0x3f9   :  { %14641 = vmatpush3.bf16.msra.mxu0 %v16227_v59  ;;  %v4353_v48 = vsel %vm108_vm1, %v4349_v22, %v17382_v24  ;;  %v16230_v24 = vld [vmem:[%s20008_s1 + $0x1a0] sm:$0xff]   ;;  %v4857_v22 = vunpack.c.l.bf16 %v17357_v44 }
 0x3fa   :  { %14654 = vmatprep.subr.bf16.mxu0 %v16228_v42 }
 0x3fc   :  { %14631 = vmatmul.mubr.msk.bf16.gmra.mrb[16].mxu0 %vm19_vm0, %v17539_v11  ;;  %v4366_v11 = vrot.slane %v17520_v16, 3 }
 0x3fd   :  { %14634 = vmatprep.mubr.msk.bf16.mxu0 %vm19_vm0, %v4203_v30 }
 0x3fe   :  { %v4368_v52 = vor.u32 %v4367_v7, %v4366_v11  ;;  %v4858_v7 = vunpack.c.h.bf16 %v17357_v44  ;;  %v4867_v44 = vunpack.c.l.bf16 %v17503_v55 }
 0x400   :  { %v4369_v16 = vsel %vm108_vm1, %v17469_v39, %v4368_v52  ;;  %v4524_v39 = vrot.slane %v17503_v55, 4 }
 0x404   :  { %14635 = vmatmul.mubr.msk.bf16.gmra.mrb[20].mxu0 %vm19_vm0, %v4211_v20  ;;  %v4860_v20 = vunpack.c.h.bf16 %v17354_v14 }
 0x405   :  { %14642 = vmatprep.mubr.msk.bf16.mxu0 %vm19_vm0, %v4353_v48 }
 0x40c   :  { %14643 = vmatmul.mubr.msk.bf16.vlgmr.msra.gmra.mrb[12].mxu0 %vm19_vm0, %v17437_v51  ;;  %v4373_v51 = vrot.slane %v4371_v26, 3 }
 0x40d   :  { %14646 = vmatprep.mubr.msk.bf16.mxu0 %vm19_vm0, %v17440_v33  ;;  %14655 = vmatpush3.bf16.msra.mxu0 %v16228_v42  ;;  %v4502_v33 = vld [vmem:[#allocation2 + $0x8] sm:$0xf0] }
 0x40e   :  { %14656 = vmatprep.subr.bf16.mxu0 %v16229_v13  ;;  %v4377_v35 = vor.u32 %v4376_v29, %v4373_v51  ;;  %v4515_v19 = vrot.slane %v4502_v33, 4  ;;  %v4658_v9 = vshrl.u32 %v4502_v33, 16  ;;  %v4661_v40 = vshll.u32 %v4502_v33, 16  ;;  %v4946_v51 = vld [vmem:[#allocation2] sm:$0xf8] }
 0x410   :  { %v4378_v58 = vsel %vm108_vm1, %v4368_v52, %v4377_v35  ;;  %v4517_v4 = vsel %vm401_vm5, %v4515_v19, %v17571_v43  ;;  %v4525_v43 = vsel %vm401_vm5, %v17591_v5, %v4524_v39  ;;  %v4660_v3 = vrot.slane %v4658_v9, 4 }
 0x411   :  { %14657 = vmatpush3.bf16.msra.mxu0 %v16229_v13  ;;  %v4663_v8 = vrot.slane %v4661_v40, 5  ;;  %v4864_v52 = vunpack.c.h.bf16 %v17384_v1 }
 0x412   :  { %14670 = vmatprep.subr.bf16.mxu0 %v16230_v24 }
 0x413   :  { %v4664_v56 = vor.u32 %v4663_v8, %v4660_v3 }
 0x414   :  { %14647 = vmatmul.mubr.msk.bf16.gmra.mrb[16].mxu0 %vm19_vm0, %v17482_v47  ;;  %v16231_v47 = vld [vmem:[%s20008_s1 + $0x1a8] sm:$0xff]  }
 0x415   :  { %14650 = vmatprep.mubr.msk.bf16.mxu0 %vm19_vm0, %v4369_v16  ;;  %v4668_v63 = vsel %vm544_vm2, %v4664_v56, %v17424_v0  ;;  %v4862_v16 = vunpack.c.h.bf16 %v17388_v49 }
 0x41c   :  { %14651 = vmatmul.mubr.msk.bf16.gmra.mrb[20].mxu0 %vm19_vm0, %v4378_v58 }
 0x41d   :  { %14658 = vmatprep.mubr.msk.bf16.mxu0 %vm19_vm0, %v4517_v4 }
 0x424   :  { %14659 = vmatmul.mubr.msk.bf16.vlgmr.msra.gmra.mrb[12].mxu0 %vm19_vm0, %v17582_v36  ;;  %v4526_v36 = vrot.slane %v4336_v27, 4  ;;  %v4863_v27 = vunpack.c.l.bf16 %v17384_v1 }
 0x425   :  { %14662 = vmatprep.mubr.msk.bf16.mxu0 %vm19_vm0, %v17594_v54  ;;  %14671 = vmatpush3.bf16.msra.mxu0 %v16230_v24 }
 0x426   :  { %14672 = vmatprep.subr.bf16.mxu0 %v16231_v47  ;;  %v4527_v54 = vsel %vm401_vm5, %v4524_v39, %v4526_v36  ;;  %v4954_v39 = vshrl.u32 %v4946_v51, 16 }
 0x429   :  { %14673 = vmatpush3.bf16.msra.mxu0 %v16231_v47 }
 0x42c   :  { %14663 = vmatmul.mubr.msk.bf16.gmra.mrb[16].mxu0 %vm19_vm0, %v17600_v17  ;;  %v4651_v17 = vld [vmem:[#allocation2 + $0x38] sm:$0x1f] }
 0x42d   :  { %14666 = vmatprep.mubr.msk.bf16.mxu0 %vm19_vm0, %v4525_v43  ;;  %v4686_v5 = vshrl.u32 %v4651_v17, 16  ;;  %v4689_v60 = vshll.u32 %v4651_v17, 16 }
 0x42f   :  { %v4688_v59 = vrot.slane %v4686_v5, 4  ;;  %v4691_v25 = vrot.slane %v4689_v60, 5 }
 0x431   :  { %v4692_v0 = vor.u32 %v4691_v25, %v4688_v59 }
 0x433   :  { %v4693_v42 = vsel %vm544_vm2, %v17554_v37, %v4692_v0  ;;  %v17741_v37 = vld [vmem:[%s20009_s2 + $0x2] ss:$0 sm:$0xff]  ;;  %v4957_v0 = vshll.u32 %v4946_v51, 16 }
 0x434   :  { %14667 = vmatmul.mubr.msk.bf16.gmra.mrb[20].mxu0 %vm19_vm0, %v4527_v54 }
 0x435   :  { %14674 = vmatprep.mubr.msk.bf16.mxu0 %vm19_vm0, %v4668_v63 }
 0x43c   :  { %14675 = vmatmul.mubr.msk.bf16.vlgmr.msra.gmra.mrb[12].mxu0 %vm19_vm0, %v17459_v12  ;;  %v16232_v12 = vld [vmem:[%s20008_s1 + $0x1b0] sm:$0xff]  }
 0x43d   :  { %14678 = vmatprep.mubr.msk.bf16.mxu0 %vm19_vm0, %v17465_v23  ;;  %14686 = vmatprep.subr.bf16.mxu1 %v16232_v12  ;;  %v16233_v23 = vld [vmem:[%s20008_s1 + $0x1b8] sm:$0xff]  }
 0x43e   :  { %14687 = vmatpush3.bf16.msra.mxu1 %v16232_v12 }
 0x43f   :  { %14688 = vmatprep.subr.bf16.mxu1 %v16233_v23 }
 0x442   :  { %14689 = vmatpush3.bf16.msra.mxu1 %v16233_v23 }
 0x444   :  { %14679 = vmatmul.mubr.msk.bf16.gmra.mrb[16].mxu0 %vm19_vm0, %v17493_v53  ;;  %v17735_v53 = vld [vmem:[%s20008_s1 + $0x1f0] sm:$0xff]  }
 0x445   :  { %14682 = vmatprep.mubr.msk.bf16.mxu0 %vm19_vm0, %v17559_v41  ;;  %14702 = vmatprep.subr.bf16.mxu1 %v17735_v53 }
 0x44c   :  { %14683 = vmatmul.mubr.msk.bf16.gmra.mrb[20].mxu0 %vm19_vm0, %v4693_v42 }
 0x50f   :  { %v14676_v41 = vpop.f32.mrb[12].mxu0 }
 0x510   :  { %v4827_v21 = vadd.f32 %v14676_v41, %v17741_v37  ;;  %v4758_v6 = vpop.f32.mrb[13].mxu0  ;;  %v4865_v41 = vunpack.c.l.bf16 %v17446_v62 }
 0x511   :  { %v4825_v61 = vadd.f32 %v17741_v37, %v4758_v6  ;;  %v14677_v38 = vpop.f32.mrb[14].mxu0 }
 0x512   :  { %v4847_v30 = vmul.f32 %v17746_v10, %v4827_v21  ;;  %v4828_v46 = vadd.f32 %v14677_v38, %v17741_v37  ;;  %v4761_v18 = vpop.f32.mrb[15].mxu0 }
 0x513   :  { %v4845_v31 = vmul.f32 %v17746_v10, %v4825_v61  ;;  %v4826_v48 = vadd.f32 %v17741_v37, %v4761_v18 }
 0x514   :  { %v4871_v13 = vadd.f32 %v4859_v50, %v4847_v30  ;;  %v4848_v11 = vmul.f32 %v17746_v10, %v4828_v46  ;;  %v17777_v46 = vrot.slane %v4954_v39, 3 }
 0x515   :  { %v4869_v24 = vadd.f32 %v4857_v22, %v4845_v31  ;;  %v4846_v26 = vmul.f32 %v17746_v10, %v4826_v48 }
 0x516   :  { %vm4883_vm10 = vcmp.ge.f32.partialorder %v4871_v13, 0.0  ;;  %v4895_v29 = vmul.f32 0.2, %v4871_v13  ;;  %v4872_v14 = vadd.f32 %v4860_v20, %v4848_v11  ;;  %v17781_v20 = vrot.slane %v4957_v0, 4 }
 0x517   :  { %vm4881_vm11 = vcmp.ge.f32.partialorder %v4869_v24, 0.0  ;;  %v4893_v33 = vmul.f32 0.2, %v4869_v24  ;;  %v4870_v35 = vadd.f32 %v4858_v7, %v4846_v26  ;;  %v14680_v19 = vpop.f32.mrb[16].mxu0 }
 0x518   :  { %vm4884_vm12 = vcmp.ge.f32.partialorder %v4872_v14, 0.0  ;;  %v4896_v58 = vmul.f32 0.2, %v4872_v14  ;;  %v4831_v4 = vadd.f32 %v14680_v19, %v17741_v37  ;;  %v4774_v47 = vpop.f32.mrb[17].mxu0  ;;  %v4907_v9 = vsel %vm4883_vm10, %v4871_v13, %v4895_v29 }
 0x519   :  { %vm4882_vm13 = vcmp.ge.f32.partialorder %v4870_v35, 0.0  ;;  %v4894_v1 = vmul.f32 0.2, %v4870_v35  ;;  %v4829_v40 = vadd.f32 %v17741_v37, %v4774_v47  ;;  %v14681_v43 = vpop.f32.mrb[18].mxu0  ;;  %v4905_v3 = vsel %vm4881_vm11, %v4869_v24, %v4893_v33 }
 0x51a   :  { %v4908_v49 = vsel %vm4884_vm12, %v4872_v14, %v4896_v58  ;;  %v4851_v8 = vmul.f32 %v17746_v10, %v4831_v4  ;;  %v4832_v36 = vadd.f32 %v14681_v43, %v17741_v37  ;;  %v4777_v56 = vpop.f32.mrb[19].mxu0  ;;  %v4868_v58 = vunpack.c.h.bf16 %v17503_v55 }
 0x51b   :  { %v4918_v54 = vpack.c.bf16 %v4908_v49, %v4907_v9  ;;  %v4906_v63 = vsel %vm4882_vm13, %v4870_v35, %v4894_v1  ;;  %v4849_v17 = vmul.f32 %v17746_v10, %v4829_v40  ;;  %v4830_v5 = vadd.f32 %v17741_v37, %v4777_v56 }
 0x51c   :  { %v4917_v60 = vpack.c.bf16 %v4906_v63, %v4905_v3  ;;  %v4875_v59 = vadd.f32 %v4863_v27, %v4851_v8  ;;  %v4852_v25 = vmul.f32 %v17746_v10, %v4832_v36  ;;  %v4866_v9 = vunpack.c.h.bf16 %v17446_v62 }
 0x51d   :  { %v4924_v42 = vmul.bf16 %v16828_v45, %v4918_v54  ;;  %v4873_v12 = vadd.f32 %v4861_v15, %v4849_v17  ;;  %v4850_v23 = vmul.f32 %v17746_v10, %v4830_v5  ;;  %v4960_v55 = vor.u32 %v17781_v20, %v17777_v46  ;;  %v16235_v20 = vld [vmem:[%s20008_s1 + $0x1f8] sm:$0xff]  }
 0x51e   :  { %v4923_v21 = vmul.bf16 %v16830_v28, %v4917_v60  ;;  %vm4887_vm14 = vcmp.ge.f32.partialorder %v4875_v59, 0.0  ;;  %v4899_v6 = vmul.f32 0.2, %v4875_v59  ;;  %v4876_v61 = vadd.f32 %v4864_v52, %v4852_v25 }
 0x51f   :  { %4930 = vst.msk [vmem:[#allocation2 + $0x10] sm:$0xff] %vm19_vm0, %v4924_v42  ;;  %vm4885_vm15 = vcmp.ge.f32.partialorder %v4873_v12, 0.0  ;;  %v4897_v38 = vmul.f32 0.2, %v4873_v12  ;;  %v4874_v30 = vadd.f32 %v4862_v16, %v4850_v23  ;;  %v14684_v50 = vpop.f32.mrb[20].mxu0 }
 0x520   :  { %4929 = vst.msk [vmem:[#allocation2 + $0x8] sm:$0xff] %vm19_vm0, %v4923_v21  ;;  %vm4888_vm6 = vcmp.ge.f32.partialorder %v4876_v61, 0.0  ;;  %v4900_v18 = vmul.f32 0.2, %v4876_v61  ;;  %v4835_v31 = vadd.f32 %v14684_v50, %v17741_v37  ;;  %v4790_v22 = vpop.f32.mrb[21].mxu0  ;;  %v4911_v48 = vsel %vm4887_vm14, %v4875_v59, %v4899_v6 }
 0x521   :  { %vm4886_vm7 = vcmp.ge.f32.partialorder %v4874_v30, 0.0  ;;  %v4898_v13 = vmul.f32 0.2, %v4874_v30  ;;  %v4833_v11 = vadd.f32 %v17741_v37, %v4790_v22  ;;  %v14685_v7 = vpop.f32.mrb[22].mxu0  ;;  %v4909_v27 = vsel %vm4885_vm15, %v4873_v12, %v4897_v38 }
 0x522   :  { %v4912_v24 = vsel %vm4888_vm6, %v4876_v61, %v4900_v18  ;;  %v4855_v26 = vmul.f32 %v17746_v10, %v4835_v31  ;;  %v4836_v15 = vadd.f32 %v14685_v7, %v17741_v37  ;;  %v4793_v52 = vpop.f32.mrb[23].mxu0 }
 0x523   :  { %v4920_v51 = vpack.c.bf16 %v4912_v24, %v4911_v48  ;;  %v4910_v29 = vsel %vm4886_vm7, %v4874_v30, %v4898_v13  ;;  %v4853_v14 = vmul.f32 %v17746_v10, %v4833_v11  ;;  %v4834_v16 = vadd.f32 %v17741_v37, %v4793_v52 }
 0x524   :  { %v4919_v33 = vpack.c.bf16 %v4910_v29, %v4909_v27  ;;  %v4879_v35 = vadd.f32 %v4867_v44, %v4855_v26  ;;  %v4856_v19 = vmul.f32 %v17746_v10, %v4836_v15 }
 0x525   :  { %v4926_v4 = vmul.bf16 %v16841_v2, %v4920_v51  ;;  %v4877_v47 = vadd.f32 %v4865_v41, %v4853_v14  ;;  %v4854_v39 = vmul.f32 %v17746_v10, %v4834_v16  ;;  %v17863_v14 = vld [vmem:[%s20008_s1 + $0x1c0] sm:$0xff]  }
 0x526   :  { %v4925_v1 = vmul.bf16 %v16839_v34, %v4919_v33  ;;  %vm4891_vm8 = vcmp.ge.f32.partialorder %v4879_v35, 0.0  ;;  %v4903_v40 = vmul.f32 0.2, %v4879_v35  ;;  %v4880_v43 = vadd.f32 %v4868_v58, %v4856_v19  ;;  %v17795_v3 = vld [vmem:[#allocation2 + $0x10] sm:$0xff] }
 0x527   :  { %4932 = vst.msk [vmem:[#allocation2 + $0x20] sm:$0xff] %vm19_vm0, %v4926_v4  ;;  %v4901_v37 = vmul.f32 0.2, %v4877_v47  ;;  %v4878_v44 = vadd.f32 %v4866_v9, %v4854_v39  ;;  %v17798_v49 = vld [vmem:[#allocation2 + $0x8] sm:$0xff]  ;;  %v17803_v10 = vshrl.u32 %v17795_v3, 16  ;;  %vm4889_vm9 = vcmp.ge.f32.partialorder %v4877_v47, 0.0 }
 0x528   :  { %4931 = vst.msk [vmem:[#allocation2 + $0x18] sm:$0xff] %vm19_vm0, %v4925_v1  ;;  %vm4892_vm10 = vcmp.ge.f32.partialorder %v4880_v43, 0.0  ;;  %v4904_v62 = vmul.f32 0.2, %v4880_v43  ;;  %v17807_v8 = vshrl.u32 %v17798_v49, 16  ;;  %v4915_v36 = vsel %vm4891_vm8, %v4879_v35, %v4903_v40 }
 0x529   :  { %vm4890_vm11 = vcmp.ge.f32.partialorder %v4878_v44, 0.0  ;;  %v4902_v56 = vmul.f32 0.2, %v4878_v44  ;;  %v17810_v54 = vshll.u32 %v17798_v49, 16  ;;  %v4973_v5 = vrot.slane %v17803_v10, 3 }
 0x52a   :  { %v4916_v63 = vsel %vm4892_vm10, %v4880_v43, %v4904_v62  ;;  %v4964_v17 = vrot.slane %v17807_v8, 3  ;;  %v17815_v60 = vshll.u32 %v17795_v3, 16  ;;  %v4913_v59 = vsel %vm4889_vm9, %v4877_v47, %v4901_v37 }
 0x52b   :  { %v4922_v25 = vpack.c.bf16 %v4916_v63, %v4915_v36  ;;  %v4914_v0 = vsel %vm4890_vm11, %v4878_v44, %v4902_v56  ;;  %v4967_v42 = vrot.slane %v17810_v54, 4  ;;  %v5395_v6 = vrot.slane %v17807_v8, 4 }
 0x52c   :  { %v4921_v12 = vpack.c.bf16 %v4914_v0, %v4913_v59  ;;  %v4976_v23 = vrot.slane %v17815_v60, 4  ;;  %v5396_v61 = vrot.slane %v17810_v54, 5  ;;  %v5399_v48 = vrot.slane %v17803_v10, 4 }
 0x52d   :  { %v4928_v41 = vmul.bf16 %v16899_v32, %v4922_v25  ;;  %v4968_v21 = vor.u32 %v4967_v42, %v4964_v17  ;;  %v5400_v15 = vrot.slane %v17815_v60, 5  ;;  %v5560_v62 = vrot.slane %v17803_v10, 7 }
 0x52e   :  { %v4927_v38 = vmul.bf16 %v16934_v57, %v4921_v12  ;;  %v17823_v30 = vor.u32 %v4976_v23, %v4973_v5  ;;  %v17825_v50 = vld [vmem:[#allocation2 + $0x20] sm:$0xff]  ;;  %v17854_v26 = vor.u32 %v5396_v61, %v5395_v6 }
 0x52f   :  { %4934 = vst.msk [vmem:[#allocation2 + $0x30] sm:$0xff] %vm19_vm0, %v4928_v41  ;;  %v4969_v46 = vsel %vm108_vm1, %v4960_v55, %v4968_v21  ;;  %v17829_v18 = vld [vmem:[#allocation2 + $0x18] sm:$0xff]  ;;  %v17832_v31 = vshrl.u32 %v17825_v50, 16  ;;  %v17835_v22 = vshll.u32 %v17825_v50, 16  ;;  %v17865_v16 = vor.u32 %v5400_v15, %v5399_v48 }
 0x530   :  { %4933 = vst.msk [vmem:[#allocation2 + $0x28] sm:$0xff] %vm19_vm0, %v4927_v38  ;;  %14690 = vmatprep.mubr.msk.bf16.mxu1 %vm19_vm0, %v4969_v46  ;;  %v4978_v13 = vsel %vm108_vm1, %v4968_v21, %v17823_v30  ;;  %v17846_v11 = vshrl.u32 %v17829_v18, 16  ;;  %v17849_v7 = vshll.u32 %v17829_v18, 16  ;;  %v5557_v55 = vrot.slane %v17807_v8, 7 }
 0x531   :  { %14691 = vmatmul.mubr.msk.bf16.vlgmr.msra.gmra.mrb[12].mxu1 %vm19_vm0, %v4978_v13  ;;  %v4991_v27 = vrot.slane %v17832_v31, 3  ;;  %v4994_v24 = vrot.slane %v17835_v22, 4  ;;  %v5408_v58 = vrot.slane %v17835_v22, 5  ;;  %v17874_v4 = vsel %vm544_vm2, %v17854_v26, %v17865_v16 }
 0x532   :  { %14703 = vmatpush3.bf16.msra.mxu1 %v17735_v53  ;;  %v4982_v52 = vrot.slane %v17846_v11, 3  ;;  %v4985_v51 = vrot.slane %v17849_v7, 4  ;;  %v5403_v33 = vrot.slane %v17846_v11, 4  ;;  %v5404_v19 = vrot.slane %v17849_v7, 5 }
 0x533   :  { %v4995_v29 = vor.u32 %v4994_v24, %v4991_v27  ;;  %14704 = vmatprep.subr.bf16.mxu1 %v16235_v20  ;;  %v5407_v53 = vrot.slane %v17832_v31, 4  ;;  %v5563_v17 = vrot.slane %v17846_v11, 7  ;;  %v17913_v6 = vor.u32 %v5557_v55, %v17810_v54 }
 0x534   :  { %v4986_v35 = vor.u32 %v4985_v51, %v4982_v52  ;;  %v5405_v1 = vor.u32 %v5404_v19, %v5403_v33  ;;  %v5561_v61 = vor.u32 %v5560_v62, %v17815_v60  ;;  %v5719_v33 = vrot.slane %v17810_v54, 1 }
 0x535   :  { %v5409_v40 = vor.u32 %v5408_v58, %v5407_v53  ;;  %v5564_v38 = vor.u32 %v5563_v17, %v17849_v7  ;;  %v5724_v53 = vrot.slane %v17815_v60, 1  ;;  %v5732_v58 = vrot.slane %v17849_v7, 1 }
 0x536   :  { %v17878_v47 = vsel %vm108_vm1, %v17823_v30, %v4986_v35  ;;  %v17881_v39 = vsel %vm108_vm1, %v4986_v35, %v4995_v29  ;;  %14705 = vmatpush3.bf16.msra.mxu1 %v16235_v20  ;;  %v17883_v9 = vld [vmem:[#allocation2 + $0x30] sm:$0xf]  ;;  %v17900_v63 = vsel %vm544_vm2, %v17865_v16, %v5405_v1  ;;  %v5566_v20 = vrot.slane %v17832_v31, 7 }
 0x537   :  { %14694 = vmatprep.mubr.msk.bf16.mxu1 %vm19_vm0, %v17878_v47  ;;  %v17887_v43 = vld [vmem:[#allocation2 + $0x28] sm:$0xff]  ;;  %v5007_v37 = vshrl.u32 %v17883_v9, 16  ;;  %v5010_v44 = vshll.u32 %v17883_v9, 16  ;;  %14718 = vmatprep.subr.bf16.mxu1 %v17863_v14  ;;  %v17906_v25 = vsel %vm544_vm2, %v5405_v1, %v5409_v40  ;;  %v17928_v24 = vsel %vm711_vm3, %v5557_v55, %v5561_v61  ;;  %v17944_v35 = vld [vmem:[#allocation2 + $0x30] sm:$0xff] }
 0x538   :  { %v17895_v36 = vshrl.u32 %v17887_v43, 16  ;;  %v5001_v56 = vshll.u32 %v17887_v43, 16  ;;  %v17937_v52 = vsel %vm711_vm3, %v5560_v62, %v5564_v38  ;;  %v5567_v51 = vor.u32 %v5566_v20, %v17835_v22 }
 0x539   :  { %14695 = vmatmul.mubr.msk.bf16.gmra.mrb[16].mxu1 %vm19_vm0, %v17881_v39  ;;  %v5009_v5 = vrot.slane %v5007_v37, 3  ;;  %v5012_v59 = vrot.slane %v5010_v44, 4  ;;  %v5740_v54 = vrot.slane %v17835_v22, 1  ;;  %v5728_v37 = vor.u32 %v5724_v53, %v17803_v10 }
 0x53a   :  { %v5000_v0 = vrot.slane %v17895_v36, 3  ;;  %v5003_v42 = vrot.slane %v5001_v56, 4  ;;  %v5411_v23 = vrot.slane %v17895_v36, 4  ;;  %v5412_v41 = vrot.slane %v5001_v56, 5 }
 0x53b   :  { %v5013_v12 = vor.u32 %v5012_v59, %v5009_v5  ;;  %v5569_v48 = vrot.slane %v17895_v36, 7  ;;  %v17947_v19 = vsel %vm711_vm3, %v5563_v17, %v5567_v51  ;;  %v5736_v44 = vor.u32 %v5732_v58, %v17846_v11  ;;  %v16238_v59 = vld [vmem:[%s20008_s1 + $0x1d0] sm:$0xff]  }
 0x53c   :  { %v17910_v21 = vor.u32 %v5003_v42, %v5000_v0  ;;  %v17917_v46 = vor.u32 %v5412_v41, %v5411_v23  ;;  %v5748_v55 = vrot.slane %v5001_v56, 1  ;;  %v17961_v62 = vshrl.u32 %v17944_v35, 16 }
 0x53d   :  { %v5744_v7 = vor.u32 %v5740_v54, %v17832_v31  ;;  %v17968_v17 = vshll.u32 %v17944_v35, 16  ;;  %v17974_v22 = vsel %vm873_vm4, %v5736_v44, %v5740_v54  ;;  %v5246_v23 = vrot.slane %v17798_v49, 4 }
 0x53e   :  { %v17923_v13 = vsel %vm108_vm1, %v4995_v29, %v17910_v21  ;;  %v5014_v27 = vsel %vm108_vm1, %v17910_v21, %v5013_v12  ;;  %v17934_v15 = vsel %vm544_vm2, %v5409_v40, %v17917_v46  ;;  %v5570_v29 = vor.u32 %v5569_v48, %v5001_v56  ;;  %v16237_v56 = vld [vmem:[%s20008_s1 + $0x1c8] sm:$0xff]  }
 0x53f   :  { %14698 = vmatprep.mubr.msk.bf16.mxu1 %vm19_vm0, %v17923_v13  ;;  %v5720_v40 = vor.u32 %v5719_v33, %v17807_v8  ;;  %v17971_v8 = vsel %vm873_vm4, %v5728_v37, %v5732_v58  ;;  %v17977_v10 = vor.u32 %v5748_v55, %v17895_v36  ;;  %v17980_v11 = vsel %vm873_vm4, %v5744_v7, %v5748_v55  ;;  %v16246_v36 = vld [vmem:[%s20008_s1 + $0x220] sm:$0xff]  }
 0x540   :  { %v17954_v1 = vsel %vm711_vm3, %v5566_v20, %v5570_v29  ;;  %v6235_v31 = vrot.slane %v17961_v62, 4  ;;  %v6236_v5 = vrot.slane %v17968_v17, 5  ;;  %v18012_v61 = vrot.slane %v17795_v3, 4  ;;  %v16239_v20 = vld [vmem:[%s20008_s1 + $0x1d8] sm:$0xff]   ;;  %v16240_v29 = vld [vmem:[%s20008_s1 + $0x1e0] sm:$0xff]  }
 0x541   :  { %14699 = vmatmul.mubr.msk.bf16.gmra.mrb[20].mxu1 %vm19_vm0, %v5014_v27  ;;  %v17964_v60 = vsel %vm873_vm4, %v5720_v40, %v5724_v53  ;;  %v5250_v38 = vrot.slane %v17829_v18, 4  ;;  %v5252_v33 = vrot.slane %v17825_v50, 4  ;;  %v18032_v53 = vrot.slane %v17887_v43, 4 }
 0x542   :  { %14706 = vmatprep.mubr.msk.bf16.mxu1 %vm19_vm0, %v17798_v49  ;;  %v17995_v0 = vor.u32 %v6236_v5, %v6235_v31  ;;  %v5249_v27 = vsel %vm401_vm5, %v5246_v23, %v18012_v61  ;;  %v5256_v7 = vrot.slane %v17883_v9, 4  ;;  %v16242_v9 = vld [vmem:[%s20008_s1 + $0x200] sm:$0xff]  }
 0x543   :  { %v18023_v51 = vsel %vm401_vm5, %v18012_v61, %v5250_v38  ;;  %v18035_v54 = vsel %vm401_vm5, %v5250_v38, %v5252_v33  ;;  %v18041_v37 = vsel %vm401_vm5, %v5252_v33, %v18032_v53 }
 0x544   :  { %v18000_v42 = vsel %vm544_vm2, %v17917_v46, %v17995_v0  ;;  %v5257_v31 = vsel %vm401_vm5, %v18032_v53, %v5256_v7 }
 0x549   :  { %14707 = vmatmul.mubr.msk.bf16.vlgmr.msra.gmra.mrb[12].mxu1 %vm19_vm0, %v17795_v3 }
 0x54a   :  { %14710 = vmatprep.mubr.msk.bf16.mxu1 %vm19_vm0, %v17829_v18  ;;  %14719 = vmatpush3.bf16.msra.mxu1 %v17863_v14  ;;  %v5232_v14 = vld [vmem:[#allocation2] sm:$0xf0] }
 0x54b   :  { %14720 = vmatprep.subr.bf16.mxu1 %v16237_v56  ;;  %v5245_v12 = vrot.slane %v5232_v14, 4  ;;  %v5388_v58 = vshrl.u32 %v5232_v14, 16  ;;  %v5391_v40 = vshll.u32 %v5232_v14, 16  ;;  %v5381_v14 = vld [vmem:[#allocation2 + $0x30] sm:$0x1f] }
 0x54d   :  { %v5247_v41 = vsel %vm401_vm5, %v5245_v12, %v5246_v23  ;;  %v5390_v44 = vrot.slane %v5388_v58, 4  ;;  %v5393_v55 = vrot.slane %v5391_v40, 5  ;;  %v5419_v12 = vshll.u32 %v5381_v14, 16  ;;  %v5547_v23 = vld [vmem:[#allocation2] sm:$0x80]  ;;  %v16243_v58 = vld [vmem:[%s20008_s1 + $0x208] sm:$0xff]  }
 0x54e   :  { %14721 = vmatpush3.bf16.msra.mxu1 %v16237_v56  ;;  %v16245_v40 = vld [vmem:[%s20008_s1 + $0x218] sm:$0xff]  }
 0x54f   :  { %14734 = vmatprep.subr.bf16.mxu1 %v16238_v59  ;;  %v5394_v56 = vor.u32 %v5393_v55, %v5390_v44  ;;  %v5421_v38 = vrot.slane %v5419_v12, 5  ;;  %v5756_v44 = vrot.slane %v17968_v17, 1 }
 0x551   :  { %14711 = vmatmul.mubr.msk.bf16.gmra.mrb[16].mxu1 %vm19_vm0, %v17825_v50  ;;  %v5398_v5 = vsel %vm544_vm2, %v5394_v56, %v17854_v26  ;;  %v5416_v26 = vshrl.u32 %v5381_v14, 16  ;;  %v5760_v56 = vor.u32 %v5756_v44, %v17961_v62 }
 0x552   :  { %14714 = vmatprep.mubr.msk.bf16.mxu1 %vm19_vm0, %v17887_v43 }
 0x559   :  { %14715 = vmatmul.mubr.msk.bf16.gmra.mrb[20].mxu1 %vm19_vm0, %v17944_v35 }
 0x55a   :  { %14722 = vmatprep.mubr.msk.bf16.mxu1 %vm19_vm0, %v5247_v41  ;;  %v5418_v41 = vrot.slane %v5416_v26, 4  ;;  %v5890_v26 = vld [vmem:[#allocation2 + $0x38] sm:$0xf] }
 0x55b   :  { %v5925_v12 = vshrl.u32 %v5890_v26, 16 }
 0x561   :  { %14723 = vmatmul.mubr.msk.bf16.vlgmr.msra.gmra.mrb[12].mxu1 %vm19_vm0, %v5249_v27 }
 0x562   :  { %14726 = vmatprep.mubr.msk.bf16.mxu1 %vm19_vm0, %v18023_v51  ;;  %14735 = vmatpush3.bf16.msra.mxu1 %v16238_v59  ;;  %v16241_v59 = vld [vmem:[%s20008_s1 + $0x1e8] sm:$0xff]  }
 0x563   :  { %14736 = vmatprep.subr.bf16.mxu1 %v16239_v20 }
 0x566   :  { %14737 = vmatpush3.bf16.msra.mxu1 %v16239_v20  ;;  %v5422_v20 = vor.u32 %v5421_v38, %v5418_v41 }
 0x567   :  { %14750 = vmatprep.subr.bf16.mxu1 %v16240_v29 }
 0x569   :  { %14727 = vmatmul.mubr.msk.bf16.gmra.mrb[16].mxu1 %vm19_vm0, %v18035_v54 }
 0x56a   :  { %14730 = vmatprep.mubr.msk.bf16.mxu1 %vm19_vm0, %v18041_v37 }
 0x571   :  { %14731 = vmatmul.mubr.msk.bf16.gmra.mrb[20].mxu1 %vm19_vm0, %v5257_v31 }
 0x572   :  { %14738 = vmatprep.mubr.msk.bf16.mxu1 %vm19_vm0, %v5398_v5 }
 0x579   :  { %14739 = vmatmul.mubr.msk.bf16.vlgmr.msra.gmra.mrb[12].mxu1 %vm19_vm0, %v17874_v4  ;;  %v5554_v4 = vshrl.u32 %v5547_v23, 16  ;;  %v5928_v23 = vshll.u32 %v5890_v26, 16 }
 0x57a   :  { %14742 = vmatprep.mubr.msk.bf16.mxu1 %vm19_vm0, %v17900_v63  ;;  %14751 = vmatpush3.bf16.msra.mxu1 %v16240_v29  ;;  %v5423_v29 = vsel %vm544_vm2, %v17917_v46, %v5422_v20  ;;  %v16244_v46 = vld [vmem:[%s20008_s1 + $0x210] sm:$0xff]  }
 0x57b   :  { %14752 = vmatprep.subr.bf16.mxu1 %v16241_v59  ;;  %v5556_v27 = vrot.slane %v5554_v4, 7  ;;  %v5930_v38 = vrot.slane %v5928_v23, 4  ;;  %v6415_v23 = vunpack.c.l.bf16 %v17829_v18 }
 0x57d   :  { %v5559_v33 = vsel %vm711_vm3, %v5556_v27, %v17913_v6  ;;  %v5574_v6 = vrot.slane %v17961_v62, 7 }
 0x57e   :  { %14753 = vmatpush3.bf16.msra.mxu1 %v16241_v59 }
 0x57f   :  { %14766 = vmatprep.subr.bf16.mxu1 %v16242_v9 }
 0x581   :  { %14743 = vmatmul.mubr.msk.bf16.gmra.mrb[16].mxu1 %vm19_vm0, %v17906_v25 }
 0x582   :  { %14746 = vmatprep.mubr.msk.bf16.mxu1 %vm19_vm0, %v17934_v15 }
 0x589   :  { %14747 = vmatmul.mubr.msk.bf16.gmra.mrb[20].mxu1 %vm19_vm0, %v5423_v29 }
 0x58a   :  { %14754 = vmatprep.mubr.msk.bf16.mxu1 %vm19_vm0, %v5559_v33 }
 0x591   :  { %14755 = vmatmul.mubr.msk.bf16.vlgmr.msra.gmra.mrb[12].mxu1 %vm19_vm0, %v17928_v24  ;;  %v5577_v24 = vor.u32 %v17968_v17, %v5574_v6 }
 0x592   :  { %14758 = vmatprep.mubr.msk.bf16.mxu1 %vm19_vm0, %v17937_v52  ;;  %14767 = vmatpush3.bf16.msra.mxu1 %v16242_v9  ;;  %v5921_v9 = vrot.slane %v17968_v17, 4 }
 0x593   :  { %14768 = vmatprep.subr.bf16.mxu1 %v16243_v58  ;;  %v5578_v52 = vsel %vm711_vm3, %v5569_v48, %v5577_v24  ;;  %v5708_v48 = vld [vmem:[#allocation2 + $0x38] sm:$0x1] }
 0x594   :  { %v5762_v55 = vshll.u32 %v5708_v48, 16  ;;  %v18187_v48 = vld [vmem:[%s20010_s3 + $0x3] ss:$0 sm:$0xff] }
 0x596   :  { %14769 = vmatpush3.bf16.msra.mxu1 %v16243_v58  ;;  %v5764_v31 = vrot.slane %v5762_v55, 1 }
 0x597   :  { %14782 = vmatprep.subr.bf16.mxu1 %v16244_v46 }
 0x598   :  { %v5765_v59 = vsel %vm873_vm4, %v5760_v56, %v5764_v31 }
 0x599   :  { %14759 = vmatmul.mubr.msk.bf16.gmra.mrb[16].mxu1 %vm19_vm0, %v17947_v19  ;;  %v5889_v19 = vld [vmem:[#allocation2 + $0x8] sm:$0xf8] }
 0x59a   :  { %14762 = vmatprep.mubr.msk.bf16.mxu1 %vm19_vm0, %v17954_v1  ;;  %v5897_v1 = vshrl.u32 %v5889_v19, 16 }
 0x5a1   :  { %14763 = vmatmul.mubr.msk.bf16.gmra.mrb[20].mxu1 %vm19_vm0, %v5578_v52 }
 0x5a2   :  { %14770 = vmatprep.mubr.msk.bf16.mxu1 %vm19_vm0, %v17964_v60  ;;  %v5900_v60 = vshll.u32 %v5889_v19, 16 }
 0x5a4   :  { %v5902_v7 = vrot.slane %v5900_v60, 4 }
 0x5a9   :  { %14771 = vmatmul.mubr.msk.bf16.vlgmr.msra.gmra.mrb[12].mxu1 %vm19_vm0, %v17971_v8  ;;  %v5757_v8 = vsel %vm873_vm4, %v17977_v10, %v5756_v44  ;;  %v16247_v10 = vld [vmem:[%s20008_s1 + $0x228] sm:$0xff]  }
 0x5aa   :  { %14774 = vmatprep.mubr.msk.bf16.mxu1 %vm19_vm0, %v17974_v22  ;;  %14783 = vmatpush3.bf16.msra.mxu1 %v16244_v46  ;;  %v5899_v22 = vrot.slane %v5897_v1, 3 }
 0x5ab   :  { %14784 = vmatprep.subr.bf16.mxu1 %v16245_v40 }
 0x5ac   :  { %v5903_v5 = vor.u32 %v5902_v7, %v5899_v22  ;;  %v6413_v22 = vunpack.c.l.bf16 %v17795_v3 }
 0x5ae   :  { %14785 = vmatpush3.bf16.msra.mxu1 %v16245_v40  ;;  %v5907_v14 = vsel %vm108_vm1, %v5903_v5, %v17823_v30  ;;  %v16248_v30 = vld [vmem:[%s20008_s1 + $0x230] sm:$0xff]   ;;  %v6411_v5 = vunpack.c.l.bf16 %v17798_v49 }
 0x5af   :  { %14798 = vmatprep.subr.bf16.mxu1 %v16246_v36 }
 0x5b1   :  { %14775 = vmatmul.mubr.msk.bf16.gmra.mrb[16].mxu1 %vm19_vm0, %v17980_v11  ;;  %v5920_v11 = vrot.slane %v17961_v62, 3 }
 0x5b2   :  { %14778 = vmatprep.mubr.msk.bf16.mxu1 %vm19_vm0, %v5757_v8 }
 0x5b3   :  { %v5922_v41 = vor.u32 %v5921_v9, %v5920_v11  ;;  %v6412_v9 = vunpack.c.h.bf16 %v17798_v49  ;;  %v6421_v49 = vunpack.c.l.bf16 %v17944_v35 }
 0x5b5   :  { %v5923_v62 = vsel %vm108_vm1, %v17910_v21, %v5922_v41  ;;  %v6078_v21 = vrot.slane %v17944_v35, 4 }
 0x5b9   :  { %14779 = vmatmul.mubr.msk.bf16.gmra.mrb[20].mxu1 %vm19_vm0, %v5765_v59  ;;  %v6414_v59 = vunpack.c.h.bf16 %v17795_v3 }
 0x5ba   :  { %14786 = vmatprep.mubr.msk.bf16.mxu1 %vm19_vm0, %v5907_v14 }
 0x5c1   :  { %14787 = vmatmul.mubr.msk.bf16.vlgmr.msra.gmra.mrb[12].mxu1 %vm19_vm0, %v17878_v47  ;;  %v5927_v47 = vrot.slane %v5925_v12, 3 }
 0x5c2   :  { %14790 = vmatprep.mubr.msk.bf16.mxu1 %vm19_vm0, %v17881_v39  ;;  %14799 = vmatpush3.bf16.msra.mxu1 %v16246_v36  ;;  %v6056_v39 = vld [vmem:[#allocation2 + $0x8] sm:$0xf0] }
 0x5c3   :  { %14800 = vmatprep.subr.bf16.mxu1 %v16247_v10  ;;  %v5931_v17 = vor.u32 %v5930_v38, %v5927_v47  ;;  %v6069_v4 = vrot.slane %v6056_v39, 4  ;;  %v6212_v29 = vshrl.u32 %v6056_v39, 16  ;;  %v6215_v33 = vshll.u32 %v6056_v39, 16  ;;  %v6500_v47 = vld [vmem:[#allocation2] sm:$0xf8] }
 0x5c5   :  { %v5932_v20 = vsel %vm108_vm1, %v5922_v41, %v5931_v17  ;;  %v6071_v27 = vsel %vm401_vm5, %v6069_v4, %v18012_v61  ;;  %v6079_v61 = vsel %vm401_vm5, %v18032_v53, %v6078_v21  ;;  %v6214_v58 = vrot.slane %v6212_v29, 4 }
 0x5c6   :  { %14801 = vmatpush3.bf16.msra.mxu1 %v16247_v10  ;;  %v6217_v46 = vrot.slane %v6215_v33, 5  ;;  %v6418_v41 = vunpack.c.h.bf16 %v17825_v50 }
 0x5c7   :  { %14814 = vmatprep.subr.bf16.mxu1 %v16248_v30 }
 0x5c8   :  { %v6218_v6 = vor.u32 %v6217_v46, %v6214_v58 }
 0x5c9   :  { %14791 = vmatmul.mubr.msk.bf16.gmra.mrb[16].mxu1 %vm19_vm0, %v17923_v13  ;;  %v16249_v13 = vld [vmem:[%s20008_s1 + $0x238] sm:$0xff]  }
 0x5ca   :  { %14794 = vmatprep.mubr.msk.bf16.mxu1 %vm19_vm0, %v5923_v62  ;;  %v6222_v24 = vsel %vm544_vm2, %v6218_v6, %v17865_v16  ;;  %v6416_v62 = vunpack.c.h.bf16 %v17829_v18 }
 0x5d1   :  { %14795 = vmatmul.mubr.msk.bf16.gmra.mrb[20].mxu1 %vm19_vm0, %v5932_v20 }
 0x5d2   :  { %14802 = vmatprep.mubr.msk.bf16.mxu1 %vm19_vm0, %v6071_v27 }
 0x5d9   :  { %14803 = vmatmul.mubr.msk.bf16.vlgmr.msra.gmra.mrb[12].mxu1 %vm19_vm0, %v18023_v51  ;;  %v6080_v51 = vrot.slane %v5890_v26, 4  ;;  %v6417_v26 = vunpack.c.l.bf16 %v17825_v50 }
 0x5da   :  { %14806 = vmatprep.mubr.msk.bf16.mxu1 %vm19_vm0, %v18035_v54  ;;  %14815 = vmatpush3.bf16.msra.mxu1 %v16248_v30 }
 0x5db   :  { %14816 = vmatprep.subr.bf16.mxu1 %v16249_v13  ;;  %v6081_v54 = vsel %vm401_vm5, %v6078_v21, %v6080_v51  ;;  %v6508_v21 = vshrl.u32 %v6500_v47, 16 }
 0x5de   :  { %14817 = vmatpush3.bf16.msra.mxu1 %v16249_v13 }
 0x5e1   :  { %14807 = vmatmul.mubr.msk.bf16.gmra.mrb[16].mxu1 %vm19_vm0, %v18041_v37  ;;  %v6205_v37 = vld [vmem:[#allocation2 + $0x38] sm:$0x1f] }
 0x5e2   :  { %14810 = vmatprep.mubr.msk.bf16.mxu1 %vm19_vm0, %v6079_v61  ;;  %v6240_v53 = vshrl.u32 %v6205_v37, 16  ;;  %v6243_v52 = vshll.u32 %v6205_v37, 16 }
 0x5e4   :  { %v6242_v40 = vrot.slane %v6240_v53, 4  ;;  %v6245_v19 = vrot.slane %v6243_v52, 5 }
 0x5e6   :  { %v6246_v16 = vor.u32 %v6245_v19, %v6242_v40 }
 0x5e8   :  { %v6247_v36 = vsel %vm544_vm2, %v17995_v0, %v6246_v16  ;;  %v18182_v0 = vld [vmem:[%s20009_s2 + $0x3] ss:$0 sm:$0xff]  ;;  %v6511_v16 = vshll.u32 %v6500_v47, 16 }
 0x5e9   :  { %14811 = vmatmul.mubr.msk.bf16.gmra.mrb[20].mxu1 %vm19_vm0, %v6081_v54 }
 0x5ea   :  { %14818 = vmatprep.mubr.msk.bf16.mxu1 %vm19_vm0, %v6222_v24 }
 0x5f1   :  { %14819 = vmatmul.mubr.msk.bf16.vlgmr.msra.gmra.mrb[12].mxu1 %vm19_vm0, %v17900_v63  ;;  %v16250_v63 = vld [vmem:[%s20008_s1 + $0x240] sm:$0xff]  }
 0x5f2   :  { %14822 = vmatprep.mubr.msk.bf16.mxu1 %vm19_vm0, %v17906_v25  ;;  %14830 = vmatprep.subr.bf16.mxu0 %v16250_v63  ;;  %v16251_v25 = vld [vmem:[%s20008_s1 + $0x248] sm:$0xff]  }
 0x5f3   :  { %14831 = vmatpush3.bf16.msra.mxu0 %v16250_v63 }
 0x5f4   :  { %14832 = vmatprep.subr.bf16.mxu0 %v16251_v25 }
 0x5f7   :  { %14833 = vmatpush3.bf16.msra.mxu0 %v16251_v25 }
 0x5f9   :  { %14823 = vmatmul.mubr.msk.bf16.gmra.mrb[16].mxu1 %vm19_vm0, %v17934_v15  ;;  %v18176_v15 = vld [vmem:[%s20008_s1 + $0x280] sm:$0xff]  }
 0x5fa   :  { %14826 = vmatprep.mubr.msk.bf16.mxu1 %vm19_vm0, %v18000_v42  ;;  %14846 = vmatprep.subr.bf16.mxu0 %v18176_v15 }
 0x601   :  { %14827 = vmatmul.mubr.msk.bf16.gmra.mrb[20].mxu1 %vm19_vm0, %v6247_v36 }
 0x6c4   :  { %v14820_v42 = vpop.f32.mrb[12].mxu1 }
 0x6c5   :  { %v6381_v1 = vadd.f32 %v14820_v42, %v18182_v0  ;;  %v6312_v60 = vpop.f32.mrb[13].mxu1  ;;  %v6419_v42 = vunpack.c.l.bf16 %v17887_v43 }
 0x6c6   :  { %v6379_v44 = vadd.f32 %v18182_v0, %v6312_v60  ;;  %v14821_v55 = vpop.f32.mrb[14].mxu1 }
 0x6c7   :  { %v6401_v8 = vmul.f32 %v18187_v48, %v6381_v1  ;;  %v6382_v7 = vadd.f32 %v14821_v55, %v18182_v0  ;;  %v6315_v56 = vpop.f32.mrb[15].mxu1 }
 0x6c8   :  { %v6399_v31 = vmul.f32 %v18187_v48, %v6379_v44  ;;  %v6380_v14 = vadd.f32 %v18182_v0, %v6315_v56 }
 0x6c9   :  { %v6425_v10 = vadd.f32 %v6413_v22, %v6401_v8  ;;  %v6402_v11 = vmul.f32 %v18187_v48, %v6382_v7  ;;  %v18218_v7 = vrot.slane %v6508_v21, 3 }
 0x6ca   :  { %v6423_v30 = vadd.f32 %v6411_v5, %v6399_v31  ;;  %v6400_v12 = vmul.f32 %v18187_v48, %v6380_v14 }
 0x6cb   :  { %vm6437_vm12 = vcmp.ge.f32.partialorder %v6425_v10, 0.0  ;;  %v6449_v38 = vmul.f32 0.2, %v6425_v10  ;;  %v6426_v3 = vadd.f32 %v6414_v59, %v6402_v11  ;;  %v18222_v59 = vrot.slane %v6511_v16, 4 }
 0x6cc   :  { %vm6435_vm13 = vcmp.ge.f32.partialorder %v6423_v30, 0.0  ;;  %v6447_v39 = vmul.f32 0.2, %v6423_v30  ;;  %v6424_v17 = vadd.f32 %v6412_v9, %v6400_v12  ;;  %v14824_v4 = vpop.f32.mrb[16].mxu1 }
 0x6cd   :  { %vm6438_vm14 = vcmp.ge.f32.partialorder %v6426_v3, 0.0  ;;  %v6450_v20 = vmul.f32 0.2, %v6426_v3  ;;  %v6385_v27 = vadd.f32 %v14824_v4, %v18182_v0  ;;  %v6328_v13 = vpop.f32.mrb[17].mxu1  ;;  %v6461_v29 = vsel %vm6437_vm12, %v6425_v10, %v6449_v38 }
 0x6ce   :  { %vm6436_vm15 = vcmp.ge.f32.partialorder %v6424_v17, 0.0  ;;  %v6448_v50 = vmul.f32 0.2, %v6424_v17  ;;  %v6383_v33 = vadd.f32 %v18182_v0, %v6328_v13  ;;  %v14825_v61 = vpop.f32.mrb[18].mxu1  ;;  %v6459_v58 = vsel %vm6435_vm13, %v6423_v30, %v6447_v39 }
 0x6cf   :  { %v6462_v18 = vsel %vm6438_vm14, %v6426_v3, %v6450_v20  ;;  %v6405_v46 = vmul.f32 %v18187_v48, %v6385_v27  ;;  %v6386_v51 = vadd.f32 %v14825_v61, %v18182_v0  ;;  %v6331_v6 = vpop.f32.mrb[19].mxu1  ;;  %v6422_v20 = vunpack.c.h.bf16 %v17944_v35 }
 0x6d0   :  { %v6472_v54 = vpack.c.bf16 %v6462_v18, %v6461_v29  ;;  %v6460_v24 = vsel %vm6436_vm15, %v6424_v17, %v6448_v50  ;;  %v6403_v37 = vmul.f32 %v18187_v48, %v6383_v33  ;;  %v6384_v53 = vadd.f32 %v18182_v0, %v6331_v6 }
 0x6d1   :  { %v6471_v52 = vpack.c.bf16 %v6460_v24, %v6459_v58  ;;  %v6429_v40 = vadd.f32 %v6417_v26, %v6405_v46  ;;  %v6406_v19 = vmul.f32 %v18187_v48, %v6386_v51  ;;  %v6420_v29 = vunpack.c.h.bf16 %v17887_v43 }
 0x6d2   :  { %v6478_v36 = vmul.bf16 %v16828_v45, %v6472_v54  ;;  %v6427_v63 = vadd.f32 %v6415_v23, %v6403_v37  ;;  %v6404_v25 = vmul.f32 %v18187_v48, %v6384_v53  ;;  %v6514_v35 = vor.u32 %v18222_v59, %v18218_v7  ;;  %v16253_v59 = vld [vmem:[%s20008_s1 + $0x288] sm:$0xff]  }
 0x6d3   :  { %v6477_v1 = vmul.bf16 %v16830_v28, %v6471_v52  ;;  %vm6441_vm6 = vcmp.ge.f32.partialorder %v6429_v40, 0.0  ;;  %v6453_v60 = vmul.f32 0.2, %v6429_v40  ;;  %v6430_v44 = vadd.f32 %v6418_v41, %v6406_v19 }
 0x6d4   :  { %6484 = vst.msk [vmem:[#allocation2 + $0x10] sm:$0xff] %vm19_vm0, %v6478_v36  ;;  %vm6439_vm7 = vcmp.ge.f32.partialorder %v6427_v63, 0.0  ;;  %v6451_v55 = vmul.f32 0.2, %v6427_v63  ;;  %v6428_v8 = vadd.f32 %v6416_v62, %v6404_v25  ;;  %v14828_v22 = vpop.f32.mrb[20].mxu1 }
 0x6d5   :  { %6483 = vst.msk [vmem:[#allocation2 + $0x8] sm:$0xff] %vm19_vm0, %v6477_v1  ;;  %vm6442_vm8 = vcmp.ge.f32.partialorder %v6430_v44, 0.0  ;;  %v6454_v56 = vmul.f32 0.2, %v6430_v44  ;;  %v6389_v31 = vadd.f32 %v14828_v22, %v18182_v0  ;;  %v6344_v5 = vpop.f32.mrb[21].mxu1  ;;  %v6465_v14 = vsel %vm6441_vm6, %v6429_v40, %v6453_v60 }
 0x6d6   :  { %vm6440_vm9 = vcmp.ge.f32.partialorder %v6428_v8, 0.0  ;;  %v6452_v10 = vmul.f32 0.2, %v6428_v8  ;;  %v6387_v11 = vadd.f32 %v18182_v0, %v6344_v5  ;;  %v14829_v9 = vpop.f32.mrb[22].mxu1  ;;  %v6463_v26 = vsel %vm6439_vm7, %v6427_v63, %v6451_v55 }
 0x6d7   :  { %v6466_v30 = vsel %vm6442_vm8, %v6430_v44, %v6454_v56  ;;  %v6409_v12 = vmul.f32 %v18187_v48, %v6389_v31  ;;  %v6390_v23 = vadd.f32 %v14829_v9, %v18182_v0  ;;  %v6347_v41 = vpop.f32.mrb[23].mxu1 }
 0x6d8   :  { %v6474_v47 = vpack.c.bf16 %v6466_v30, %v6465_v14  ;;  %v6464_v38 = vsel %vm6440_vm9, %v6428_v8, %v6452_v10  ;;  %v6407_v3 = vmul.f32 %v18187_v48, %v6387_v11  ;;  %v6388_v62 = vadd.f32 %v18182_v0, %v6347_v41 }
 0x6d9   :  { %v6473_v39 = vpack.c.bf16 %v6464_v38, %v6463_v26  ;;  %v6433_v17 = vadd.f32 %v6421_v49, %v6409_v12  ;;  %v6410_v4 = vmul.f32 %v18187_v48, %v6390_v23 }
 0x6da   :  { %v6480_v27 = vmul.bf16 %v16841_v2, %v6474_v47  ;;  %v6431_v13 = vadd.f32 %v6419_v42, %v6407_v3  ;;  %v6408_v21 = vmul.f32 %v18187_v48, %v6388_v62  ;;  %v18304_v3 = vld [vmem:[%s20008_s1 + $0x250] sm:$0xff]  }
 0x6db   :  { %v6479_v50 = vmul.bf16 %v16839_v34, %v6473_v39  ;;  %vm6445_vm10 = vcmp.ge.f32.partialorder %v6433_v17, 0.0  ;;  %v6457_v33 = vmul.f32 0.2, %v6433_v17  ;;  %v6434_v61 = vadd.f32 %v6422_v20, %v6410_v4  ;;  %v18236_v58 = vld [vmem:[#allocation2 + $0x10] sm:$0xff] }
 0x6dc   :  { %6486 = vst.msk [vmem:[#allocation2 + $0x20] sm:$0xff] %vm19_vm0, %v6480_v27  ;;  %v6455_v0 = vmul.f32 0.2, %v6431_v13  ;;  %v6432_v49 = vadd.f32 %v6420_v29, %v6408_v21  ;;  %v18239_v18 = vld [vmem:[#allocation2 + $0x8] sm:$0xff]  ;;  %v18244_v48 = vshrl.u32 %v18236_v58, 16  ;;  %vm6443_vm11 = vcmp.ge.f32.partialorder %v6431_v13, 0.0 }
 0x6dd   :  { %6485 = vst.msk [vmem:[#allocation2 + $0x18] sm:$0xff] %vm19_vm0, %v6479_v50  ;;  %vm6446_vm12 = vcmp.ge.f32.partialorder %v6434_v61, 0.0  ;;  %v6458_v43 = vmul.f32 0.2, %v6434_v61  ;;  %v18248_v46 = vshrl.u32 %v18239_v18, 16  ;;  %v6469_v51 = vsel %vm6445_vm10, %v6433_v17, %v6457_v33 }
 0x6de   :  { %vm6444_vm13 = vcmp.ge.f32.partialorder %v6432_v49, 0.0  ;;  %v6456_v6 = vmul.f32 0.2, %v6432_v49  ;;  %v18251_v54 = vshll.u32 %v18239_v18, 16  ;;  %v6527_v53 = vrot.slane %v18244_v48, 3 }
 0x6df   :  { %v6470_v24 = vsel %vm6446_vm12, %v6434_v61, %v6458_v43  ;;  %v6518_v37 = vrot.slane %v18248_v46, 3  ;;  %v18256_v52 = vshll.u32 %v18236_v58, 16  ;;  %v6467_v40 = vsel %vm6443_vm11, %v6431_v13, %v6455_v0 }
 0x6e0   :  { %v6476_v19 = vpack.c.bf16 %v6470_v24, %v6469_v51  ;;  %v6468_v16 = vsel %vm6444_vm13, %v6432_v49, %v6456_v6  ;;  %v6521_v36 = vrot.slane %v18251_v54, 4  ;;  %v6949_v60 = vrot.slane %v18248_v46, 4 }
 0x6e1   :  { %v6475_v63 = vpack.c.bf16 %v6468_v16, %v6467_v40  ;;  %v6530_v25 = vrot.slane %v18256_v52, 4  ;;  %v6950_v44 = vrot.slane %v18251_v54, 5  ;;  %v6953_v14 = vrot.slane %v18244_v48, 4 }
 0x6e2   :  { %v6482_v42 = vmul.bf16 %v16899_v32, %v6476_v19  ;;  %v6522_v1 = vor.u32 %v6521_v36, %v6518_v37  ;;  %v6954_v23 = vrot.slane %v18256_v52, 5  ;;  %v7114_v43 = vrot.slane %v18244_v48, 7 }
 0x6e3   :  { %v6481_v55 = vmul.bf16 %v16934_v57, %v6475_v63  ;;  %v18264_v8 = vor.u32 %v6530_v25, %v6527_v53  ;;  %v18266_v22 = vld [vmem:[#allocation2 + $0x20] sm:$0xff]  ;;  %v18295_v12 = vor.u32 %v6950_v44, %v6949_v60 }
 0x6e4   :  { %6488 = vst.msk [vmem:[#allocation2 + $0x30] sm:$0xff] %vm19_vm0, %v6482_v42  ;;  %v6523_v7 = vsel %vm108_vm1, %v6514_v35, %v6522_v1  ;;  %v18270_v56 = vld [vmem:[#allocation2 + $0x18] sm:$0xff]  ;;  %v18273_v31 = vshrl.u32 %v18266_v22, 16  ;;  %v18276_v5 = vshll.u32 %v18266_v22, 16  ;;  %v18306_v62 = vor.u32 %v6954_v23, %v6953_v14 }
 0x6e5   :  { %6487 = vst.msk [vmem:[#allocation2 + $0x28] sm:$0xff] %vm19_vm0, %v6481_v55  ;;  %14834 = vmatprep.mubr.msk.bf16.mxu0 %vm19_vm0, %v6523_v7  ;;  %v6532_v10 = vsel %vm108_vm1, %v6522_v1, %v18264_v8  ;;  %v18287_v11 = vshrl.u32 %v18270_v56, 16  ;;  %v18290_v9 = vshll.u32 %v18270_v56, 16  ;;  %v7111_v35 = vrot.slane %v18248_v46, 7 }
 0x6e6   :  { %14835 = vmatmul.mubr.msk.bf16.vlgmr.msra.gmra.mrb[24].mxu0 %vm19_vm0, %v6532_v10  ;;  %v6545_v26 = vrot.slane %v18273_v31, 3  ;;  %v6548_v30 = vrot.slane %v18276_v5, 4  ;;  %v6962_v20 = vrot.slane %v18276_v5, 5  ;;  %v18315_v27 = vsel %vm544_vm2, %v18295_v12, %v18306_v62 }
 0x6e7   :  { %14847 = vmatpush3.bf16.msra.mxu0 %v18176_v15  ;;  %v6536_v41 = vrot.slane %v18287_v11, 3  ;;  %v6539_v47 = vrot.slane %v18290_v9, 4  ;;  %v6957_v39 = vrot.slane %v18287_v11, 4  ;;  %v6958_v4 = vrot.slane %v18290_v9, 5 }
 0x6e8   :  { %v6549_v38 = vor.u32 %v6548_v30, %v6545_v26  ;;  %14848 = vmatprep.subr.bf16.mxu0 %v16253_v59  ;;  %v6961_v15 = vrot.slane %v18273_v31, 4  ;;  %v7117_v37 = vrot.slane %v18287_v11, 7  ;;  %v18354_v60 = vor.u32 %v7111_v35, %v18251_v54 }
 0x6e9   :  { %v6540_v17 = vor.u32 %v6539_v47, %v6536_v41  ;;  %v6959_v50 = vor.u32 %v6958_v4, %v6957_v39  ;;  %v7115_v44 = vor.u32 %v7114_v43, %v18256_v52  ;;  %v7273_v39 = vrot.slane %v18251_v54, 1 }
 0x6ea   :  { %v6963_v33 = vor.u32 %v6962_v20, %v6961_v15  ;;  %v7118_v55 = vor.u32 %v7117_v37, %v18290_v9  ;;  %v7278_v15 = vrot.slane %v18256_v52, 1  ;;  %v7286_v20 = vrot.slane %v18290_v9, 1 }
 0x6eb   :  { %v18319_v13 = vsel %vm108_vm1, %v18264_v8, %v6540_v17  ;;  %v18322_v21 = vsel %vm108_vm1, %v6540_v17, %v6549_v38  ;;  %14849 = vmatpush3.bf16.msra.mxu0 %v16253_v59  ;;  %v18324_v29 = vld [vmem:[#allocation2 + $0x30] sm:$0xf]  ;;  %v18341_v24 = vsel %vm544_vm2, %v18306_v62, %v6959_v50  ;;  %v7120_v59 = vrot.slane %v18273_v31, 7 }
 0x6ec   :  { %14838 = vmatprep.mubr.msk.bf16.mxu0 %vm19_vm0, %v18319_v13  ;;  %v18328_v61 = vld [vmem:[#allocation2 + $0x28] sm:$0xff]  ;;  %v6561_v0 = vshrl.u32 %v18324_v29, 16  ;;  %v6564_v49 = vshll.u32 %v18324_v29, 16  ;;  %14862 = vmatprep.subr.bf16.mxu0 %v18304_v3  ;;  %v18347_v19 = vsel %vm544_vm2, %v6959_v50, %v6963_v33  ;;  %v18369_v30 = vsel %vm711_vm3, %v7111_v35, %v7115_v44  ;;  %v18385_v17 = vld [vmem:[#allocation2 + $0x30] sm:$0xff] }
 0x6ed   :  { %v18336_v51 = vshrl.u32 %v18328_v61, 16  ;;  %v6555_v6 = vshll.u32 %v18328_v61, 16  ;;  %v18378_v41 = vsel %vm711_vm3, %v7114_v43, %v7118_v55  ;;  %v7121_v47 = vor.u32 %v7120_v59, %v18276_v5 }
 0x6ee   :  { %14839 = vmatmul.mubr.msk.bf16.gmra.mrb[28].mxu0 %vm19_vm0, %v18322_v21  ;;  %v6563_v53 = vrot.slane %v6561_v0, 3  ;;  %v6566_v40 = vrot.slane %v6564_v49, 4  ;;  %v7294_v54 = vrot.slane %v18276_v5, 1  ;;  %v7282_v0 = vor.u32 %v7278_v15, %v18244_v48 }
 0x6ef   :  { %v6554_v16 = vrot.slane %v18336_v51, 3  ;;  %v6557_v36 = vrot.slane %v6555_v6, 4  ;;  %v6965_v25 = vrot.slane %v18336_v51, 4  ;;  %v6966_v42 = vrot.slane %v6555_v6, 5 }
 0x6f0   :  { %v6567_v63 = vor.u32 %v6566_v40, %v6563_v53  ;;  %v7123_v14 = vrot.slane %v18336_v51, 7  ;;  %v18388_v4 = vsel %vm711_vm3, %v7117_v37, %v7121_v47  ;;  %v7290_v49 = vor.u32 %v7286_v20, %v18287_v11  ;;  %v16256_v40 = vld [vmem:[%s20008_s1 + $0x260] sm:$0xff]  }
 0x6f1   :  { %v18351_v1 = vor.u32 %v6557_v36, %v6554_v16  ;;  %v18358_v7 = vor.u32 %v6966_v42, %v6965_v25  ;;  %v7302_v35 = vrot.slane %v6555_v6, 1  ;;  %v18402_v43 = vshrl.u32 %v18385_v17, 16 }
 0x6f2   :  { %v7298_v9 = vor.u32 %v7294_v54, %v18273_v31  ;;  %v18409_v37 = vshll.u32 %v18385_v17, 16  ;;  %v18415_v5 = vsel %vm873_vm4, %v7290_v49, %v7294_v54  ;;  %v6800_v25 = vrot.slane %v18239_v18, 4 }
 0x6f3   :  { %v18364_v10 = vsel %vm108_vm1, %v6549_v38, %v18351_v1  ;;  %v6568_v26 = vsel %vm108_vm1, %v18351_v1, %v6567_v63  ;;  %v18375_v23 = vsel %vm544_vm2, %v6963_v33, %v18358_v7  ;;  %v7124_v38 = vor.u32 %v7123_v14, %v6555_v6  ;;  %v16255_v6 = vld [vmem:[%s20008_s1 + $0x258] sm:$0xff]  }
 0x6f4   :  { %14842 = vmatprep.mubr.msk.bf16.mxu0 %vm19_vm0, %v18364_v10  ;;  %v7274_v33 = vor.u32 %v7273_v39, %v18248_v46  ;;  %v18412_v46 = vsel %vm873_vm4, %v7282_v0, %v7286_v20  ;;  %v18418_v48 = vor.u32 %v7302_v35, %v18336_v51  ;;  %v18421_v11 = vsel %vm873_vm4, %v7298_v9, %v7302_v35  ;;  %v16264_v51 = vld [vmem:[%s20008_s1 + $0x2b0] sm:$0xff]  }
 0x6f5   :  { %v18395_v50 = vsel %vm711_vm3, %v7120_v59, %v7124_v38  ;;  %v7789_v31 = vrot.slane %v18402_v43, 4  ;;  %v7790_v53 = vrot.slane %v18409_v37, 5  ;;  %v18453_v44 = vrot.slane %v18236_v58, 4  ;;  %v16257_v59 = vld [vmem:[%s20008_s1 + $0x268] sm:$0xff]   ;;  %v16258_v38 = vld [vmem:[%s20008_s1 + $0x270] sm:$0xff]  }
 0x6f6   :  { %14843 = vmatmul.mubr.msk.bf16.gmra.mrb[32].mxu0 %vm19_vm0, %v6568_v26  ;;  %v18405_v52 = vsel %vm873_vm4, %v7274_v33, %v7278_v15  ;;  %v6804_v55 = vrot.slane %v18270_v56, 4  ;;  %v6806_v39 = vrot.slane %v18266_v22, 4  ;;  %v18473_v15 = vrot.slane %v18328_v61, 4 }
 0x6f7   :  { %14850 = vmatprep.mubr.msk.bf16.mxu0 %vm19_vm0, %v18239_v18  ;;  %v18436_v16 = vor.u32 %v7790_v53, %v7789_v31  ;;  %v6803_v26 = vsel %vm401_vm5, %v6800_v25, %v18453_v44  ;;  %v6810_v9 = vrot.slane %v18324_v29, 4  ;;  %v16260_v29 = vld [vmem:[%s20008_s1 + $0x290] sm:$0xff]  }
 0x6f8   :  { %v18464_v47 = vsel %vm401_vm5, %v18453_v44, %v6804_v55  ;;  %v18476_v54 = vsel %vm401_vm5, %v6804_v55, %v6806_v39  ;;  %v18482_v0 = vsel %vm401_vm5, %v6806_v39, %v18473_v15 }
 0x6f9   :  { %v18441_v36 = vsel %vm544_vm2, %v18358_v7, %v18436_v16  ;;  %v6811_v31 = vsel %vm401_vm5, %v18473_v15, %v6810_v9 }
 0x6fe   :  { %14851 = vmatmul.mubr.msk.bf16.vlgmr.msra.gmra.mrb[24].mxu0 %vm19_vm0, %v18236_v58 }
 0x6ff   :  { %14854 = vmatprep.mubr.msk.bf16.mxu0 %vm19_vm0, %v18270_v56  ;;  %14863 = vmatpush3.bf16.msra.mxu0 %v18304_v3  ;;  %v6786_v3 = vld [vmem:[#allocation2] sm:$0xf0] }
 0x700   :  { %14864 = vmatprep.subr.bf16.mxu0 %v16255_v6  ;;  %v6799_v63 = vrot.slane %v6786_v3, 4  ;;  %v6942_v20 = vshrl.u32 %v6786_v3, 16  ;;  %v6945_v33 = vshll.u32 %v6786_v3, 16  ;;  %v6935_v3 = vld [vmem:[#allocation2 + $0x30] sm:$0x1f] }
 0x702   :  { %v6801_v42 = vsel %vm401_vm5, %v6799_v63, %v6800_v25  ;;  %v6944_v49 = vrot.slane %v6942_v20, 4  ;;  %v6947_v35 = vrot.slane %v6945_v33, 5  ;;  %v6973_v63 = vshll.u32 %v6935_v3, 16  ;;  %v7101_v25 = vld [vmem:[#allocation2] sm:$0x80]  ;;  %v16261_v20 = vld [vmem:[%s20008_s1 + $0x298] sm:$0xff]  }
 0x703   :  { %14865 = vmatpush3.bf16.msra.mxu0 %v16255_v6  ;;  %v16263_v33 = vld [vmem:[%s20008_s1 + $0x2a8] sm:$0xff]  }
 0x704   :  { %14878 = vmatprep.subr.bf16.mxu0 %v16256_v40  ;;  %v6948_v6 = vor.u32 %v6947_v35, %v6944_v49  ;;  %v6975_v55 = vrot.slane %v6973_v63, 5  ;;  %v7310_v49 = vrot.slane %v18409_v37, 1 }
 0x706   :  { %14855 = vmatmul.mubr.msk.bf16.gmra.mrb[28].mxu0 %vm19_vm0, %v18266_v22  ;;  %v6952_v53 = vsel %vm544_vm2, %v6948_v6, %v18295_v12  ;;  %v6970_v12 = vshrl.u32 %v6935_v3, 16  ;;  %v7314_v6 = vor.u32 %v7310_v49, %v18402_v43 }
 0x707   :  { %14858 = vmatprep.mubr.msk.bf16.mxu0 %vm19_vm0, %v18328_v61 }
 0x70e   :  { %14859 = vmatmul.mubr.msk.bf16.gmra.mrb[32].mxu0 %vm19_vm0, %v18385_v17 }
 0x70f   :  { %14866 = vmatprep.mubr.msk.bf16.mxu0 %vm19_vm0, %v6801_v42  ;;  %v6972_v42 = vrot.slane %v6970_v12, 4  ;;  %v7444_v12 = vld [vmem:[#allocation2 + $0x38] sm:$0xf] }
 0x710   :  { %v7479_v63 = vshrl.u32 %v7444_v12, 16 }
 0x716   :  { %14867 = vmatmul.mubr.msk.bf16.vlgmr.msra.gmra.mrb[24].mxu0 %vm19_vm0, %v6803_v26 }
 0x717   :  { %14870 = vmatprep.mubr.msk.bf16.mxu0 %vm19_vm0, %v18464_v47  ;;  %14879 = vmatpush3.bf16.msra.mxu0 %v16256_v40  ;;  %v16259_v40 = vld [vmem:[%s20008_s1 + $0x278] sm:$0xff]  }
 0x718   :  { %14880 = vmatprep.subr.bf16.mxu0 %v16257_v59 }
 0x71b   :  { %14881 = vmatpush3.bf16.msra.mxu0 %v16257_v59  ;;  %v6976_v59 = vor.u32 %v6975_v55, %v6972_v42 }
 0x71c   :  { %14894 = vmatprep.subr.bf16.mxu0 %v16258_v38 }
 0x71e   :  { %14871 = vmatmul.mubr.msk.bf16.gmra.mrb[28].mxu0 %vm19_vm0, %v18476_v54 }
 0x71f   :  { %14874 = vmatprep.mubr.msk.bf16.mxu0 %vm19_vm0, %v18482_v0 }
 0x726   :  { %14875 = vmatmul.mubr.msk.bf16.gmra.mrb[32].mxu0 %vm19_vm0, %v6811_v31 }
 0x727   :  { %14882 = vmatprep.mubr.msk.bf16.mxu0 %vm19_vm0, %v6952_v53 }
 0x72e   :  { %14883 = vmatmul.mubr.msk.bf16.vlgmr.msra.gmra.mrb[24].mxu0 %vm19_vm0, %v18315_v27  ;;  %v7108_v27 = vshrl.u32 %v7101_v25, 16  ;;  %v7482_v25 = vshll.u32 %v7444_v12, 16 }
 0x72f   :  { %14886 = vmatprep.mubr.msk.bf16.mxu0 %vm19_vm0, %v18341_v24  ;;  %14895 = vmatpush3.bf16.msra.mxu0 %v16258_v38  ;;  %v6977_v38 = vsel %vm544_vm2, %v18358_v7, %v6976_v59  ;;  %v16262_v7 = vld [vmem:[%s20008_s1 + $0x2a0] sm:$0xff]  }
 0x730   :  { %14896 = vmatprep.subr.bf16.mxu0 %v16259_v40  ;;  %v7110_v26 = vrot.slane %v7108_v27, 7  ;;  %v7484_v55 = vrot.slane %v7482_v25, 4  ;;  %v7969_v25 = vunpack.c.l.bf16 %v18270_v56 }
 0x732   :  { %v7113_v39 = vsel %vm711_vm3, %v7110_v26, %v18354_v60  ;;  %v7128_v60 = vrot.slane %v18402_v43, 7 }
 0x733   :  { %14897 = vmatpush3.bf16.msra.mxu0 %v16259_v40 }
 0x734   :  { %14910 = vmatprep.subr.bf16.mxu0 %v16260_v29 }
 0x736   :  { %14887 = vmatmul.mubr.msk.bf16.gmra.mrb[28].mxu0 %vm19_vm0, %v18347_v19 }
 0x737   :  { %14890 = vmatprep.mubr.msk.bf16.mxu0 %vm19_vm0, %v18375_v23 }
 0x73e   :  { %14891 = vmatmul.mubr.msk.bf16.gmra.mrb[32].mxu0 %vm19_vm0, %v6977_v38 }
 0x73f   :  { %14898 = vmatprep.mubr.msk.bf16.mxu0 %vm19_vm0, %v7113_v39 }
 0x746   :  { %14899 = vmatmul.mubr.msk.bf16.vlgmr.msra.gmra.mrb[24].mxu0 %vm19_vm0, %v18369_v30  ;;  %v7131_v30 = vor.u32 %v18409_v37, %v7128_v60 }
 0x747   :  { %14902 = vmatprep.mubr.msk.bf16.mxu0 %vm19_vm0, %v18378_v41  ;;  %14911 = vmatpush3.bf16.msra.mxu0 %v16260_v29  ;;  %v7475_v29 = vrot.slane %v18409_v37, 4 }
 0x748   :  { %14912 = vmatprep.subr.bf16.mxu0 %v16261_v20  ;;  %v7132_v41 = vsel %vm711_vm3, %v7123_v14, %v7131_v30  ;;  %v7262_v14 = vld [vmem:[#allocation2 + $0x38] sm:$0x1] }
 0x749   :  { %v7316_v35 = vshll.u32 %v7262_v14, 16  ;;  %v18628_v14 = vld [vmem:[%s20010_s3 + $0x4] ss:$0 sm:$0xff] }
 0x74b   :  { %14913 = vmatpush3.bf16.msra.mxu0 %v16261_v20  ;;  %v7318_v31 = vrot.slane %v7316_v35, 1 }
 0x74c   :  { %14926 = vmatprep.subr.bf16.mxu0 %v16262_v7 }
 0x74d   :  { %v7319_v40 = vsel %vm873_vm4, %v7314_v6, %v7318_v31 }
 0x74e   :  { %14903 = vmatmul.mubr.msk.bf16.gmra.mrb[28].mxu0 %vm19_vm0, %v18388_v4  ;;  %v7443_v4 = vld [vmem:[#allocation2 + $0x8] sm:$0xf8] }
 0x74f   :  { %14906 = vmatprep.mubr.msk.bf16.mxu0 %vm19_vm0, %v18395_v50  ;;  %v7451_v50 = vshrl.u32 %v7443_v4, 16 }
 0x756   :  { %14907 = vmatmul.mubr.msk.bf16.gmra.mrb[32].mxu0 %vm19_vm0, %v7132_v41 }
 0x757   :  { %14914 = vmatprep.mubr.msk.bf16.mxu0 %vm19_vm0, %v18405_v52  ;;  %v7454_v52 = vshll.u32 %v7443_v4, 16 }
 0x759   :  { %v7456_v9 = vrot.slane %v7454_v52, 4 }
 0x75e   :  { %14915 = vmatmul.mubr.msk.bf16.vlgmr.msra.gmra.mrb[24].mxu0 %vm19_vm0, %v18412_v46  ;;  %v7311_v46 = vsel %vm873_vm4, %v18418_v48, %v7310_v49  ;;  %v16265_v48 = vld [vmem:[%s20008_s1 + $0x2b8] sm:$0xff]  }
 0x75f   :  { %14918 = vmatprep.mubr.msk.bf16.mxu0 %vm19_vm0, %v18415_v5  ;;  %14927 = vmatpush3.bf16.msra.mxu0 %v16262_v7  ;;  %v7453_v5 = vrot.slane %v7451_v50, 3 }
 0x760   :  { %14928 = vmatprep.subr.bf16.mxu0 %v16263_v33 }
 0x761   :  { %v7457_v53 = vor.u32 %v7456_v9, %v7453_v5  ;;  %v7967_v5 = vunpack.c.l.bf16 %v18236_v58 }
 0x763   :  { %14929 = vmatpush3.bf16.msra.mxu0 %v16263_v33  ;;  %v7461_v3 = vsel %vm108_vm1, %v7457_v53, %v18264_v8  ;;  %v16266_v8 = vld [vmem:[%s20008_s1 + $0x2c0] sm:$0xff]   ;;  %v7965_v53 = vunpack.c.l.bf16 %v18239_v18 }
 0x764   :  { %14942 = vmatprep.subr.bf16.mxu0 %v16264_v51 }
 0x766   :  { %14919 = vmatmul.mubr.msk.bf16.gmra.mrb[28].mxu0 %vm19_vm0, %v18421_v11  ;;  %v7474_v11 = vrot.slane %v18402_v43, 3 }
 0x767   :  { %14922 = vmatprep.mubr.msk.bf16.mxu0 %vm19_vm0, %v7311_v46 }
 0x768   :  { %v7476_v42 = vor.u32 %v7475_v29, %v7474_v11  ;;  %v7966_v29 = vunpack.c.h.bf16 %v18239_v18  ;;  %v7975_v18 = vunpack.c.l.bf16 %v18385_v17 }
 0x76a   :  { %v7477_v43 = vsel %vm108_vm1, %v18351_v1, %v7476_v42  ;;  %v7632_v1 = vrot.slane %v18385_v17, 4 }
 0x76e   :  { %14923 = vmatmul.mubr.msk.bf16.gmra.mrb[32].mxu0 %vm19_vm0, %v7319_v40  ;;  %v7968_v40 = vunpack.c.h.bf16 %v18236_v58 }
 0x76f   :  { %14930 = vmatprep.mubr.msk.bf16.mxu0 %vm19_vm0, %v7461_v3 }
 0x776   :  { %14931 = vmatmul.mubr.msk.bf16.vlgmr.msra.gmra.mrb[24].mxu0 %vm19_vm0, %v18319_v13  ;;  %v7481_v13 = vrot.slane %v7479_v63, 3 }
 0x777   :  { %14934 = vmatprep.mubr.msk.bf16.mxu0 %vm19_vm0, %v18322_v21  ;;  %14943 = vmatpush3.bf16.msra.mxu0 %v16264_v51  ;;  %v7610_v21 = vld [vmem:[#allocation2 + $0x8] sm:$0xf0] }
 0x778   :  { %14944 = vmatprep.subr.bf16.mxu0 %v16265_v48  ;;  %v7485_v37 = vor.u32 %v7484_v55, %v7481_v13  ;;  %v7623_v27 = vrot.slane %v7610_v21, 4  ;;  %v7766_v38 = vshrl.u32 %v7610_v21, 16  ;;  %v7769_v39 = vshll.u32 %v7610_v21, 16  ;;  %v8054_v13 = vld [vmem:[#allocation2] sm:$0xf8] }
 0x77a   :  { %v7486_v59 = vsel %vm108_vm1, %v7476_v42, %v7485_v37  ;;  %v7625_v26 = vsel %vm401_vm5, %v7623_v27, %v18453_v44  ;;  %v7633_v44 = vsel %vm401_vm5, %v18473_v15, %v7632_v1  ;;  %v7768_v20 = vrot.slane %v7766_v38, 4 }
 0x77b   :  { %14945 = vmatpush3.bf16.msra.mxu0 %v16265_v48  ;;  %v7771_v7 = vrot.slane %v7769_v39, 5  ;;  %v7972_v42 = vunpack.c.h.bf16 %v18266_v22 }
 0x77c   :  { %14958 = vmatprep.subr.bf16.mxu0 %v16266_v8 }
 0x77d   :  { %v7772_v60 = vor.u32 %v7771_v7, %v7768_v20 }
 0x77e   :  { %14935 = vmatmul.mubr.msk.bf16.gmra.mrb[28].mxu0 %vm19_vm0, %v18364_v10  ;;  %v16267_v10 = vld [vmem:[%s20008_s1 + $0x2c8] sm:$0xff]  }
 0x77f   :  { %14938 = vmatprep.mubr.msk.bf16.mxu0 %vm19_vm0, %v7477_v43  ;;  %v7776_v30 = vsel %vm544_vm2, %v7772_v60, %v18306_v62  ;;  %v7970_v43 = vunpack.c.h.bf16 %v18270_v56 }
 0x786   :  { %14939 = vmatmul.mubr.msk.bf16.gmra.mrb[32].mxu0 %vm19_vm0, %v7486_v59 }
 0x787   :  { %14946 = vmatprep.mubr.msk.bf16.mxu0 %vm19_vm0, %v7625_v26 }
 0x78e   :  { %14947 = vmatmul.mubr.msk.bf16.vlgmr.msra.gmra.mrb[24].mxu0 %vm19_vm0, %v18464_v47  ;;  %v7634_v47 = vrot.slane %v7444_v12, 4  ;;  %v7971_v12 = vunpack.c.l.bf16 %v18266_v22 }
 0x78f   :  { %14950 = vmatprep.mubr.msk.bf16.mxu0 %vm19_vm0, %v18476_v54  ;;  %14959 = vmatpush3.bf16.msra.mxu0 %v16266_v8 }
 0x790   :  { %14960 = vmatprep.subr.bf16.mxu0 %v16267_v10  ;;  %v7635_v54 = vsel %vm401_vm5, %v7632_v1, %v7634_v47  ;;  %v8062_v1 = vshrl.u32 %v8054_v13, 16 }
 0x793   :  { %14961 = vmatpush3.bf16.msra.mxu0 %v16267_v10 }
 0x796   :  { %14951 = vmatmul.mubr.msk.bf16.gmra.mrb[28].mxu0 %vm19_vm0, %v18482_v0  ;;  %v7759_v0 = vld [vmem:[#allocation2 + $0x38] sm:$0x1f] }
 0x797   :  { %14954 = vmatprep.mubr.msk.bf16.mxu0 %vm19_vm0, %v7633_v44  ;;  %v7794_v15 = vshrl.u32 %v7759_v0, 16  ;;  %v7797_v41 = vshll.u32 %v7759_v0, 16 }
 0x799   :  { %v7796_v33 = vrot.slane %v7794_v15, 4  ;;  %v7799_v4 = vrot.slane %v7797_v41, 5 }
 0x79b   :  { %v7800_v62 = vor.u32 %v7799_v4, %v7796_v33 }
 0x79d   :  { %v7801_v51 = vsel %vm544_vm2, %v18436_v16, %v7800_v62  ;;  %v18623_v16 = vld [vmem:[%s20009_s2 + $0x4] ss:$0 sm:$0xff]  ;;  %v8065_v62 = vshll.u32 %v8054_v13, 16 }
 0x79e   :  { %14955 = vmatmul.mubr.msk.bf16.gmra.mrb[32].mxu0 %vm19_vm0, %v7635_v54 }
 0x79f   :  { %14962 = vmatprep.mubr.msk.bf16.mxu0 %vm19_vm0, %v7776_v30 }
 0x7a6   :  { %14963 = vmatmul.mubr.msk.bf16.vlgmr.msra.gmra.mrb[24].mxu0 %vm19_vm0, %v18341_v24  ;;  %v16268_v24 = vld [vmem:[%s20008_s1 + $0x2d0] sm:$0xff]  }
 0x7a7   :  { %14966 = vmatprep.mubr.msk.bf16.mxu0 %vm19_vm0, %v18347_v19  ;;  %14974 = vmatprep.subr.bf16.mxu1 %v16268_v24  ;;  %v16269_v19 = vld [vmem:[%s20008_s1 + $0x2d8] sm:$0xff]  }
 0x7a8   :  { %14975 = vmatpush3.bf16.msra.mxu1 %v16268_v24 }
 0x7a9   :  { %14976 = vmatprep.subr.bf16.mxu1 %v16269_v19 }
 0x7ac   :  { %14977 = vmatpush3.bf16.msra.mxu1 %v16269_v19 }
 0x7ae   :  { %14967 = vmatmul.mubr.msk.bf16.gmra.mrb[28].mxu0 %vm19_vm0, %v18375_v23  ;;  %v18617_v23 = vld [vmem:[%s20008_s1 + $0x310] sm:$0xff]  }
 0x7af   :  { %14970 = vmatprep.mubr.msk.bf16.mxu0 %vm19_vm0, %v18441_v36  ;;  %14990 = vmatprep.subr.bf16.mxu1 %v18617_v23 }
 0x7b6   :  { %14971 = vmatmul.mubr.msk.bf16.gmra.mrb[32].mxu0 %vm19_vm0, %v7801_v51 }
 0x879   :  { %v14964_v36 = vpop.f32.mrb[24].mxu0 }
 0x87a   :  { %v7935_v50 = vadd.f32 %v14964_v36, %v18623_v16  ;;  %v7866_v52 = vpop.f32.mrb[25].mxu0  ;;  %v7973_v36 = vunpack.c.l.bf16 %v18328_v61 }
 0x87b   :  { %v7933_v49 = vadd.f32 %v18623_v16, %v7866_v52  ;;  %v14965_v35 = vpop.f32.mrb[26].mxu0 }
 0x87c   :  { %v7955_v46 = vmul.f32 %v18628_v14, %v7935_v50  ;;  %v7936_v9 = vadd.f32 %v14965_v35, %v18623_v16  ;;  %v7869_v6 = vpop.f32.mrb[27].mxu0 }
 0x87d   :  { %v7953_v31 = vmul.f32 %v18628_v14, %v7933_v49  ;;  %v7934_v3 = vadd.f32 %v18623_v16, %v7869_v6 }
 0x87e   :  { %v7979_v48 = vadd.f32 %v7967_v5, %v7955_v46  ;;  %v7956_v11 = vmul.f32 %v18628_v14, %v7936_v9  ;;  %v18659_v9 = vrot.slane %v8062_v1, 3 }
 0x87f   :  { %v7977_v8 = vadd.f32 %v7965_v53, %v7953_v31  ;;  %v7954_v63 = vmul.f32 %v18628_v14, %v7934_v3 }
 0x880   :  { %vm7991_vm14 = vcmp.ge.f32.partialorder %v7979_v48, 0.0  ;;  %v8003_v55 = vmul.f32 0.2, %v7979_v48  ;;  %v7980_v58 = vadd.f32 %v7968_v40, %v7956_v11  ;;  %v18663_v40 = vrot.slane %v8065_v62, 4 }
 0x881   :  { %vm7989_vm15 = vcmp.ge.f32.partialorder %v7977_v8, 0.0  ;;  %v8001_v21 = vmul.f32 0.2, %v7977_v8  ;;  %v7978_v37 = vadd.f32 %v7966_v29, %v7954_v63  ;;  %v14968_v27 = vpop.f32.mrb[28].mxu0 }
 0x882   :  { %vm7992_vm6 = vcmp.ge.f32.partialorder %v7980_v58, 0.0  ;;  %v8004_v59 = vmul.f32 0.2, %v7980_v58  ;;  %v7939_v26 = vadd.f32 %v14968_v27, %v18623_v16  ;;  %v7882_v10 = vpop.f32.mrb[29].mxu0  ;;  %v8015_v38 = vsel %vm7991_vm14, %v7979_v48, %v8003_v55 }
 0x883   :  { %vm7990_vm7 = vcmp.ge.f32.partialorder %v7978_v37, 0.0  ;;  %v8002_v22 = vmul.f32 0.2, %v7978_v37  ;;  %v7937_v39 = vadd.f32 %v18623_v16, %v7882_v10  ;;  %v14969_v44 = vpop.f32.mrb[30].mxu0  ;;  %v8013_v20 = vsel %vm7989_vm15, %v7977_v8, %v8001_v21 }
 0x884   :  { %v8016_v56 = vsel %vm7992_vm6, %v7980_v58, %v8004_v59  ;;  %v7959_v7 = vmul.f32 %v18628_v14, %v7939_v26  ;;  %v7940_v47 = vadd.f32 %v14969_v44, %v18623_v16  ;;  %v7885_v60 = vpop.f32.mrb[31].mxu0  ;;  %v7976_v59 = vunpack.c.h.bf16 %v18385_v17 }
 0x885   :  { %v8026_v54 = vpack.c.bf16 %v8016_v56, %v8015_v38  ;;  %v8014_v30 = vsel %vm7990_vm7, %v7978_v37, %v8002_v22  ;;  %v7957_v0 = vmul.f32 %v18628_v14, %v7937_v39  ;;  %v7938_v15 = vadd.f32 %v18623_v16, %v7885_v60 }
 0x886   :  { %v8025_v41 = vpack.c.bf16 %v8014_v30, %v8013_v20  ;;  %v7983_v33 = vadd.f32 %v7971_v12, %v7959_v7  ;;  %v7960_v4 = vmul.f32 %v18628_v14, %v7940_v47  ;;  %v7974_v38 = vunpack.c.h.bf16 %v18328_v61 }
 0x887   :  { %v8032_v51 = vmul.bf16 %v16828_v45, %v8026_v54  ;;  %v7981_v24 = vadd.f32 %v7969_v25, %v7957_v0  ;;  %v7958_v19 = vmul.f32 %v18628_v14, %v7938_v15  ;;  %v8068_v17 = vor.u32 %v18663_v40, %v18659_v9  ;;  %v16271_v40 = vld [vmem:[%s20008_s1 + $0x318] sm:$0xff]  }
 0x888   :  { %v8031_v50 = vmul.bf16 %v16830_v28, %v8025_v41  ;;  %vm7995_vm8 = vcmp.ge.f32.partialorder %v7983_v33, 0.0  ;;  %v8007_v52 = vmul.f32 0.2, %v7983_v33  ;;  %v7984_v49 = vadd.f32 %v7972_v42, %v7960_v4 }
 0x889   :  { %8038 = vst.msk [vmem:[#allocation2 + $0x10] sm:$0xff] %vm19_vm0, %v8032_v51  ;;  %vm7993_vm9 = vcmp.ge.f32.partialorder %v7981_v24, 0.0  ;;  %v8005_v35 = vmul.f32 0.2, %v7981_v24  ;;  %v7982_v46 = vadd.f32 %v7970_v43, %v7958_v19  ;;  %v14972_v5 = vpop.f32.mrb[32].mxu0 }
 0x88a   :  { %8037 = vst.msk [vmem:[#allocation2 + $0x8] sm:$0xff] %vm19_vm0, %v8031_v50  ;;  %vm7996_vm10 = vcmp.ge.f32.partialorder %v7984_v49, 0.0  ;;  %v8008_v6 = vmul.f32 0.2, %v7984_v49  ;;  %v7943_v31 = vadd.f32 %v14972_v5, %v18623_v16  ;;  %v7898_v53 = vpop.f32.mrb[33].mxu0  ;;  %v8019_v3 = vsel %vm7995_vm8, %v7983_v33, %v8007_v52 }
 0x88b   :  { %vm7994_vm11 = vcmp.ge.f32.partialorder %v7982_v46, 0.0  ;;  %v8006_v48 = vmul.f32 0.2, %v7982_v46  ;;  %v7941_v11 = vadd.f32 %v18623_v16, %v7898_v53  ;;  %v14973_v29 = vpop.f32.mrb[34].mxu0  ;;  %v8017_v12 = vsel %vm7993_vm9, %v7981_v24, %v8005_v35 }
 0x88c   :  { %v8020_v8 = vsel %vm7996_vm10, %v7984_v49, %v8008_v6  ;;  %v7963_v63 = vmul.f32 %v18628_v14, %v7943_v31  ;;  %v7944_v25 = vadd.f32 %v14973_v29, %v18623_v16  ;;  %v7901_v42 = vpop.f32.mrb[35].mxu0 }
 0x88d   :  { %v8028_v13 = vpack.c.bf16 %v8020_v8, %v8019_v3  ;;  %v8018_v55 = vsel %vm7994_vm11, %v7982_v46, %v8006_v48  ;;  %v7961_v58 = vmul.f32 %v18628_v14, %v7941_v11  ;;  %v7942_v43 = vadd.f32 %v18623_v16, %v7901_v42 }
 0x88e   :  { %v8027_v21 = vpack.c.bf16 %v8018_v55, %v8017_v12  ;;  %v7987_v37 = vadd.f32 %v7975_v18, %v7963_v63  ;;  %v7964_v27 = vmul.f32 %v18628_v14, %v7944_v25 }
 0x88f   :  { %v8034_v26 = vmul.bf16 %v16841_v2, %v8028_v13  ;;  %v7985_v10 = vadd.f32 %v7973_v36, %v7961_v58  ;;  %v7962_v1 = vmul.f32 %v18628_v14, %v7942_v43  ;;  %v18745_v58 = vld [vmem:[%s20008_s1 + $0x2e0] sm:$0xff]  }
 0x890   :  { %v8033_v22 = vmul.bf16 %v16839_v34, %v8027_v21  ;;  %vm7999_vm12 = vcmp.ge.f32.partialorder %v7987_v37, 0.0  ;;  %v8011_v39 = vmul.f32 0.2, %v7987_v37  ;;  %v7988_v44 = vadd.f32 %v7976_v59, %v7964_v27  ;;  %v18677_v20 = vld [vmem:[#allocation2 + $0x10] sm:$0xff] }
 0x891   :  { %8040 = vst.msk [vmem:[#allocation2 + $0x20] sm:$0xff] %vm19_vm0, %v8034_v26  ;;  %v8009_v16 = vmul.f32 0.2, %v7985_v10  ;;  %v7986_v18 = vadd.f32 %v7974_v38, %v7962_v1  ;;  %v18680_v56 = vld [vmem:[#allocation2 + $0x8] sm:$0xff]  ;;  %v18685_v14 = vshrl.u32 %v18677_v20, 16  ;;  %vm7997_vm13 = vcmp.ge.f32.partialorder %v7985_v10, 0.0 }
 0x892   :  { %8039 = vst.msk [vmem:[#allocation2 + $0x18] sm:$0xff] %vm19_vm0, %v8033_v22  ;;  %vm8000_vm14 = vcmp.ge.f32.partialorder %v7988_v44, 0.0  ;;  %v8012_v61 = vmul.f32 0.2, %v7988_v44  ;;  %v18689_v7 = vshrl.u32 %v18680_v56, 16  ;;  %v8023_v47 = vsel %vm7999_vm12, %v7987_v37, %v8011_v39 }
 0x893   :  { %vm7998_vm15 = vcmp.ge.f32.partialorder %v7986_v18, 0.0  ;;  %v8010_v60 = vmul.f32 0.2, %v7986_v18  ;;  %v18692_v54 = vshll.u32 %v18680_v56, 16  ;;  %v8081_v15 = vrot.slane %v18685_v14, 3 }
 0x894   :  { %v8024_v30 = vsel %vm8000_vm14, %v7988_v44, %v8012_v61  ;;  %v8072_v0 = vrot.slane %v18689_v7, 3  ;;  %v18697_v41 = vshll.u32 %v18677_v20, 16  ;;  %v8021_v33 = vsel %vm7997_vm13, %v7985_v10, %v8009_v16 }
 0x895   :  { %v8030_v4 = vpack.c.bf16 %v8024_v30, %v8023_v47  ;;  %v8022_v62 = vsel %vm7998_vm15, %v7986_v18, %v8010_v60  ;;  %v8075_v51 = vrot.slane %v18692_v54, 4  ;;  %v8503_v52 = vrot.slane %v18689_v7, 4 }
 0x896   :  { %v8029_v24 = vpack.c.bf16 %v8022_v62, %v8021_v33  ;;  %v8084_v19 = vrot.slane %v18697_v41, 4  ;;  %v8504_v49 = vrot.slane %v18692_v54, 5  ;;  %v8507_v3 = vrot.slane %v18685_v14, 4 }
 0x897   :  { %v8036_v36 = vmul.bf16 %v16899_v32, %v8030_v4  ;;  %v8076_v50 = vor.u32 %v8075_v51, %v8072_v0  ;;  %v8508_v25 = vrot.slane %v18697_v41, 5  ;;  %v8668_v61 = vrot.slane %v18685_v14, 7 }
 0x898   :  { %v8035_v35 = vmul.bf16 %v16934_v57, %v8029_v24  ;;  %v18705_v46 = vor.u32 %v8084_v19, %v8081_v15  ;;  %v18707_v5 = vld [vmem:[#allocation2 + $0x20] sm:$0xff]  ;;  %v18736_v63 = vor.u32 %v8504_v49, %v8503_v52 }
 0x899   :  { %8042 = vst.msk [vmem:[#allocation2 + $0x30] sm:$0xff] %vm19_vm0, %v8036_v36  ;;  %v8077_v9 = vsel %vm108_vm1, %v8068_v17, %v8076_v50  ;;  %v18711_v6 = vld [vmem:[#allocation2 + $0x18] sm:$0xff]  ;;  %v18714_v31 = vshrl.u32 %v18707_v5, 16  ;;  %v18717_v53 = vshll.u32 %v18707_v5, 16  ;;  %v18747_v43 = vor.u32 %v8508_v25, %v8507_v3 }
 0x89a   :  { %8041 = vst.msk [vmem:[#allocation2 + $0x28] sm:$0xff] %vm19_vm0, %v8035_v35  ;;  %14978 = vmatprep.mubr.msk.bf16.mxu1 %vm19_vm0, %v8077_v9  ;;  %v8086_v48 = vsel %vm108_vm1, %v8076_v50, %v18705_v46  ;;  %v18728_v11 = vshrl.u32 %v18711_v6, 16  ;;  %v18731_v29 = vshll.u32 %v18711_v6, 16  ;;  %v8665_v17 = vrot.slane %v18689_v7, 7 }
 0x89b   :  { %14979 = vmatmul.mubr.msk.bf16.vlgmr.msra.gmra.mrb[24].mxu1 %vm19_vm0, %v8086_v48  ;;  %v8099_v12 = vrot.slane %v18714_v31, 3  ;;  %v8102_v8 = vrot.slane %v18717_v53, 4  ;;  %v8516_v59 = vrot.slane %v18717_v53, 5  ;;  %v18756_v26 = vsel %vm544_vm2, %v18736_v63, %v18747_v43 }
 0x89c   :  { %14991 = vmatpush3.bf16.msra.mxu1 %v18617_v23  ;;  %v8090_v42 = vrot.slane %v18728_v11, 3  ;;  %v8093_v13 = vrot.slane %v18731_v29, 4  ;;  %v8511_v21 = vrot.slane %v18728_v11, 4  ;;  %v8512_v27 = vrot.slane %v18731_v29, 5 }
 0x89d   :  { %v8103_v55 = vor.u32 %v8102_v8, %v8099_v12  ;;  %14992 = vmatprep.subr.bf16.mxu1 %v16271_v40  ;;  %v8515_v23 = vrot.slane %v18714_v31, 4  ;;  %v8671_v0 = vrot.slane %v18728_v11, 7  ;;  %v18795_v52 = vor.u32 %v8665_v17, %v18692_v54 }
 0x89e   :  { %v8094_v37 = vor.u32 %v8093_v13, %v8090_v42  ;;  %v8513_v22 = vor.u32 %v8512_v27, %v8511_v21  ;;  %v8669_v49 = vor.u32 %v8668_v61, %v18697_v41  ;;  %v8827_v21 = vrot.slane %v18692_v54, 1 }
 0x89f   :  { %v8517_v39 = vor.u32 %v8516_v59, %v8515_v23  ;;  %v8672_v35 = vor.u32 %v8671_v0, %v18731_v29  ;;  %v8832_v23 = vrot.slane %v18697_v41, 1  ;;  %v8840_v59 = vrot.slane %v18731_v29, 1 }
 0x8a0   :  { %v18760_v10 = vsel %vm108_vm1, %v18705_v46, %v8094_v37  ;;  %v18763_v1 = vsel %vm108_vm1, %v8094_v37, %v8103_v55  ;;  %14993 = vmatpush3.bf16.msra.mxu1 %v16271_v40  ;;  %v18765_v38 = vld [vmem:[#allocation2 + $0x30] sm:$0xf]  ;;  %v18782_v30 = vsel %vm544_vm2, %v18747_v43, %v8513_v22  ;;  %v8674_v40 = vrot.slane %v18714_v31, 7 }
 0x8a1   :  { %14982 = vmatprep.mubr.msk.bf16.mxu1 %vm19_vm0, %v18760_v10  ;;  %v18769_v44 = vld [vmem:[#allocation2 + $0x28] sm:$0xff]  ;;  %v8115_v16 = vshrl.u32 %v18765_v38, 16  ;;  %v8118_v18 = vshll.u32 %v18765_v38, 16  ;;  %15006 = vmatprep.subr.bf16.mxu1 %v18745_v58  ;;  %v18788_v4 = vsel %vm544_vm2, %v8513_v22, %v8517_v39  ;;  %v18810_v8 = vsel %vm711_vm3, %v8665_v17, %v8669_v49  ;;  %v18826_v37 = vld [vmem:[#allocation2 + $0x30] sm:$0xff] }
 0x8a2   :  { %v18777_v47 = vshrl.u32 %v18769_v44, 16  ;;  %v8109_v60 = vshll.u32 %v18769_v44, 16  ;;  %v18819_v42 = vsel %vm711_vm3, %v8668_v61, %v8672_v35  ;;  %v8675_v13 = vor.u32 %v8674_v40, %v18717_v53 }
 0x8a3   :  { %14983 = vmatmul.mubr.msk.bf16.gmra.mrb[28].mxu1 %vm19_vm0, %v18763_v1  ;;  %v8117_v15 = vrot.slane %v8115_v16, 3  ;;  %v8120_v33 = vrot.slane %v8118_v18, 4  ;;  %v8848_v54 = vrot.slane %v18717_v53, 1  ;;  %v8836_v16 = vor.u32 %v8832_v23, %v18685_v14 }
 0x8a4   :  { %v8108_v62 = vrot.slane %v18777_v47, 3  ;;  %v8111_v51 = vrot.slane %v8109_v60, 4  ;;  %v8519_v19 = vrot.slane %v18777_v47, 4  ;;  %v8520_v36 = vrot.slane %v8109_v60, 5 }
 0x8a5   :  { %v8121_v24 = vor.u32 %v8120_v33, %v8117_v15  ;;  %v8677_v3 = vrot.slane %v18777_v47, 7  ;;  %v18829_v27 = vsel %vm711_vm3, %v8671_v0, %v8675_v13  ;;  %v8844_v18 = vor.u32 %v8840_v59, %v18728_v11  ;;  %v16274_v33 = vld [vmem:[%s20008_s1 + $0x2f0] sm:$0xff]  }
 0x8a6   :  { %v18792_v50 = vor.u32 %v8111_v51, %v8108_v62  ;;  %v18799_v9 = vor.u32 %v8520_v36, %v8519_v19  ;;  %v8856_v17 = vrot.slane %v8109_v60, 1  ;;  %v18843_v61 = vshrl.u32 %v18826_v37, 16 }
 0x8a7   :  { %v8852_v29 = vor.u32 %v8848_v54, %v18714_v31  ;;  %v18850_v0 = vshll.u32 %v18826_v37, 16  ;;  %v18856_v53 = vsel %vm873_vm4, %v8844_v18, %v8848_v54  ;;  %v8354_v19 = vrot.slane %v18680_v56, 4 }
 0x8a8   :  { %v18805_v48 = vsel %vm108_vm1, %v8103_v55, %v18792_v50  ;;  %v8122_v12 = vsel %vm108_vm1, %v18792_v50, %v8121_v24  ;;  %v18816_v25 = vsel %vm544_vm2, %v8517_v39, %v18799_v9  ;;  %v8678_v55 = vor.u32 %v8677_v3, %v8109_v60  ;;  %v16273_v60 = vld [vmem:[%s20008_s1 + $0x2e8] sm:$0xff]  }
 0x8a9   :  { %14986 = vmatprep.mubr.msk.bf16.mxu1 %vm19_vm0, %v18805_v48  ;;  %v8828_v39 = vor.u32 %v8827_v21, %v18689_v7  ;;  %v18853_v7 = vsel %vm873_vm4, %v8836_v16, %v8840_v59  ;;  %v18859_v14 = vor.u32 %v8856_v17, %v18777_v47  ;;  %v18862_v11 = vsel %vm873_vm4, %v8852_v29, %v8856_v17  ;;  %v16282_v47 = vld [vmem:[%s20008_s1 + $0x340] sm:$0xff]  }
 0x8aa   :  { %v18836_v22 = vsel %vm711_vm3, %v8674_v40, %v8678_v55  ;;  %v9343_v31 = vrot.slane %v18843_v61, 4  ;;  %v9344_v15 = vrot.slane %v18850_v0, 5  ;;  %v18894_v49 = vrot.slane %v18677_v20, 4  ;;  %v16275_v40 = vld [vmem:[%s20008_s1 + $0x2f8] sm:$0xff]   ;;  %v16276_v55 = vld [vmem:[%s20008_s1 + $0x300] sm:$0xff]  }
 0x8ab   :  { %14987 = vmatmul.mubr.msk.bf16.gmra.mrb[32].mxu1 %vm19_vm0, %v8122_v12  ;;  %v18846_v41 = vsel %vm873_vm4, %v8828_v39, %v8832_v23  ;;  %v8358_v35 = vrot.slane %v18711_v6, 4  ;;  %v8360_v21 = vrot.slane %v18707_v5, 4  ;;  %v18914_v23 = vrot.slane %v18769_v44, 4 }
 0x8ac   :  { %14994 = vmatprep.mubr.msk.bf16.mxu1 %vm19_vm0, %v18680_v56  ;;  %v18877_v62 = vor.u32 %v9344_v15, %v9343_v31  ;;  %v8357_v12 = vsel %vm401_vm5, %v8354_v19, %v18894_v49  ;;  %v8364_v29 = vrot.slane %v18765_v38, 4  ;;  %v16278_v38 = vld [vmem:[%s20008_s1 + $0x320] sm:$0xff]  }
 0x8ad   :  { %v18905_v13 = vsel %vm401_vm5, %v18894_v49, %v8358_v35  ;;  %v18917_v54 = vsel %vm401_vm5, %v8358_v35, %v8360_v21  ;;  %v18923_v16 = vsel %vm401_vm5, %v8360_v21, %v18914_v23 }
 0x8ae   :  { %v18882_v51 = vsel %vm544_vm2, %v18799_v9, %v18877_v62  ;;  %v8365_v31 = vsel %vm401_vm5, %v18914_v23, %v8364_v29 }
 0x8b3   :  { %14995 = vmatmul.mubr.msk.bf16.vlgmr.msra.gmra.mrb[24].mxu1 %vm19_vm0, %v18677_v20 }
 0x8b4   :  { %14998 = vmatprep.mubr.msk.bf16.mxu1 %vm19_vm0, %v18711_v6  ;;  %15007 = vmatpush3.bf16.msra.mxu1 %v18745_v58  ;;  %v8340_v58 = vld [vmem:[#allocation2] sm:$0xf0] }
 0x8b5   :  { %15008 = vmatprep.subr.bf16.mxu1 %v16273_v60  ;;  %v8353_v24 = vrot.slane %v8340_v58, 4  ;;  %v8496_v59 = vshrl.u32 %v8340_v58, 16  ;;  %v8499_v39 = vshll.u32 %v8340_v58, 16  ;;  %v8489_v58 = vld [vmem:[#allocation2 + $0x30] sm:$0x1f] }
 0x8b7   :  { %v8355_v36 = vsel %vm401_vm5, %v8353_v24, %v8354_v19  ;;  %v8498_v18 = vrot.slane %v8496_v59, 4  ;;  %v8501_v17 = vrot.slane %v8499_v39, 5  ;;  %v8527_v24 = vshll.u32 %v8489_v58, 16  ;;  %v8655_v19 = vld [vmem:[#allocation2] sm:$0x80]  ;;  %v16279_v59 = vld [vmem:[%s20008_s1 + $0x328] sm:$0xff]  }
 0x8b8   :  { %15009 = vmatpush3.bf16.msra.mxu1 %v16273_v60  ;;  %v16281_v39 = vld [vmem:[%s20008_s1 + $0x338] sm:$0xff]  }
 0x8b9   :  { %15022 = vmatprep.subr.bf16.mxu1 %v16274_v33  ;;  %v8502_v60 = vor.u32 %v8501_v17, %v8498_v18  ;;  %v8529_v35 = vrot.slane %v8527_v24, 5  ;;  %v8864_v18 = vrot.slane %v18850_v0, 1 }
 0x8bb   :  { %14999 = vmatmul.mubr.msk.bf16.gmra.mrb[28].mxu1 %vm19_vm0, %v18707_v5  ;;  %v8506_v15 = vsel %vm544_vm2, %v8502_v60, %v18736_v63  ;;  %v8524_v63 = vshrl.u32 %v8489_v58, 16  ;;  %v8868_v60 = vor.u32 %v8864_v18, %v18843_v61 }
 0x8bc   :  { %15002 = vmatprep.mubr.msk.bf16.mxu1 %vm19_vm0, %v18769_v44 }
 0x8c3   :  { %15003 = vmatmul.mubr.msk.bf16.gmra.mrb[32].mxu1 %vm19_vm0, %v18826_v37 }
 0x8c4   :  { %15010 = vmatprep.mubr.msk.bf16.mxu1 %vm19_vm0, %v8355_v36  ;;  %v8526_v36 = vrot.slane %v8524_v63, 4  ;;  %v8998_v63 = vld [vmem:[#allocation2 + $0x38] sm:$0xf] }
 0x8c5   :  { %v9033_v24 = vshrl.u32 %v8998_v63, 16 }
 0x8cb   :  { %15011 = vmatmul.mubr.msk.bf16.vlgmr.msra.gmra.mrb[24].mxu1 %vm19_vm0, %v8357_v12 }
 0x8cc   :  { %15014 = vmatprep.mubr.msk.bf16.mxu1 %vm19_vm0, %v18905_v13  ;;  %15023 = vmatpush3.bf16.msra.mxu1 %v16274_v33  ;;  %v16277_v33 = vld [vmem:[%s20008_s1 + $0x308] sm:$0xff]  }
 0x8cd   :  { %15024 = vmatprep.subr.bf16.mxu1 %v16275_v40 }
 0x8d0   :  { %15025 = vmatpush3.bf16.msra.mxu1 %v16275_v40  ;;  %v8530_v40 = vor.u32 %v8529_v35, %v8526_v36 }
 0x8d1   :  { %15038 = vmatprep.subr.bf16.mxu1 %v16276_v55 }
 0x8d3   :  { %15015 = vmatmul.mubr.msk.bf16.gmra.mrb[28].mxu1 %vm19_vm0, %v18917_v54 }
 0x8d4   :  { %15018 = vmatprep.mubr.msk.bf16.mxu1 %vm19_vm0, %v18923_v16 }
 0x8db   :  { %15019 = vmatmul.mubr.msk.bf16.gmra.mrb[32].mxu1 %vm19_vm0, %v8365_v31 }
 0x8dc   :  { %15026 = vmatprep.mubr.msk.bf16.mxu1 %vm19_vm0, %v8506_v15 }
 0x8e3   :  { %15027 = vmatmul.mubr.msk.bf16.vlgmr.msra.gmra.mrb[24].mxu1 %vm19_vm0, %v18756_v26  ;;  %v8662_v26 = vshrl.u32 %v8655_v19, 16  ;;  %v9036_v19 = vshll.u32 %v8998_v63, 16 }
 0x8e4   :  { %15030 = vmatprep.mubr.msk.bf16.mxu1 %vm19_vm0, %v18782_v30  ;;  %15039 = vmatpush3.bf16.msra.mxu1 %v16276_v55  ;;  %v8531_v55 = vsel %vm544_vm2, %v18799_v9, %v8530_v40  ;;  %v16280_v9 = vld [vmem:[%s20008_s1 + $0x330] sm:$0xff]  }
 0x8e5   :  { %15040 = vmatprep.subr.bf16.mxu1 %v16277_v33  ;;  %v8664_v12 = vrot.slane %v8662_v26, 7  ;;  %v9038_v35 = vrot.slane %v9036_v19, 4  ;;  %v9523_v19 = vunpack.c.l.bf16 %v18711_v6 }
 0x8e7   :  { %v8667_v21 = vsel %vm711_vm3, %v8664_v12, %v18795_v52  ;;  %v8682_v52 = vrot.slane %v18843_v61, 7 }
 0x8e8   :  { %15041 = vmatpush3.bf16.msra.mxu1 %v16277_v33 }
 0x8e9   :  { %15054 = vmatprep.subr.bf16.mxu1 %v16278_v38 }
 0x8eb   :  { %15031 = vmatmul.mubr.msk.bf16.gmra.mrb[28].mxu1 %vm19_vm0, %v18788_v4 }
 0x8ec   :  { %15034 = vmatprep.mubr.msk.bf16.mxu1 %vm19_vm0, %v18816_v25 }
 0x8f3   :  { %15035 = vmatmul.mubr.msk.bf16.gmra.mrb[32].mxu1 %vm19_vm0, %v8531_v55 }
 0x8f4   :  { %15042 = vmatprep.mubr.msk.bf16.mxu1 %vm19_vm0, %v8667_v21 }
 0x8fb   :  { %15043 = vmatmul.mubr.msk.bf16.vlgmr.msra.gmra.mrb[24].mxu1 %vm19_vm0, %v18810_v8  ;;  %v8685_v8 = vor.u32 %v18850_v0, %v8682_v52 }
 0x8fc   :  { %15046 = vmatprep.mubr.msk.bf16.mxu1 %vm19_vm0, %v18819_v42  ;;  %15055 = vmatpush3.bf16.msra.mxu1 %v16278_v38  ;;  %v9029_v38 = vrot.slane %v18850_v0, 4 }
 0x8fd   :  { %15056 = vmatprep.subr.bf16.mxu1 %v16279_v59  ;;  %v8686_v42 = vsel %vm711_vm3, %v8677_v3, %v8685_v8  ;;  %v8816_v3 = vld [vmem:[#allocation2 + $0x38] sm:$0x1] }
 0x8fe   :  { %v8870_v17 = vshll.u32 %v8816_v3, 16  ;;  %v19069_v3 = vld [vmem:[%s20010_s3 + $0x5] ss:$0 sm:$0xff] }
 0x900   :  { %15057 = vmatpush3.bf16.msra.mxu1 %v16279_v59  ;;  %v8872_v31 = vrot.slane %v8870_v17, 1 }
 0x901   :  { %15070 = vmatprep.subr.bf16.mxu1 %v16280_v9 }
 0x902   :  { %v8873_v33 = vsel %vm873_vm4, %v8868_v60, %v8872_v31 }
 0x903   :  { %15047 = vmatmul.mubr.msk.bf16.gmra.mrb[28].mxu1 %vm19_vm0, %v18829_v27  ;;  %v8997_v27 = vld [vmem:[#allocation2 + $0x8] sm:$0xf8] }
 0x904   :  { %15050 = vmatprep.mubr.msk.bf16.mxu1 %vm19_vm0, %v18836_v22  ;;  %v9005_v22 = vshrl.u32 %v8997_v27, 16 }
 0x90b   :  { %15051 = vmatmul.mubr.msk.bf16.gmra.mrb[32].mxu1 %vm19_vm0, %v8686_v42 }
 0x90c   :  { %15058 = vmatprep.mubr.msk.bf16.mxu1 %vm19_vm0, %v18846_v41  ;;  %v9008_v41 = vshll.u32 %v8997_v27, 16 }
 0x90e   :  { %v9010_v29 = vrot.slane %v9008_v41, 4 }
 0x913   :  { %15059 = vmatmul.mubr.msk.bf16.vlgmr.msra.gmra.mrb[24].mxu1 %vm19_vm0, %v18853_v7  ;;  %v8865_v7 = vsel %vm873_vm4, %v18859_v14, %v8864_v18  ;;  %v16283_v14 = vld [vmem:[%s20008_s1 + $0x348] sm:$0xff]  }
 0x914   :  { %15062 = vmatprep.mubr.msk.bf16.mxu1 %vm19_vm0, %v18856_v53  ;;  %15071 = vmatpush3.bf16.msra.mxu1 %v16280_v9  ;;  %v9007_v53 = vrot.slane %v9005_v22, 3 }
 0x915   :  { %15072 = vmatprep.subr.bf16.mxu1 %v16281_v39 }
 0x916   :  { %v9011_v15 = vor.u32 %v9010_v29, %v9007_v53  ;;  %v9521_v53 = vunpack.c.l.bf16 %v18677_v20 }
 0x918   :  { %15073 = vmatpush3.bf16.msra.mxu1 %v16281_v39  ;;  %v9015_v58 = vsel %vm108_vm1, %v9011_v15, %v18705_v46  ;;  %v16284_v46 = vld [vmem:[%s20008_s1 + $0x350] sm:$0xff]   ;;  %v9519_v15 = vunpack.c.l.bf16 %v18680_v56 }
 0x919   :  { %15086 = vmatprep.subr.bf16.mxu1 %v16282_v47 }
 0x91b   :  { %15063 = vmatmul.mubr.msk.bf16.gmra.mrb[28].mxu1 %vm19_vm0, %v18862_v11  ;;  %v9028_v11 = vrot.slane %v18843_v61, 3 }
 0x91c   :  { %15066 = vmatprep.mubr.msk.bf16.mxu1 %vm19_vm0, %v8865_v7 }
 0x91d   :  { %v9030_v36 = vor.u32 %v9029_v38, %v9028_v11  ;;  %v9520_v38 = vunpack.c.h.bf16 %v18680_v56  ;;  %v9529_v56 = vunpack.c.l.bf16 %v18826_v37 }
 0x91f   :  { %v9031_v61 = vsel %vm108_vm1, %v18792_v50, %v9030_v36  ;;  %v9186_v50 = vrot.slane %v18826_v37, 4 }
 0x923   :  { %15067 = vmatmul.mubr.msk.bf16.gmra.mrb[32].mxu1 %vm19_vm0, %v8873_v33  ;;  %v9522_v33 = vunpack.c.h.bf16 %v18677_v20 }
 0x924   :  { %15074 = vmatprep.mubr.msk.bf16.mxu1 %vm19_vm0, %v9015_v58 }
 0x92b   :  { %15075 = vmatmul.mubr.msk.bf16.vlgmr.msra.gmra.mrb[24].mxu1 %vm19_vm0, %v18760_v10  ;;  %v9035_v10 = vrot.slane %v9033_v24, 3 }
 0x92c   :  { %15078 = vmatprep.mubr.msk.bf16.mxu1 %vm19_vm0, %v18763_v1  ;;  %15087 = vmatpush3.bf16.msra.mxu1 %v16282_v47  ;;  %v9164_v1 = vld [vmem:[#allocation2 + $0x8] sm:$0xf0] }
 0x92d   :  { %15088 = vmatprep.subr.bf16.mxu1 %v16283_v14  ;;  %v9039_v0 = vor.u32 %v9038_v35, %v9035_v10  ;;  %v9177_v26 = vrot.slane %v9164_v1, 4  ;;  %v9320_v55 = vshrl.u32 %v9164_v1, 16  ;;  %v9323_v21 = vshll.u32 %v9164_v1, 16  ;;  %v9608_v10 = vld [vmem:[#allocation2] sm:$0xf8] }
 0x92f   :  { %v9040_v40 = vsel %vm108_vm1, %v9030_v36, %v9039_v0  ;;  %v9179_v12 = vsel %vm401_vm5, %v9177_v26, %v18894_v49  ;;  %v9187_v49 = vsel %vm401_vm5, %v18914_v23, %v9186_v50  ;;  %v9322_v59 = vrot.slane %v9320_v55, 4 }
 0x930   :  { %15089 = vmatpush3.bf16.msra.mxu1 %v16283_v14  ;;  %v9325_v9 = vrot.slane %v9323_v21, 5  ;;  %v9526_v36 = vunpack.c.h.bf16 %v18707_v5 }
 0x931   :  { %15102 = vmatprep.subr.bf16.mxu1 %v16284_v46 }
 0x932   :  { %v9326_v52 = vor.u32 %v9325_v9, %v9322_v59 }
 0x933   :  { %15079 = vmatmul.mubr.msk.bf16.gmra.mrb[28].mxu1 %vm19_vm0, %v18805_v48  ;;  %v16285_v48 = vld [vmem:[%s20008_s1 + $0x358] sm:$0xff]  }
 0x934   :  { %15082 = vmatprep.mubr.msk.bf16.mxu1 %vm19_vm0, %v9031_v61  ;;  %v9330_v8 = vsel %vm544_vm2, %v9326_v52, %v18747_v43  ;;  %v9524_v61 = vunpack.c.h.bf16 %v18711_v6 }
 0x93b   :  { %15083 = vmatmul.mubr.msk.bf16.gmra.mrb[32].mxu1 %vm19_vm0, %v9040_v40 }
 0x93c   :  { %15090 = vmatprep.mubr.msk.bf16.mxu1 %vm19_vm0, %v9179_v12 }
 0x943   :  { %15091 = vmatmul.mubr.msk.bf16.vlgmr.msra.gmra.mrb[24].mxu1 %vm19_vm0, %v18905_v13  ;;  %v9188_v13 = vrot.slane %v8998_v63, 4  ;;  %v9525_v63 = vunpack.c.l.bf16 %v18707_v5 }
 0x944   :  { %15094 = vmatprep.mubr.msk.bf16.mxu1 %vm19_vm0, %v18917_v54  ;;  %15103 = vmatpush3.bf16.msra.mxu1 %v16284_v46 }
 0x945   :  { %15104 = vmatprep.subr.bf16.mxu1 %v16285_v48  ;;  %v9189_v54 = vsel %vm401_vm5, %v9186_v50, %v9188_v13  ;;  %v9616_v50 = vshrl.u32 %v9608_v10, 16 }
 0x948   :  { %15105 = vmatpush3.bf16.msra.mxu1 %v16285_v48 }
 0x94b   :  { %15095 = vmatmul.mubr.msk.bf16.gmra.mrb[28].mxu1 %vm19_vm0, %v18923_v16  ;;  %v9313_v16 = vld [vmem:[#allocation2 + $0x38] sm:$0x1f] }
 0x94c   :  { %15098 = vmatprep.mubr.msk.bf16.mxu1 %vm19_vm0, %v9187_v49  ;;  %v9348_v23 = vshrl.u32 %v9313_v16, 16  ;;  %v9351_v42 = vshll.u32 %v9313_v16, 16 }
 0x94e   :  { %v9350_v39 = vrot.slane %v9348_v23, 4  ;;  %v9353_v27 = vrot.slane %v9351_v42, 5 }
 0x950   :  { %v9354_v43 = vor.u32 %v9353_v27, %v9350_v39 }
 0x952   :  { %v9355_v47 = vsel %vm544_vm2, %v18877_v62, %v9354_v43  ;;  %v19064_v62 = vld [vmem:[%s20009_s2 + $0x5] ss:$0 sm:$0xff]  ;;  %v9619_v43 = vshll.u32 %v9608_v10, 16 }
 0x953   :  { %15099 = vmatmul.mubr.msk.bf16.gmra.mrb[32].mxu1 %vm19_vm0, %v9189_v54 }
 0x954   :  { %15106 = vmatprep.mubr.msk.bf16.mxu1 %vm19_vm0, %v9330_v8 }
 0x95b   :  { %15107 = vmatmul.mubr.msk.bf16.vlgmr.msra.gmra.mrb[24].mxu1 %vm19_vm0, %v18782_v30  ;;  %v16286_v30 = vld [vmem:[%s20008_s1 + $0x360] sm:$0xff]  }
 0x95c   :  { %15110 = vmatprep.mubr.msk.bf16.mxu1 %vm19_vm0, %v18788_v4  ;;  %15118 = vmatprep.subr.bf16.mxu0 %v16286_v30  ;;  %v16287_v4 = vld [vmem:[%s20008_s1 + $0x368] sm:$0xff]  }
 0x95d   :  { %15119 = vmatpush3.bf16.msra.mxu0 %v16286_v30 }
 0x95e   :  { %15120 = vmatprep.subr.bf16.mxu0 %v16287_v4 }
 0x961   :  { %15121 = vmatpush3.bf16.msra.mxu0 %v16287_v4 }
 0x963   :  { %15111 = vmatmul.mubr.msk.bf16.gmra.mrb[28].mxu1 %vm19_vm0, %v18816_v25  ;;  %v19058_v25 = vld [vmem:[%s20008_s1 + $0x3a0] sm:$0xff]  }
 0x964   :  { %15114 = vmatprep.mubr.msk.bf16.mxu1 %vm19_vm0, %v18882_v51  ;;  %15134 = vmatprep.subr.bf16.mxu0 %v19058_v25 }
 0x96b   :  { %15115 = vmatmul.mubr.msk.bf16.gmra.mrb[32].mxu1 %vm19_vm0, %v9355_v47 }
 0xa2e   :  { %v15108_v51 = vpop.f32.mrb[24].mxu1 }
 0xa2f   :  { %v9489_v22 = vadd.f32 %v15108_v51, %v19064_v62  ;;  %v9420_v41 = vpop.f32.mrb[25].mxu1  ;;  %v9527_v51 = vunpack.c.l.bf16 %v18769_v44 }
 0xa30   :  { %v9487_v18 = vadd.f32 %v19064_v62, %v9420_v41  ;;  %v15109_v17 = vpop.f32.mrb[26].mxu1 }
 0xa31   :  { %v9509_v7 = vmul.f32 %v19069_v3, %v9489_v22  ;;  %v9490_v29 = vadd.f32 %v15109_v17, %v19064_v62  ;;  %v9423_v60 = vpop.f32.mrb[27].mxu1 }
 0xa32   :  { %v9507_v31 = vmul.f32 %v19069_v3, %v9487_v18  ;;  %v9488_v58 = vadd.f32 %v19064_v62, %v9423_v60 }
 0xa33   :  { %v9533_v14 = vadd.f32 %v9521_v53, %v9509_v7  ;;  %v9510_v11 = vmul.f32 %v19069_v3, %v9490_v29  ;;  %v19100_v29 = vrot.slane %v9616_v50, 3 }
 0xa34   :  { %v9531_v46 = vadd.f32 %v9519_v15, %v9507_v31  ;;  %v9508_v24 = vmul.f32 %v19069_v3, %v9488_v58 }
 0xa35   :  { %vm9545_vm6 = vcmp.ge.f32.partialorder %v9533_v14, 0.0  ;;  %v9557_v35 = vmul.f32 0.2, %v9533_v14  ;;  %v9534_v20 = vadd.f32 %v9522_v33, %v9510_v11  ;;  %v19104_v33 = vrot.slane %v9619_v43, 4 }
 0xa36   :  { %vm9543_vm7 = vcmp.ge.f32.partialorder %v9531_v46, 0.0  ;;  %v9555_v1 = vmul.f32 0.2, %v9531_v46  ;;  %v9532_v0 = vadd.f32 %v9520_v38, %v9508_v24  ;;  %v15112_v26 = vpop.f32.mrb[28].mxu1 }
 0xa37   :  { %vm9546_vm8 = vcmp.ge.f32.partialorder %v9534_v20, 0.0  ;;  %v9558_v40 = vmul.f32 0.2, %v9534_v20  ;;  %v9493_v12 = vadd.f32 %v15112_v26, %v19064_v62  ;;  %v9436_v48 = vpop.f32.mrb[29].mxu1  ;;  %v9569_v55 = vsel %vm9545_vm6, %v9533_v14, %v9557_v35 }
 0xa38   :  { %vm9544_vm9 = vcmp.ge.f32.partialorder %v9532_v0, 0.0  ;;  %v9556_v5 = vmul.f32 0.2, %v9532_v0  ;;  %v9491_v21 = vadd.f32 %v19064_v62, %v9436_v48  ;;  %v15113_v49 = vpop.f32.mrb[30].mxu1  ;;  %v9567_v59 = vsel %vm9543_vm7, %v9531_v46, %v9555_v1 }
 0xa39   :  { %v9570_v6 = vsel %vm9546_vm8, %v9534_v20, %v9558_v40  ;;  %v9513_v9 = vmul.f32 %v19069_v3, %v9493_v12  ;;  %v9494_v13 = vadd.f32 %v15113_v49, %v19064_v62  ;;  %v9439_v52 = vpop.f32.mrb[31].mxu1  ;;  %v9530_v40 = vunpack.c.h.bf16 %v18826_v37 }
 0xa3a   :  { %v9580_v54 = vpack.c.bf16 %v9570_v6, %v9569_v55  ;;  %v9568_v8 = vsel %vm9544_vm9, %v9532_v0, %v9556_v5  ;;  %v9511_v16 = vmul.f32 %v19069_v3, %v9491_v21  ;;  %v9492_v23 = vadd.f32 %v19064_v62, %v9439_v52 }
 0xa3b   :  { %v9579_v42 = vpack.c.bf16 %v9568_v8, %v9567_v59  ;;  %v9537_v39 = vadd.f32 %v9525_v63, %v9513_v9  ;;  %v9514_v27 = vmul.f32 %v19069_v3, %v9494_v13  ;;  %v9528_v55 = vunpack.c.h.bf16 %v18769_v44 }
 0xa3c   :  { %v9586_v47 = vmul.bf16 %v16828_v45, %v9580_v54  ;;  %v9535_v30 = vadd.f32 %v9523_v19, %v9511_v16  ;;  %v9512_v4 = vmul.f32 %v19069_v3, %v9492_v23  ;;  %v9622_v37 = vor.u32 %v19104_v33, %v19100_v29  ;;  %v16289_v33 = vld [vmem:[%s20008_s1 + $0x3a8] sm:$0xff]  }
 0xa3d   :  { %v9585_v22 = vmul.bf16 %v16830_v28, %v9579_v42  ;;  %vm9549_vm10 = vcmp.ge.f32.partialorder %v9537_v39, 0.0  ;;  %v9561_v41 = vmul.f32 0.2, %v9537_v39  ;;  %v9538_v18 = vadd.f32 %v9526_v36, %v9514_v27 }
 0xa3e   :  { %9592 = vst.msk [vmem:[#allocation2 + $0x10] sm:$0xff] %vm19_vm0, %v9586_v47  ;;  %vm9547_vm11 = vcmp.ge.f32.partialorder %v9535_v30, 0.0  ;;  %v9559_v17 = vmul.f32 0.2, %v9535_v30  ;;  %v9536_v7 = vadd.f32 %v9524_v61, %v9512_v4  ;;  %v15116_v53 = vpop.f32.mrb[32].mxu1 }
 0xa3f   :  { %9591 = vst.msk [vmem:[#allocation2 + $0x8] sm:$0xff] %vm19_vm0, %v9585_v22  ;;  %vm9550_vm12 = vcmp.ge.f32.partialorder %v9538_v18, 0.0  ;;  %v9562_v60 = vmul.f32 0.2, %v9538_v18  ;;  %v9497_v31 = vadd.f32 %v15116_v53, %v19064_v62  ;;  %v9452_v15 = vpop.f32.mrb[33].mxu1  ;;  %v9573_v58 = vsel %vm9549_vm10, %v9537_v39, %v9561_v41 }
 0xa40   :  { %vm9548_vm13 = vcmp.ge.f32.partialorder %v9536_v7, 0.0  ;;  %v9560_v14 = vmul.f32 0.2, %v9536_v7  ;;  %v9495_v11 = vadd.f32 %v19064_v62, %v9452_v15  ;;  %v15117_v38 = vpop.f32.mrb[34].mxu1  ;;  %v9571_v63 = vsel %vm9547_vm11, %v9535_v30, %v9559_v17 }
 0xa41   :  { %v9574_v46 = vsel %vm9550_vm12, %v9538_v18, %v9562_v60  ;;  %v9517_v24 = vmul.f32 %v19069_v3, %v9497_v31  ;;  %v9498_v19 = vadd.f32 %v15117_v38, %v19064_v62  ;;  %v9455_v36 = vpop.f32.mrb[35].mxu1 }
 0xa42   :  { %v9582_v10 = vpack.c.bf16 %v9574_v46, %v9573_v58  ;;  %v9572_v35 = vsel %vm9548_vm13, %v9536_v7, %v9560_v14  ;;  %v9515_v20 = vmul.f32 %v19069_v3, %v9495_v11  ;;  %v9496_v61 = vadd.f32 %v19064_v62, %v9455_v36 }
 0xa43   :  { %v9581_v1 = vpack.c.bf16 %v9572_v35, %v9571_v63  ;;  %v9541_v0 = vadd.f32 %v9529_v56, %v9517_v24  ;;  %v9518_v26 = vmul.f32 %v19069_v3, %v9498_v19 }
 0xa44   :  { %v9588_v12 = vmul.bf16 %v16841_v2, %v9582_v10  ;;  %v9539_v48 = vadd.f32 %v9527_v51, %v9515_v20  ;;  %v9516_v50 = vmul.f32 %v19069_v3, %v9496_v61  ;;  %v19186_v20 = vld [vmem:[%s20008_s1 + $0x370] sm:$0xff]  }
 0xa45   :  { %v9587_v5 = vmul.bf16 %v16839_v34, %v9581_v1  ;;  %vm9553_vm14 = vcmp.ge.f32.partialorder %v9541_v0, 0.0  ;;  %v9565_v21 = vmul.f32 0.2, %v9541_v0  ;;  %v9542_v49 = vadd.f32 %v9530_v40, %v9518_v26  ;;  %v19118_v59 = vld [vmem:[#allocation2 + $0x10] sm:$0xff] }
 0xa46   :  { %9594 = vst.msk [vmem:[#allocation2 + $0x20] sm:$0xff] %vm19_vm0, %v9588_v12  ;;  %v9563_v62 = vmul.f32 0.2, %v9539_v48  ;;  %v9540_v56 = vadd.f32 %v9528_v55, %v9516_v50  ;;  %v19121_v6 = vld [vmem:[#allocation2 + $0x8] sm:$0xff]  ;;  %v19126_v3 = vshrl.u32 %v19118_v59, 16  ;;  %vm9551_vm15 = vcmp.ge.f32.partialorder %v9539_v48, 0.0 }
 0xa47   :  { %9593 = vst.msk [vmem:[#allocation2 + $0x18] sm:$0xff] %vm19_vm0, %v9587_v5  ;;  %vm9554_vm6 = vcmp.ge.f32.partialorder %v9542_v49, 0.0  ;;  %v9566_v44 = vmul.f32 0.2, %v9542_v49  ;;  %v19130_v9 = vshrl.u32 %v19121_v6, 16  ;;  %v9577_v13 = vsel %vm9553_vm14, %v9541_v0, %v9565_v21 }
 0xa48   :  { %vm9552_vm7 = vcmp.ge.f32.partialorder %v9540_v56, 0.0  ;;  %v9564_v52 = vmul.f32 0.2, %v9540_v56  ;;  %v19133_v54 = vshll.u32 %v19121_v6, 16  ;;  %v9635_v23 = vrot.slane %v19126_v3, 3 }
 0xa49   :  { %v9578_v8 = vsel %vm9554_vm6, %v9542_v49, %v9566_v44  ;;  %v9626_v16 = vrot.slane %v19130_v9, 3  ;;  %v19138_v42 = vshll.u32 %v19118_v59, 16  ;;  %v9575_v39 = vsel %vm9551_vm15, %v9539_v48, %v9563_v62 }
 0xa4a   :  { %v9584_v27 = vpack.c.bf16 %v9578_v8, %v9577_v13  ;;  %v9576_v43 = vsel %vm9552_vm7, %v9540_v56, %v9564_v52  ;;  %v9629_v47 = vrot.slane %v19133_v54, 4  ;;  %v10057_v41 = vrot.slane %v19130_v9, 4 }
 0xa4b   :  { %v9583_v30 = vpack.c.bf16 %v9576_v43, %v9575_v39  ;;  %v9638_v4 = vrot.slane %v19138_v42, 4  ;;  %v10058_v18 = vrot.slane %v19133_v54, 5  ;;  %v10061_v58 = vrot.slane %v19126_v3, 4 }
 0xa4c   :  { %v9590_v51 = vmul.bf16 %v16899_v32, %v9584_v27  ;;  %v9630_v22 = vor.u32 %v9629_v47, %v9626_v16  ;;  %v10062_v19 = vrot.slane %v19138_v42, 5  ;;  %v10222_v44 = vrot.slane %v19126_v3, 7 }
 0xa4d   :  { %v9589_v17 = vmul.bf16 %v16934_v57, %v9583_v30  ;;  %v19146_v7 = vor.u32 %v9638_v4, %v9635_v23  ;;  %v19148_v53 = vld [vmem:[#allocation2 + $0x20] sm:$0xff]  ;;  %v19177_v24 = vor.u32 %v10058_v18, %v10057_v41 }
 0xa4e   :  { %9596 = vst.msk [vmem:[#allocation2 + $0x30] sm:$0xff] %vm19_vm0, %v9590_v51  ;;  %v9631_v29 = vsel %vm108_vm1, %v9622_v37, %v9630_v22  ;;  %v19152_v60 = vld [vmem:[#allocation2 + $0x18] sm:$0xff]  ;;  %v19155_v31 = vshrl.u32 %v19148_v53, 16  ;;  %v19158_v15 = vshll.u32 %v19148_v53, 16  ;;  %v19188_v61 = vor.u32 %v10062_v19, %v10061_v58 }
 0xa4f   :  { %9595 = vst.msk [vmem:[#allocation2 + $0x28] sm:$0xff] %vm19_vm0, %v9589_v17  ;;  %15122 = vmatprep.mubr.msk.bf16.mxu0 %vm19_vm0, %v9631_v29  ;;  %v9640_v14 = vsel %vm108_vm1, %v9630_v22, %v19146_v7  ;;  %v19169_v11 = vshrl.u32 %v19152_v60, 16  ;;  %v19172_v38 = vshll.u32 %v19152_v60, 16  ;;  %v10219_v37 = vrot.slane %v19130_v9, 7 }
 0xa50   :  { %15123 = vmatmul.mubr.msk.bf16.vlgmr.msra.gmra.mrb[36].mxu0 %vm19_vm0, %v9640_v14  ;;  %v9653_v63 = vrot.slane %v19155_v31, 3  ;;  %v9656_v46 = vrot.slane %v19158_v15, 4  ;;  %v10070_v40 = vrot.slane %v19158_v15, 5  ;;  %v19197_v12 = vsel %vm544_vm2, %v19177_v24, %v19188_v61 }
 0xa51   :  { %15135 = vmatpush3.bf16.msra.mxu0 %v19058_v25  ;;  %v9644_v36 = vrot.slane %v19169_v11, 3  ;;  %v9647_v10 = vrot.slane %v19172_v38, 4  ;;  %v10065_v1 = vrot.slane %v19169_v11, 4  ;;  %v10066_v26 = vrot.slane %v19172_v38, 5 }
 0xa52   :  { %v9657_v35 = vor.u32 %v9656_v46, %v9653_v63  ;;  %15136 = vmatprep.subr.bf16.mxu0 %v16289_v33  ;;  %v10069_v25 = vrot.slane %v19155_v31, 4  ;;  %v10225_v16 = vrot.slane %v19169_v11, 7  ;;  %v19236_v41 = vor.u32 %v10219_v37, %v19133_v54 }
 0xa53   :  { %v9648_v0 = vor.u32 %v9647_v10, %v9644_v36  ;;  %v10067_v5 = vor.u32 %v10066_v26, %v10065_v1  ;;  %v10223_v18 = vor.u32 %v10222_v44, %v19138_v42  ;;  %v10381_v1 = vrot.slane %v19133_v54, 1 }
 0xa54   :  { %v10071_v21 = vor.u32 %v10070_v40, %v10069_v25  ;;  %v10226_v17 = vor.u32 %v10225_v16, %v19172_v38  ;;  %v10386_v25 = vrot.slane %v19138_v42, 1  ;;  %v10394_v40 = vrot.slane %v19172_v38, 1 }
 0xa55   :  { %v19201_v48 = vsel %vm108_vm1, %v19146_v7, %v9648_v0  ;;  %v19204_v50 = vsel %vm108_vm1, %v9648_v0, %v9657_v35  ;;  %15137 = vmatpush3.bf16.msra.mxu0 %v16289_v33  ;;  %v19206_v55 = vld [vmem:[#allocation2 + $0x30] sm:$0xf]  ;;  %v19223_v8 = vsel %vm544_vm2, %v19188_v61, %v10067_v5  ;;  %v10228_v33 = vrot.slane %v19155_v31, 7 }
 0xa56   :  { %15126 = vmatprep.mubr.msk.bf16.mxu0 %vm19_vm0, %v19201_v48  ;;  %v19210_v49 = vld [vmem:[#allocation2 + $0x28] sm:$0xff]  ;;  %v9669_v62 = vshrl.u32 %v19206_v55, 16  ;;  %v9672_v56 = vshll.u32 %v19206_v55, 16  ;;  %15150 = vmatprep.subr.bf16.mxu0 %v19186_v20  ;;  %v19229_v27 = vsel %vm544_vm2, %v10067_v5, %v10071_v21  ;;  %v19251_v46 = vsel %vm711_vm3, %v10219_v37, %v10223_v18  ;;  %v19267_v0 = vld [vmem:[#allocation2 + $0x30] sm:$0xff] }
 0xa57   :  { %v19218_v13 = vshrl.u32 %v19210_v49, 16  ;;  %v9663_v52 = vshll.u32 %v19210_v49, 16  ;;  %v19260_v36 = vsel %vm711_vm3, %v10222_v44, %v10226_v17  ;;  %v10229_v10 = vor.u32 %v10228_v33, %v19158_v15 }
 0xa58   :  { %15127 = vmatmul.mubr.msk.bf16.gmra.mrb[40].mxu0 %vm19_vm0, %v19204_v50  ;;  %v9671_v23 = vrot.slane %v9669_v62, 3  ;;  %v9674_v39 = vrot.slane %v9672_v56, 4  ;;  %v10402_v54 = vrot.slane %v19158_v15, 1  ;;  %v10390_v62 = vor.u32 %v10386_v25, %v19126_v3 }
 0xa59   :  { %v9662_v43 = vrot.slane %v19218_v13, 3  ;;  %v9665_v47 = vrot.slane %v9663_v52, 4  ;;  %v10073_v4 = vrot.slane %v19218_v13, 4  ;;  %v10074_v51 = vrot.slane %v9663_v52, 5 }
 0xa5a   :  { %v9675_v30 = vor.u32 %v9674_v39, %v9671_v23  ;;  %v10231_v58 = vrot.slane %v19218_v13, 7  ;;  %v19270_v26 = vsel %vm711_vm3, %v10225_v16, %v10229_v10  ;;  %v10398_v56 = vor.u32 %v10394_v40, %v19169_v11  ;;  %v16292_v39 = vld [vmem:[%s20008_s1 + $0x380] sm:$0xff]  }
 0xa5b   :  { %v19233_v22 = vor.u32 %v9665_v47, %v9662_v43  ;;  %v19240_v29 = vor.u32 %v10074_v51, %v10073_v4  ;;  %v10410_v37 = vrot.slane %v9663_v52, 1  ;;  %v19284_v44 = vshrl.u32 %v19267_v0, 16 }
 0xa5c   :  { %v10406_v38 = vor.u32 %v10402_v54, %v19155_v31  ;;  %v19291_v16 = vshll.u32 %v19267_v0, 16  ;;  %v19297_v15 = vsel %vm873_vm4, %v10398_v56, %v10402_v54  ;;  %v9908_v4 = vrot.slane %v19121_v6, 4 }
 0xa5d   :  { %v19246_v14 = vsel %vm108_vm1, %v9657_v35, %v19233_v22  ;;  %v9676_v63 = vsel %vm108_vm1, %v19233_v22, %v9675_v30  ;;  %v19257_v19 = vsel %vm544_vm2, %v10071_v21, %v19240_v29  ;;  %v10232_v35 = vor.u32 %v10231_v58, %v9663_v52  ;;  %v16291_v52 = vld [vmem:[%s20008_s1 + $0x378] sm:$0xff]  }
 0xa5e   :  { %15130 = vmatprep.mubr.msk.bf16.mxu0 %vm19_vm0, %v19246_v14  ;;  %v10382_v21 = vor.u32 %v10381_v1, %v19130_v9  ;;  %v19294_v9 = vsel %vm873_vm4, %v10390_v62, %v10394_v40  ;;  %v19300_v3 = vor.u32 %v10410_v37, %v19218_v13  ;;  %v19303_v11 = vsel %vm873_vm4, %v10406_v38, %v10410_v37  ;;  %v16300_v13 = vld [vmem:[%s20008_s1 + $0x3d0] sm:$0xff]  }
 0xa5f   :  { %v19277_v5 = vsel %vm711_vm3, %v10228_v33, %v10232_v35  ;;  %v10897_v31 = vrot.slane %v19284_v44, 4  ;;  %v10898_v23 = vrot.slane %v19291_v16, 5  ;;  %v19335_v18 = vrot.slane %v19118_v59, 4  ;;  %v16293_v33 = vld [vmem:[%s20008_s1 + $0x388] sm:$0xff]   ;;  %v16294_v35 = vld [vmem:[%s20008_s1 + $0x390] sm:$0xff]  }
 0xa60   :  { %15131 = vmatmul.mubr.msk.bf16.gmra.mrb[44].mxu0 %vm19_vm0, %v9676_v63  ;;  %v19287_v42 = vsel %vm873_vm4, %v10382_v21, %v10386_v25  ;;  %v9912_v17 = vrot.slane %v19152_v60, 4  ;;  %v9914_v1 = vrot.slane %v19148_v53, 4  ;;  %v19355_v25 = vrot.slane %v19210_v49, 4 }
 0xa61   :  { %15138 = vmatprep.mubr.msk.bf16.mxu0 %vm19_vm0, %v19121_v6  ;;  %v19318_v43 = vor.u32 %v10898_v23, %v10897_v31  ;;  %v9911_v63 = vsel %vm401_vm5, %v9908_v4, %v19335_v18  ;;  %v9918_v38 = vrot.slane %v19206_v55, 4  ;;  %v16296_v55 = vld [vmem:[%s20008_s1 + $0x3b0] sm:$0xff]  }
 0xa62   :  { %v19346_v10 = vsel %vm401_vm5, %v19335_v18, %v9912_v17  ;;  %v19358_v54 = vsel %vm401_vm5, %v9912_v17, %v9914_v1  ;;  %v19364_v62 = vsel %vm401_vm5, %v9914_v1, %v19355_v25 }
 0xa63   :  { %v19323_v47 = vsel %vm544_vm2, %v19240_v29, %v19318_v43  ;;  %v9919_v31 = vsel %vm401_vm5, %v19355_v25, %v9918_v38 }
 0xa68   :  { %15139 = vmatmul.mubr.msk.bf16.vlgmr.msra.gmra.mrb[36].mxu0 %vm19_vm0, %v19118_v59 }
 0xa69   :  { %15142 = vmatprep.mubr.msk.bf16.mxu0 %vm19_vm0, %v19152_v60  ;;  %15151 = vmatpush3.bf16.msra.mxu0 %v19186_v20  ;;  %v9894_v20 = vld [vmem:[#allocation2] sm:$0xf0] }
 0xa6a   :  { %15152 = vmatprep.subr.bf16.mxu0 %v16291_v52  ;;  %v9907_v30 = vrot.slane %v9894_v20, 4  ;;  %v10050_v40 = vshrl.u32 %v9894_v20, 16  ;;  %v10053_v21 = vshll.u32 %v9894_v20, 16  ;;  %v10043_v20 = vld [vmem:[#allocation2 + $0x30] sm:$0x1f] }
 0xa6c   :  { %v9909_v51 = vsel %vm401_vm5, %v9907_v30, %v9908_v4  ;;  %v10052_v56 = vrot.slane %v10050_v40, 4  ;;  %v10055_v37 = vrot.slane %v10053_v21, 5  ;;  %v10081_v30 = vshll.u32 %v10043_v20, 16  ;;  %v10209_v4 = vld [vmem:[#allocation2] sm:$0x80]  ;;  %v16297_v40 = vld [vmem:[%s20008_s1 + $0x3b8] sm:$0xff]  }
 0xa6d   :  { %15153 = vmatpush3.bf16.msra.mxu0 %v16291_v52  ;;  %v16299_v21 = vld [vmem:[%s20008_s1 + $0x3c8] sm:$0xff]  }
 0xa6e   :  { %15166 = vmatprep.subr.bf16.mxu0 %v16292_v39  ;;  %v10056_v52 = vor.u32 %v10055_v37, %v10052_v56  ;;  %v10083_v17 = vrot.slane %v10081_v30, 5  ;;  %v10418_v56 = vrot.slane %v19291_v16, 1 }
 0xa70   :  { %15143 = vmatmul.mubr.msk.bf16.gmra.mrb[40].mxu0 %vm19_vm0, %v19148_v53  ;;  %v10060_v23 = vsel %vm544_vm2, %v10056_v52, %v19177_v24  ;;  %v10078_v24 = vshrl.u32 %v10043_v20, 16  ;;  %v10422_v52 = vor.u32 %v10418_v56, %v19284_v44 }
 0xa71   :  { %15146 = vmatprep.mubr.msk.bf16.mxu0 %vm19_vm0, %v19210_v49 }
 0xa78   :  { %15147 = vmatmul.mubr.msk.bf16.gmra.mrb[44].mxu0 %vm19_vm0, %v19267_v0 }
 0xa79   :  { %15154 = vmatprep.mubr.msk.bf16.mxu0 %vm19_vm0, %v9909_v51  ;;  %v10080_v51 = vrot.slane %v10078_v24, 4  ;;  %v10552_v24 = vld [vmem:[#allocation2 + $0x38] sm:$0xf] }
 0xa7a   :  { %v10587_v30 = vshrl.u32 %v10552_v24, 16 }
 0xa80   :  { %15155 = vmatmul.mubr.msk.bf16.vlgmr.msra.gmra.mrb[36].mxu0 %vm19_vm0, %v9911_v63 }
 0xa81   :  { %15158 = vmatprep.mubr.msk.bf16.mxu0 %vm19_vm0, %v19346_v10  ;;  %15167 = vmatpush3.bf16.msra.mxu0 %v16292_v39  ;;  %v16295_v39 = vld [vmem:[%s20008_s1 + $0x398] sm:$0xff]  }
 0xa82   :  { %15168 = vmatprep.subr.bf16.mxu0 %v16293_v33 }
 0xa85   :  { %15169 = vmatpush3.bf16.msra.mxu0 %v16293_v33  ;;  %v10084_v33 = vor.u32 %v10083_v17, %v10080_v51 }
 0xa86   :  { %15182 = vmatprep.subr.bf16.mxu0 %v16294_v35 }
 0xa88   :  { %15159 = vmatmul.mubr.msk.bf16.gmra.mrb[40].mxu0 %vm19_vm0, %v19358_v54 }
 0xa89   :  { %15162 = vmatprep.mubr.msk.bf16.mxu0 %vm19_vm0, %v19364_v62 }
 0xa90   :  { %15163 = vmatmul.mubr.msk.bf16.gmra.mrb[44].mxu0 %vm19_vm0, %v9919_v31 }
 0xa91   :  { %15170 = vmatprep.mubr.msk.bf16.mxu0 %vm19_vm0, %v10060_v23 }
 0xa98   :  { %15171 = vmatmul.mubr.msk.bf16.vlgmr.msra.gmra.mrb[36].mxu0 %vm19_vm0, %v19197_v12  ;;  %v10216_v12 = vshrl.u32 %v10209_v4, 16  ;;  %v10590_v4 = vshll.u32 %v10552_v24, 16 }
 0xa99   :  { %15174 = vmatprep.mubr.msk.bf16.mxu0 %vm19_vm0, %v19223_v8  ;;  %15183 = vmatpush3.bf16.msra.mxu0 %v16294_v35  ;;  %v10085_v35 = vsel %vm544_vm2, %v19240_v29, %v10084_v33  ;;  %v16298_v29 = vld [vmem:[%s20008_s1 + $0x3c0] sm:$0xff]  }
 0xa9a   :  { %15184 = vmatprep.subr.bf16.mxu0 %v16295_v39  ;;  %v10218_v63 = vrot.slane %v10216_v12, 7  ;;  %v10592_v17 = vrot.slane %v10590_v4, 4  ;;  %v11077_v4 = vunpack.c.l.bf16 %v19152_v60 }
 0xa9c   :  { %v10221_v1 = vsel %vm711_vm3, %v10218_v63, %v19236_v41  ;;  %v10236_v41 = vrot.slane %v19284_v44, 7 }
 0xa9d   :  { %15185 = vmatpush3.bf16.msra.mxu0 %v16295_v39 }
 0xa9e   :  { %15198 = vmatprep.subr.bf16.mxu0 %v16296_v55 }
 0xaa0   :  { %15175 = vmatmul.mubr.msk.bf16.gmra.mrb[40].mxu0 %vm19_vm0, %v19229_v27 }
 0xaa1   :  { %15178 = vmatprep.mubr.msk.bf16.mxu0 %vm19_vm0, %v19257_v19 }
 0xaa8   :  { %15179 = vmatmul.mubr.msk.bf16.gmra.mrb[44].mxu0 %vm19_vm0, %v10085_v35 }
 0xaa9   :  { %15186 = vmatprep.mubr.msk.bf16.mxu0 %vm19_vm0, %v10221_v1 }
 0xab0   :  { %15187 = vmatmul.mubr.msk.bf16.vlgmr.msra.gmra.mrb[36].mxu0 %vm19_vm0, %v19251_v46  ;;  %v10239_v46 = vor.u32 %v19291_v16, %v10236_v41 }
 0xab1   :  { %15190 = vmatprep.mubr.msk.bf16.mxu0 %vm19_vm0, %v19260_v36  ;;  %15199 = vmatpush3.bf16.msra.mxu0 %v16296_v55  ;;  %v10583_v55 = vrot.slane %v19291_v16, 4 }
 0xab2   :  { %15200 = vmatprep.subr.bf16.mxu0 %v16297_v40  ;;  %v10240_v36 = vsel %vm711_vm3, %v10231_v58, %v10239_v46  ;;  %v10370_v58 = vld [vmem:[#allocation2 + $0x38] sm:$0x1] }
 0xab3   :  { %v10424_v37 = vshll.u32 %v10370_v58, 16  ;;  %v19510_v58 = vld [vmem:[%s20010_s3 + $0x6] ss:$0 sm:$0xff] }
 0xab5   :  { %15201 = vmatpush3.bf16.msra.mxu0 %v16297_v40  ;;  %v10426_v31 = vrot.slane %v10424_v37, 1 }
 0xab6   :  { %15214 = vmatprep.subr.bf16.mxu0 %v16298_v29 }
 0xab7   :  { %v10427_v39 = vsel %vm873_vm4, %v10422_v52, %v10426_v31 }
 0xab8   :  { %15191 = vmatmul.mubr.msk.bf16.gmra.mrb[40].mxu0 %vm19_vm0, %v19270_v26  ;;  %v10551_v26 = vld [vmem:[#allocation2 + $0x8] sm:$0xf8] }
 0xab9   :  { %15194 = vmatprep.mubr.msk.bf16.mxu0 %vm19_vm0, %v19277_v5  ;;  %v10559_v5 = vshrl.u32 %v10551_v26, 16 }
 0xac0   :  { %15195 = vmatmul.mubr.msk.bf16.gmra.mrb[44].mxu0 %vm19_vm0, %v10240_v36 }
 0xac1   :  { %15202 = vmatprep.mubr.msk.bf16.mxu0 %vm19_vm0, %v19287_v42  ;;  %v10562_v42 = vshll.u32 %v10551_v26, 16 }
 0xac3   :  { %v10564_v38 = vrot.slane %v10562_v42, 4 }
 0xac8   :  { %15203 = vmatmul.mubr.msk.bf16.vlgmr.msra.gmra.mrb[36].mxu0 %vm19_vm0, %v19294_v9  ;;  %v10419_v9 = vsel %vm873_vm4, %v19300_v3, %v10418_v56  ;;  %v16301_v3 = vld [vmem:[%s20008_s1 + $0x3d8] sm:$0xff]  }
 0xac9   :  { %15206 = vmatprep.mubr.msk.bf16.mxu0 %vm19_vm0, %v19297_v15  ;;  %15215 = vmatpush3.bf16.msra.mxu0 %v16298_v29  ;;  %v10561_v15 = vrot.slane %v10559_v5, 3 }
 0xaca   :  { %15216 = vmatprep.subr.bf16.mxu0 %v16299_v21 }
 0xacb   :  { %v10565_v23 = vor.u32 %v10564_v38, %v10561_v15  ;;  %v11075_v15 = vunpack.c.l.bf16 %v19118_v59 }
 0xacd   :  { %15217 = vmatpush3.bf16.msra.mxu0 %v16299_v21  ;;  %v10569_v20 = vsel %vm108_vm1, %v10565_v23, %v19146_v7  ;;  %v16302_v7 = vld [vmem:[%s20008_s1 + $0x3e0] sm:$0xff]   ;;  %v11073_v23 = vunpack.c.l.bf16 %v19121_v6 }
 0xace   :  { %15230 = vmatprep.subr.bf16.mxu0 %v16300_v13 }
 0xad0   :  { %15207 = vmatmul.mubr.msk.bf16.gmra.mrb[40].mxu0 %vm19_vm0, %v19303_v11  ;;  %v10582_v11 = vrot.slane %v19284_v44, 3 }
 0xad1   :  { %15210 = vmatprep.mubr.msk.bf16.mxu0 %vm19_vm0, %v10419_v9 }
 0xad2   :  { %v10584_v51 = vor.u32 %v10583_v55, %v10582_v11  ;;  %v11074_v55 = vunpack.c.h.bf16 %v19121_v6  ;;  %v11083_v6 = vunpack.c.l.bf16 %v19267_v0 }
 0xad4   :  { %v10585_v44 = vsel %vm108_vm1, %v19233_v22, %v10584_v51  ;;  %v10740_v22 = vrot.slane %v19267_v0, 4 }
 0xad8   :  { %15211 = vmatmul.mubr.msk.bf16.gmra.mrb[44].mxu0 %vm19_vm0, %v10427_v39  ;;  %v11076_v39 = vunpack.c.h.bf16 %v19118_v59 }
 0xad9   :  { %15218 = vmatprep.mubr.msk.bf16.mxu0 %vm19_vm0, %v10569_v20 }
 0xae0   :  { %15219 = vmatmul.mubr.msk.bf16.vlgmr.msra.gmra.mrb[36].mxu0 %vm19_vm0, %v19201_v48  ;;  %v10589_v48 = vrot.slane %v10587_v30, 3 }
 0xae1   :  { %15222 = vmatprep.mubr.msk.bf16.mxu0 %vm19_vm0, %v19204_v50  ;;  %15231 = vmatpush3.bf16.msra.mxu0 %v16300_v13  ;;  %v10718_v50 = vld [vmem:[#allocation2 + $0x8] sm:$0xf0] }
 0xae2   :  { %15232 = vmatprep.subr.bf16.mxu0 %v16301_v3  ;;  %v10593_v16 = vor.u32 %v10592_v17, %v10589_v48  ;;  %v10731_v12 = vrot.slane %v10718_v50, 4  ;;  %v10874_v35 = vshrl.u32 %v10718_v50, 16  ;;  %v10877_v1 = vshll.u32 %v10718_v50, 16  ;;  %v11162_v48 = vld [vmem:[#allocation2] sm:$0xf8] }
 0xae4   :  { %v10594_v33 = vsel %vm108_vm1, %v10584_v51, %v10593_v16  ;;  %v10733_v63 = vsel %vm401_vm5, %v10731_v12, %v19335_v18  ;;  %v10741_v18 = vsel %vm401_vm5, %v19355_v25, %v10740_v22  ;;  %v10876_v40 = vrot.slane %v10874_v35, 4 }
 0xae5   :  { %15233 = vmatpush3.bf16.msra.mxu0 %v16301_v3  ;;  %v10879_v29 = vrot.slane %v10877_v1, 5  ;;  %v11080_v51 = vunpack.c.h.bf16 %v19148_v53 }
 0xae6   :  { %15246 = vmatprep.subr.bf16.mxu0 %v16302_v7 }
 0xae7   :  { %v10880_v41 = vor.u32 %v10879_v29, %v10876_v40 }
 0xae8   :  { %15223 = vmatmul.mubr.msk.bf16.gmra.mrb[40].mxu0 %vm19_vm0, %v19246_v14  ;;  %v16303_v14 = vld [vmem:[%s20008_s1 + $0x3e8] sm:$0xff]  }
 0xae9   :  { %15226 = vmatprep.mubr.msk.bf16.mxu0 %vm19_vm0, %v10585_v44  ;;  %v10884_v46 = vsel %vm544_vm2, %v10880_v41, %v19188_v61  ;;  %v11078_v44 = vunpack.c.h.bf16 %v19152_v60 }
 0xaf0   :  { %15227 = vmatmul.mubr.msk.bf16.gmra.mrb[44].mxu0 %vm19_vm0, %v10594_v33 }
 0xaf1   :  { %15234 = vmatprep.mubr.msk.bf16.mxu0 %vm19_vm0, %v10733_v63 }
 0xaf8   :  { %15235 = vmatmul.mubr.msk.bf16.vlgmr.msra.gmra.mrb[36].mxu0 %vm19_vm0, %v19346_v10  ;;  %v10742_v10 = vrot.slane %v10552_v24, 4  ;;  %v11079_v24 = vunpack.c.l.bf16 %v19148_v53 }
 0xaf9   :  { %15238 = vmatprep.mubr.msk.bf16.mxu0 %vm19_vm0, %v19358_v54  ;;  %15247 = vmatpush3.bf16.msra.mxu0 %v16302_v7 }
 0xafa   :  { %15248 = vmatprep.subr.bf16.mxu0 %v16303_v14  ;;  %v10743_v54 = vsel %vm401_vm5, %v10740_v22, %v10742_v10  ;;  %v11170_v22 = vshrl.u32 %v11162_v48, 16 }
 0xafd   :  { %15249 = vmatpush3.bf16.msra.mxu0 %v16303_v14 }
 0xb00   :  { %15239 = vmatmul.mubr.msk.bf16.gmra.mrb[40].mxu0 %vm19_vm0, %v19364_v62  ;;  %v10867_v62 = vld [vmem:[#allocation2 + $0x38] sm:$0x1f] }
 0xb01   :  { %15242 = vmatprep.mubr.msk.bf16.mxu0 %vm19_vm0, %v10741_v18  ;;  %v10902_v25 = vshrl.u32 %v10867_v62, 16  ;;  %v10905_v36 = vshll.u32 %v10867_v62, 16 }
 0xb03   :  { %v10904_v21 = vrot.slane %v10902_v25, 4  ;;  %v10907_v26 = vrot.slane %v10905_v36, 5 }
 0xb05   :  { %v10908_v61 = vor.u32 %v10907_v26, %v10904_v21 }
 0xb07   :  { %v10909_v13 = vsel %vm544_vm2, %v19318_v43, %v10908_v61  ;;  %v19505_v43 = vld [vmem:[%s20009_s2 + $0x6] ss:$0 sm:$0xff]  ;;  %v11173_v61 = vshll.u32 %v11162_v48, 16 }
 0xb08   :  { %15243 = vmatmul.mubr.msk.bf16.gmra.mrb[44].mxu0 %vm19_vm0, %v10743_v54 }
 0xb09   :  { %15250 = vmatprep.mubr.msk.bf16.mxu0 %vm19_vm0, %v10884_v46 }
 0xb10   :  { %15251 = vmatmul.mubr.msk.bf16.vlgmr.msra.gmra.mrb[36].mxu0 %vm19_vm0, %v19223_v8  ;;  %v16304_v8 = vld [vmem:[%s20008_s1 + $0x3f0] sm:$0xff]  }
 0xb11   :  { %15254 = vmatprep.mubr.msk.bf16.mxu0 %vm19_vm0, %v19229_v27  ;;  %15262 = vmatprep.subr.bf16.mxu1 %v16304_v8  ;;  %v16305_v27 = vld [vmem:[%s20008_s1 + $0x3f8] sm:$0xff]  }
 0xb12   :  { %15263 = vmatpush3.bf16.msra.mxu1 %v16304_v8 }
 0xb13   :  { %15264 = vmatprep.subr.bf16.mxu1 %v16305_v27 }
 0xb16   :  { %15265 = vmatpush3.bf16.msra.mxu1 %v16305_v27 }
 0xb18   :  { %15255 = vmatmul.mubr.msk.bf16.gmra.mrb[40].mxu0 %vm19_vm0, %v19257_v19  ;;  %v19499_v19 = vld [vmem:[%s20008_s1 + $0x430] sm:$0xff]  }
 0xb19   :  { %15258 = vmatprep.mubr.msk.bf16.mxu0 %vm19_vm0, %v19323_v47  ;;  %15278 = vmatprep.subr.bf16.mxu1 %v19499_v19 }
 0xb20   :  { %15259 = vmatmul.mubr.msk.bf16.gmra.mrb[44].mxu0 %vm19_vm0, %v10909_v13 }
 0xbe3   :  { %v15252_v47 = vpop.f32.mrb[36].mxu0 }
 0xbe4   :  { %v11043_v5 = vadd.f32 %v15252_v47, %v19505_v43  ;;  %v10974_v42 = vpop.f32.mrb[37].mxu0  ;;  %v11081_v47 = vunpack.c.l.bf16 %v19210_v49 }
 0xbe5   :  { %v11041_v56 = vadd.f32 %v19505_v43, %v10974_v42  ;;  %v15253_v37 = vpop.f32.mrb[38].mxu0 }
 0xbe6   :  { %v11063_v9 = vmul.f32 %v19510_v58, %v11043_v5  ;;  %v11044_v38 = vadd.f32 %v15253_v37, %v19505_v43  ;;  %v10977_v52 = vpop.f32.mrb[39].mxu0 }
 0xbe7   :  { %v11061_v31 = vmul.f32 %v19510_v58, %v11041_v56  ;;  %v11042_v20 = vadd.f32 %v19505_v43, %v10977_v52 }
 0xbe8   :  { %v11087_v3 = vadd.f32 %v11075_v15, %v11063_v9  ;;  %v11064_v11 = vmul.f32 %v19510_v58, %v11044_v38  ;;  %v19541_v38 = vrot.slane %v11170_v22, 3 }
 0xbe9   :  { %v11085_v7 = vadd.f32 %v11073_v23, %v11061_v31  ;;  %v11062_v30 = vmul.f32 %v19510_v58, %v11042_v20 }
 0xbea   :  { %vm11099_vm8 = vcmp.ge.f32.partialorder %v11087_v3, 0.0  ;;  %v11111_v17 = vmul.f32 0.2, %v11087_v3  ;;  %v11088_v59 = vadd.f32 %v11076_v39, %v11064_v11  ;;  %v19545_v39 = vrot.slane %v11173_v61, 4 }
 0xbeb   :  { %vm11097_vm9 = vcmp.ge.f32.partialorder %v11085_v7, 0.0  ;;  %v11109_v50 = vmul.f32 0.2, %v11085_v7  ;;  %v11086_v16 = vadd.f32 %v11074_v55, %v11062_v30  ;;  %v15256_v12 = vpop.f32.mrb[40].mxu0 }
 0xbec   :  { %vm11100_vm10 = vcmp.ge.f32.partialorder %v11088_v59, 0.0  ;;  %v11112_v33 = vmul.f32 0.2, %v11088_v59  ;;  %v11047_v63 = vadd.f32 %v15256_v12, %v19505_v43  ;;  %v10990_v14 = vpop.f32.mrb[41].mxu0  ;;  %v11123_v35 = vsel %vm11099_vm8, %v11087_v3, %v11111_v17 }
 0xbed   :  { %vm11098_vm11 = vcmp.ge.f32.partialorder %v11086_v16, 0.0  ;;  %v11110_v53 = vmul.f32 0.2, %v11086_v16  ;;  %v11045_v1 = vadd.f32 %v19505_v43, %v10990_v14  ;;  %v15257_v18 = vpop.f32.mrb[42].mxu0  ;;  %v11121_v40 = vsel %vm11097_vm9, %v11085_v7, %v11109_v50 }
 0xbee   :  { %v11124_v60 = vsel %vm11100_vm10, %v11088_v59, %v11112_v33  ;;  %v11067_v29 = vmul.f32 %v19510_v58, %v11047_v63  ;;  %v11048_v10 = vadd.f32 %v15257_v18, %v19505_v43  ;;  %v10993_v41 = vpop.f32.mrb[43].mxu0  ;;  %v11084_v33 = vunpack.c.h.bf16 %v19267_v0 }
 0xbef   :  { %v11134_v54 = vpack.c.bf16 %v11124_v60, %v11123_v35  ;;  %v11122_v46 = vsel %vm11098_vm11, %v11086_v16, %v11110_v53  ;;  %v11065_v62 = vmul.f32 %v19510_v58, %v11045_v1  ;;  %v11046_v25 = vadd.f32 %v19505_v43, %v10993_v41 }
 0xbf0   :  { %v11133_v36 = vpack.c.bf16 %v11122_v46, %v11121_v40  ;;  %v11091_v21 = vadd.f32 %v11079_v24, %v11067_v29  ;;  %v11068_v26 = vmul.f32 %v19510_v58, %v11048_v10  ;;  %v11082_v35 = vunpack.c.h.bf16 %v19210_v49 }
 0xbf1   :  { %v11140_v13 = vmul.bf16 %v16828_v45, %v11134_v54  ;;  %v11089_v8 = vadd.f32 %v11077_v4, %v11065_v62  ;;  %v11066_v27 = vmul.f32 %v19510_v58, %v11046_v25  ;;  %v11176_v0 = vor.u32 %v19545_v39, %v19541_v38  ;;  %v16307_v39 = vld [vmem:[%s20008_s1 + $0x438] sm:$0xff]  }
 0xbf2   :  { %v11139_v5 = vmul.bf16 %v16830_v28, %v11133_v36  ;;  %vm11103_vm12 = vcmp.ge.f32.partialorder %v11091_v21, 0.0  ;;  %v11115_v42 = vmul.f32 0.2, %v11091_v21  ;;  %v11092_v56 = vadd.f32 %v11080_v51, %v11068_v26 }
 0xbf3   :  { %11146 = vst.msk [vmem:[#allocation2 + $0x10] sm:$0xff] %vm19_vm0, %v11140_v13  ;;  %vm11101_vm13 = vcmp.ge.f32.partialorder %v11089_v8, 0.0  ;;  %v11113_v37 = vmul.f32 0.2, %v11089_v8  ;;  %v11090_v9 = vadd.f32 %v11078_v44, %v11066_v27  ;;  %v15260_v15 = vpop.f32.mrb[44].mxu0 }
 0xbf4   :  { %11145 = vst.msk [vmem:[#allocation2 + $0x8] sm:$0xff] %vm19_vm0, %v11139_v5  ;;  %vm11104_vm14 = vcmp.ge.f32.partialorder %v11092_v56, 0.0  ;;  %v11116_v52 = vmul.f32 0.2, %v11092_v56  ;;  %v11051_v31 = vadd.f32 %v15260_v15, %v19505_v43  ;;  %v11006_v23 = vpop.f32.mrb[45].mxu0  ;;  %v11127_v20 = vsel %vm11103_vm12, %v11091_v21, %v11115_v42 }
 0xbf5   :  { %vm11102_vm15 = vcmp.ge.f32.partialorder %v11090_v9, 0.0  ;;  %v11114_v3 = vmul.f32 0.2, %v11090_v9  ;;  %v11049_v11 = vadd.f32 %v19505_v43, %v11006_v23  ;;  %v15261_v55 = vpop.f32.mrb[46].mxu0  ;;  %v11125_v24 = vsel %vm11101_vm13, %v11089_v8, %v11113_v37 }
 0xbf6   :  { %v11128_v7 = vsel %vm11104_vm14, %v11092_v56, %v11116_v52  ;;  %v11071_v30 = vmul.f32 %v19510_v58, %v11051_v31  ;;  %v11052_v4 = vadd.f32 %v15261_v55, %v19505_v43  ;;  %v11009_v51 = vpop.f32.mrb[47].mxu0 }
 0xbf7   :  { %v11136_v48 = vpack.c.bf16 %v11128_v7, %v11127_v20  ;;  %v11126_v17 = vsel %vm11102_vm15, %v11090_v9, %v11114_v3  ;;  %v11069_v59 = vmul.f32 %v19510_v58, %v11049_v11  ;;  %v11050_v44 = vadd.f32 %v19505_v43, %v11009_v51 }
 0xbf8   :  { %v11135_v50 = vpack.c.bf16 %v11126_v17, %v11125_v24  ;;  %v11095_v16 = vadd.f32 %v11083_v6, %v11071_v30  ;;  %v11072_v12 = vmul.f32 %v19510_v58, %v11052_v4 }
 0xbf9   :  { %v11142_v63 = vmul.bf16 %v16841_v2, %v11136_v48  ;;  %v11093_v14 = vadd.f32 %v11081_v47, %v11069_v59  ;;  %v11070_v22 = vmul.f32 %v19510_v58, %v11050_v44  ;;  %v19627_v59 = vld [vmem:[%s20008_s1 + $0x400] sm:$0xff]  }
 0xbfa   :  { %v11141_v53 = vmul.bf16 %v16839_v34, %v11135_v50  ;;  %vm11107_vm6 = vcmp.ge.f32.partialorder %v11095_v16, 0.0  ;;  %v11119_v1 = vmul.f32 0.2, %v11095_v16  ;;  %v11096_v18 = vadd.f32 %v11084_v33, %v11072_v12  ;;  %v19559_v40 = vld [vmem:[#allocation2 + $0x10] sm:$0xff] }
 0xbfb   :  { %11148 = vst.msk [vmem:[#allocation2 + $0x20] sm:$0xff] %vm19_vm0, %v11142_v63  ;;  %v11117_v43 = vmul.f32 0.2, %v11093_v14  ;;  %v11094_v6 = vadd.f32 %v11082_v35, %v11070_v22  ;;  %v19562_v60 = vld [vmem:[#allocation2 + $0x8] sm:$0xff]  ;;  %v19567_v58 = vshrl.u32 %v19559_v40, 16  ;;  %vm11105_vm7 = vcmp.ge.f32.partialorder %v11093_v14, 0.0 }
 0xbfc   :  { %11147 = vst.msk [vmem:[#allocation2 + $0x18] sm:$0xff] %vm19_vm0, %v11141_v53  ;;  %vm11108_vm8 = vcmp.ge.f32.partialorder %v11096_v18, 0.0  ;;  %v11120_v49 = vmul.f32 0.2, %v11096_v18  ;;  %v19571_v29 = vshrl.u32 %v19562_v60, 16  ;;  %v11131_v10 = vsel %vm11107_vm6, %v11095_v16, %v11119_v1 }
 0xbfd   :  { %vm11106_vm9 = vcmp.ge.f32.partialorder %v11094_v6, 0.0  ;;  %v11118_v41 = vmul.f32 0.2, %v11094_v6  ;;  %v19574_v54 = vshll.u32 %v19562_v60, 16  ;;  %v11189_v25 = vrot.slane %v19567_v58, 3 }
 0xbfe   :  { %v11132_v46 = vsel %vm11108_vm8, %v11096_v18, %v11120_v49  ;;  %v11180_v62 = vrot.slane %v19571_v29, 3  ;;  %v19579_v36 = vshll.u32 %v19559_v40, 16  ;;  %v11129_v21 = vsel %vm11105_vm7, %v11093_v14, %v11117_v43 }
 0xbff   :  { %v11138_v26 = vpack.c.bf16 %v11132_v46, %v11131_v10  ;;  %v11130_v61 = vsel %vm11106_vm9, %v11094_v6, %v11118_v41  ;;  %v11183_v13 = vrot.slane %v19574_v54, 4  ;;  %v11611_v42 = vrot.slane %v19571_v29, 4 }
 0xc00   :  { %v11137_v8 = vpack.c.bf16 %v11130_v61, %v11129_v21  ;;  %v11192_v27 = vrot.slane %v19579_v36, 4  ;;  %v11612_v56 = vrot.slane %v19574_v54, 5  ;;  %v11615_v20 = vrot.slane %v19567_v58, 4 }
 0xc01   :  { %v11144_v47 = vmul.bf16 %v16899_v32, %v11138_v26  ;;  %v11184_v5 = vor.u32 %v11183_v13, %v11180_v62  ;;  %v11616_v4 = vrot.slane %v19579_v36, 5  ;;  %v11776_v49 = vrot.slane %v19567_v58, 7 }
 0xc02   :  { %v11143_v37 = vmul.bf16 %v16934_v57, %v11137_v8  ;;  %v19587_v9 = vor.u32 %v11192_v27, %v11189_v25  ;;  %v19589_v15 = vld [vmem:[#allocation2 + $0x20] sm:$0xff]  ;;  %v19618_v30 = vor.u32 %v11612_v56, %v11611_v42 }
 0xc03   :  { %11150 = vst.msk [vmem:[#allocation2 + $0x30] sm:$0xff] %vm19_vm0, %v11144_v47  ;;  %v11185_v38 = vsel %vm108_vm1, %v11176_v0, %v11184_v5  ;;  %v19593_v52 = vld [vmem:[#allocation2 + $0x18] sm:$0xff]  ;;  %v19596_v31 = vshrl.u32 %v19589_v15, 16  ;;  %v19599_v23 = vshll.u32 %v19589_v15, 16  ;;  %v19629_v44 = vor.u32 %v11616_v4, %v11615_v20 }
 0xc04   :  { %11149 = vst.msk [vmem:[#allocation2 + $0x28] sm:$0xff] %vm19_vm0, %v11143_v37  ;;  %15266 = vmatprep.mubr.msk.bf16.mxu1 %vm19_vm0, %v11185_v38  ;;  %v11194_v3 = vsel %vm108_vm1, %v11184_v5, %v19587_v9  ;;  %v19610_v11 = vshrl.u32 %v19593_v52, 16  ;;  %v19613_v55 = vshll.u32 %v19593_v52, 16  ;;  %v11773_v0 = vrot.slane %v19571_v29, 7 }
 0xc05   :  { %15267 = vmatmul.mubr.msk.bf16.vlgmr.msra.gmra.mrb[36].mxu1 %vm19_vm0, %v11194_v3  ;;  %v11207_v24 = vrot.slane %v19596_v31, 3  ;;  %v11210_v7 = vrot.slane %v19599_v23, 4  ;;  %v11624_v33 = vrot.slane %v19599_v23, 5  ;;  %v19638_v63 = vsel %vm544_vm2, %v19618_v30, %v19629_v44 }
 0xc06   :  { %15279 = vmatpush3.bf16.msra.mxu1 %v19499_v19  ;;  %v11198_v51 = vrot.slane %v19610_v11, 3  ;;  %v11201_v48 = vrot.slane %v19613_v55, 4  ;;  %v11619_v50 = vrot.slane %v19610_v11, 4  ;;  %v11620_v12 = vrot.slane %v19613_v55, 5 }
 0xc07   :  { %v11211_v17 = vor.u32 %v11210_v7, %v11207_v24  ;;  %15280 = vmatprep.subr.bf16.mxu1 %v16307_v39  ;;  %v11623_v19 = vrot.slane %v19596_v31, 4  ;;  %v11779_v62 = vrot.slane %v19610_v11, 7  ;;  %v19677_v42 = vor.u32 %v11773_v0, %v19574_v54 }
 0xc08   :  { %v11202_v16 = vor.u32 %v11201_v48, %v11198_v51  ;;  %v11621_v53 = vor.u32 %v11620_v12, %v11619_v50  ;;  %v11777_v56 = vor.u32 %v11776_v49, %v19579_v36  ;;  %v11935_v50 = vrot.slane %v19574_v54, 1 }
 0xc09   :  { %v11625_v1 = vor.u32 %v11624_v33, %v11623_v19  ;;  %v11780_v37 = vor.u32 %v11779_v62, %v19613_v55  ;;  %v11940_v19 = vrot.slane %v19579_v36, 1  ;;  %v11948_v33 = vrot.slane %v19613_v55, 1 }
 0xc0a   :  { %v19642_v14 = vsel %vm108_vm1, %v19587_v9, %v11202_v16  ;;  %v19645_v22 = vsel %vm108_vm1, %v11202_v16, %v11211_v17  ;;  %15281 = vmatpush3.bf16.msra.mxu1 %v16307_v39  ;;  %v19647_v35 = vld [vmem:[#allocation2 + $0x30] sm:$0xf]  ;;  %v19664_v46 = vsel %vm544_vm2, %v19629_v44, %v11621_v53  ;;  %v11782_v39 = vrot.slane %v19596_v31, 7 }
 0xc0b   :  { %15270 = vmatprep.mubr.msk.bf16.mxu1 %vm19_vm0, %v19642_v14  ;;  %v19651_v18 = vld [vmem:[#allocation2 + $0x28] sm:$0xff]  ;;  %v11223_v43 = vshrl.u32 %v19647_v35, 16  ;;  %v11226_v6 = vshll.u32 %v19647_v35, 16  ;;  %15294 = vmatprep.subr.bf16.mxu1 %v19627_v59  ;;  %v19670_v26 = vsel %vm544_vm2, %v11621_v53, %v11625_v1  ;;  %v19692_v7 = vsel %vm711_vm3, %v11773_v0, %v11777_v56  ;;  %v19708_v16 = vld [vmem:[#allocation2 + $0x30] sm:$0xff] }
 0xc0c   :  { %v19659_v10 = vshrl.u32 %v19651_v18, 16  ;;  %v11217_v41 = vshll.u32 %v19651_v18, 16  ;;  %v19701_v51 = vsel %vm711_vm3, %v11776_v49, %v11780_v37  ;;  %v11783_v48 = vor.u32 %v11782_v39, %v19599_v23 }
 0xc0d   :  { %15271 = vmatmul.mubr.msk.bf16.gmra.mrb[40].mxu1 %vm19_vm0, %v19645_v22  ;;  %v11225_v25 = vrot.slane %v11223_v43, 3  ;;  %v11228_v21 = vrot.slane %v11226_v6, 4  ;;  %v11956_v54 = vrot.slane %v19599_v23, 1  ;;  %v11944_v43 = vor.u32 %v11940_v19, %v19567_v58 }
 0xc0e   :  { %v11216_v61 = vrot.slane %v19659_v10, 3  ;;  %v11219_v13 = vrot.slane %v11217_v41, 4  ;;  %v11627_v27 = vrot.slane %v19659_v10, 4  ;;  %v11628_v47 = vrot.slane %v11217_v41, 5 }
 0xc0f   :  { %v11229_v8 = vor.u32 %v11228_v21, %v11225_v25  ;;  %v11785_v20 = vrot.slane %v19659_v10, 7  ;;  %v19711_v12 = vsel %vm711_vm3, %v11779_v62, %v11783_v48  ;;  %v11952_v6 = vor.u32 %v11948_v33, %v19610_v11  ;;  %v16310_v21 = vld [vmem:[%s20008_s1 + $0x410] sm:$0xff]  }
 0xc10   :  { %v19674_v5 = vor.u32 %v11219_v13, %v11216_v61  ;;  %v19681_v38 = vor.u32 %v11628_v47, %v11627_v27  ;;  %v11964_v0 = vrot.slane %v11217_v41, 1  ;;  %v19725_v49 = vshrl.u32 %v19708_v16, 16 }
 0xc11   :  { %v11960_v55 = vor.u32 %v11956_v54, %v19596_v31  ;;  %v19732_v62 = vshll.u32 %v19708_v16, 16  ;;  %v19738_v23 = vsel %vm873_vm4, %v11952_v6, %v11956_v54  ;;  %v11462_v27 = vrot.slane %v19562_v60, 4 }
 0xc12   :  { %v19687_v3 = vsel %vm108_vm1, %v11211_v17, %v19674_v5  ;;  %v11230_v24 = vsel %vm108_vm1, %v19674_v5, %v11229_v8  ;;  %v19698_v4 = vsel %vm544_vm2, %v11625_v1, %v19681_v38  ;;  %v11786_v17 = vor.u32 %v11785_v20, %v11217_v41  ;;  %v16309_v41 = vld [vmem:[%s20008_s1 + $0x408] sm:$0xff]  }
 0xc13   :  { %15274 = vmatprep.mubr.msk.bf16.mxu1 %vm19_vm0, %v19687_v3  ;;  %v11936_v1 = vor.u32 %v11935_v50, %v19571_v29  ;;  %v19735_v29 = vsel %vm873_vm4, %v11944_v43, %v11948_v33  ;;  %v19741_v58 = vor.u32 %v11964_v0, %v19659_v10  ;;  %v19744_v11 = vsel %vm873_vm4, %v11960_v55, %v11964_v0  ;;  %v16318_v10 = vld [vmem:[%s20008_s1 + $0x460] sm:$0xff]  }
 0xc14   :  { %v19718_v53 = vsel %vm711_vm3, %v11782_v39, %v11786_v17  ;;  %v12451_v31 = vrot.slane %v19725_v49, 4  ;;  %v12452_v25 = vrot.slane %v19732_v62, 5  ;;  %v19776_v56 = vrot.slane %v19559_v40, 4  ;;  %v16311_v39 = vld [vmem:[%s20008_s1 + $0x418] sm:$0xff]   ;;  %v16312_v17 = vld [vmem:[%s20008_s1 + $0x420] sm:$0xff]  }
 0xc15   :  { %15275 = vmatmul.mubr.msk.bf16.gmra.mrb[44].mxu1 %vm19_vm0, %v11230_v24  ;;  %v19728_v36 = vsel %vm873_vm4, %v11936_v1, %v11940_v19  ;;  %v11466_v37 = vrot.slane %v19593_v52, 4  ;;  %v11468_v50 = vrot.slane %v19589_v15, 4  ;;  %v19796_v19 = vrot.slane %v19651_v18, 4 }
 0xc16   :  { %15282 = vmatprep.mubr.msk.bf16.mxu1 %vm19_vm0, %v19562_v60  ;;  %v19759_v61 = vor.u32 %v12452_v25, %v12451_v31  ;;  %v11465_v24 = vsel %vm401_vm5, %v11462_v27, %v19776_v56  ;;  %v11472_v55 = vrot.slane %v19647_v35, 4  ;;  %v16314_v35 = vld [vmem:[%s20008_s1 + $0x440] sm:$0xff]  }
 0xc17   :  { %v19787_v48 = vsel %vm401_vm5, %v19776_v56, %v11466_v37  ;;  %v19799_v54 = vsel %vm401_vm5, %v11466_v37, %v11468_v50  ;;  %v19805_v43 = vsel %vm401_vm5, %v11468_v50, %v19796_v19 }
 0xc18   :  { %v19764_v13 = vsel %vm544_vm2, %v19681_v38, %v19759_v61  ;;  %v11473_v31 = vsel %vm401_vm5, %v19796_v19, %v11472_v55 }
 0xc1d   :  { %15283 = vmatmul.mubr.msk.bf16.vlgmr.msra.gmra.mrb[36].mxu1 %vm19_vm0, %v19559_v40 }
 0xc1e   :  { %15286 = vmatprep.mubr.msk.bf16.mxu1 %vm19_vm0, %v19593_v52  ;;  %15295 = vmatpush3.bf16.msra.mxu1 %v19627_v59  ;;  %v11448_v59 = vld [vmem:[#allocation2] sm:$0xf0] }
 0xc1f   :  { %15296 = vmatprep.subr.bf16.mxu1 %v16309_v41  ;;  %v11461_v8 = vrot.slane %v11448_v59, 4  ;;  %v11604_v33 = vshrl.u32 %v11448_v59, 16  ;;  %v11607_v1 = vshll.u32 %v11448_v59, 16  ;;  %v11597_v59 = vld [vmem:[#allocation2 + $0x30] sm:$0x1f] }
 0xc21   :  { %v11463_v47 = vsel %vm401_vm5, %v11461_v8, %v11462_v27  ;;  %v11606_v6 = vrot.slane %v11604_v33, 4  ;;  %v11609_v0 = vrot.slane %v11607_v1, 5  ;;  %v11635_v8 = vshll.u32 %v11597_v59, 16  ;;  %v11763_v27 = vld [vmem:[#allocation2] sm:$0x80]  ;;  %v16315_v33 = vld [vmem:[%s20008_s1 + $0x448] sm:$0xff]  }
 0xc22   :  { %15297 = vmatpush3.bf16.msra.mxu1 %v16309_v41  ;;  %v16317_v1 = vld [vmem:[%s20008_s1 + $0x458] sm:$0xff]  }
 0xc23   :  { %15310 = vmatprep.subr.bf16.mxu1 %v16310_v21  ;;  %v11610_v41 = vor.u32 %v11609_v0, %v11606_v6  ;;  %v11637_v37 = vrot.slane %v11635_v8, 5  ;;  %v11972_v6 = vrot.slane %v19732_v62, 1 }
 0xc25   :  { %15287 = vmatmul.mubr.msk.bf16.gmra.mrb[40].mxu1 %vm19_vm0, %v19589_v15  ;;  %v11614_v25 = vsel %vm544_vm2, %v11610_v41, %v19618_v30  ;;  %v11632_v30 = vshrl.u32 %v11597_v59, 16  ;;  %v11976_v41 = vor.u32 %v11972_v6, %v19725_v49 }
 0xc26   :  { %15290 = vmatprep.mubr.msk.bf16.mxu1 %vm19_vm0, %v19651_v18 }
 0xc2d   :  { %15291 = vmatmul.mubr.msk.bf16.gmra.mrb[44].mxu1 %vm19_vm0, %v19708_v16 }
 0xc2e   :  { %15298 = vmatprep.mubr.msk.bf16.mxu1 %vm19_vm0, %v11463_v47  ;;  %v11634_v47 = vrot.slane %v11632_v30, 4  ;;  %v12106_v30 = vld [vmem:[#allocation2 + $0x38] sm:$0xf] }
 0xc2f   :  { %v12141_v8 = vshrl.u32 %v12106_v30, 16 }
 0xc35   :  { %15299 = vmatmul.mubr.msk.bf16.vlgmr.msra.gmra.mrb[36].mxu1 %vm19_vm0, %v11465_v24 }
 0xc36   :  { %15302 = vmatprep.mubr.msk.bf16.mxu1 %vm19_vm0, %v19787_v48  ;;  %15311 = vmatpush3.bf16.msra.mxu1 %v16310_v21  ;;  %v16313_v21 = vld [vmem:[%s20008_s1 + $0x428] sm:$0xff]  }
 0xc37   :  { %15312 = vmatprep.subr.bf16.mxu1 %v16311_v39 }
 0xc3a   :  { %15313 = vmatpush3.bf16.msra.mxu1 %v16311_v39  ;;  %v11638_v39 = vor.u32 %v11637_v37, %v11634_v47 }
 0xc3b   :  { %15326 = vmatprep.subr.bf16.mxu1 %v16312_v17 }
 0xc3d   :  { %15303 = vmatmul.mubr.msk.bf16.gmra.mrb[40].mxu1 %vm19_vm0, %v19799_v54 }
 0xc3e   :  { %15306 = vmatprep.mubr.msk.bf16.mxu1 %vm19_vm0, %v19805_v43 }
 0xc45   :  { %15307 = vmatmul.mubr.msk.bf16.gmra.mrb[44].mxu1 %vm19_vm0, %v11473_v31 }
 0xc46   :  { %15314 = vmatprep.mubr.msk.bf16.mxu1 %vm19_vm0, %v11614_v25 }
 0xc4d   :  { %15315 = vmatmul.mubr.msk.bf16.vlgmr.msra.gmra.mrb[36].mxu1 %vm19_vm0, %v19638_v63  ;;  %v11770_v63 = vshrl.u32 %v11763_v27, 16  ;;  %v12144_v27 = vshll.u32 %v12106_v30, 16 }
 0xc4e   :  { %15318 = vmatprep.mubr.msk.bf16.mxu1 %vm19_vm0, %v19664_v46  ;;  %15327 = vmatpush3.bf16.msra.mxu1 %v16312_v17  ;;  %v11639_v17 = vsel %vm544_vm2, %v19681_v38, %v11638_v39  ;;  %v16316_v38 = vld [vmem:[%s20008_s1 + $0x450] sm:$0xff]  }
 0xc4f   :  { %15328 = vmatprep.subr.bf16.mxu1 %v16313_v21  ;;  %v11772_v24 = vrot.slane %v11770_v63, 7  ;;  %v12146_v37 = vrot.slane %v12144_v27, 4 }
 0xc51   :  { %v11775_v50 = vsel %vm711_vm3, %v11772_v24, %v19677_v42  ;;  %v11790_v42 = vrot.slane %v19725_v49, 7 }
 0xc52   :  { %15329 = vmatpush3.bf16.msra.mxu1 %v16313_v21 }
 0xc53   :  { %15342 = vmatprep.subr.bf16.mxu1 %v16314_v35 }
 0xc55   :  { %15319 = vmatmul.mubr.msk.bf16.gmra.mrb[40].mxu1 %vm19_vm0, %v19670_v26 }
 0xc56   :  { %15322 = vmatprep.mubr.msk.bf16.mxu1 %vm19_vm0, %v19698_v4 }
 0xc5d   :  { %15323 = vmatmul.mubr.msk.bf16.gmra.mrb[44].mxu1 %vm19_vm0, %v11639_v17 }
 0xc5e   :  { %15330 = vmatprep.mubr.msk.bf16.mxu1 %vm19_vm0, %v11775_v50 }
 0xc65   :  { %15331 = vmatmul.mubr.msk.bf16.vlgmr.msra.gmra.mrb[36].mxu1 %vm19_vm0, %v19692_v7  ;;  %v11793_v7 = vor.u32 %v19732_v62, %v11790_v42 }
 0xc66   :  { %15334 = vmatprep.mubr.msk.bf16.mxu1 %vm19_vm0, %v19701_v51  ;;  %15343 = vmatpush3.bf16.msra.mxu1 %v16314_v35  ;;  %v12137_v35 = vrot.slane %v19732_v62, 4 }
 0xc67   :  { %15344 = vmatprep.subr.bf16.mxu1 %v16315_v33  ;;  %v11794_v51 = vsel %vm711_vm3, %v11785_v20, %v11793_v7  ;;  %v11924_v20 = vld [vmem:[#allocation2 + $0x38] sm:$0x1] }
 0xc68   :  { %v11978_v0 = vshll.u32 %v11924_v20, 16  ;;  %v19939_v20 = vld [vmem:[%s20010_s3 + $0x7] ss:$0 sm:$0xff] }
 0xc6a   :  { %15345 = vmatpush3.bf16.msra.mxu1 %v16315_v33  ;;  %v11980_v31 = vrot.slane %v11978_v0, 1 }
 0xc6b   :  { %15358 = vmatprep.subr.bf16.mxu1 %v16316_v38 }
 0xc6c   :  { %v11981_v21 = vsel %vm873_vm4, %v11976_v41, %v11980_v31 }
 0xc6d   :  { %15335 = vmatmul.mubr.msk.bf16.gmra.mrb[40].mxu1 %vm19_vm0, %v19711_v12  ;;  %v12105_v12 = vld [vmem:[#allocation2 + $0x8] sm:$0xf8] }
 0xc6e   :  { %15338 = vmatprep.mubr.msk.bf16.mxu1 %vm19_vm0, %v19718_v53  ;;  %v12113_v53 = vshrl.u32 %v12105_v12, 16 }
 0xc75   :  { %15339 = vmatmul.mubr.msk.bf16.gmra.mrb[44].mxu1 %vm19_vm0, %v11794_v51 }
 0xc76   :  { %15346 = vmatprep.mubr.msk.bf16.mxu1 %vm19_vm0, %v19728_v36  ;;  %v12116_v36 = vshll.u32 %v12105_v12, 16 }
 0xc78   :  { %v12118_v55 = vrot.slane %v12116_v36, 4 }
 0xc7d   :  { %15347 = vmatmul.mubr.msk.bf16.vlgmr.msra.gmra.mrb[36].mxu1 %vm19_vm0, %v19735_v29  ;;  %v11973_v29 = vsel %vm873_vm4, %v19741_v58, %v11972_v6  ;;  %v16319_v58 = vld [vmem:[%s20008_s1 + $0x468] sm:$0xff]   ;;  %v12629_v6 = vunpack.c.l.bf16 %v19559_v40 }
 0xc7e   :  { %15350 = vmatprep.mubr.msk.bf16.mxu1 %vm19_vm0, %v19738_v23  ;;  %15359 = vmatpush3.bf16.msra.mxu1 %v16316_v38  ;;  %v12115_v23 = vrot.slane %v12113_v53, 3 }
 0xc7f   :  { %15360 = vmatprep.subr.bf16.mxu1 %v16317_v1 }
 0xc80   :  { %v12119_v25 = vor.u32 %v12118_v55, %v12115_v23  ;;  %v12627_v55 = vunpack.c.l.bf16 %v19562_v60 }
 0xc82   :  { %15361 = vmatpush3.bf16.msra.mxu1 %v16317_v1  ;;  %v12123_v59 = vsel %vm108_vm1, %v12119_v25, %v19587_v9  ;;  %v16320_v9 = vld [vmem:[%s20008_s1 + $0x470] sm:$0xff]  }
 0xc83   :  { %15374 = vmatprep.subr.bf16.mxu1 %v16318_v10 }
 0xc85   :  { %15351 = vmatmul.mubr.msk.bf16.gmra.mrb[40].mxu1 %vm19_vm0, %v19744_v11  ;;  %v12136_v11 = vrot.slane %v19725_v49, 3 }
 0xc86   :  { %15354 = vmatprep.mubr.msk.bf16.mxu1 %vm19_vm0, %v11973_v29 }
 0xc87   :  { %v12138_v47 = vor.u32 %v12137_v35, %v12136_v11  ;;  %v12628_v11 = vunpack.c.h.bf16 %v19562_v60 }
 0xc89   :  { %v12139_v49 = vsel %vm108_vm1, %v19674_v5, %v12138_v47  ;;  %v12294_v5 = vrot.slane %v19708_v16, 4 }
 0xc8d   :  { %15355 = vmatmul.mubr.msk.bf16.gmra.mrb[44].mxu1 %vm19_vm0, %v11981_v21  ;;  %v12630_v21 = vunpack.c.h.bf16 %v19559_v40  ;;  %v12631_v40 = vunpack.c.l.bf16 %v19593_v52 }
 0xc8e   :  { %15362 = vmatprep.mubr.msk.bf16.mxu1 %vm19_vm0, %v12123_v59 }
 0xc95   :  { %15363 = vmatmul.mubr.msk.bf16.vlgmr.msra.gmra.mrb[36].mxu1 %vm19_vm0, %v19642_v14  ;;  %v12143_v14 = vrot.slane %v12141_v8, 3 }
 0xc96   :  { %15366 = vmatprep.mubr.msk.bf16.mxu1 %vm19_vm0, %v19645_v22  ;;  %15375 = vmatpush3.bf16.msra.mxu1 %v16318_v10  ;;  %v12272_v22 = vld [vmem:[#allocation2 + $0x8] sm:$0xf0] }
 0xc97   :  { %15376 = vmatprep.subr.bf16.mxu1 %v16319_v58  ;;  %v12147_v62 = vor.u32 %v12146_v37, %v12143_v14  ;;  %v12285_v63 = vrot.slane %v12272_v22, 4  ;;  %v12428_v17 = vshrl.u32 %v12272_v22, 16  ;;  %v12431_v50 = vshll.u32 %v12272_v22, 16 }
 0xc99   :  { %v12148_v39 = vsel %vm108_vm1, %v12138_v47, %v12147_v62  ;;  %v12287_v24 = vsel %vm401_vm5, %v12285_v63, %v19776_v56  ;;  %v12295_v56 = vsel %vm401_vm5, %v19796_v19, %v12294_v5  ;;  %v12430_v33 = vrot.slane %v12428_v17, 4 }
 0xc9a   :  { %15377 = vmatpush3.bf16.msra.mxu1 %v16319_v58  ;;  %v12433_v38 = vrot.slane %v12431_v50, 5  ;;  %v12633_v47 = vunpack.c.l.bf16 %v19589_v15 }
 0xc9b   :  { %15390 = vmatprep.subr.bf16.mxu1 %v16320_v9 }
 0xc9c   :  { %v12434_v42 = vor.u32 %v12433_v38, %v12430_v33 }
 0xc9d   :  { %15367 = vmatmul.mubr.msk.bf16.gmra.mrb[40].mxu1 %vm19_vm0, %v19687_v3  ;;  %v16321_v3 = vld [vmem:[%s20008_s1 + $0x478] sm:$0xff]  }
 0xc9e   :  { %15370 = vmatprep.mubr.msk.bf16.mxu1 %vm19_vm0, %v12139_v49  ;;  %v12438_v7 = vsel %vm544_vm2, %v12434_v42, %v19629_v44 }
 0xca5   :  { %15371 = vmatmul.mubr.msk.bf16.gmra.mrb[44].mxu1 %vm19_vm0, %v12148_v39 }
 0xca6   :  { %15378 = vmatprep.mubr.msk.bf16.mxu1 %vm19_vm0, %v12287_v24 }
 0xcad   :  { %15379 = vmatmul.mubr.msk.bf16.vlgmr.msra.gmra.mrb[36].mxu1 %vm19_vm0, %v19787_v48  ;;  %v12296_v48 = vrot.slane %v12106_v30, 4 }
 0xcae   :  { %15382 = vmatprep.mubr.msk.bf16.mxu1 %vm19_vm0, %v19799_v54  ;;  %15391 = vmatpush3.bf16.msra.mxu1 %v16320_v9 }
 0xcaf   :  { %15392 = vmatprep.subr.bf16.mxu1 %v16321_v3  ;;  %v12297_v54 = vsel %vm401_vm5, %v12294_v5, %v12296_v48 }
 0xcb2   :  { %15393 = vmatpush3.bf16.msra.mxu1 %v16321_v3 }
 0xcb5   :  { %15383 = vmatmul.mubr.msk.bf16.gmra.mrb[40].mxu1 %vm19_vm0, %v19805_v43  ;;  %v12421_v43 = vld [vmem:[#allocation2 + $0x38] sm:$0x1f] }
 0xcb6   :  { %15386 = vmatprep.mubr.msk.bf16.mxu1 %vm19_vm0, %v12295_v56  ;;  %v12456_v19 = vshrl.u32 %v12421_v43, 16  ;;  %v12459_v51 = vshll.u32 %v12421_v43, 16 }
 0xcb8   :  { %v12458_v1 = vrot.slane %v12456_v19, 4  ;;  %v12461_v12 = vrot.slane %v12459_v51, 5 }
 0xcba   :  { %v12462_v44 = vor.u32 %v12461_v12, %v12458_v1  ;;  %v12632_v1 = vunpack.c.h.bf16 %v19593_v52 }
 0xcbc   :  { %v12463_v10 = vsel %vm544_vm2, %v19759_v61, %v12462_v44 }
 0xcbd   :  { %15387 = vmatmul.mubr.msk.bf16.gmra.mrb[44].mxu1 %vm19_vm0, %v12297_v54 }
 0xcbe   :  { %15394 = vmatprep.mubr.msk.bf16.mxu1 %vm19_vm0, %v12438_v7  ;;  %v12634_v7 = vunpack.c.h.bf16 %v19589_v15  ;;  %v12637_v15 = vunpack.c.l.bf16 %v19708_v16 }
 0xcc5   :  { %15395 = vmatmul.mubr.msk.bf16.vlgmr.msra.gmra.mrb[36].mxu1 %vm19_vm0, %v19664_v46  ;;  %v19934_v46 = vld [vmem:[%s20009_s2 + $0x7] ss:$0 sm:$0xff] }
 0xcc6   :  { %15398 = vmatprep.mubr.msk.bf16.mxu1 %vm19_vm0, %v19670_v26 }
 0xccd   :  { %15399 = vmatmul.mubr.msk.bf16.gmra.mrb[40].mxu1 %vm19_vm0, %v19698_v4 }
 0xcce   :  { %15402 = vmatprep.mubr.msk.bf16.mxu1 %vm19_vm0, %v19764_v13 }
 0xcd5   :  { %15403 = vmatmul.mubr.msk.bf16.gmra.mrb[44].mxu1 %vm19_vm0, %v12463_v10 }
 0xd98   :  { %v15396_v26 = vpop.f32.mrb[36].mxu1 }
 0xd99   :  { %v12597_v4 = vadd.f32 %v15396_v26, %v19934_v46  ;;  %v12528_v13 = vpop.f32.mrb[37].mxu1 }
 0xd9a   :  { %v12595_v53 = vadd.f32 %v19934_v46, %v12528_v13  ;;  %v15397_v36 = vpop.f32.mrb[38].mxu1 }
 0xd9b   :  { %v12617_v61 = vmul.f32 %v19939_v20, %v12597_v4  ;;  %v12598_v0 = vadd.f32 %v15397_v36, %v19934_v46  ;;  %v12531_v29 = vpop.f32.mrb[39].mxu1 }
 0xd9c   :  { %v12615_v23 = vmul.f32 %v19939_v20, %v12595_v53  ;;  %v12596_v41 = vadd.f32 %v19934_v46, %v12531_v29 }
 0xd9d   :  { %v12641_v31 = vadd.f32 %v12629_v6, %v12617_v61  ;;  %v12618_v25 = vmul.f32 %v19939_v20, %v12598_v0 }
 0xd9e   :  { %v12639_v59 = vadd.f32 %v12627_v55, %v12615_v23  ;;  %v12616_v58 = vmul.f32 %v19939_v20, %v12596_v41 }
 0xd9f   :  { %vm12653_vm1 = vcmp.ge.f32.partialorder %v12641_v31, 0.0  ;;  %v12665_v35 = vmul.f32 0.2, %v12641_v31  ;;  %v12642_v30 = vadd.f32 %v12630_v21, %v12618_v25 }
 0xda0   :  { %vm12651_vm2 = vcmp.ge.f32.partialorder %v12639_v59, 0.0  ;;  %v12663_v9 = vmul.f32 0.2, %v12639_v59  ;;  %v12640_v8 = vadd.f32 %v12628_v11, %v12616_v58  ;;  %v15400_v27 = vpop.f32.mrb[40].mxu1 }
 0xda1   :  { %vm12654_vm3 = vcmp.ge.f32.partialorder %v12642_v30, 0.0  ;;  %v12666_v14 = vmul.f32 0.2, %v12642_v30  ;;  %v12601_v37 = vadd.f32 %v15400_v27, %v19934_v46  ;;  %v12544_v49 = vpop.f32.mrb[41].mxu1  ;;  %v12677_v22 = vsel %vm12653_vm1, %v12641_v31, %v12665_v35 }
 0xda2   :  { %vm12652_vm4 = vcmp.ge.f32.partialorder %v12640_v8, 0.0  ;;  %v12664_v62 = vmul.f32 0.2, %v12640_v8  ;;  %v12599_v60 = vadd.f32 %v19934_v46, %v12544_v49  ;;  %v15401_v63 = vpop.f32.mrb[42].mxu1  ;;  %v12675_v39 = vsel %vm12651_vm2, %v12639_v59, %v12663_v9 }
 0xda3   :  { %v12678_v24 = vsel %vm12654_vm3, %v12642_v30, %v12666_v14  ;;  %v12621_v3 = vmul.f32 %v19939_v20, %v12601_v37  ;;  %v12602_v5 = vadd.f32 %v15401_v63, %v19934_v46  ;;  %v12547_v17 = vpop.f32.mrb[43].mxu1  ;;  %v12638_v9 = vunpack.c.h.bf16 %v19708_v16 }
 0xda4   :  { %v12688_v50 = vpack.c.bf16 %v12678_v24, %v12677_v22  ;;  %v12676_v56 = vsel %vm12652_vm4, %v12640_v8, %v12664_v62  ;;  %v12619_v33 = vmul.f32 %v19939_v20, %v12599_v60  ;;  %v12600_v38 = vadd.f32 %v19934_v46, %v12547_v17 }
 0xda5   :  { %v12687_v48 = vpack.c.bf16 %v12676_v56, %v12675_v39  ;;  %v12645_v42 = vadd.f32 %v12633_v47, %v12621_v3  ;;  %v12622_v54 = vmul.f32 %v19939_v20, %v12602_v5  ;;  %v12636_v14 = vunpack.c.h.bf16 %v19651_v18 }
 0xda6   :  { %v12694_v43 = vmul.bf16 %v16828_v45, %v12688_v50  ;;  %v12643_v19 = vadd.f32 %v12631_v40, %v12619_v33  ;;  %v12620_v51 = vmul.f32 %v19939_v20, %v12600_v38 }
 0xda7   :  { %v12693_v12 = vmul.bf16 %v16830_v28, %v12687_v48  ;;  %vm12657_vm5 = vcmp.ge.f32.partialorder %v12645_v42, 0.0  ;;  %v12669_v44 = vmul.f32 0.2, %v12645_v42  ;;  %v12646_v10 = vadd.f32 %v12634_v7, %v12622_v54 }
 0xda8   :  { %12700 = vst.msk [vmem:[#allocation2 + $0x10] sm:$0xff] %vm19_vm0, %v12694_v43  ;;  %vm12655_vm10 = vcmp.ge.f32.partialorder %v12643_v19, 0.0  ;;  %v12667_v26 = vmul.f32 0.2, %v12643_v19  ;;  %v12644_v4 = vadd.f32 %v12632_v1, %v12620_v51  ;;  %v15404_v13 = vpop.f32.mrb[44].mxu1  ;;  %v12635_v28 = vunpack.c.l.bf16 %v19651_v18 }
 0xda9   :  { %12699 = vst.msk [vmem:[#allocation2 + $0x8] sm:$0xff] %vm19_vm0, %v12693_v12  ;;  %vm12658_vm11 = vcmp.ge.f32.partialorder %v12646_v10, 0.0  ;;  %v12670_v45 = vmul.f32 0.2, %v12646_v10  ;;  %v12605_v53 = vadd.f32 %v15404_v13, %v19934_v46  ;;  %v12560_v52 = vpop.f32.mrb[45].mxu1  ;;  %v12681_v36 = vsel %vm12657_vm5, %v12645_v42, %v12669_v44 }
 0xdaa   :  { %vm12656_vm12 = vcmp.ge.f32.partialorder %v12644_v4, 0.0  ;;  %v12668_v61 = vmul.f32 0.2, %v12644_v4  ;;  %v12603_v6 = vadd.f32 %v19934_v46, %v12560_v52  ;;  %v15405_v0 = vpop.f32.mrb[46].mxu1  ;;  %v12679_v29 = vsel %vm12655_vm10, %v12643_v19, %v12667_v26 }
 0xdab   :  { %v12682_v23 = vsel %vm12658_vm11, %v12646_v10, %v12670_v45  ;;  %v12625_v55 = vmul.f32 %v19939_v20, %v12605_v53  ;;  %v12606_v41 = vadd.f32 %v15405_v0, %v19934_v46  ;;  %v12563_v31 = vpop.f32.mrb[47].mxu1 }
 0xdac   :  { %v12690_v25 = vpack.c.bf16 %v12682_v23, %v12681_v36  ;;  %v12680_v21 = vsel %vm12656_vm12, %v12644_v4, %v12668_v61  ;;  %v12623_v59 = vmul.f32 %v19939_v20, %v12603_v6  ;;  %v12604_v58 = vadd.f32 %v19934_v46, %v12563_v31 }
 0xdad   :  { %v12689_v11 = vpack.c.bf16 %v12680_v21, %v12679_v29  ;;  %v12649_v35 = vadd.f32 %v12637_v15, %v12625_v55  ;;  %v12626_v30 = vmul.f32 %v19939_v20, %v12606_v41 }
 0xdae   :  { %v12696_v8 = vmul.bf16 %v16841_v2, %v12690_v25  ;;  %v12647_v27 = vadd.f32 %v12635_v28, %v12623_v59  ;;  %v12624_v47 = vmul.f32 %v19939_v20, %v12604_v58 }
 0xdaf   :  { %v12739_v37 = vld [vmem:[#allocation2 + $0x10] sm:$0xff]  ;;  %v12695_v49 = vmul.bf16 %v16839_v34, %v12689_v11  ;;  %v12673_v40 = vmul.f32 0.2, %v12649_v35  ;;  %v12650_v22 = vadd.f32 %v12638_v9, %v12626_v30  ;;  %vm12661_vm13 = vcmp.ge.f32.partialorder %v12649_v35, 0.0 }
 0xdb0   :  { %12740 = vst [vmem:[%s20012_s5 + $0x8] sm:$0xff] %v12739_v37  ;;  %v12737_v46 = vld [vmem:[#allocation2 + $0x8] sm:$0xff]  ;;  %12702 = vst.msk [vmem:[#allocation2 + $0x20] sm:$0xff] %vm19_vm0, %v12696_v8  ;;  %v12671_v16 = vmul.f32 0.2, %v12647_v27  ;;  %v12648_v2 = vadd.f32 %v12636_v14, %v12624_v47  ;;  %vm12659_vm14 = vcmp.ge.f32.partialorder %v12647_v27, 0.0 }
 0xdb1   :  { %12738 = vst [vmem:[%s20012_s5] sm:$0xff] %v12737_v46  ;;  %12701 = vst.msk [vmem:[#allocation2 + $0x18] sm:$0xff] %vm19_vm0, %v12695_v49  ;;  %vm12662_vm15 = vcmp.ge.f32.partialorder %v12650_v22, 0.0  ;;  %v12674_v34 = vmul.f32 0.2, %v12650_v22  ;;  %v12685_v20 = vsel %vm12661_vm13, %v12649_v35, %v12673_v40 }
 0xdb2   :  { %vm12660_vm6 = vcmp.ge.f32.partialorder %v12648_v2, 0.0  ;;  %v12672_v18 = vmul.f32 0.2, %v12648_v2  ;;  %v12683_v60 = vsel %vm12659_vm14, %v12647_v27, %v12671_v16 }
 0xdb3   :  { %v12686_v62 = vsel %vm12662_vm15, %v12650_v22, %v12674_v34 }
 0xdb4   :  { %v12692_v63 = vpack.c.bf16 %v12686_v62, %v12685_v20  ;;  %v12684_v39 = vsel %vm12660_vm6, %v12648_v2, %v12672_v18 }
 0xdb5   :  { %v12691_v24 = vpack.c.bf16 %v12684_v39, %v12683_v60 }
 0xdb6   :  { %v12698_v3 = vmul.bf16 %v16899_v32, %v12692_v63 }
 0xdb7   :  { %v12743_v5 = vld [vmem:[#allocation2 + $0x20] sm:$0xff]  ;;  %v12697_v17 = vmul.bf16 %v16934_v57, %v12691_v24 }
 0xdb8   :  { %12744 = vst [vmem:[%s20012_s5 + $0x18] sm:$0xff] %v12743_v5  ;;  %v12741_v50 = vld [vmem:[#allocation2 + $0x18] sm:$0xff]  ;;  %12704 = vst.msk [vmem:[#allocation2 + $0x30] sm:$0xff] %vm19_vm0, %v12698_v3 }
 0xdb9   :  { %12742 = vst [vmem:[%s20012_s5 + $0x10] sm:$0xff] %v12741_v50  ;;  %12703 = vst.msk [vmem:[#allocation2 + $0x28] sm:$0xff] %vm19_vm0, %v12697_v17 }
 0xdbf   :  { %v12747_v56 = vld [vmem:[#allocation2 + $0x30] sm:$0xff] }
 0xdc0   :  { %12748 = vst [vmem:[%s20012_s5 + $0x28] sm:$0xff] %v12747_v56  ;;  %v12745_v32 = vld [vmem:[#allocation2 + $0x28] sm:$0xff] }
 0xdc1   :  { %12746 = vst [vmem:[%s20012_s5 + $0x20] sm:$0xff] %v12745_v32 }
 0xdc2   :  { %12756 = vsyncadd [#allocation3], 768 }
 0xdc3   :  { %16329 = dma.done.wait [#allocation3], 768 }
 0xdc4   :  { %16330 = vsyncadd [#allocation3], 4294966528 }
 0xdc5   :  { %12759 = vsyncmov [#allocation3] }
 0xdc8   :  { %s12760_s8 = vpop.sfrf %12759 }
 0xdc9   :  { %p13677_p0 = scmp.ne.s32.totalorder %s12760_s8, 0 }
 0xdcb   :  { %12764 = shalt.err (%p13677_p0)  }

</bundles_post_ra>
